<compile_context>
chip_gen: v6e
topology: v6e:2x2x1
jax: 0.10.0
libtpu: 0.0.40
codegen_flags: <defaults>
</compile_context>

<pallas_src>
import functools

import jax
import jax.numpy as jnp
from jax import lax
from jax.experimental import pallas as pl
from jax.experimental.pallas import tpu as pltpu


# -----------------------------------------------------------------------------
# Shared LSTM cell math (gate column order: i, f, o, g  -> sigmoid on [0:3H])
# -----------------------------------------------------------------------------
def _lstm_cell(gates, c_prev, H):
    act = jax.nn.sigmoid(gates[:, :3 * H])     # i | f | o  (one contiguous EUP slab)
    i = act[:, 0:H]
    f = act[:, H:2 * H]
    o = act[:, 2 * H:3 * H]
    g = jnp.tanh(gates[:, 3 * H:4 * H])
    c = f * c_prev + i * g
    h = o * jnp.tanh(c)
    return h, c


def _pick_chunk(T, cap=8):
    """Largest divisor of T that is <= cap (time-chunk size)."""
    for tc in range(min(cap, T), 0, -1):
        if T % tc == 0:
            return tc
    return 1


# -----------------------------------------------------------------------------
# Fused bidirectional LSTM layer (sequence outputs) — layer 1
# -----------------------------------------------------------------------------
def bilstm_seq_kernel(gxf_ref, gxb_ref, whf_ref, whb_ref, outf_ref, outb_ref,
                      hf_scr, cf_scr, hb_scr, cb_scr):
    c = pl.program_id(0)

    @pl.when(c == 0)
    def _init():
        for r in (hf_scr, cf_scr, hb_scr, cb_scr):
            r[...] = jnp.zeros_like(r)

    Tc = gxf_ref.shape[0]
    H = hf_scr.shape[1]
    whf = whf_ref[...]          # (H, 4H) bf16, resident
    whb = whb_ref[...]

    def step(j, carry):
        hf, cf, hb, cb = carry
        # forward: intra-chunk time j; backward: reversed intra-chunk time
        jb = Tc - 1 - j
        gf = gxf_ref[j] + jnp.dot(hf.astype(jnp.bfloat16), whf,
                                  preferred_element_type=jnp.float32)
        gb = gxb_ref[jb] + jnp.dot(hb.astype(jnp.bfloat16), whb,
                                   preferred_element_type=jnp.float32)
        hf, cf = _lstm_cell(gf, cf, H)
        hb, cb = _lstm_cell(gb, cb, H)
        outf_ref[j] = hf.astype(outf_ref.dtype)
        outb_ref[jb] = hb.astype(outb_ref.dtype)
        return (hf, cf, hb, cb)

    carry = (hf_scr[...], cf_scr[...], hb_scr[...], cb_scr[...])
    hf, cf, hb, cb = lax.fori_loop(0, Tc, step, carry, unroll=True)
    hf_scr[...] = hf
    cf_scr[...] = cf
    hb_scr[...] = hb
    cb_scr[...] = cb


def bilstm_seq(gx_f, gx_b, whh_f, whh_b, chunk=8):
    """gx_*: (T, B, 4H) f32 pre-projected gates; whh_*: (H, 4H) bf16.
    Returns (h_fwd, h_bwd), each (T, B, H) bf16 (torch layer output = concat of both)."""
    T, B, H4 = gx_f.shape
    H = H4 // 4
    Tc = _pick_chunk(T, chunk)
    nc = T // Tc
    grid_spec = pltpu.PrefetchScalarGridSpec(
        num_scalar_prefetch=0,
        grid=(nc,),
        in_specs=[
            pl.BlockSpec((Tc, B, H4), lambda c: (c, 0, 0)),
            pl.BlockSpec((Tc, B, H4), lambda c: (nc - 1 - c, 0, 0)),   # time reversal
            pl.BlockSpec((H, H4), lambda c: (0, 0)),
            pl.BlockSpec((H, H4), lambda c: (0, 0)),
        ],
        out_specs=[
            pl.BlockSpec((Tc, B, H), lambda c: (c, 0, 0)),
            pl.BlockSpec((Tc, B, H), lambda c: (nc - 1 - c, 0, 0)),    # reversed writeback
        ],
        scratch_shapes=[pltpu.VMEM((B, H), jnp.float32)] * 4,          # h_f, c_f, h_b, c_b
    )
    return pl.pallas_call(
        bilstm_seq_kernel,
        out_shape=[jax.ShapeDtypeStruct((T, B, H), jnp.bfloat16)] * 2,
        grid_spec=grid_spec,
        compiler_params=pltpu.CompilerParams(
            dimension_semantics=("arbitrary",)),   # sequential recurrence over time
    )(gx_f, gx_b, whh_f, whh_b)


# -----------------------------------------------------------------------------
# Fused bidirectional LSTM + time pooling — layer 2 (emits only the (B, 6H) feature)
# -----------------------------------------------------------------------------
def bilstm_pool_kernel(gxf_ref, gxb_ref, whf_ref, whb_ref, feat_ref,
                       hf_scr, cf_scr, hb_scr, cb_scr,
                       maxf_scr, maxb_scr, sumf_scr, sumb_scr, *, seq_len):
    c = pl.program_id(0)
    nc = pl.num_programs(0)

    @pl.when(c == 0)
    def _init():
        for r in (hf_scr, cf_scr, hb_scr, cb_scr, sumf_scr, sumb_scr):
            r[...] = jnp.zeros_like(r)
        maxf_scr[...] = jnp.full(maxf_scr.shape, -jnp.inf, jnp.float32)
        maxb_scr[...] = jnp.full(maxb_scr.shape, -jnp.inf, jnp.float32)

    Tc = gxf_ref.shape[0]
    H = hf_scr.shape[1]
    whf = whf_ref[...]
    whb = whb_ref[...]

    def step(j, carry):
        hf, cf, hb, cb, mf, mb, sf, sb = carry
        jb = Tc - 1 - j
        gf = gxf_ref[j] + jnp.dot(hf.astype(jnp.bfloat16), whf,
                                  preferred_element_type=jnp.float32)
        gb = gxb_ref[jb] + jnp.dot(hb.astype(jnp.bfloat16), whb,
                                   preferred_element_type=jnp.float32)
        hf, cf = _lstm_cell(gf, cf, H)
        hb, cb = _lstm_cell(gb, cb, H)
        mf = jnp.maximum(mf, hf)
        mb = jnp.maximum(mb, hb)
        sf = sf + hf
        sb = sb + hb
        return (hf, cf, hb, cb, mf, mb, sf, sb)

    carry = (hf_scr[...], cf_scr[...], hb_scr[...], cb_scr[...],
             maxf_scr[...], maxb_scr[...], sumf_scr[...], sumb_scr[...])
    hf, cf, hb, cb, mf, mb, sf, sb = lax.fori_loop(0, Tc, step, carry, unroll=True)
    hf_scr[...] = hf
    cf_scr[...] = cf
    hb_scr[...] = hb
    cb_scr[...] = cb
    maxf_scr[...] = mf
    maxb_scr[...] = mb
    sumf_scr[...] = sf
    sumb_scr[...] = sb

    @pl.when(c == nc - 1)
    def _finalize():
        inv_t = jnp.float32(1.0 / seq_len)
        # torch: cat([h_first_bwd, h_last_fwd, max_pool(2H), avg_pool(2H)], -1)
        feat_ref[:, 0 * H:1 * H] = hb            # backward half at t=0  (final bwd state)
        feat_ref[:, 1 * H:2 * H] = hf            # forward half at t=T-1 (final fwd state)
        feat_ref[:, 2 * H:3 * H] = mf            # max pool, forward half
        feat_ref[:, 3 * H:4 * H] = mb            # max pool, backward half
        feat_ref[:, 4 * H:5 * H] = sf * inv_t    # mean pool, forward half
        feat_ref[:, 5 * H:6 * H] = sb * inv_t    # mean pool, backward half


def bilstm_pool(gx_f, gx_b, whh_f, whh_b, chunk=8):
    T, B, H4 = gx_f.shape
    H = H4 // 4
    Tc = _pick_chunk(T, chunk)
    nc = T // Tc
    grid_spec = pltpu.PrefetchScalarGridSpec(
        num_scalar_prefetch=0,
        grid=(nc,),
        in_specs=[
            pl.BlockSpec((Tc, B, H4), lambda c: (c, 0, 0)),
            pl.BlockSpec((Tc, B, H4), lambda c: (nc - 1 - c, 0, 0)),
            pl.BlockSpec((H, H4), lambda c: (0, 0)),
            pl.BlockSpec((H, H4), lambda c: (0, 0)),
        ],
        out_specs=pl.BlockSpec((B, 6 * H), lambda c: (0, 0)),   # resident accumulator
        scratch_shapes=[pltpu.VMEM((B, H), jnp.float32)] * 8,
    )
    return pl.pallas_call(
        functools.partial(bilstm_pool_kernel, seq_len=T),
        out_shape=jax.ShapeDtypeStruct((B, 6 * H), jnp.float32),
        grid_spec=grid_spec,
        compiler_params=pltpu.CompilerParams(
            dimension_semantics=("arbitrary",)),
    )(gx_f, gx_b, whh_f, whh_b)


# -----------------------------------------------------------------------------
# Head: fused linear1+linear2 (one 6H x 12H matmul) + residual + fused output proj
# -----------------------------------------------------------------------------
def head_kernel(feat_ref, w12_ref, b12_ref, wo_ref, bo_ref, out_ref):
    feat = feat_ref[...]                                  # (B, 6H) f32
    h6 = feat.shape[1]
    lin = jnp.dot(feat.astype(jnp.bfloat16), w12_ref[...],
                  preferred_element_type=jnp.float32) + b12_ref[...]   # (B, 12H)
    h_add = feat + jnp.maximum(lin[:, :h6], 0.0) + jnp.maximum(lin[:, h6:], 0.0)
    out = jnp.dot(h_add.astype(jnp.bfloat16), wo_ref[...],
                  preferred_element_type=jnp.float32) + bo_ref[...]    # (B, 128) padded
    out_ref[...] = out


def head(feat, w12, b12, wo_pad, bo_pad):
    B = feat.shape[0]
    return pl.pallas_call(
        head_kernel,
        out_shape=jax.ShapeDtypeStruct((B, wo_pad.shape[1]), jnp.float32),
    )(feat, w12, b12, wo_pad, bo_pad)


# -----------------------------------------------------------------------------
# Hoisted input projections (one big bf16 MXU matmul per direction; plain XLA glue)
# -----------------------------------------------------------------------------
def _input_proj(x, w_ih, b):
    """x: (T, B, D) bf16; w_ih: (D, 4H) bf16; b: (1, 4H) f32 -> (T, B, 4H) f32."""
    T, B, D = x.shape
    g = jnp.dot(x.reshape(T * B, D), w_ih, preferred_element_type=jnp.float32)
    return g.reshape(T, B, -1) + b


def _input_proj_split(h_f, h_b, w_ih, b):
    """Equivalent to concat([h_f, h_b], -1) @ w_ih + b without materializing the concat.
    h_*: (T, B, H) bf16; w_ih: (2H, 4H) bf16."""
    T, B, H = h_f.shape
    g = (jnp.dot(h_f.reshape(T * B, H), w_ih[:H], preferred_element_type=jnp.float32)
         + jnp.dot(h_b.reshape(T * B, H), w_ih[H:], preferred_element_type=jnp.float32))
    return g.reshape(T, B, -1) + b


# -----------------------------------------------------------------------------
# Full model
# -----------------------------------------------------------------------------
def lstm_model_forward(seq, params):
    # Embedding lookup (glue gather); SpatialDropout(0.3) is identity at inference.
    h_emb = jnp.take(params["emb"], seq, axis=0).astype(jnp.bfloat16)       # (T, B, E)

    # Layer 1: hoisted input projections + fused bidirectional recurrence.
    gx1_f = _input_proj(h_emb, params["lstm1_f"]["w_ih"], params["lstm1_f"]["b"])
    gx1_b = _input_proj(h_emb, params["lstm1_b"]["w_ih"], params["lstm1_b"]["b"])
    h1_f, h1_b = bilstm_seq(gx1_f, gx1_b,
                            params["lstm1_f"]["w_hh"], params["lstm1_b"]["w_hh"])

    # Layer 2 input projections (consume the two direction streams; no concat pass).
    gx2_f = _input_proj_split(h1_f, h1_b, params["lstm2_f"]["w_ih"], params["lstm2_f"]["b"])
    gx2_b = _input_proj_split(h1_f, h1_b, params["lstm2_b"]["w_ih"], params["lstm2_b"]["b"])

    # Layer 2 recurrence fused with time pooling -> (B, 6H) head features.
    feat = bilstm_pool(gx2_f, gx2_b,
                       params["lstm2_f"]["w_hh"], params["lstm2_b"]["w_hh"])

    # Head (dropout = identity at inference); output padded to 128 lanes, real cols [:2].
    out_pad = head(feat, params["w12"], params["b12"], params["wo_pad"], params["bo_pad"])
    return out_pad[:, :2]                                   # [target_out, aux_out]


# -----------------------------------------------------------------------------
# Deterministic parameter construction
# -----------------------------------------------------------------------------
def init_params(key, vocab, emb_dim, hidden):
    keys = iter(jax.random.split(key, 32))

    def u(shape, scale=0.08, dtype=jnp.float32):
        return jax.random.uniform(next(keys), shape, jnp.float32, -scale, scale).astype(dtype)

    def lstm_dir(d_in, h):
        # Gate columns stored in (i, f, o, g) order so sigmoid covers a contiguous
        # [0:3H] slab in-kernel. Importing real PyTorch weights (i, f, g, o order,
        # (4H, D) layout) is a transpose + column permutation; b = b_ih + b_hh.
        return {
            "w_ih": u((d_in, 4 * h), dtype=jnp.bfloat16),
            "w_hh": u((h, 4 * h), dtype=jnp.bfloat16),
            "b": u((1, 4 * h)),
        }

    H6 = 6 * hidden
    wo = jnp.concatenate([u((H6, 1)), u((H6, 1))], axis=1)     # target_out | aux_out
    bo = jnp.concatenate([u((1, 1)), u((1, 1))], axis=1)
    return {
        "emb": u((vocab, emb_dim), 0.5),
        "lstm1_f": lstm_dir(emb_dim, hidden),
        "lstm1_b": lstm_dir(emb_dim, hidden),
        "lstm2_f": lstm_dir(2 * hidden, hidden),
        "lstm2_b": lstm_dir(2 * hidden, hidden),
        # linear1 / linear2 fused into a single (6H, 12H) weight (split in-kernel).
        "w12": jnp.concatenate([u((H6, H6)), u((H6, H6))], axis=1).astype(jnp.bfloat16),
        "b12": jnp.concatenate([u((1, H6)), u((1, H6))], axis=1),
        # target_out / aux_out fused and zero-padded to 128 lanes for an unmasked store.
        "wo_pad": jnp.pad(wo, ((0, 0), (0, 126))).astype(jnp.bfloat16),
        "bo_pad": jnp.pad(bo, ((0, 0), (0, 126))),
    }


if __name__ == "__main__":
    T, B = 16, 8          # seq_len, batch
    V, E = 64, 128        # vocab size, embedding dim (stand-in for GloVe 300)
    H = 128               # lstm_units (stand-in for 150; kept a 128 multiple so gate
                          # slices / outputs stay lane-dense — real 150 would pad to 256)

    key = jax.random.PRNGKey(0)
    k_seq, k_params = jax.random.split(key)

    params = init_params(k_params, V, E, H)
    seq = jax.random.randint(k_seq, (T, B), 0, V, dtype=jnp.int32)

    out = jax.jit(lstm_model_forward)(seq, params)
    out = jax.block_until_ready(out)
    assert out.shape == (B, 2) and out.dtype == jnp.float32
    print("KERNEL_OK")
</pallas_src>

<mosaic_0001>
module attributes {stable_mosaic.version = 11 : i64} {
  func.func @bilstm_seq_kernel(%arg0: i32, %arg1: memref<8x8x512xf32, #tpu.memory_space<vmem>>, %arg2: memref<8x8x512xf32, #tpu.memory_space<vmem>>, %arg3: memref<128x512xbf16, #tpu.memory_space<vmem>>, %arg4: memref<128x512xbf16, #tpu.memory_space<vmem>>, %arg5: memref<8x8x128xbf16, #tpu.memory_space<vmem>>, %arg6: memref<8x8x128xbf16, #tpu.memory_space<vmem>>, %arg7: memref<8x128xf32, #tpu.memory_space<vmem>>, %arg8: memref<8x128xf32, #tpu.memory_space<vmem>>, %arg9: memref<8x128xf32, #tpu.memory_space<vmem>>, %arg10: memref<8x128xf32, #tpu.memory_space<vmem>>) attributes {dimension_semantics = [#tpu.dimension_semantics<arbitrary>], iteration_bounds = array<i64: 2>, scalar_prefetch = 0 : i64, scratch_operands = 4 : i64, tpu.core_type = #tpu.core_type<tc>, window_params = [{transform_indices = @transform_0, window_bounds = array<i64: 8, 8, 512>}, {transform_indices = @transform_1, window_bounds = array<i64: 8, 8, 512>}, {pipeline_mode = #tpu.pipeline_mode<synchronous>, transform_indices = @transform_2, window_bounds = array<i64: 128, 512>}, {pipeline_mode = #tpu.pipeline_mode<synchronous>, transform_indices = @transform_3, window_bounds = array<i64: 128, 512>}, {transform_indices = @transform_4, window_bounds = array<i64: 8, 8, 128>}, {transform_indices = @transform_5, window_bounds = array<i64: 8, 8, 128>}]} {
    %c0_i32 = arith.constant 0 : i32
    %0 = arith.cmpi eq, %arg0, %c0_i32 : i32
    %1 = arith.extui %0 : i1 to i32
    %c0_i32_0 = arith.constant 0 : i32
    %2 = arith.cmpi ne, %1, %c0_i32_0 : i32
    scf.if %2 {
      %cst_124 = arith.constant 0.000000e+00 : f32
      %453 = vector.broadcast %cst_124 : f32 to vector<8x128xf32>
      %c0_125 = arith.constant 0 : index
      %c0_126 = arith.constant 0 : index
      %454 = vector.load %arg7[%c0_125, %c0_126] : memref<8x128xf32, #tpu.memory_space<vmem>>, vector<8x128xf32>
      tpu.vector_store %arg7[%c0_125, %c0_126], %453 {strides = array<i32>} : memref<8x128xf32, #tpu.memory_space<vmem>>, vector<8x128xf32>,
      %cst_127 = arith.constant 0.000000e+00 : f32
      %455 = vector.broadcast %cst_127 : f32 to vector<8x128xf32>
      %c0_128 = arith.constant 0 : index
      %c0_129 = arith.constant 0 : index
      %456 = vector.load %arg8[%c0_128, %c0_129] : memref<8x128xf32, #tpu.memory_space<vmem>>, vector<8x128xf32>
      tpu.vector_store %arg8[%c0_128, %c0_129], %455 {strides = array<i32>} : memref<8x128xf32, #tpu.memory_space<vmem>>, vector<8x128xf32>,
      %cst_130 = arith.constant 0.000000e+00 : f32
      %457 = vector.broadcast %cst_130 : f32 to vector<8x128xf32>
      %c0_131 = arith.constant 0 : index
      %c0_132 = arith.constant 0 : index
      %458 = vector.load %arg9[%c0_131, %c0_132] : memref<8x128xf32, #tpu.memory_space<vmem>>, vector<8x128xf32>
      tpu.vector_store %arg9[%c0_131, %c0_132], %457 {strides = array<i32>} : memref<8x128xf32, #tpu.memory_space<vmem>>, vector<8x128xf32>,
      %cst_133 = arith.constant 0.000000e+00 : f32
      %459 = vector.broadcast %cst_133 : f32 to vector<8x128xf32>
      %c0_134 = arith.constant 0 : index
      %c0_135 = arith.constant 0 : index
      %460 = vector.load %arg10[%c0_134, %c0_135] : memref<8x128xf32, #tpu.memory_space<vmem>>, vector<8x128xf32>
      tpu.vector_store %arg10[%c0_134, %c0_135], %459 {strides = array<i32>} : memref<8x128xf32, #tpu.memory_space<vmem>>, vector<8x128xf32>,
    } else {
    }
    %c0 = arith.constant 0 : index
    %c0_1 = arith.constant 0 : index
    %3 = vector.load %arg3[%c0, %c0_1] : memref<128x512xbf16, #tpu.memory_space<vmem>>, vector<128x512xbf16>
    %c0_2 = arith.constant 0 : index
    %c0_3 = arith.constant 0 : index
    %4 = vector.load %arg4[%c0_2, %c0_3] : memref<128x512xbf16, #tpu.memory_space<vmem>>, vector<128x512xbf16>
    %c0_4 = arith.constant 0 : index
    %c0_5 = arith.constant 0 : index
    %5 = vector.load %arg7[%c0_4, %c0_5] : memref<8x128xf32, #tpu.memory_space<vmem>>, vector<8x128xf32>
    %c0_6 = arith.constant 0 : index
    %c0_7 = arith.constant 0 : index
    %6 = vector.load %arg8[%c0_6, %c0_7] : memref<8x128xf32, #tpu.memory_space<vmem>>, vector<8x128xf32>
    %c0_8 = arith.constant 0 : index
    %c0_9 = arith.constant 0 : index
    %7 = vector.load %arg9[%c0_8, %c0_9] : memref<8x128xf32, #tpu.memory_space<vmem>>, vector<8x128xf32>
    %c0_10 = arith.constant 0 : index
    %c0_11 = arith.constant 0 : index
    %8 = vector.load %arg10[%c0_10, %c0_11] : memref<8x128xf32, #tpu.memory_space<vmem>>, vector<8x128xf32>
    %c0_i32_12 = arith.constant 0 : i32
    %c7_i32 = arith.constant 7 : i32
    %9 = arith.subi %c7_i32, %c0_i32_12 : i32
    %10 = arith.index_cast %c0_i32_12 : i32 to index
    %c0_13 = arith.constant 0 : index
    %c0_14 = arith.constant 0 : index
    %11 = vector.load %arg1[%10, %c0_13, %c0_14] : memref<8x8x512xf32, #tpu.memory_space<vmem>>, vector<1x8x512xf32>
    %12 = vector.shape_cast %11 : vector<1x8x512xf32> to vector<8x512xf32>
    %13 = arith.truncf %5 : vector<8x128xf32> to vector<8x128xbf16>
    %cst = arith.constant dense<0.000000e+00> : vector<8x512xf32>
    %14 = tpu.matmul %13, %3, %cst {dimension_numbers = #tpu.dot_dimension_numbers<[1], [0], [0], [1], [0, 0, 1, 1], [], []>} : vector<8x128xbf16>, vector<128x512xbf16>, vector<8x512xf32> -> vector<8x512xf32>
    %15 = arith.addf %12, %14 : vector<8x512xf32>
    %16 = arith.index_cast %9 : i32 to index
    %c0_15 = arith.constant 0 : index
    %c0_16 = arith.constant 0 : index
    %17 = vector.load %arg2[%16, %c0_15, %c0_16] : memref<8x8x512xf32, #tpu.memory_space<vmem>>, vector<1x8x512xf32>
    %18 = vector.shape_cast %17 : vector<1x8x512xf32> to vector<8x512xf32>
    %19 = arith.truncf %7 : vector<8x128xf32> to vector<8x128xbf16>
    %cst_17 = arith.constant dense<0.000000e+00> : vector<8x512xf32>
    %20 = tpu.matmul %19, %4, %cst_17 {dimension_numbers = #tpu.dot_dimension_numbers<[1], [0], [0], [1], [0, 0, 1, 1], [], []>} : vector<8x128xbf16>, vector<128x512xbf16>, vector<8x512xf32> -> vector<8x512xf32>
    %21 = arith.addf %18, %20 : vector<8x512xf32>
    %22 = vector.extract_strided_slice %15 {offsets = [0, 0], sizes = [8, 384], strides = [1, 1]} : vector<8x512xf32> to vector<8x384xf32>
    %23 = arith.negf %22 : vector<8x384xf32>
    %24 = math.exp %23 : vector<8x384xf32>
    %cst_18 = arith.constant 1.000000e+00 : f32
    %25 = vector.broadcast %cst_18 : f32 to vector<8x384xf32>
    %26 = arith.addf %25, %24 : vector<8x384xf32>
    %27 = arith.divf %25, %26 : vector<8x384xf32>
    %28 = vector.extract_strided_slice %27 {offsets = [0, 0], sizes = [8, 128], strides = [1, 1]} : vector<8x384xf32> to vector<8x128xf32>
    %29 = vector.extract_strided_slice %27 {offsets = [0, 128], sizes = [8, 128], strides = [1, 1]} : vector<8x384xf32> to vector<8x128xf32>
    %30 = vector.extract_strided_slice %27 {offsets = [0, 256], sizes = [8, 128], strides = [1, 1]} : vector<8x384xf32> to vector<8x128xf32>
    %31 = vector.extract_strided_slice %15 {offsets = [0, 384], sizes = [8, 128], strides = [1, 1]} : vector<8x512xf32> to vector<8x128xf32>
    %32 = math.tanh %31 : vector<8x128xf32>
    %33 = arith.mulf %29, %6 : vector<8x128xf32>
    %34 = arith.mulf %28, %32 : vector<8x128xf32>
    %35 = arith.addf %33, %34 : vector<8x128xf32>
    %36 = math.tanh %35 : vector<8x128xf32>
    %37 = arith.mulf %30, %36 : vector<8x128xf32>
    %38 = vector.extract_strided_slice %21 {offsets = [0, 0], sizes = [8, 384], strides = [1, 1]} : vector<8x512xf32> to vector<8x384xf32>
    %39 = arith.negf %38 : vector<8x384xf32>
    %40 = math.exp %39 : vector<8x384xf32>
    %cst_19 = arith.constant 1.000000e+00 : f32
    %41 = vector.broadcast %cst_19 : f32 to vector<8x384xf32>
    %42 = arith.addf %41, %40 : vector<8x384xf32>
    %43 = arith.divf %41, %42 : vector<8x384xf32>
    %44 = vector.extract_strided_slice %43 {offsets = [0, 0], sizes = [8, 128], strides = [1, 1]} : vector<8x384xf32> to vector<8x128xf32>
    %45 = vector.extract_strided_slice %43 {offsets = [0, 128], sizes = [8, 128], strides = [1, 1]} : vector<8x384xf32> to vector<8x128xf32>
    %46 = vector.extract_strided_slice %43 {offsets = [0, 256], sizes = [8, 128], strides = [1, 1]} : vector<8x384xf32> to vector<8x128xf32>
    %47 = vector.extract_strided_slice %21 {offsets = [0, 384], sizes = [8, 128], strides = [1, 1]} : vector<8x512xf32> to vector<8x128xf32>
    %48 = math.tanh %47 : vector<8x128xf32>
    %49 = arith.mulf %45, %8 : vector<8x128xf32>
    %50 = arith.mulf %44, %48 : vector<8x128xf32>
    %51 = arith.addf %49, %50 : vector<8x128xf32>
    %52 = math.tanh %51 : vector<8x128xf32>
    %53 = arith.mulf %46, %52 : vector<8x128xf32>
    %54 = arith.truncf %37 : vector<8x128xf32> to vector<8x128xbf16>
    %55 = arith.index_cast %c0_i32_12 : i32 to index
    %c0_20 = arith.constant 0 : index
    %c0_21 = arith.constant 0 : index
    %56 = vector.load %arg5[%55, %c0_20, %c0_21] : memref<8x8x128xbf16, #tpu.memory_space<vmem>>, vector<1x8x128xbf16>
    %57 = vector.shape_cast %56 : vector<1x8x128xbf16> to vector<8x128xbf16>
    %58 = vector.shape_cast %54 : vector<8x128xbf16> to vector<1x8x128xbf16>
    tpu.vector_store %arg5[%55, %c0_20, %c0_21], %58 {strides = array<i32>} : memref<8x8x128xbf16, #tpu.memory_space<vmem>>, vector<1x8x128xbf16>,
    %59 = arith.truncf %53 : vector<8x128xf32> to vector<8x128xbf16>
    %60 = arith.index_cast %9 : i32 to index
    %c0_22 = arith.constant 0 : index
    %c0_23 = arith.constant 0 : index
    %61 = vector.load %arg6[%60, %c0_22, %c0_23] : memref<8x8x128xbf16, #tpu.memory_space<vmem>>, vector<1x8x128xbf16>
    %62 = vector.shape_cast %61 : vector<1x8x128xbf16> to vector<8x128xbf16>
    %63 = vector.shape_cast %59 : vector<8x128xbf16> to vector<1x8x128xbf16>
    tpu.vector_store %arg6[%60, %c0_22, %c0_23], %63 {strides = array<i32>} : memref<8x8x128xbf16, #tpu.memory_space<vmem>>, vector<1x8x128xbf16>,
    %c1_i32 = arith.constant 1 : i32
    %c7_i32_24 = arith.constant 7 : i32
    %64 = arith.subi %c7_i32_24, %c1_i32 : i32
    %65 = arith.index_cast %c1_i32 : i32 to index
    %c0_25 = arith.constant 0 : index
    %c0_26 = arith.constant 0 : index
    %66 = vector.load %arg1[%65, %c0_25, %c0_26] : memref<8x8x512xf32, #tpu.memory_space<vmem>>, vector<1x8x512xf32>
    %67 = vector.shape_cast %66 : vector<1x8x512xf32> to vector<8x512xf32>
    %68 = arith.truncf %37 : vector<8x128xf32> to vector<8x128xbf16>
    %cst_27 = arith.constant dense<0.000000e+00> : vector<8x512xf32>
    %69 = tpu.matmul %68, %3, %cst_27 {dimension_numbers = #tpu.dot_dimension_numbers<[1], [0], [0], [1], [0, 0, 1, 1], [], []>} : vector<8x128xbf16>, vector<128x512xbf16>, vector<8x512xf32> -> vector<8x512xf32>
    %70 = arith.addf %67, %69 : vector<8x512xf32>
    %71 = arith.index_cast %64 : i32 to index
    %c0_28 = arith.constant 0 : index
    %c0_29 = arith.constant 0 : index
    %72 = vector.load %arg2[%71, %c0_28, %c0_29] : memref<8x8x512xf32, #tpu.memory_space<vmem>>, vector<1x8x512xf32>
    %73 = vector.shape_cast %72 : vector<1x8x512xf32> to vector<8x512xf32>
    %74 = arith.truncf %53 : vector<8x128xf32> to vector<8x128xbf16>
    %cst_30 = arith.constant dense<0.000000e+00> : vector<8x512xf32>
    %75 = tpu.matmul %74, %4, %cst_30 {dimension_numbers = #tpu.dot_dimension_numbers<[1], [0], [0], [1], [0, 0, 1, 1], [], []>} : vector<8x128xbf16>, vector<128x512xbf16>, vector<8x512xf32> -> vector<8x512xf32>
    %76 = arith.addf %73, %75 : vector<8x512xf32>
    %77 = vector.extract_strided_slice %70 {offsets = [0, 0], sizes = [8, 384], strides = [1, 1]} : vector<8x512xf32> to vector<8x384xf32>
    %78 = arith.negf %77 : vector<8x384xf32>
    %79 = math.exp %78 : vector<8x384xf32>
    %cst_31 = arith.constant 1.000000e+00 : f32
    %80 = vector.broadcast %cst_31 : f32 to vector<8x384xf32>
    %81 = arith.addf %80, %79 : vector<8x384xf32>
    %82 = arith.divf %80, %81 : vector<8x384xf32>
    %83 = vector.extract_strided_slice %82 {offsets = [0, 0], sizes = [8, 128], strides = [1, 1]} : vector<8x384xf32> to vector<8x128xf32>
    %84 = vector.extract_strided_slice %82 {offsets = [0, 128], sizes = [8, 128], strides = [1, 1]} : vector<8x384xf32> to vector<8x128xf32>
    %85 = vector.extract_strided_slice %82 {offsets = [0, 256], sizes = [8, 128], strides = [1, 1]} : vector<8x384xf32> to vector<8x128xf32>
    %86 = vector.extract_strided_slice %70 {offsets = [0, 384], sizes = [8, 128], strides = [1, 1]} : vector<8x512xf32> to vector<8x128xf32>
    %87 = math.tanh %86 : vector<8x128xf32>
    %88 = arith.mulf %84, %35 : vector<8x128xf32>
    %89 = arith.mulf %83, %87 : vector<8x128xf32>
    %90 = arith.addf %88, %89 : vector<8x128xf32>
    %91 = math.tanh %90 : vector<8x128xf32>
    %92 = arith.mulf %85, %91 : vector<8x128xf32>
    %93 = vector.extract_strided_slice %76 {offsets = [0, 0], sizes = [8, 384], strides = [1, 1]} : vector<8x512xf32> to vector<8x384xf32>
    %94 = arith.negf %93 : vector<8x384xf32>
    %95 = math.exp %94 : vector<8x384xf32>
    %cst_32 = arith.constant 1.000000e+00 : f32
    %96 = vector.broadcast %cst_32 : f32 to vector<8x384xf32>
    %97 = arith.addf %96, %95 : vector<8x384xf32>
    %98 = arith.divf %96, %97 : vector<8x384xf32>
    %99 = vector.extract_strided_slice %98 {offsets = [0, 0], sizes = [8, 128], strides = [1, 1]} : vector<8x384xf32> to vector<8x128xf32>
    %100 = vector.extract_strided_slice %98 {offsets = [0, 128], sizes = [8, 128], strides = [1, 1]} : vector<8x384xf32> to vector<8x128xf32>
    %101 = vector.extract_strided_slice %98 {offsets = [0, 256], sizes = [8, 128], strides = [1, 1]} : vector<8x384xf32> to vector<8x128xf32>
    %102 = vector.extract_strided_slice %76 {offsets = [0, 384], sizes = [8, 128], strides = [1, 1]} : vector<8x512xf32> to vector<8x128xf32>
    %103 = math.tanh %102 : vector<8x128xf32>
    %104 = arith.mulf %100, %51 : vector<8x128xf32>
    %105 = arith.mulf %99, %103 : vector<8x128xf32>
    %106 = arith.addf %104, %105 : vector<8x128xf32>
    %107 = math.tanh %106 : vector<8x128xf32>
    %108 = arith.mulf %101, %107 : vector<8x128xf32>
    %109 = arith.truncf %92 : vector<8x128xf32> to vector<8x128xbf16>
    %110 = arith.index_cast %c1_i32 : i32 to index
    %c0_33 = arith.constant 0 : index
    %c0_34 = arith.constant 0 : index
    %111 = vector.load %arg5[%110, %c0_33, %c0_34] : memref<8x8x128xbf16, #tpu.memory_space<vmem>>, vector<1x8x128xbf16>
    %112 = vector.shape_cast %111 : vector<1x8x128xbf16> to vector<8x128xbf16>
    %113 = vector.shape_cast %109 : vector<8x128xbf16> to vector<1x8x128xbf16>
    tpu.vector_store %arg5[%110, %c0_33, %c0_34], %113 {strides = array<i32>} : memref<8x8x128xbf16, #tpu.memory_space<vmem>>, vector<1x8x128xbf16>,
    %114 = arith.truncf %108 : vector<8x128xf32> to vector<8x128xbf16>
    %115 = arith.index_cast %64 : i32 to index
    %c0_35 = arith.constant 0 : index
    %c0_36 = arith.constant 0 : index
    %116 = vector.load %arg6[%115, %c0_35, %c0_36] : memref<8x8x128xbf16, #tpu.memory_space<vmem>>, vector<1x8x128xbf16>
    %117 = vector.shape_cast %116 : vector<1x8x128xbf16> to vector<8x128xbf16>
    %118 = vector.shape_cast %114 : vector<8x128xbf16> to vector<1x8x128xbf16>
    tpu.vector_store %arg6[%115, %c0_35, %c0_36], %118 {strides = array<i32>} : memref<8x8x128xbf16, #tpu.memory_space<vmem>>, vector<1x8x128xbf16>,
    %c2_i32 = arith.constant 2 : i32
    %c7_i32_37 = arith.constant 7 : i32
    %119 = arith.subi %c7_i32_37, %c2_i32 : i32
    %120 = arith.index_cast %c2_i32 : i32 to index
    %c0_38 = arith.constant 0 : index
    %c0_39 = arith.constant 0 : index
    %121 = vector.load %arg1[%120, %c0_38, %c0_39] : memref<8x8x512xf32, #tpu.memory_space<vmem>>, vector<1x8x512xf32>
    %122 = vector.shape_cast %121 : vector<1x8x512xf32> to vector<8x512xf32>
    %123 = arith.truncf %92 : vector<8x128xf32> to vector<8x128xbf16>
    %cst_40 = arith.constant dense<0.000000e+00> : vector<8x512xf32>
    %124 = tpu.matmul %123, %3, %cst_40 {dimension_numbers = #tpu.dot_dimension_numbers<[1], [0], [0], [1], [0, 0, 1, 1], [], []>} : vector<8x128xbf16>, vector<128x512xbf16>, vector<8x512xf32> -> vector<8x512xf32>
    %125 = arith.addf %122, %124 : vector<8x512xf32>
    %126 = arith.index_cast %119 : i32 to index
    %c0_41 = arith.constant 0 : index
    %c0_42 = arith.constant 0 : index
    %127 = vector.load %arg2[%126, %c0_41, %c0_42] : memref<8x8x512xf32, #tpu.memory_space<vmem>>, vector<1x8x512xf32>
    %128 = vector.shape_cast %127 : vector<1x8x512xf32> to vector<8x512xf32>
    %129 = arith.truncf %108 : vector<8x128xf32> to vector<8x128xbf16>
    %cst_43 = arith.constant dense<0.000000e+00> : vector<8x512xf32>
    %130 = tpu.matmul %129, %4, %cst_43 {dimension_numbers = #tpu.dot_dimension_numbers<[1], [0], [0], [1], [0, 0, 1, 1], [], []>} : vector<8x128xbf16>, vector<128x512xbf16>, vector<8x512xf32> -> vector<8x512xf32>
    %131 = arith.addf %128, %130 : vector<8x512xf32>
    %132 = vector.extract_strided_slice %125 {offsets = [0, 0], sizes = [8, 384], strides = [1, 1]} : vector<8x512xf32> to vector<8x384xf32>
    %133 = arith.negf %132 : vector<8x384xf32>
    %134 = math.exp %133 : vector<8x384xf32>
    %cst_44 = arith.constant 1.000000e+00 : f32
    %135 = vector.broadcast %cst_44 : f32 to vector<8x384xf32>
    %136 = arith.addf %135, %134 : vector<8x384xf32>
    %137 = arith.divf %135, %136 : vector<8x384xf32>
    %138 = vector.extract_strided_slice %137 {offsets = [0, 0], sizes = [8, 128], strides = [1, 1]} : vector<8x384xf32> to vector<8x128xf32>
    %139 = vector.extract_strided_slice %137 {offsets = [0, 128], sizes = [8, 128], strides = [1, 1]} : vector<8x384xf32> to vector<8x128xf32>
    %140 = vector.extract_strided_slice %137 {offsets = [0, 256], sizes = [8, 128], strides = [1, 1]} : vector<8x384xf32> to vector<8x128xf32>
    %141 = vector.extract_strided_slice %125 {offsets = [0, 384], sizes = [8, 128], strides = [1, 1]} : vector<8x512xf32> to vector<8x128xf32>
    %142 = math.tanh %141 : vector<8x128xf32>
    %143 = arith.mulf %139, %90 : vector<8x128xf32>
    %144 = arith.mulf %138, %142 : vector<8x128xf32>
    %145 = arith.addf %143, %144 : vector<8x128xf32>
    %146 = math.tanh %145 : vector<8x128xf32>
    %147 = arith.mulf %140, %146 : vector<8x128xf32>
    %148 = vector.extract_strided_slice %131 {offsets = [0, 0], sizes = [8, 384], strides = [1, 1]} : vector<8x512xf32> to vector<8x384xf32>
    %149 = arith.negf %148 : vector<8x384xf32>
    %150 = math.exp %149 : vector<8x384xf32>
    %cst_45 = arith.constant 1.000000e+00 : f32
    %151 = vector.broadcast %cst_45 : f32 to vector<8x384xf32>
    %152 = arith.addf %151, %150 : vector<8x384xf32>
    %153 = arith.divf %151, %152 : vector<8x384xf32>
    %154 = vector.extract_strided_slice %153 {offsets = [0, 0], sizes = [8, 128], strides = [1, 1]} : vector<8x384xf32> to vector<8x128xf32>
    %155 = vector.extract_strided_slice %153 {offsets = [0, 128], sizes = [8, 128], strides = [1, 1]} : vector<8x384xf32> to vector<8x128xf32>
    %156 = vector.extract_strided_slice %153 {offsets = [0, 256], sizes = [8, 128], strides = [1, 1]} : vector<8x384xf32> to vector<8x128xf32>
    %157 = vector.extract_strided_slice %131 {offsets = [0, 384], sizes = [8, 128], strides = [1, 1]} : vector<8x512xf32> to vector<8x128xf32>
    %158 = math.tanh %157 : vector<8x128xf32>
    %159 = arith.mulf %155, %106 : vector<8x128xf32>
    %160 = arith.mulf %154, %158 : vector<8x128xf32>
    %161 = arith.addf %159, %160 : vector<8x128xf32>
    %162 = math.tanh %161 : vector<8x128xf32>
    %163 = arith.mulf %156, %162 : vector<8x128xf32>
    %164 = arith.truncf %147 : vector<8x128xf32> to vector<8x128xbf16>
    %165 = arith.index_cast %c2_i32 : i32 to index
    %c0_46 = arith.constant 0 : index
    %c0_47 = arith.constant 0 : index
    %166 = vector.load %arg5[%165, %c0_46, %c0_47] : memref<8x8x128xbf16, #tpu.memory_space<vmem>>, vector<1x8x128xbf16>
    %167 = vector.shape_cast %166 : vector<1x8x128xbf16> to vector<8x128xbf16>
    %168 = vector.shape_cast %164 : vector<8x128xbf16> to vector<1x8x128xbf16>
    tpu.vector_store %arg5[%165, %c0_46, %c0_47], %168 {strides = array<i32>} : memref<8x8x128xbf16, #tpu.memory_space<vmem>>, vector<1x8x128xbf16>,
    %169 = arith.truncf %163 : vector<8x128xf32> to vector<8x128xbf16>
    %170 = arith.index_cast %119 : i32 to index
    %c0_48 = arith.constant 0 : index
    %c0_49 = arith.constant 0 : index
    %171 = vector.load %arg6[%170, %c0_48, %c0_49] : memref<8x8x128xbf16, #tpu.memory_space<vmem>>, vector<1x8x128xbf16>
    %172 = vector.shape_cast %171 : vector<1x8x128xbf16> to vector<8x128xbf16>
    %173 = vector.shape_cast %169 : vector<8x128xbf16> to vector<1x8x128xbf16>
    tpu.vector_store %arg6[%170, %c0_48, %c0_49], %173 {strides = array<i32>} : memref<8x8x128xbf16, #tpu.memory_space<vmem>>, vector<1x8x128xbf16>,
    %c3_i32 = arith.constant 3 : i32
    %c7_i32_50 = arith.constant 7 : i32
    %174 = arith.subi %c7_i32_50, %c3_i32 : i32
    %175 = arith.index_cast %c3_i32 : i32 to index
    %c0_51 = arith.constant 0 : index
    %c0_52 = arith.constant 0 : index
    %176 = vector.load %arg1[%175, %c0_51, %c0_52] : memref<8x8x512xf32, #tpu.memory_space<vmem>>, vector<1x8x512xf32>
    %177 = vector.shape_cast %176 : vector<1x8x512xf32> to vector<8x512xf32>
    %178 = arith.truncf %147 : vector<8x128xf32> to vector<8x128xbf16>
    %cst_53 = arith.constant dense<0.000000e+00> : vector<8x512xf32>
    %179 = tpu.matmul %178, %3, %cst_53 {dimension_numbers = #tpu.dot_dimension_numbers<[1], [0], [0], [1], [0, 0, 1, 1], [], []>} : vector<8x128xbf16>, vector<128x512xbf16>, vector<8x512xf32> -> vector<8x512xf32>
    %180 = arith.addf %177, %179 : vector<8x512xf32>
    %181 = arith.index_cast %174 : i32 to index
    %c0_54 = arith.constant 0 : index
    %c0_55 = arith.constant 0 : index
    %182 = vector.load %arg2[%181, %c0_54, %c0_55] : memref<8x8x512xf32, #tpu.memory_space<vmem>>, vector<1x8x512xf32>
    %183 = vector.shape_cast %182 : vector<1x8x512xf32> to vector<8x512xf32>
    %184 = arith.truncf %163 : vector<8x128xf32> to vector<8x128xbf16>
    %cst_56 = arith.constant dense<0.000000e+00> : vector<8x512xf32>
    %185 = tpu.matmul %184, %4, %cst_56 {dimension_numbers = #tpu.dot_dimension_numbers<[1], [0], [0], [1], [0, 0, 1, 1], [], []>} : vector<8x128xbf16>, vector<128x512xbf16>, vector<8x512xf32> -> vector<8x512xf32>
    %186 = arith.addf %183, %185 : vector<8x512xf32>
    %187 = vector.extract_strided_slice %180 {offsets = [0, 0], sizes = [8, 384], strides = [1, 1]} : vector<8x512xf32> to vector<8x384xf32>
    %188 = arith.negf %187 : vector<8x384xf32>
    %189 = math.exp %188 : vector<8x384xf32>
    %cst_57 = arith.constant 1.000000e+00 : f32
    %190 = vector.broadcast %cst_57 : f32 to vector<8x384xf32>
    %191 = arith.addf %190, %189 : vector<8x384xf32>
    %192 = arith.divf %190, %191 : vector<8x384xf32>
    %193 = vector.extract_strided_slice %192 {offsets = [0, 0], sizes = [8, 128], strides = [1, 1]} : vector<8x384xf32> to vector<8x128xf32>
    %194 = vector.extract_strided_slice %192 {offsets = [0, 128], sizes = [8, 128], strides = [1, 1]} : vector<8x384xf32> to vector<8x128xf32>
    %195 = vector.extract_strided_slice %192 {offsets = [0, 256], sizes = [8, 128], strides = [1, 1]} : vector<8x384xf32> to vector<8x128xf32>
    %196 = vector.extract_strided_slice %180 {offsets = [0, 384], sizes = [8, 128], strides = [1, 1]} : vector<8x512xf32> to vector<8x128xf32>
    %197 = math.tanh %196 : vector<8x128xf32>
    %198 = arith.mulf %194, %145 : vector<8x128xf32>
    %199 = arith.mulf %193, %197 : vector<8x128xf32>
    %200 = arith.addf %198, %199 : vector<8x128xf32>
    %201 = math.tanh %200 : vector<8x128xf32>
    %202 = arith.mulf %195, %201 : vector<8x128xf32>
    %203 = vector.extract_strided_slice %186 {offsets = [0, 0], sizes = [8, 384], strides = [1, 1]} : vector<8x512xf32> to vector<8x384xf32>
    %204 = arith.negf %203 : vector<8x384xf32>
    %205 = math.exp %204 : vector<8x384xf32>
    %cst_58 = arith.constant 1.000000e+00 : f32
    %206 = vector.broadcast %cst_58 : f32 to vector<8x384xf32>
    %207 = arith.addf %206, %205 : vector<8x384xf32>
    %208 = arith.divf %206, %207 : vector<8x384xf32>
    %209 = vector.extract_strided_slice %208 {offsets = [0, 0], sizes = [8, 128], strides = [1, 1]} : vector<8x384xf32> to vector<8x128xf32>
    %210 = vector.extract_strided_slice %208 {offsets = [0, 128], sizes = [8, 128], strides = [1, 1]} : vector<8x384xf32> to vector<8x128xf32>
    %211 = vector.extract_strided_slice %208 {offsets = [0, 256], sizes = [8, 128], strides = [1, 1]} : vector<8x384xf32> to vector<8x128xf32>
    %212 = vector.extract_strided_slice %186 {offsets = [0, 384], sizes = [8, 128], strides = [1, 1]} : vector<8x512xf32> to vector<8x128xf32>
    %213 = math.tanh %212 : vector<8x128xf32>
    %214 = arith.mulf %210, %161 : vector<8x128xf32>
    %215 = arith.mulf %209, %213 : vector<8x128xf32>
    %216 = arith.addf %214, %215 : vector<8x128xf32>
    %217 = math.tanh %216 : vector<8x128xf32>
    %218 = arith.mulf %211, %217 : vector<8x128xf32>
    %219 = arith.truncf %202 : vector<8x128xf32> to vector<8x128xbf16>
    %220 = arith.index_cast %c3_i32 : i32 to index
    %c0_59 = arith.constant 0 : index
    %c0_60 = arith.constant 0 : index
    %221 = vector.load %arg5[%220, %c0_59, %c0_60] : memref<8x8x128xbf16, #tpu.memory_space<vmem>>, vector<1x8x128xbf16>
    %222 = vector.shape_cast %221 : vector<1x8x128xbf16> to vector<8x128xbf16>
    %223 = vector.shape_cast %219 : vector<8x128xbf16> to vector<1x8x128xbf16>
    tpu.vector_store %arg5[%220, %c0_59, %c0_60], %223 {strides = array<i32>} : memref<8x8x128xbf16, #tpu.memory_space<vmem>>, vector<1x8x128xbf16>,
    %224 = arith.truncf %218 : vector<8x128xf32> to vector<8x128xbf16>
    %225 = arith.index_cast %174 : i32 to index
    %c0_61 = arith.constant 0 : index
    %c0_62 = arith.constant 0 : index
    %226 = vector.load %arg6[%225, %c0_61, %c0_62] : memref<8x8x128xbf16, #tpu.memory_space<vmem>>, vector<1x8x128xbf16>
    %227 = vector.shape_cast %226 : vector<1x8x128xbf16> to vector<8x128xbf16>
    %228 = vector.shape_cast %224 : vector<8x128xbf16> to vector<1x8x128xbf16>
    tpu.vector_store %arg6[%225, %c0_61, %c0_62], %228 {strides = array<i32>} : memref<8x8x128xbf16, #tpu.memory_space<vmem>>, vector<1x8x128xbf16>,
    %c4_i32 = arith.constant 4 : i32
    %c7_i32_63 = arith.constant 7 : i32
    %229 = arith.subi %c7_i32_63, %c4_i32 : i32
    %230 = arith.index_cast %c4_i32 : i32 to index
    %c0_64 = arith.constant 0 : index
    %c0_65 = arith.constant 0 : index
    %231 = vector.load %arg1[%230, %c0_64, %c0_65] : memref<8x8x512xf32, #tpu.memory_space<vmem>>, vector<1x8x512xf32>
    %232 = vector.shape_cast %231 : vector<1x8x512xf32> to vector<8x512xf32>
    %233 = arith.truncf %202 : vector<8x128xf32> to vector<8x128xbf16>
    %cst_66 = arith.constant dense<0.000000e+00> : vector<8x512xf32>
    %234 = tpu.matmul %233, %3, %cst_66 {dimension_numbers = #tpu.dot_dimension_numbers<[1], [0], [0], [1], [0, 0, 1, 1], [], []>} : vector<8x128xbf16>, vector<128x512xbf16>, vector<8x512xf32> -> vector<8x512xf32>
    %235 = arith.addf %232, %234 : vector<8x512xf32>
    %236 = arith.index_cast %229 : i32 to index
    %c0_67 = arith.constant 0 : index
    %c0_68 = arith.constant 0 : index
    %237 = vector.load %arg2[%236, %c0_67, %c0_68] : memref<8x8x512xf32, #tpu.memory_space<vmem>>, vector<1x8x512xf32>
    %238 = vector.shape_cast %237 : vector<1x8x512xf32> to vector<8x512xf32>
    %239 = arith.truncf %218 : vector<8x128xf32> to vector<8x128xbf16>
    %cst_69 = arith.constant dense<0.000000e+00> : vector<8x512xf32>
    %240 = tpu.matmul %239, %4, %cst_69 {dimension_numbers = #tpu.dot_dimension_numbers<[1], [0], [0], [1], [0, 0, 1, 1], [], []>} : vector<8x128xbf16>, vector<128x512xbf16>, vector<8x512xf32> -> vector<8x512xf32>
    %241 = arith.addf %238, %240 : vector<8x512xf32>
    %242 = vector.extract_strided_slice %235 {offsets = [0, 0], sizes = [8, 384], strides = [1, 1]} : vector<8x512xf32> to vector<8x384xf32>
    %243 = arith.negf %242 : vector<8x384xf32>
    %244 = math.exp %243 : vector<8x384xf32>
    %cst_70 = arith.constant 1.000000e+00 : f32
    %245 = vector.broadcast %cst_70 : f32 to vector<8x384xf32>
    %246 = arith.addf %245, %244 : vector<8x384xf32>
    %247 = arith.divf %245, %246 : vector<8x384xf32>
    %248 = vector.extract_strided_slice %247 {offsets = [0, 0], sizes = [8, 128], strides = [1, 1]} : vector<8x384xf32> to vector<8x128xf32>
    %249 = vector.extract_strided_slice %247 {offsets = [0, 128], sizes = [8, 128], strides = [1, 1]} : vector<8x384xf32> to vector<8x128xf32>
    %250 = vector.extract_strided_slice %247 {offsets = [0, 256], sizes = [8, 128], strides = [1, 1]} : vector<8x384xf32> to vector<8x128xf32>
    %251 = vector.extract_strided_slice %235 {offsets = [0, 384], sizes = [8, 128], strides = [1, 1]} : vector<8x512xf32> to vector<8x128xf32>
    %252 = math.tanh %251 : vector<8x128xf32>
    %253 = arith.mulf %249, %200 : vector<8x128xf32>
    %254 = arith.mulf %248, %252 : vector<8x128xf32>
    %255 = arith.addf %253, %254 : vector<8x128xf32>
    %256 = math.tanh %255 : vector<8x128xf32>
    %257 = arith.mulf %250, %256 : vector<8x128xf32>
    %258 = vector.extract_strided_slice %241 {offsets = [0, 0], sizes = [8, 384], strides = [1, 1]} : vector<8x512xf32> to vector<8x384xf32>
    %259 = arith.negf %258 : vector<8x384xf32>
    %260 = math.exp %259 : vector<8x384xf32>
    %cst_71 = arith.constant 1.000000e+00 : f32
    %261 = vector.broadcast %cst_71 : f32 to vector<8x384xf32>
    %262 = arith.addf %261, %260 : vector<8x384xf32>
    %263 = arith.divf %261, %262 : vector<8x384xf32>
    %264 = vector.extract_strided_slice %263 {offsets = [0, 0], sizes = [8, 128], strides = [1, 1]} : vector<8x384xf32> to vector<8x128xf32>
    %265 = vector.extract_strided_slice %263 {offsets = [0, 128], sizes = [8, 128], strides = [1, 1]} : vector<8x384xf32> to vector<8x128xf32>
    %266 = vector.extract_strided_slice %263 {offsets = [0, 256], sizes = [8, 128], strides = [1, 1]} : vector<8x384xf32> to vector<8x128xf32>
    %267 = vector.extract_strided_slice %241 {offsets = [0, 384], sizes = [8, 128], strides = [1, 1]} : vector<8x512xf32> to vector<8x128xf32>
    %268 = math.tanh %267 : vector<8x128xf32>
    %269 = arith.mulf %265, %216 : vector<8x128xf32>
    %270 = arith.mulf %264, %268 : vector<8x128xf32>
    %271 = arith.addf %269, %270 : vector<8x128xf32>
    %272 = math.tanh %271 : vector<8x128xf32>
    %273 = arith.mulf %266, %272 : vector<8x128xf32>
    %274 = arith.truncf %257 : vector<8x128xf32> to vector<8x128xbf16>
    %275 = arith.index_cast %c4_i32 : i32 to index
    %c0_72 = arith.constant 0 : index
    %c0_73 = arith.constant 0 : index
    %276 = vector.load %arg5[%275, %c0_72, %c0_73] : memref<8x8x128xbf16, #tpu.memory_space<vmem>>, vector<1x8x128xbf16>
    %277 = vector.shape_cast %276 : vector<1x8x128xbf16> to vector<8x128xbf16>
    %278 = vector.shape_cast %274 : vector<8x128xbf16> to vector<1x8x128xbf16>
    tpu.vector_store %arg5[%275, %c0_72, %c0_73], %278 {strides = array<i32>} : memref<8x8x128xbf16, #tpu.memory_space<vmem>>, vector<1x8x128xbf16>,
    %279 = arith.truncf %273 : vector<8x128xf32> to vector<8x128xbf16>
    %280 = arith.index_cast %229 : i32 to index
    %c0_74 = arith.constant 0 : index
    %c0_75 = arith.constant 0 : index
    %281 = vector.load %arg6[%280, %c0_74, %c0_75] : memref<8x8x128xbf16, #tpu.memory_space<vmem>>, vector<1x8x128xbf16>
    %282 = vector.shape_cast %281 : vector<1x8x128xbf16> to vector<8x128xbf16>
    %283 = vector.shape_cast %279 : vector<8x128xbf16> to vector<1x8x128xbf16>
    tpu.vector_store %arg6[%280, %c0_74, %c0_75], %283 {strides = array<i32>} : memref<8x8x128xbf16, #tpu.memory_space<vmem>>, vector<1x8x128xbf16>,
    %c5_i32 = arith.constant 5 : i32
    %c7_i32_76 = arith.constant 7 : i32
    %284 = arith.subi %c7_i32_76, %c5_i32 : i32
    %285 = arith.index_cast %c5_i32 : i32 to index
    %c0_77 = arith.constant 0 : index
    %c0_78 = arith.constant 0 : index
    %286 = vector.load %arg1[%285, %c0_77, %c0_78] : memref<8x8x512xf32, #tpu.memory_space<vmem>>, vector<1x8x512xf32>
    %287 = vector.shape_cast %286 : vector<1x8x512xf32> to vector<8x512xf32>
    %288 = arith.truncf %257 : vector<8x128xf32> to vector<8x128xbf16>
    %cst_79 = arith.constant dense<0.000000e+00> : vector<8x512xf32>
    %289 = tpu.matmul %288, %3, %cst_79 {dimension_numbers = #tpu.dot_dimension_numbers<[1], [0], [0], [1], [0, 0, 1, 1], [], []>} : vector<8x128xbf16>, vector<128x512xbf16>, vector<8x512xf32> -> vector<8x512xf32>
    %290 = arith.addf %287, %289 : vector<8x512xf32>
    %291 = arith.index_cast %284 : i32 to index
    %c0_80 = arith.constant 0 : index
    %c0_81 = arith.constant 0 : index
    %292 = vector.load %arg2[%291, %c0_80, %c0_81] : memref<8x8x512xf32, #tpu.memory_space<vmem>>, vector<1x8x512xf32>
    %293 = vector.shape_cast %292 : vector<1x8x512xf32> to vector<8x512xf32>
    %294 = arith.truncf %273 : vector<8x128xf32> to vector<8x128xbf16>
    %cst_82 = arith.constant dense<0.000000e+00> : vector<8x512xf32>
    %295 = tpu.matmul %294, %4, %cst_82 {dimension_numbers = #tpu.dot_dimension_numbers<[1], [0], [0], [1], [0, 0, 1, 1], [], []>} : vector<8x128xbf16>, vector<128x512xbf16>, vector<8x512xf32> -> vector<8x512xf32>
    %296 = arith.addf %293, %295 : vector<8x512xf32>
    %297 = vector.extract_strided_slice %290 {offsets = [0, 0], sizes = [8, 384], strides = [1, 1]} : vector<8x512xf32> to vector<8x384xf32>
    %298 = arith.negf %297 : vector<8x384xf32>
    %299 = math.exp %298 : vector<8x384xf32>
    %cst_83 = arith.constant 1.000000e+00 : f32
    %300 = vector.broadcast %cst_83 : f32 to vector<8x384xf32>
    %301 = arith.addf %300, %299 : vector<8x384xf32>
    %302 = arith.divf %300, %301 : vector<8x384xf32>
    %303 = vector.extract_strided_slice %302 {offsets = [0, 0], sizes = [8, 128], strides = [1, 1]} : vector<8x384xf32> to vector<8x128xf32>
    %304 = vector.extract_strided_slice %302 {offsets = [0, 128], sizes = [8, 128], strides = [1, 1]} : vector<8x384xf32> to vector<8x128xf32>
    %305 = vector.extract_strided_slice %302 {offsets = [0, 256], sizes = [8, 128], strides = [1, 1]} : vector<8x384xf32> to vector<8x128xf32>
    %306 = vector.extract_strided_slice %290 {offsets = [0, 384], sizes = [8, 128], strides = [1, 1]} : vector<8x512xf32> to vector<8x128xf32>
    %307 = math.tanh %306 : vector<8x128xf32>
    %308 = arith.mulf %304, %255 : vector<8x128xf32>
    %309 = arith.mulf %303, %307 : vector<8x128xf32>
    %310 = arith.addf %308, %309 : vector<8x128xf32>
    %311 = math.tanh %310 : vector<8x128xf32>
    %312 = arith.mulf %305, %311 : vector<8x128xf32>
    %313 = vector.extract_strided_slice %296 {offsets = [0, 0], sizes = [8, 384], strides = [1, 1]} : vector<8x512xf32> to vector<8x384xf32>
    %314 = arith.negf %313 : vector<8x384xf32>
    %315 = math.exp %314 : vector<8x384xf32>
    %cst_84 = arith.constant 1.000000e+00 : f32
    %316 = vector.broadcast %cst_84 : f32 to vector<8x384xf32>
    %317 = arith.addf %316, %315 : vector<8x384xf32>
    %318 = arith.divf %316, %317 : vector<8x384xf32>
    %319 = vector.extract_strided_slice %318 {offsets = [0, 0], sizes = [8, 128], strides = [1, 1]} : vector<8x384xf32> to vector<8x128xf32>
    %320 = vector.extract_strided_slice %318 {offsets = [0, 128], sizes = [8, 128], strides = [1, 1]} : vector<8x384xf32> to vector<8x128xf32>
    %321 = vector.extract_strided_slice %318 {offsets = [0, 256], sizes = [8, 128], strides = [1, 1]} : vector<8x384xf32> to vector<8x128xf32>
    %322 = vector.extract_strided_slice %296 {offsets = [0, 384], sizes = [8, 128], strides = [1, 1]} : vector<8x512xf32> to vector<8x128xf32>
    %323 = math.tanh %322 : vector<8x128xf32>
    %324 = arith.mulf %320, %271 : vector<8x128xf32>
    %325 = arith.mulf %319, %323 : vector<8x128xf32>
    %326 = arith.addf %324, %325 : vector<8x128xf32>
    %327 = math.tanh %326 : vector<8x128xf32>
    %328 = arith.mulf %321, %327 : vector<8x128xf32>
    %329 = arith.truncf %312 : vector<8x128xf32> to vector<8x128xbf16>
    %330 = arith.index_cast %c5_i32 : i32 to index
    %c0_85 = arith.constant 0 : index
    %c0_86 = arith.constant 0 : index
    %331 = vector.load %arg5[%330, %c0_85, %c0_86] : memref<8x8x128xbf16, #tpu.memory_space<vmem>>, vector<1x8x128xbf16>
    %332 = vector.shape_cast %331 : vector<1x8x128xbf16> to vector<8x128xbf16>
    %333 = vector.shape_cast %329 : vector<8x128xbf16> to vector<1x8x128xbf16>
    tpu.vector_store %arg5[%330, %c0_85, %c0_86], %333 {strides = array<i32>} : memref<8x8x128xbf16, #tpu.memory_space<vmem>>, vector<1x8x128xbf16>,
    %334 = arith.truncf %328 : vector<8x128xf32> to vector<8x128xbf16>
    %335 = arith.index_cast %284 : i32 to index
    %c0_87 = arith.constant 0 : index
    %c0_88 = arith.constant 0 : index
    %336 = vector.load %arg6[%335, %c0_87, %c0_88] : memref<8x8x128xbf16, #tpu.memory_space<vmem>>, vector<1x8x128xbf16>
    %337 = vector.shape_cast %336 : vector<1x8x128xbf16> to vector<8x128xbf16>
    %338 = vector.shape_cast %334 : vector<8x128xbf16> to vector<1x8x128xbf16>
    tpu.vector_store %arg6[%335, %c0_87, %c0_88], %338 {strides = array<i32>} : memref<8x8x128xbf16, #tpu.memory_space<vmem>>, vector<1x8x128xbf16>,
    %c6_i32 = arith.constant 6 : i32
    %c7_i32_89 = arith.constant 7 : i32
    %339 = arith.subi %c7_i32_89, %c6_i32 : i32
    %340 = arith.index_cast %c6_i32 : i32 to index
    %c0_90 = arith.constant 0 : index
    %c0_91 = arith.constant 0 : index
    %341 = vector.load %arg1[%340, %c0_90, %c0_91] : memref<8x8x512xf32, #tpu.memory_space<vmem>>, vector<1x8x512xf32>
    %342 = vector.shape_cast %341 : vector<1x8x512xf32> to vector<8x512xf32>
    %343 = arith.truncf %312 : vector<8x128xf32> to vector<8x128xbf16>
    %cst_92 = arith.constant dense<0.000000e+00> : vector<8x512xf32>
    %344 = tpu.matmul %343, %3, %cst_92 {dimension_numbers = #tpu.dot_dimension_numbers<[1], [0], [0], [1], [0, 0, 1, 1], [], []>} : vector<8x128xbf16>, vector<128x512xbf16>, vector<8x512xf32> -> vector<8x512xf32>
    %345 = arith.addf %342, %344 : vector<8x512xf32>
    %346 = arith.index_cast %339 : i32 to index
    %c0_93 = arith.constant 0 : index
    %c0_94 = arith.constant 0 : index
    %347 = vector.load %arg2[%346, %c0_93, %c0_94] : memref<8x8x512xf32, #tpu.memory_space<vmem>>, vector<1x8x512xf32>
    %348 = vector.shape_cast %347 : vector<1x8x512xf32> to vector<8x512xf32>
    %349 = arith.truncf %328 : vector<8x128xf32> to vector<8x128xbf16>
    %cst_95 = arith.constant dense<0.000000e+00> : vector<8x512xf32>
    %350 = tpu.matmul %349, %4, %cst_95 {dimension_numbers = #tpu.dot_dimension_numbers<[1], [0], [0], [1], [0, 0, 1, 1], [], []>} : vector<8x128xbf16>, vector<128x512xbf16>, vector<8x512xf32> -> vector<8x512xf32>
    %351 = arith.addf %348, %350 : vector<8x512xf32>
    %352 = vector.extract_strided_slice %345 {offsets = [0, 0], sizes = [8, 384], strides = [1, 1]} : vector<8x512xf32> to vector<8x384xf32>
    %353 = arith.negf %352 : vector<8x384xf32>
    %354 = math.exp %353 : vector<8x384xf32>
    %cst_96 = arith.constant 1.000000e+00 : f32
    %355 = vector.broadcast %cst_96 : f32 to vector<8x384xf32>
    %356 = arith.addf %355, %354 : vector<8x384xf32>
    %357 = arith.divf %355, %356 : vector<8x384xf32>
    %358 = vector.extract_strided_slice %357 {offsets = [0, 0], sizes = [8, 128], strides = [1, 1]} : vector<8x384xf32> to vector<8x128xf32>
    %359 = vector.extract_strided_slice %357 {offsets = [0, 128], sizes = [8, 128], strides = [1, 1]} : vector<8x384xf32> to vector<8x128xf32>
    %360 = vector.extract_strided_slice %357 {offsets = [0, 256], sizes = [8, 128], strides = [1, 1]} : vector<8x384xf32> to vector<8x128xf32>
    %361 = vector.extract_strided_slice %345 {offsets = [0, 384], sizes = [8, 128], strides = [1, 1]} : vector<8x512xf32> to vector<8x128xf32>
    %362 = math.tanh %361 : vector<8x128xf32>
    %363 = arith.mulf %359, %310 : vector<8x128xf32>
    %364 = arith.mulf %358, %362 : vector<8x128xf32>
    %365 = arith.addf %363, %364 : vector<8x128xf32>
    %366 = math.tanh %365 : vector<8x128xf32>
    %367 = arith.mulf %360, %366 : vector<8x128xf32>
    %368 = vector.extract_strided_slice %351 {offsets = [0, 0], sizes = [8, 384], strides = [1, 1]} : vector<8x512xf32> to vector<8x384xf32>
    %369 = arith.negf %368 : vector<8x384xf32>
    %370 = math.exp %369 : vector<8x384xf32>
    %cst_97 = arith.constant 1.000000e+00 : f32
    %371 = vector.broadcast %cst_97 : f32 to vector<8x384xf32>
    %372 = arith.addf %371, %370 : vector<8x384xf32>
    %373 = arith.divf %371, %372 : vector<8x384xf32>
    %374 = vector.extract_strided_slice %373 {offsets = [0, 0], sizes = [8, 128], strides = [1, 1]} : vector<8x384xf32> to vector<8x128xf32>
    %375 = vector.extract_strided_slice %373 {offsets = [0, 128], sizes = [8, 128], strides = [1, 1]} : vector<8x384xf32> to vector<8x128xf32>
    %376 = vector.extract_strided_slice %373 {offsets = [0, 256], sizes = [8, 128], strides = [1, 1]} : vector<8x384xf32> to vector<8x128xf32>
    %377 = vector.extract_strided_slice %351 {offsets = [0, 384], sizes = [8, 128], strides = [1, 1]} : vector<8x512xf32> to vector<8x128xf32>
    %378 = math.tanh %377 : vector<8x128xf32>
    %379 = arith.mulf %375, %326 : vector<8x128xf32>
    %380 = arith.mulf %374, %378 : vector<8x128xf32>
    %381 = arith.addf %379, %380 : vector<8x128xf32>
    %382 = math.tanh %381 : vector<8x128xf32>
    %383 = arith.mulf %376, %382 : vector<8x128xf32>
    %384 = arith.truncf %367 : vector<8x128xf32> to vector<8x128xbf16>
    %385 = arith.index_cast %c6_i32 : i32 to index
    %c0_98 = arith.constant 0 : index
    %c0_99 = arith.constant 0 : index
    %386 = vector.load %arg5[%385, %c0_98, %c0_99] : memref<8x8x128xbf16, #tpu.memory_space<vmem>>, vector<1x8x128xbf16>
    %387 = vector.shape_cast %386 : vector<1x8x128xbf16> to vector<8x128xbf16>
    %388 = vector.shape_cast %384 : vector<8x128xbf16> to vector<1x8x128xbf16>
    tpu.vector_store %arg5[%385, %c0_98, %c0_99], %388 {strides = array<i32>} : memref<8x8x128xbf16, #tpu.memory_space<vmem>>, vector<1x8x128xbf16>,
    %389 = arith.truncf %383 : vector<8x128xf32> to vector<8x128xbf16>
    %390 = arith.index_cast %339 : i32 to index
    %c0_100 = arith.constant 0 : index
    %c0_101 = arith.constant 0 : index
    %391 = vector.load %arg6[%390, %c0_100, %c0_101] : memref<8x8x128xbf16, #tpu.memory_space<vmem>>, vector<1x8x128xbf16>
    %392 = vector.shape_cast %391 : vector<1x8x128xbf16> to vector<8x128xbf16>
    %393 = vector.shape_cast %389 : vector<8x128xbf16> to vector<1x8x128xbf16>
    tpu.vector_store %arg6[%390, %c0_100, %c0_101], %393 {strides = array<i32>} : memref<8x8x128xbf16, #tpu.memory_space<vmem>>, vector<1x8x128xbf16>,
    %c7_i32_102 = arith.constant 7 : i32
    %c7_i32_103 = arith.constant 7 : i32
    %394 = arith.subi %c7_i32_103, %c7_i32_102 : i32
    %395 = arith.index_cast %c7_i32_102 : i32 to index
    %c0_104 = arith.constant 0 : index
    %c0_105 = arith.constant 0 : index
    %396 = vector.load %arg1[%395, %c0_104, %c0_105] : memref<8x8x512xf32, #tpu.memory_space<vmem>>, vector<1x8x512xf32>
    %397 = vector.shape_cast %396 : vector<1x8x512xf32> to vector<8x512xf32>
    %398 = arith.truncf %367 : vector<8x128xf32> to vector<8x128xbf16>
    %cst_106 = arith.constant dense<0.000000e+00> : vector<8x512xf32>
    %399 = tpu.matmul %398, %3, %cst_106 {dimension_numbers = #tpu.dot_dimension_numbers<[1], [0], [0], [1], [0, 0, 1, 1], [], []>} : vector<8x128xbf16>, vector<128x512xbf16>, vector<8x512xf32> -> vector<8x512xf32>
    %400 = arith.addf %397, %399 : vector<8x512xf32>
    %401 = arith.index_cast %394 : i32 to index
    %c0_107 = arith.constant 0 : index
    %c0_108 = arith.constant 0 : index
    %402 = vector.load %arg2[%401, %c0_107, %c0_108] : memref<8x8x512xf32, #tpu.memory_space<vmem>>, vector<1x8x512xf32>
    %403 = vector.shape_cast %402 : vector<1x8x512xf32> to vector<8x512xf32>
    %404 = arith.truncf %383 : vector<8x128xf32> to vector<8x128xbf16>
    %cst_109 = arith.constant dense<0.000000e+00> : vector<8x512xf32>
    %405 = tpu.matmul %404, %4, %cst_109 {dimension_numbers = #tpu.dot_dimension_numbers<[1], [0], [0], [1], [0, 0, 1, 1], [], []>} : vector<8x128xbf16>, vector<128x512xbf16>, vector<8x512xf32> -> vector<8x512xf32>
    %406 = arith.addf %403, %405 : vector<8x512xf32>
    %407 = vector.extract_strided_slice %400 {offsets = [0, 0], sizes = [8, 384], strides = [1, 1]} : vector<8x512xf32> to vector<8x384xf32>
    %408 = arith.negf %407 : vector<8x384xf32>
    %409 = math.exp %408 : vector<8x384xf32>
    %cst_110 = arith.constant 1.000000e+00 : f32
    %410 = vector.broadcast %cst_110 : f32 to vector<8x384xf32>
    %411 = arith.addf %410, %409 : vector<8x384xf32>
    %412 = arith.divf %410, %411 : vector<8x384xf32>
    %413 = vector.extract_strided_slice %412 {offsets = [0, 0], sizes = [8, 128], strides = [1, 1]} : vector<8x384xf32> to vector<8x128xf32>
    %414 = vector.extract_strided_slice %412 {offsets = [0, 128], sizes = [8, 128], strides = [1, 1]} : vector<8x384xf32> to vector<8x128xf32>
    %415 = vector.extract_strided_slice %412 {offsets = [0, 256], sizes = [8, 128], strides = [1, 1]} : vector<8x384xf32> to vector<8x128xf32>
    %416 = vector.extract_strided_slice %400 {offsets = [0, 384], sizes = [8, 128], strides = [1, 1]} : vector<8x512xf32> to vector<8x128xf32>
    %417 = math.tanh %416 : vector<8x128xf32>
    %418 = arith.mulf %414, %365 : vector<8x128xf32>
    %419 = arith.mulf %413, %417 : vector<8x128xf32>
    %420 = arith.addf %418, %419 : vector<8x128xf32>
    %421 = math.tanh %420 : vector<8x128xf32>
    %422 = arith.mulf %415, %421 : vector<8x128xf32>
    %423 = vector.extract_strided_slice %406 {offsets = [0, 0], sizes = [8, 384], strides = [1, 1]} : vector<8x512xf32> to vector<8x384xf32>
    %424 = arith.negf %423 : vector<8x384xf32>
    %425 = math.exp %424 : vector<8x384xf32>
    %cst_111 = arith.constant 1.000000e+00 : f32
    %426 = vector.broadcast %cst_111 : f32 to vector<8x384xf32>
    %427 = arith.addf %426, %425 : vector<8x384xf32>
    %428 = arith.divf %426, %427 : vector<8x384xf32>
    %429 = vector.extract_strided_slice %428 {offsets = [0, 0], sizes = [8, 128], strides = [1, 1]} : vector<8x384xf32> to vector<8x128xf32>
    %430 = vector.extract_strided_slice %428 {offsets = [0, 128], sizes = [8, 128], strides = [1, 1]} : vector<8x384xf32> to vector<8x128xf32>
    %431 = vector.extract_strided_slice %428 {offsets = [0, 256], sizes = [8, 128], strides = [1, 1]} : vector<8x384xf32> to vector<8x128xf32>
    %432 = vector.extract_strided_slice %406 {offsets = [0, 384], sizes = [8, 128], strides = [1, 1]} : vector<8x512xf32> to vector<8x128xf32>
    %433 = math.tanh %432 : vector<8x128xf32>
    %434 = arith.mulf %430, %381 : vector<8x128xf32>
    %435 = arith.mulf %429, %433 : vector<8x128xf32>
    %436 = arith.addf %434, %435 : vector<8x128xf32>
    %437 = math.tanh %436 : vector<8x128xf32>
    %438 = arith.mulf %431, %437 : vector<8x128xf32>
    %439 = arith.truncf %422 : vector<8x128xf32> to vector<8x128xbf16>
    %440 = arith.index_cast %c7_i32_102 : i32 to index
    %c0_112 = arith.constant 0 : index
    %c0_113 = arith.constant 0 : index
    %441 = vector.load %arg5[%440, %c0_112, %c0_113] : memref<8x8x128xbf16, #tpu.memory_space<vmem>>, vector<1x8x128xbf16>
    %442 = vector.shape_cast %441 : vector<1x8x128xbf16> to vector<8x128xbf16>
    %443 = vector.shape_cast %439 : vector<8x128xbf16> to vector<1x8x128xbf16>
    tpu.vector_store %arg5[%440, %c0_112, %c0_113], %443 {strides = array<i32>} : memref<8x8x128xbf16, #tpu.memory_space<vmem>>, vector<1x8x128xbf16>,
    %444 = arith.truncf %438 : vector<8x128xf32> to vector<8x128xbf16>
    %445 = arith.index_cast %394 : i32 to index
    %c0_114 = arith.constant 0 : index
    %c0_115 = arith.constant 0 : index
    %446 = vector.load %arg6[%445, %c0_114, %c0_115] : memref<8x8x128xbf16, #tpu.memory_space<vmem>>, vector<1x8x128xbf16>
    %447 = vector.shape_cast %446 : vector<1x8x128xbf16> to vector<8x128xbf16>
    %448 = vector.shape_cast %444 : vector<8x128xbf16> to vector<1x8x128xbf16>
    tpu.vector_store %arg6[%445, %c0_114, %c0_115], %448 {strides = array<i32>} : memref<8x8x128xbf16, #tpu.memory_space<vmem>>, vector<1x8x128xbf16>,
    %c8_i32 = arith.constant 8 : i32
    %c0_116 = arith.constant 0 : index
    %c0_117 = arith.constant 0 : index
    %449 = vector.load %arg7[%c0_116, %c0_117] : memref<8x128xf32, #tpu.memory_space<vmem>>, vector<8x128xf32>
    tpu.vector_store %arg7[%c0_116, %c0_117], %422 {strides = array<i32>} : memref<8x128xf32, #tpu.memory_space<vmem>>, vector<8x128xf32>,
    %c0_118 = arith.constant 0 : index
    %c0_119 = arith.constant 0 : index
    %450 = vector.load %arg8[%c0_118, %c0_119] : memref<8x128xf32, #tpu.memory_space<vmem>>, vector<8x128xf32>
    tpu.vector_store %arg8[%c0_118, %c0_119], %420 {strides = array<i32>} : memref<8x128xf32, #tpu.memory_space<vmem>>, vector<8x128xf32>,
    %c0_120 = arith.constant 0 : index
    %c0_121 = arith.constant 0 : index
    %451 = vector.load %arg9[%c0_120, %c0_121] : memref<8x128xf32, #tpu.memory_space<vmem>>, vector<8x128xf32>
    tpu.vector_store %arg9[%c0_120, %c0_121], %438 {strides = array<i32>} : memref<8x128xf32, #tpu.memory_space<vmem>>, vector<8x128xf32>,
    %c0_122 = arith.constant 0 : index
    %c0_123 = arith.constant 0 : index
    %452 = vector.load %arg10[%c0_122, %c0_123] : memref<8x128xf32, #tpu.memory_space<vmem>>, vector<8x128xf32>
    tpu.vector_store %arg10[%c0_122, %c0_123], %436 {strides = array<i32>} : memref<8x128xf32, #tpu.memory_space<vmem>>, vector<8x128xf32>,
    return
  }
  func.func @transform_0(%arg0: i32) -> (i32, i32, i32) {
    %c0_i32 = arith.constant 0 : i32
    %c0_i32_0 = arith.constant 0 : i32
    %c0_i32_1 = arith.constant 0 : i32
    return %arg0, %c0_i32, %c0_i32_0 : i32, i32, i32
  }
  func.func @transform_1(%arg0: i32) -> (i32, i32, i32) {
    %c1_i32 = arith.constant 1 : i32
    %0 = arith.subi %c1_i32, %arg0 : i32
    %c0_i32 = arith.constant 0 : i32
    %c0_i32_0 = arith.constant 0 : i32
    %c0_i32_1 = arith.constant 0 : i32
    return %0, %c0_i32, %c0_i32_0 : i32, i32, i32
  }
  func.func @transform_2(%arg0: i32) -> (i32, i32) {
    %c0_i32 = arith.constant 0 : i32
    %c0_i32_0 = arith.constant 0 : i32
    %c0_i32_1 = arith.constant 0 : i32
    return %c0_i32, %c0_i32_0 : i32, i32
  }
  func.func @transform_3(%arg0: i32) -> (i32, i32) {
    %c0_i32 = arith.constant 0 : i32
    %c0_i32_0 = arith.constant 0 : i32
    %c0_i32_1 = arith.constant 0 : i32
    return %c0_i32, %c0_i32_0 : i32, i32
  }
  func.func @transform_4(%arg0: i32) -> (i32, i32, i32) {
    %c0_i32 = arith.constant 0 : i32
    %c0_i32_0 = arith.constant 0 : i32
    %c0_i32_1 = arith.constant 0 : i32
    return %arg0, %c0_i32, %c0_i32_0 : i32, i32, i32
  }
  func.func @transform_5(%arg0: i32) -> (i32, i32, i32) {
    %c1_i32 = arith.constant 1 : i32
    %0 = arith.subi %c1_i32, %arg0 : i32
    %c0_i32 = arith.constant 0 : i32
    %c0_i32_0 = arith.constant 0 : i32
    %c0_i32_1 = arith.constant 0 : i32
    return %0, %c0_i32, %c0_i32_0 : i32, i32, i32
  }
}

module attributes {stable_mosaic.version = 11 : i64} {
  func.func @head_kernel(%arg0: memref<8x768xf32, #tpu.memory_space<vmem>>, %arg1: memref<768x1536xbf16, #tpu.memory_space<vmem>>, %arg2: memref<1x1536xf32, #tpu.memory_space<vmem>>, %arg3: memref<768x128xbf16, #tpu.memory_space<vmem>>, %arg4: memref<1x128xf32, #tpu.memory_space<vmem>>, %arg5: memref<8x128xf32, #tpu.memory_space<vmem>>) attributes {dimension_semantics = [], scalar_prefetch = 0 : i64, scratch_operands = 0 : i64, tpu.core_type = #tpu.core_type<tc>} {
    %c0 = arith.constant 0 : index
    %c0_0 = arith.constant 0 : index
    %0 = vector.load %arg0[%c0, %c0_0] : memref<8x768xf32, #tpu.memory_space<vmem>>, vector<8x768xf32>
    %1 = arith.truncf %0 : vector<8x768xf32> to vector<8x768xbf16>
    %c0_1 = arith.constant 0 : index
    %c0_2 = arith.constant 0 : index
    %2 = vector.load %arg1[%c0_1, %c0_2] : memref<768x1536xbf16, #tpu.memory_space<vmem>>, vector<768x1536xbf16>
    %cst = arith.constant dense<0.000000e+00> : vector<8x1536xf32>
    %3 = tpu.matmul %1, %2, %cst {dimension_numbers = #tpu.dot_dimension_numbers<[1], [0], [0], [1], [0, 0, 1, 1], [], []>} : vector<8x768xbf16>, vector<768x1536xbf16>, vector<8x1536xf32> -> vector<8x1536xf32>
    %c0_3 = arith.constant 0 : index
    %c0_4 = arith.constant 0 : index
    %4 = vector.load %arg2[%c0_3, %c0_4] : memref<1x1536xf32, #tpu.memory_space<vmem>>, vector<1x1536xf32>
    %5 = vector.broadcast %4 : vector<1x1536xf32> to vector<8x1536xf32>
    %6 = arith.addf %3, %5 : vector<8x1536xf32>
    %7 = vector.extract_strided_slice %6 {offsets = [0, 0], sizes = [8, 768], strides = [1, 1]} : vector<8x1536xf32> to vector<8x768xf32>
    %cst_5 = arith.constant 0.000000e+00 : f32
    %8 = vector.broadcast %cst_5 : f32 to vector<8x768xf32>
    %9 = arith.maximumf %7, %8 : vector<8x768xf32>
    %10 = arith.addf %0, %9 : vector<8x768xf32>
    %11 = vector.extract_strided_slice %6 {offsets = [0, 768], sizes = [8, 768], strides = [1, 1]} : vector<8x1536xf32> to vector<8x768xf32>
    %cst_6 = arith.constant 0.000000e+00 : f32
    %12 = vector.broadcast %cst_6 : f32 to vector<8x768xf32>
    %13 = arith.maximumf %11, %12 : vector<8x768xf32>
    %14 = arith.addf %10, %13 : vector<8x768xf32>
    %15 = arith.truncf %14 : vector<8x768xf32> to vector<8x768xbf16>
    %c0_7 = arith.constant 0 : index
    %c0_8 = arith.constant 0 : index
    %16 = vector.load %arg3[%c0_7, %c0_8] : memref<768x128xbf16, #tpu.memory_space<vmem>>, vector<768x128xbf16>
    %cst_9 = arith.constant dense<0.000000e+00> : vector<8x128xf32>
    %17 = tpu.matmul %15, %16, %cst_9 {dimension_numbers = #tpu.dot_dimension_numbers<[1], [0], [0], [1], [0, 0, 1, 1], [], []>} : vector<8x768xbf16>, vector<768x128xbf16>, vector<8x128xf32> -> vector<8x128xf32>
    %c0_10 = arith.constant 0 : index
    %c0_11 = arith.constant 0 : index
    %18 = vector.load %arg4[%c0_10, %c0_11] : memref<1x128xf32, #tpu.memory_space<vmem>>, vector<1x128xf32>
    %19 = vector.broadcast %18 : vector<1x128xf32> to vector<8x128xf32>
    %20 = arith.addf %17, %19 : vector<8x128xf32>
    %c0_12 = arith.constant 0 : index
    %c0_13 = arith.constant 0 : index
    %21 = vector.load %arg5[%c0_12, %c0_13] : memref<8x128xf32, #tpu.memory_space<vmem>>, vector<8x128xf32>
    tpu.vector_store %arg5[%c0_12, %c0_13], %20 {strides = array<i32>} : memref<8x128xf32, #tpu.memory_space<vmem>>, vector<8x128xf32>,
    return
  }
}

module attributes {stable_mosaic.version = 11 : i64} {
  func.func @bilstm_pool_kernel(%arg0: i32, %arg1: memref<8x8x512xf32, #tpu.memory_space<vmem>>, %arg2: memref<8x8x512xf32, #tpu.memory_space<vmem>>, %arg3: memref<128x512xbf16, #tpu.memory_space<vmem>>, %arg4: memref<128x512xbf16, #tpu.memory_space<vmem>>, %arg5: memref<8x768xf32, #tpu.memory_space<vmem>>, %arg6: memref<8x128xf32, #tpu.memory_space<vmem>>, %arg7: memref<8x128xf32, #tpu.memory_space<vmem>>, %arg8: memref<8x128xf32, #tpu.memory_space<vmem>>, %arg9: memref<8x128xf32, #tpu.memory_space<vmem>>, %arg10: memref<8x128xf32, #tpu.memory_space<vmem>>, %arg11: memref<8x128xf32, #tpu.memory_space<vmem>>, %arg12: memref<8x128xf32, #tpu.memory_space<vmem>>, %arg13: memref<8x128xf32, #tpu.memory_space<vmem>>) attributes {dimension_semantics = [#tpu.dimension_semantics<arbitrary>], iteration_bounds = array<i64: 2>, scalar_prefetch = 0 : i64, scratch_operands = 8 : i64, tpu.core_type = #tpu.core_type<tc>, window_params = [{transform_indices = @transform_0, window_bounds = array<i64: 8, 8, 512>}, {transform_indices = @transform_1, window_bounds = array<i64: 8, 8, 512>}, {pipeline_mode = #tpu.pipeline_mode<synchronous>, transform_indices = @transform_2, window_bounds = array<i64: 128, 512>}, {pipeline_mode = #tpu.pipeline_mode<synchronous>, transform_indices = @transform_3, window_bounds = array<i64: 128, 512>}, {pipeline_mode = #tpu.pipeline_mode<synchronous>, transform_indices = @transform_4, window_bounds = array<i64: 8, 768>}]} {
    %c0_i32 = arith.constant 0 : i32
    %0 = arith.cmpi eq, %arg0, %c0_i32 : i32
    %1 = arith.extui %0 : i1 to i32
    %c0_i32_0 = arith.constant 0 : i32
    %2 = arith.cmpi ne, %1, %c0_i32_0 : i32
    scf.if %2 {
      %cst_110 = arith.constant 0.000000e+00 : f32
      %416 = vector.broadcast %cst_110 : f32 to vector<8x128xf32>
      %c0_111 = arith.constant 0 : index
      %c0_112 = arith.constant 0 : index
      %417 = vector.load %arg6[%c0_111, %c0_112] : memref<8x128xf32, #tpu.memory_space<vmem>>, vector<8x128xf32>
      tpu.vector_store %arg6[%c0_111, %c0_112], %416 {strides = array<i32>} : memref<8x128xf32, #tpu.memory_space<vmem>>, vector<8x128xf32>,
      %cst_113 = arith.constant 0.000000e+00 : f32
      %418 = vector.broadcast %cst_113 : f32 to vector<8x128xf32>
      %c0_114 = arith.constant 0 : index
      %c0_115 = arith.constant 0 : index
      %419 = vector.load %arg7[%c0_114, %c0_115] : memref<8x128xf32, #tpu.memory_space<vmem>>, vector<8x128xf32>
      tpu.vector_store %arg7[%c0_114, %c0_115], %418 {strides = array<i32>} : memref<8x128xf32, #tpu.memory_space<vmem>>, vector<8x128xf32>,
      %cst_116 = arith.constant 0.000000e+00 : f32
      %420 = vector.broadcast %cst_116 : f32 to vector<8x128xf32>
      %c0_117 = arith.constant 0 : index
      %c0_118 = arith.constant 0 : index
      %421 = vector.load %arg8[%c0_117, %c0_118] : memref<8x128xf32, #tpu.memory_space<vmem>>, vector<8x128xf32>
      tpu.vector_store %arg8[%c0_117, %c0_118], %420 {strides = array<i32>} : memref<8x128xf32, #tpu.memory_space<vmem>>, vector<8x128xf32>,
      %cst_119 = arith.constant 0.000000e+00 : f32
      %422 = vector.broadcast %cst_119 : f32 to vector<8x128xf32>
      %c0_120 = arith.constant 0 : index
      %c0_121 = arith.constant 0 : index
      %423 = vector.load %arg9[%c0_120, %c0_121] : memref<8x128xf32, #tpu.memory_space<vmem>>, vector<8x128xf32>
      tpu.vector_store %arg9[%c0_120, %c0_121], %422 {strides = array<i32>} : memref<8x128xf32, #tpu.memory_space<vmem>>, vector<8x128xf32>,
      %cst_122 = arith.constant 0.000000e+00 : f32
      %424 = vector.broadcast %cst_122 : f32 to vector<8x128xf32>
      %c0_123 = arith.constant 0 : index
      %c0_124 = arith.constant 0 : index
      %425 = vector.load %arg12[%c0_123, %c0_124] : memref<8x128xf32, #tpu.memory_space<vmem>>, vector<8x128xf32>
      tpu.vector_store %arg12[%c0_123, %c0_124], %424 {strides = array<i32>} : memref<8x128xf32, #tpu.memory_space<vmem>>, vector<8x128xf32>,
      %cst_125 = arith.constant 0.000000e+00 : f32
      %426 = vector.broadcast %cst_125 : f32 to vector<8x128xf32>
      %c0_126 = arith.constant 0 : index
      %c0_127 = arith.constant 0 : index
      %427 = vector.load %arg13[%c0_126, %c0_127] : memref<8x128xf32, #tpu.memory_space<vmem>>, vector<8x128xf32>
      tpu.vector_store %arg13[%c0_126, %c0_127], %426 {strides = array<i32>} : memref<8x128xf32, #tpu.memory_space<vmem>>, vector<8x128xf32>,
      %cst_128 = arith.constant 0xFF800000 : f32
      %428 = vector.broadcast %cst_128 : f32 to vector<8x128xf32>
      %c0_129 = arith.constant 0 : index
      %c0_130 = arith.constant 0 : index
      %429 = vector.load %arg10[%c0_129, %c0_130] : memref<8x128xf32, #tpu.memory_space<vmem>>, vector<8x128xf32>
      tpu.vector_store %arg10[%c0_129, %c0_130], %428 {strides = array<i32>} : memref<8x128xf32, #tpu.memory_space<vmem>>, vector<8x128xf32>,
      %cst_131 = arith.constant 0xFF800000 : f32
      %430 = vector.broadcast %cst_131 : f32 to vector<8x128xf32>
      %c0_132 = arith.constant 0 : index
      %c0_133 = arith.constant 0 : index
      %431 = vector.load %arg11[%c0_132, %c0_133] : memref<8x128xf32, #tpu.memory_space<vmem>>, vector<8x128xf32>
      tpu.vector_store %arg11[%c0_132, %c0_133], %430 {strides = array<i32>} : memref<8x128xf32, #tpu.memory_space<vmem>>, vector<8x128xf32>,
    } else {
    }
    %c0 = arith.constant 0 : index
    %c0_1 = arith.constant 0 : index
    %3 = vector.load %arg3[%c0, %c0_1] : memref<128x512xbf16, #tpu.memory_space<vmem>>, vector<128x512xbf16>
    %c0_2 = arith.constant 0 : index
    %c0_3 = arith.constant 0 : index
    %4 = vector.load %arg4[%c0_2, %c0_3] : memref<128x512xbf16, #tpu.memory_space<vmem>>, vector<128x512xbf16>
    %c0_4 = arith.constant 0 : index
    %c0_5 = arith.constant 0 : index
    %5 = vector.load %arg6[%c0_4, %c0_5] : memref<8x128xf32, #tpu.memory_space<vmem>>, vector<8x128xf32>
    %c0_6 = arith.constant 0 : index
    %c0_7 = arith.constant 0 : index
    %6 = vector.load %arg7[%c0_6, %c0_7] : memref<8x128xf32, #tpu.memory_space<vmem>>, vector<8x128xf32>
    %c0_8 = arith.constant 0 : index
    %c0_9 = arith.constant 0 : index
    %7 = vector.load %arg8[%c0_8, %c0_9] : memref<8x128xf32, #tpu.memory_space<vmem>>, vector<8x128xf32>
    %c0_10 = arith.constant 0 : index
    %c0_11 = arith.constant 0 : index
    %8 = vector.load %arg9[%c0_10, %c0_11] : memref<8x128xf32, #tpu.memory_space<vmem>>, vector<8x128xf32>
    %c0_12 = arith.constant 0 : index
    %c0_13 = arith.constant 0 : index
    %9 = vector.load %arg10[%c0_12, %c0_13] : memref<8x128xf32, #tpu.memory_space<vmem>>, vector<8x128xf32>
    %c0_14 = arith.constant 0 : index
    %c0_15 = arith.constant 0 : index
    %10 = vector.load %arg11[%c0_14, %c0_15] : memref<8x128xf32, #tpu.memory_space<vmem>>, vector<8x128xf32>
    %c0_16 = arith.constant 0 : index
    %c0_17 = arith.constant 0 : index
    %11 = vector.load %arg12[%c0_16, %c0_17] : memref<8x128xf32, #tpu.memory_space<vmem>>, vector<8x128xf32>
    %c0_18 = arith.constant 0 : index
    %c0_19 = arith.constant 0 : index
    %12 = vector.load %arg13[%c0_18, %c0_19] : memref<8x128xf32, #tpu.memory_space<vmem>>, vector<8x128xf32>
    %c0_i32_20 = arith.constant 0 : i32
    %c7_i32 = arith.constant 7 : i32
    %13 = arith.subi %c7_i32, %c0_i32_20 : i32
    %14 = arith.index_cast %c0_i32_20 : i32 to index
    %c0_21 = arith.constant 0 : index
    %c0_22 = arith.constant 0 : index
    %15 = vector.load %arg1[%14, %c0_21, %c0_22] : memref<8x8x512xf32, #tpu.memory_space<vmem>>, vector<1x8x512xf32>
    %16 = vector.shape_cast %15 : vector<1x8x512xf32> to vector<8x512xf32>
    %17 = arith.truncf %5 : vector<8x128xf32> to vector<8x128xbf16>
    %cst = arith.constant dense<0.000000e+00> : vector<8x512xf32>
    %18 = tpu.matmul %17, %3, %cst {dimension_numbers = #tpu.dot_dimension_numbers<[1], [0], [0], [1], [0, 0, 1, 1], [], []>} : vector<8x128xbf16>, vector<128x512xbf16>, vector<8x512xf32> -> vector<8x512xf32>
    %19 = arith.addf %16, %18 : vector<8x512xf32>
    %20 = arith.index_cast %13 : i32 to index
    %c0_23 = arith.constant 0 : index
    %c0_24 = arith.constant 0 : index
    %21 = vector.load %arg2[%20, %c0_23, %c0_24] : memref<8x8x512xf32, #tpu.memory_space<vmem>>, vector<1x8x512xf32>
    %22 = vector.shape_cast %21 : vector<1x8x512xf32> to vector<8x512xf32>
    %23 = arith.truncf %7 : vector<8x128xf32> to vector<8x128xbf16>
    %cst_25 = arith.constant dense<0.000000e+00> : vector<8x512xf32>
    %24 = tpu.matmul %23, %4, %cst_25 {dimension_numbers = #tpu.dot_dimension_numbers<[1], [0], [0], [1], [0, 0, 1, 1], [], []>} : vector<8x128xbf16>, vector<128x512xbf16>, vector<8x512xf32> -> vector<8x512xf32>
    %25 = arith.addf %22, %24 : vector<8x512xf32>
    %26 = vector.extract_strided_slice %19 {offsets = [0, 0], sizes = [8, 384], strides = [1, 1]} : vector<8x512xf32> to vector<8x384xf32>
    %27 = arith.negf %26 : vector<8x384xf32>
    %28 = math.exp %27 : vector<8x384xf32>
    %cst_26 = arith.constant 1.000000e+00 : f32
    %29 = vector.broadcast %cst_26 : f32 to vector<8x384xf32>
    %30 = arith.addf %29, %28 : vector<8x384xf32>
    %31 = arith.divf %29, %30 : vector<8x384xf32>
    %32 = vector.extract_strided_slice %31 {offsets = [0, 0], sizes = [8, 128], strides = [1, 1]} : vector<8x384xf32> to vector<8x128xf32>
    %33 = vector.extract_strided_slice %31 {offsets = [0, 128], sizes = [8, 128], strides = [1, 1]} : vector<8x384xf32> to vector<8x128xf32>
    %34 = vector.extract_strided_slice %31 {offsets = [0, 256], sizes = [8, 128], strides = [1, 1]} : vector<8x384xf32> to vector<8x128xf32>
    %35 = vector.extract_strided_slice %19 {offsets = [0, 384], sizes = [8, 128], strides = [1, 1]} : vector<8x512xf32> to vector<8x128xf32>
    %36 = math.tanh %35 : vector<8x128xf32>
    %37 = arith.mulf %33, %6 : vector<8x128xf32>
    %38 = arith.mulf %32, %36 : vector<8x128xf32>
    %39 = arith.addf %37, %38 : vector<8x128xf32>
    %40 = math.tanh %39 : vector<8x128xf32>
    %41 = arith.mulf %34, %40 : vector<8x128xf32>
    %42 = vector.extract_strided_slice %25 {offsets = [0, 0], sizes = [8, 384], strides = [1, 1]} : vector<8x512xf32> to vector<8x384xf32>
    %43 = arith.negf %42 : vector<8x384xf32>
    %44 = math.exp %43 : vector<8x384xf32>
    %cst_27 = arith.constant 1.000000e+00 : f32
    %45 = vector.broadcast %cst_27 : f32 to vector<8x384xf32>
    %46 = arith.addf %45, %44 : vector<8x384xf32>
    %47 = arith.divf %45, %46 : vector<8x384xf32>
    %48 = vector.extract_strided_slice %47 {offsets = [0, 0], sizes = [8, 128], strides = [1, 1]} : vector<8x384xf32> to vector<8x128xf32>
    %49 = vector.extract_strided_slice %47 {offsets = [0, 128], sizes = [8, 128], strides = [1, 1]} : vector<8x384xf32> to vector<8x128xf32>
    %50 = vector.extract_strided_slice %47 {offsets = [0, 256], sizes = [8, 128], strides = [1, 1]} : vector<8x384xf32> to vector<8x128xf32>
    %51 = vector.extract_strided_slice %25 {offsets = [0, 384], sizes = [8, 128], strides = [1, 1]} : vector<8x512xf32> to vector<8x128xf32>
    %52 = math.tanh %51 : vector<8x128xf32>
    %53 = arith.mulf %49, %8 : vector<8x128xf32>
    %54 = arith.mulf %48, %52 : vector<8x128xf32>
    %55 = arith.addf %53, %54 : vector<8x128xf32>
    %56 = math.tanh %55 : vector<8x128xf32>
    %57 = arith.mulf %50, %56 : vector<8x128xf32>
    %58 = arith.maximumf %9, %41 : vector<8x128xf32>
    %59 = arith.maximumf %10, %57 : vector<8x128xf32>
    %60 = arith.addf %11, %41 : vector<8x128xf32>
    %61 = arith.addf %12, %57 : vector<8x128xf32>
    %c1_i32 = arith.constant 1 : i32
    %c7_i32_28 = arith.constant 7 : i32
    %62 = arith.subi %c7_i32_28, %c1_i32 : i32
    %63 = arith.index_cast %c1_i32 : i32 to index
    %c0_29 = arith.constant 0 : index
    %c0_30 = arith.constant 0 : index
    %64 = vector.load %arg1[%63, %c0_29, %c0_30] : memref<8x8x512xf32, #tpu.memory_space<vmem>>, vector<1x8x512xf32>
    %65 = vector.shape_cast %64 : vector<1x8x512xf32> to vector<8x512xf32>
    %66 = arith.truncf %41 : vector<8x128xf32> to vector<8x128xbf16>
    %cst_31 = arith.constant dense<0.000000e+00> : vector<8x512xf32>
    %67 = tpu.matmul %66, %3, %cst_31 {dimension_numbers = #tpu.dot_dimension_numbers<[1], [0], [0], [1], [0, 0, 1, 1], [], []>} : vector<8x128xbf16>, vector<128x512xbf16>, vector<8x512xf32> -> vector<8x512xf32>
    %68 = arith.addf %65, %67 : vector<8x512xf32>
    %69 = arith.index_cast %62 : i32 to index
    %c0_32 = arith.constant 0 : index
    %c0_33 = arith.constant 0 : index
    %70 = vector.load %arg2[%69, %c0_32, %c0_33] : memref<8x8x512xf32, #tpu.memory_space<vmem>>, vector<1x8x512xf32>
    %71 = vector.shape_cast %70 : vector<1x8x512xf32> to vector<8x512xf32>
    %72 = arith.truncf %57 : vector<8x128xf32> to vector<8x128xbf16>
    %cst_34 = arith.constant dense<0.000000e+00> : vector<8x512xf32>
    %73 = tpu.matmul %72, %4, %cst_34 {dimension_numbers = #tpu.dot_dimension_numbers<[1], [0], [0], [1], [0, 0, 1, 1], [], []>} : vector<8x128xbf16>, vector<128x512xbf16>, vector<8x512xf32> -> vector<8x512xf32>
    %74 = arith.addf %71, %73 : vector<8x512xf32>
    %75 = vector.extract_strided_slice %68 {offsets = [0, 0], sizes = [8, 384], strides = [1, 1]} : vector<8x512xf32> to vector<8x384xf32>
    %76 = arith.negf %75 : vector<8x384xf32>
    %77 = math.exp %76 : vector<8x384xf32>
    %cst_35 = arith.constant 1.000000e+00 : f32
    %78 = vector.broadcast %cst_35 : f32 to vector<8x384xf32>
    %79 = arith.addf %78, %77 : vector<8x384xf32>
    %80 = arith.divf %78, %79 : vector<8x384xf32>
    %81 = vector.extract_strided_slice %80 {offsets = [0, 0], sizes = [8, 128], strides = [1, 1]} : vector<8x384xf32> to vector<8x128xf32>
    %82 = vector.extract_strided_slice %80 {offsets = [0, 128], sizes = [8, 128], strides = [1, 1]} : vector<8x384xf32> to vector<8x128xf32>
    %83 = vector.extract_strided_slice %80 {offsets = [0, 256], sizes = [8, 128], strides = [1, 1]} : vector<8x384xf32> to vector<8x128xf32>
    %84 = vector.extract_strided_slice %68 {offsets = [0, 384], sizes = [8, 128], strides = [1, 1]} : vector<8x512xf32> to vector<8x128xf32>
    %85 = math.tanh %84 : vector<8x128xf32>
    %86 = arith.mulf %82, %39 : vector<8x128xf32>
    %87 = arith.mulf %81, %85 : vector<8x128xf32>
    %88 = arith.addf %86, %87 : vector<8x128xf32>
    %89 = math.tanh %88 : vector<8x128xf32>
    %90 = arith.mulf %83, %89 : vector<8x128xf32>
    %91 = vector.extract_strided_slice %74 {offsets = [0, 0], sizes = [8, 384], strides = [1, 1]} : vector<8x512xf32> to vector<8x384xf32>
    %92 = arith.negf %91 : vector<8x384xf32>
    %93 = math.exp %92 : vector<8x384xf32>
    %cst_36 = arith.constant 1.000000e+00 : f32
    %94 = vector.broadcast %cst_36 : f32 to vector<8x384xf32>
    %95 = arith.addf %94, %93 : vector<8x384xf32>
    %96 = arith.divf %94, %95 : vector<8x384xf32>
    %97 = vector.extract_strided_slice %96 {offsets = [0, 0], sizes = [8, 128], strides = [1, 1]} : vector<8x384xf32> to vector<8x128xf32>
    %98 = vector.extract_strided_slice %96 {offsets = [0, 128], sizes = [8, 128], strides = [1, 1]} : vector<8x384xf32> to vector<8x128xf32>
    %99 = vector.extract_strided_slice %96 {offsets = [0, 256], sizes = [8, 128], strides = [1, 1]} : vector<8x384xf32> to vector<8x128xf32>
    %100 = vector.extract_strided_slice %74 {offsets = [0, 384], sizes = [8, 128], strides = [1, 1]} : vector<8x512xf32> to vector<8x128xf32>
    %101 = math.tanh %100 : vector<8x128xf32>
    %102 = arith.mulf %98, %55 : vector<8x128xf32>
    %103 = arith.mulf %97, %101 : vector<8x128xf32>
    %104 = arith.addf %102, %103 : vector<8x128xf32>
    %105 = math.tanh %104 : vector<8x128xf32>
    %106 = arith.mulf %99, %105 : vector<8x128xf32>
    %107 = arith.maximumf %58, %90 : vector<8x128xf32>
    %108 = arith.maximumf %59, %106 : vector<8x128xf32>
    %109 = arith.addf %60, %90 : vector<8x128xf32>
    %110 = arith.addf %61, %106 : vector<8x128xf32>
    %c2_i32 = arith.constant 2 : i32
    %c7_i32_37 = arith.constant 7 : i32
    %111 = arith.subi %c7_i32_37, %c2_i32 : i32
    %112 = arith.index_cast %c2_i32 : i32 to index
    %c0_38 = arith.constant 0 : index
    %c0_39 = arith.constant 0 : index
    %113 = vector.load %arg1[%112, %c0_38, %c0_39] : memref<8x8x512xf32, #tpu.memory_space<vmem>>, vector<1x8x512xf32>
    %114 = vector.shape_cast %113 : vector<1x8x512xf32> to vector<8x512xf32>
    %115 = arith.truncf %90 : vector<8x128xf32> to vector<8x128xbf16>
    %cst_40 = arith.constant dense<0.000000e+00> : vector<8x512xf32>
    %116 = tpu.matmul %115, %3, %cst_40 {dimension_numbers = #tpu.dot_dimension_numbers<[1], [0], [0], [1], [0, 0, 1, 1], [], []>} : vector<8x128xbf16>, vector<128x512xbf16>, vector<8x512xf32> -> vector<8x512xf32>
    %117 = arith.addf %114, %116 : vector<8x512xf32>
    %118 = arith.index_cast %111 : i32 to index
    %c0_41 = arith.constant 0 : index
    %c0_42 = arith.constant 0 : index
    %119 = vector.load %arg2[%118, %c0_41, %c0_42] : memref<8x8x512xf32, #tpu.memory_space<vmem>>, vector<1x8x512xf32>
    %120 = vector.shape_cast %119 : vector<1x8x512xf32> to vector<8x512xf32>
    %121 = arith.truncf %106 : vector<8x128xf32> to vector<8x128xbf16>
    %cst_43 = arith.constant dense<0.000000e+00> : vector<8x512xf32>
    %122 = tpu.matmul %121, %4, %cst_43 {dimension_numbers = #tpu.dot_dimension_numbers<[1], [0], [0], [1], [0, 0, 1, 1], [], []>} : vector<8x128xbf16>, vector<128x512xbf16>, vector<8x512xf32> -> vector<8x512xf32>
    %123 = arith.addf %120, %122 : vector<8x512xf32>
    %124 = vector.extract_strided_slice %117 {offsets = [0, 0], sizes = [8, 384], strides = [1, 1]} : vector<8x512xf32> to vector<8x384xf32>
    %125 = arith.negf %124 : vector<8x384xf32>
    %126 = math.exp %125 : vector<8x384xf32>
    %cst_44 = arith.constant 1.000000e+00 : f32
    %127 = vector.broadcast %cst_44 : f32 to vector<8x384xf32>
    %128 = arith.addf %127, %126 : vector<8x384xf32>
    %129 = arith.divf %127, %128 : vector<8x384xf32>
    %130 = vector.extract_strided_slice %129 {offsets = [0, 0], sizes = [8, 128], strides = [1, 1]} : vector<8x384xf32> to vector<8x128xf32>
    %131 = vector.extract_strided_slice %129 {offsets = [0, 128], sizes = [8, 128], strides = [1, 1]} : vector<8x384xf32> to vector<8x128xf32>
    %132 = vector.extract_strided_slice %129 {offsets = [0, 256], sizes = [8, 128], strides = [1, 1]} : vector<8x384xf32> to vector<8x128xf32>
    %133 = vector.extract_strided_slice %117 {offsets = [0, 384], sizes = [8, 128], strides = [1, 1]} : vector<8x512xf32> to vector<8x128xf32>
    %134 = math.tanh %133 : vector<8x128xf32>
    %135 = arith.mulf %131, %88 : vector<8x128xf32>
    %136 = arith.mulf %130, %134 : vector<8x128xf32>
    %137 = arith.addf %135, %136 : vector<8x128xf32>
    %138 = math.tanh %137 : vector<8x128xf32>
    %139 = arith.mulf %132, %138 : vector<8x128xf32>
    %140 = vector.extract_strided_slice %123 {offsets = [0, 0], sizes = [8, 384], strides = [1, 1]} : vector<8x512xf32> to vector<8x384xf32>
    %141 = arith.negf %140 : vector<8x384xf32>
    %142 = math.exp %141 : vector<8x384xf32>
    %cst_45 = arith.constant 1.000000e+00 : f32
    %143 = vector.broadcast %cst_45 : f32 to vector<8x384xf32>
    %144 = arith.addf %143, %142 : vector<8x384xf32>
    %145 = arith.divf %143, %144 : vector<8x384xf32>
    %146 = vector.extract_strided_slice %145 {offsets = [0, 0], sizes = [8, 128], strides = [1, 1]} : vector<8x384xf32> to vector<8x128xf32>
    %147 = vector.extract_strided_slice %145 {offsets = [0, 128], sizes = [8, 128], strides = [1, 1]} : vector<8x384xf32> to vector<8x128xf32>
    %148 = vector.extract_strided_slice %145 {offsets = [0, 256], sizes = [8, 128], strides = [1, 1]} : vector<8x384xf32> to vector<8x128xf32>
    %149 = vector.extract_strided_slice %123 {offsets = [0, 384], sizes = [8, 128], strides = [1, 1]} : vector<8x512xf32> to vector<8x128xf32>
    %150 = math.tanh %149 : vector<8x128xf32>
    %151 = arith.mulf %147, %104 : vector<8x128xf32>
    %152 = arith.mulf %146, %150 : vector<8x128xf32>
    %153 = arith.addf %151, %152 : vector<8x128xf32>
    %154 = math.tanh %153 : vector<8x128xf32>
    %155 = arith.mulf %148, %154 : vector<8x128xf32>
    %156 = arith.maximumf %107, %139 : vector<8x128xf32>
    %157 = arith.maximumf %108, %155 : vector<8x128xf32>
    %158 = arith.addf %109, %139 : vector<8x128xf32>
    %159 = arith.addf %110, %155 : vector<8x128xf32>
    %c3_i32 = arith.constant 3 : i32
    %c7_i32_46 = arith.constant 7 : i32
    %160 = arith.subi %c7_i32_46, %c3_i32 : i32
    %161 = arith.index_cast %c3_i32 : i32 to index
    %c0_47 = arith.constant 0 : index
    %c0_48 = arith.constant 0 : index
    %162 = vector.load %arg1[%161, %c0_47, %c0_48] : memref<8x8x512xf32, #tpu.memory_space<vmem>>, vector<1x8x512xf32>
    %163 = vector.shape_cast %162 : vector<1x8x512xf32> to vector<8x512xf32>
    %164 = arith.truncf %139 : vector<8x128xf32> to vector<8x128xbf16>
    %cst_49 = arith.constant dense<0.000000e+00> : vector<8x512xf32>
    %165 = tpu.matmul %164, %3, %cst_49 {dimension_numbers = #tpu.dot_dimension_numbers<[1], [0], [0], [1], [0, 0, 1, 1], [], []>} : vector<8x128xbf16>, vector<128x512xbf16>, vector<8x512xf32> -> vector<8x512xf32>
    %166 = arith.addf %163, %165 : vector<8x512xf32>
    %167 = arith.index_cast %160 : i32 to index
    %c0_50 = arith.constant 0 : index
    %c0_51 = arith.constant 0 : index
    %168 = vector.load %arg2[%167, %c0_50, %c0_51] : memref<8x8x512xf32, #tpu.memory_space<vmem>>, vector<1x8x512xf32>
    %169 = vector.shape_cast %168 : vector<1x8x512xf32> to vector<8x512xf32>
    %170 = arith.truncf %155 : vector<8x128xf32> to vector<8x128xbf16>
    %cst_52 = arith.constant dense<0.000000e+00> : vector<8x512xf32>
    %171 = tpu.matmul %170, %4, %cst_52 {dimension_numbers = #tpu.dot_dimension_numbers<[1], [0], [0], [1], [0, 0, 1, 1], [], []>} : vector<8x128xbf16>, vector<128x512xbf16>, vector<8x512xf32> -> vector<8x512xf32>
    %172 = arith.addf %169, %171 : vector<8x512xf32>
    %173 = vector.extract_strided_slice %166 {offsets = [0, 0], sizes = [8, 384], strides = [1, 1]} : vector<8x512xf32> to vector<8x384xf32>
    %174 = arith.negf %173 : vector<8x384xf32>
    %175 = math.exp %174 : vector<8x384xf32>
    %cst_53 = arith.constant 1.000000e+00 : f32
    %176 = vector.broadcast %cst_53 : f32 to vector<8x384xf32>
    %177 = arith.addf %176, %175 : vector<8x384xf32>
    %178 = arith.divf %176, %177 : vector<8x384xf32>
    %179 = vector.extract_strided_slice %178 {offsets = [0, 0], sizes = [8, 128], strides = [1, 1]} : vector<8x384xf32> to vector<8x128xf32>
    %180 = vector.extract_strided_slice %178 {offsets = [0, 128], sizes = [8, 128], strides = [1, 1]} : vector<8x384xf32> to vector<8x128xf32>
    %181 = vector.extract_strided_slice %178 {offsets = [0, 256], sizes = [8, 128], strides = [1, 1]} : vector<8x384xf32> to vector<8x128xf32>
    %182 = vector.extract_strided_slice %166 {offsets = [0, 384], sizes = [8, 128], strides = [1, 1]} : vector<8x512xf32> to vector<8x128xf32>
    %183 = math.tanh %182 : vector<8x128xf32>
    %184 = arith.mulf %180, %137 : vector<8x128xf32>
    %185 = arith.mulf %179, %183 : vector<8x128xf32>
    %186 = arith.addf %184, %185 : vector<8x128xf32>
    %187 = math.tanh %186 : vector<8x128xf32>
    %188 = arith.mulf %181, %187 : vector<8x128xf32>
    %189 = vector.extract_strided_slice %172 {offsets = [0, 0], sizes = [8, 384], strides = [1, 1]} : vector<8x512xf32> to vector<8x384xf32>
    %190 = arith.negf %189 : vector<8x384xf32>
    %191 = math.exp %190 : vector<8x384xf32>
    %cst_54 = arith.constant 1.000000e+00 : f32
    %192 = vector.broadcast %cst_54 : f32 to vector<8x384xf32>
    %193 = arith.addf %192, %191 : vector<8x384xf32>
    %194 = arith.divf %192, %193 : vector<8x384xf32>
    %195 = vector.extract_strided_slice %194 {offsets = [0, 0], sizes = [8, 128], strides = [1, 1]} : vector<8x384xf32> to vector<8x128xf32>
    %196 = vector.extract_strided_slice %194 {offsets = [0, 128], sizes = [8, 128], strides = [1, 1]} : vector<8x384xf32> to vector<8x128xf32>
    %197 = vector.extract_strided_slice %194 {offsets = [0, 256], sizes = [8, 128], strides = [1, 1]} : vector<8x384xf32> to vector<8x128xf32>
    %198 = vector.extract_strided_slice %172 {offsets = [0, 384], sizes = [8, 128], strides = [1, 1]} : vector<8x512xf32> to vector<8x128xf32>
    %199 = math.tanh %198 : vector<8x128xf32>
    %200 = arith.mulf %196, %153 : vector<8x128xf32>
    %201 = arith.mulf %195, %199 : vector<8x128xf32>
    %202 = arith.addf %200, %201 : vector<8x128xf32>
    %203 = math.tanh %202 : vector<8x128xf32>
    %204 = arith.mulf %197, %203 : vector<8x128xf32>
    %205 = arith.maximumf %156, %188 : vector<8x128xf32>
    %206 = arith.maximumf %157, %204 : vector<8x128xf32>
    %207 = arith.addf %158, %188 : vector<8x128xf32>
    %208 = arith.addf %159, %204 : vector<8x128xf32>
    %c4_i32 = arith.constant 4 : i32
    %c7_i32_55 = arith.constant 7 : i32
    %209 = arith.subi %c7_i32_55, %c4_i32 : i32
    %210 = arith.index_cast %c4_i32 : i32 to index
    %c0_56 = arith.constant 0 : index
    %c0_57 = arith.constant 0 : index
    %211 = vector.load %arg1[%210, %c0_56, %c0_57] : memref<8x8x512xf32, #tpu.memory_space<vmem>>, vector<1x8x512xf32>
    %212 = vector.shape_cast %211 : vector<1x8x512xf32> to vector<8x512xf32>
    %213 = arith.truncf %188 : vector<8x128xf32> to vector<8x128xbf16>
    %cst_58 = arith.constant dense<0.000000e+00> : vector<8x512xf32>
    %214 = tpu.matmul %213, %3, %cst_58 {dimension_numbers = #tpu.dot_dimension_numbers<[1], [0], [0], [1], [0, 0, 1, 1], [], []>} : vector<8x128xbf16>, vector<128x512xbf16>, vector<8x512xf32> -> vector<8x512xf32>
    %215 = arith.addf %212, %214 : vector<8x512xf32>
    %216 = arith.index_cast %209 : i32 to index
    %c0_59 = arith.constant 0 : index
    %c0_60 = arith.constant 0 : index
    %217 = vector.load %arg2[%216, %c0_59, %c0_60] : memref<8x8x512xf32, #tpu.memory_space<vmem>>, vector<1x8x512xf32>
    %218 = vector.shape_cast %217 : vector<1x8x512xf32> to vector<8x512xf32>
    %219 = arith.truncf %204 : vector<8x128xf32> to vector<8x128xbf16>
    %cst_61 = arith.constant dense<0.000000e+00> : vector<8x512xf32>
    %220 = tpu.matmul %219, %4, %cst_61 {dimension_numbers = #tpu.dot_dimension_numbers<[1], [0], [0], [1], [0, 0, 1, 1], [], []>} : vector<8x128xbf16>, vector<128x512xbf16>, vector<8x512xf32> -> vector<8x512xf32>
    %221 = arith.addf %218, %220 : vector<8x512xf32>
    %222 = vector.extract_strided_slice %215 {offsets = [0, 0], sizes = [8, 384], strides = [1, 1]} : vector<8x512xf32> to vector<8x384xf32>
    %223 = arith.negf %222 : vector<8x384xf32>
    %224 = math.exp %223 : vector<8x384xf32>
    %cst_62 = arith.constant 1.000000e+00 : f32
    %225 = vector.broadcast %cst_62 : f32 to vector<8x384xf32>
    %226 = arith.addf %225, %224 : vector<8x384xf32>
    %227 = arith.divf %225, %226 : vector<8x384xf32>
    %228 = vector.extract_strided_slice %227 {offsets = [0, 0], sizes = [8, 128], strides = [1, 1]} : vector<8x384xf32> to vector<8x128xf32>
    %229 = vector.extract_strided_slice %227 {offsets = [0, 128], sizes = [8, 128], strides = [1, 1]} : vector<8x384xf32> to vector<8x128xf32>
    %230 = vector.extract_strided_slice %227 {offsets = [0, 256], sizes = [8, 128], strides = [1, 1]} : vector<8x384xf32> to vector<8x128xf32>
    %231 = vector.extract_strided_slice %215 {offsets = [0, 384], sizes = [8, 128], strides = [1, 1]} : vector<8x512xf32> to vector<8x128xf32>
    %232 = math.tanh %231 : vector<8x128xf32>
    %233 = arith.mulf %229, %186 : vector<8x128xf32>
    %234 = arith.mulf %228, %232 : vector<8x128xf32>
    %235 = arith.addf %233, %234 : vector<8x128xf32>
    %236 = math.tanh %235 : vector<8x128xf32>
    %237 = arith.mulf %230, %236 : vector<8x128xf32>
    %238 = vector.extract_strided_slice %221 {offsets = [0, 0], sizes = [8, 384], strides = [1, 1]} : vector<8x512xf32> to vector<8x384xf32>
    %239 = arith.negf %238 : vector<8x384xf32>
    %240 = math.exp %239 : vector<8x384xf32>
    %cst_63 = arith.constant 1.000000e+00 : f32
    %241 = vector.broadcast %cst_63 : f32 to vector<8x384xf32>
    %242 = arith.addf %241, %240 : vector<8x384xf32>
    %243 = arith.divf %241, %242 : vector<8x384xf32>
    %244 = vector.extract_strided_slice %243 {offsets = [0, 0], sizes = [8, 128], strides = [1, 1]} : vector<8x384xf32> to vector<8x128xf32>
    %245 = vector.extract_strided_slice %243 {offsets = [0, 128], sizes = [8, 128], strides = [1, 1]} : vector<8x384xf32> to vector<8x128xf32>
    %246 = vector.extract_strided_slice %243 {offsets = [0, 256], sizes = [8, 128], strides = [1, 1]} : vector<8x384xf32> to vector<8x128xf32>
    %247 = vector.extract_strided_slice %221 {offsets = [0, 384], sizes = [8, 128], strides = [1, 1]} : vector<8x512xf32> to vector<8x128xf32>
    %248 = math.tanh %247 : vector<8x128xf32>
    %249 = arith.mulf %245, %202 : vector<8x128xf32>
    %250 = arith.mulf %244, %248 : vector<8x128xf32>
    %251 = arith.addf %249, %250 : vector<8x128xf32>
    %252 = math.tanh %251 : vector<8x128xf32>
    %253 = arith.mulf %246, %252 : vector<8x128xf32>
    %254 = arith.maximumf %205, %237 : vector<8x128xf32>
    %255 = arith.maximumf %206, %253 : vector<8x128xf32>
    %256 = arith.addf %207, %237 : vector<8x128xf32>
    %257 = arith.addf %208, %253 : vector<8x128xf32>
    %c5_i32 = arith.constant 5 : i32
    %c7_i32_64 = arith.constant 7 : i32
    %258 = arith.subi %c7_i32_64, %c5_i32 : i32
    %259 = arith.index_cast %c5_i32 : i32 to index
    %c0_65 = arith.constant 0 : index
    %c0_66 = arith.constant 0 : index
    %260 = vector.load %arg1[%259, %c0_65, %c0_66] : memref<8x8x512xf32, #tpu.memory_space<vmem>>, vector<1x8x512xf32>
    %261 = vector.shape_cast %260 : vector<1x8x512xf32> to vector<8x512xf32>
    %262 = arith.truncf %237 : vector<8x128xf32> to vector<8x128xbf16>
    %cst_67 = arith.constant dense<0.000000e+00> : vector<8x512xf32>
    %263 = tpu.matmul %262, %3, %cst_67 {dimension_numbers = #tpu.dot_dimension_numbers<[1], [0], [0], [1], [0, 0, 1, 1], [], []>} : vector<8x128xbf16>, vector<128x512xbf16>, vector<8x512xf32> -> vector<8x512xf32>
    %264 = arith.addf %261, %263 : vector<8x512xf32>
    %265 = arith.index_cast %258 : i32 to index
    %c0_68 = arith.constant 0 : index
    %c0_69 = arith.constant 0 : index
    %266 = vector.load %arg2[%265, %c0_68, %c0_69] : memref<8x8x512xf32, #tpu.memory_space<vmem>>, vector<1x8x512xf32>
    %267 = vector.shape_cast %266 : vector<1x8x512xf32> to vector<8x512xf32>
    %268 = arith.truncf %253 : vector<8x128xf32> to vector<8x128xbf16>
    %cst_70 = arith.constant dense<0.000000e+00> : vector<8x512xf32>
    %269 = tpu.matmul %268, %4, %cst_70 {dimension_numbers = #tpu.dot_dimension_numbers<[1], [0], [0], [1], [0, 0, 1, 1], [], []>} : vector<8x128xbf16>, vector<128x512xbf16>, vector<8x512xf32> -> vector<8x512xf32>
    %270 = arith.addf %267, %269 : vector<8x512xf32>
    %271 = vector.extract_strided_slice %264 {offsets = [0, 0], sizes = [8, 384], strides = [1, 1]} : vector<8x512xf32> to vector<8x384xf32>
    %272 = arith.negf %271 : vector<8x384xf32>
    %273 = math.exp %272 : vector<8x384xf32>
    %cst_71 = arith.constant 1.000000e+00 : f32
    %274 = vector.broadcast %cst_71 : f32 to vector<8x384xf32>
    %275 = arith.addf %274, %273 : vector<8x384xf32>
    %276 = arith.divf %274, %275 : vector<8x384xf32>
    %277 = vector.extract_strided_slice %276 {offsets = [0, 0], sizes = [8, 128], strides = [1, 1]} : vector<8x384xf32> to vector<8x128xf32>
    %278 = vector.extract_strided_slice %276 {offsets = [0, 128], sizes = [8, 128], strides = [1, 1]} : vector<8x384xf32> to vector<8x128xf32>
    %279 = vector.extract_strided_slice %276 {offsets = [0, 256], sizes = [8, 128], strides = [1, 1]} : vector<8x384xf32> to vector<8x128xf32>
    %280 = vector.extract_strided_slice %264 {offsets = [0, 384], sizes = [8, 128], strides = [1, 1]} : vector<8x512xf32> to vector<8x128xf32>
    %281 = math.tanh %280 : vector<8x128xf32>
    %282 = arith.mulf %278, %235 : vector<8x128xf32>
    %283 = arith.mulf %277, %281 : vector<8x128xf32>
    %284 = arith.addf %282, %283 : vector<8x128xf32>
    %285 = math.tanh %284 : vector<8x128xf32>
    %286 = arith.mulf %279, %285 : vector<8x128xf32>
    %287 = vector.extract_strided_slice %270 {offsets = [0, 0], sizes = [8, 384], strides = [1, 1]} : vector<8x512xf32> to vector<8x384xf32>
    %288 = arith.negf %287 : vector<8x384xf32>
    %289 = math.exp %288 : vector<8x384xf32>
    %cst_72 = arith.constant 1.000000e+00 : f32
    %290 = vector.broadcast %cst_72 : f32 to vector<8x384xf32>
    %291 = arith.addf %290, %289 : vector<8x384xf32>
    %292 = arith.divf %290, %291 : vector<8x384xf32>
    %293 = vector.extract_strided_slice %292 {offsets = [0, 0], sizes = [8, 128], strides = [1, 1]} : vector<8x384xf32> to vector<8x128xf32>
    %294 = vector.extract_strided_slice %292 {offsets = [0, 128], sizes = [8, 128], strides = [1, 1]} : vector<8x384xf32> to vector<8x128xf32>
    %295 = vector.extract_strided_slice %292 {offsets = [0, 256], sizes = [8, 128], strides = [1, 1]} : vector<8x384xf32> to vector<8x128xf32>
    %296 = vector.extract_strided_slice %270 {offsets = [0, 384], sizes = [8, 128], strides = [1, 1]} : vector<8x512xf32> to vector<8x128xf32>
    %297 = math.tanh %296 : vector<8x128xf32>
    %298 = arith.mulf %294, %251 : vector<8x128xf32>
    %299 = arith.mulf %293, %297 : vector<8x128xf32>
    %300 = arith.addf %298, %299 : vector<8x128xf32>
    %301 = math.tanh %300 : vector<8x128xf32>
    %302 = arith.mulf %295, %301 : vector<8x128xf32>
    %303 = arith.maximumf %254, %286 : vector<8x128xf32>
    %304 = arith.maximumf %255, %302 : vector<8x128xf32>
    %305 = arith.addf %256, %286 : vector<8x128xf32>
    %306 = arith.addf %257, %302 : vector<8x128xf32>
    %c6_i32 = arith.constant 6 : i32
    %c7_i32_73 = arith.constant 7 : i32
    %307 = arith.subi %c7_i32_73, %c6_i32 : i32
    %308 = arith.index_cast %c6_i32 : i32 to index
    %c0_74 = arith.constant 0 : index
    %c0_75 = arith.constant 0 : index
    %309 = vector.load %arg1[%308, %c0_74, %c0_75] : memref<8x8x512xf32, #tpu.memory_space<vmem>>, vector<1x8x512xf32>
    %310 = vector.shape_cast %309 : vector<1x8x512xf32> to vector<8x512xf32>
    %311 = arith.truncf %286 : vector<8x128xf32> to vector<8x128xbf16>
    %cst_76 = arith.constant dense<0.000000e+00> : vector<8x512xf32>
    %312 = tpu.matmul %311, %3, %cst_76 {dimension_numbers = #tpu.dot_dimension_numbers<[1], [0], [0], [1], [0, 0, 1, 1], [], []>} : vector<8x128xbf16>, vector<128x512xbf16>, vector<8x512xf32> -> vector<8x512xf32>
    %313 = arith.addf %310, %312 : vector<8x512xf32>
    %314 = arith.index_cast %307 : i32 to index
    %c0_77 = arith.constant 0 : index
    %c0_78 = arith.constant 0 : index
    %315 = vector.load %arg2[%314, %c0_77, %c0_78] : memref<8x8x512xf32, #tpu.memory_space<vmem>>, vector<1x8x512xf32>
    %316 = vector.shape_cast %315 : vector<1x8x512xf32> to vector<8x512xf32>
    %317 = arith.truncf %302 : vector<8x128xf32> to vector<8x128xbf16>
    %cst_79 = arith.constant dense<0.000000e+00> : vector<8x512xf32>
    %318 = tpu.matmul %317, %4, %cst_79 {dimension_numbers = #tpu.dot_dimension_numbers<[1], [0], [0], [1], [0, 0, 1, 1], [], []>} : vector<8x128xbf16>, vector<128x512xbf16>, vector<8x512xf32> -> vector<8x512xf32>
    %319 = arith.addf %316, %318 : vector<8x512xf32>
    %320 = vector.extract_strided_slice %313 {offsets = [0, 0], sizes = [8, 384], strides = [1, 1]} : vector<8x512xf32> to vector<8x384xf32>
    %321 = arith.negf %320 : vector<8x384xf32>
    %322 = math.exp %321 : vector<8x384xf32>
    %cst_80 = arith.constant 1.000000e+00 : f32
    %323 = vector.broadcast %cst_80 : f32 to vector<8x384xf32>
    %324 = arith.addf %323, %322 : vector<8x384xf32>
    %325 = arith.divf %323, %324 : vector<8x384xf32>
    %326 = vector.extract_strided_slice %325 {offsets = [0, 0], sizes = [8, 128], strides = [1, 1]} : vector<8x384xf32> to vector<8x128xf32>
    %327 = vector.extract_strided_slice %325 {offsets = [0, 128], sizes = [8, 128], strides = [1, 1]} : vector<8x384xf32> to vector<8x128xf32>
    %328 = vector.extract_strided_slice %325 {offsets = [0, 256], sizes = [8, 128], strides = [1, 1]} : vector<8x384xf32> to vector<8x128xf32>
    %329 = vector.extract_strided_slice %313 {offsets = [0, 384], sizes = [8, 128], strides = [1, 1]} : vector<8x512xf32> to vector<8x128xf32>
    %330 = math.tanh %329 : vector<8x128xf32>
    %331 = arith.mulf %327, %284 : vector<8x128xf32>
    %332 = arith.mulf %326, %330 : vector<8x128xf32>
    %333 = arith.addf %331, %332 : vector<8x128xf32>
    %334 = math.tanh %333 : vector<8x128xf32>
    %335 = arith.mulf %328, %334 : vector<8x128xf32>
    %336 = vector.extract_strided_slice %319 {offsets = [0, 0], sizes = [8, 384], strides = [1, 1]} : vector<8x512xf32> to vector<8x384xf32>
    %337 = arith.negf %336 : vector<8x384xf32>
    %338 = math.exp %337 : vector<8x384xf32>
    %cst_81 = arith.constant 1.000000e+00 : f32
    %339 = vector.broadcast %cst_81 : f32 to vector<8x384xf32>
    %340 = arith.addf %339, %338 : vector<8x384xf32>
    %341 = arith.divf %339, %340 : vector<8x384xf32>
    %342 = vector.extract_strided_slice %341 {offsets = [0, 0], sizes = [8, 128], strides = [1, 1]} : vector<8x384xf32> to vector<8x128xf32>
    %343 = vector.extract_strided_slice %341 {offsets = [0, 128], sizes = [8, 128], strides = [1, 1]} : vector<8x384xf32> to vector<8x128xf32>
    %344 = vector.extract_strided_slice %341 {offsets = [0, 256], sizes = [8, 128], strides = [1, 1]} : vector<8x384xf32> to vector<8x128xf32>
    %345 = vector.extract_strided_slice %319 {offsets = [0, 384], sizes = [8, 128], strides = [1, 1]} : vector<8x512xf32> to vector<8x128xf32>
    %346 = math.tanh %345 : vector<8x128xf32>
    %347 = arith.mulf %343, %300 : vector<8x128xf32>
    %348 = arith.mulf %342, %346 : vector<8x128xf32>
    %349 = arith.addf %347, %348 : vector<8x128xf32>
    %350 = math.tanh %349 : vector<8x128xf32>
    %351 = arith.mulf %344, %350 : vector<8x128xf32>
    %352 = arith.maximumf %303, %335 : vector<8x128xf32>
    %353 = arith.maximumf %304, %351 : vector<8x128xf32>
    %354 = arith.addf %305, %335 : vector<8x128xf32>
    %355 = arith.addf %306, %351 : vector<8x128xf32>
    %c7_i32_82 = arith.constant 7 : i32
    %c7_i32_83 = arith.constant 7 : i32
    %356 = arith.subi %c7_i32_83, %c7_i32_82 : i32
    %357 = arith.index_cast %c7_i32_82 : i32 to index
    %c0_84 = arith.constant 0 : index
    %c0_85 = arith.constant 0 : index
    %358 = vector.load %arg1[%357, %c0_84, %c0_85] : memref<8x8x512xf32, #tpu.memory_space<vmem>>, vector<1x8x512xf32>
    %359 = vector.shape_cast %358 : vector<1x8x512xf32> to vector<8x512xf32>
    %360 = arith.truncf %335 : vector<8x128xf32> to vector<8x128xbf16>
    %cst_86 = arith.constant dense<0.000000e+00> : vector<8x512xf32>
    %361 = tpu.matmul %360, %3, %cst_86 {dimension_numbers = #tpu.dot_dimension_numbers<[1], [0], [0], [1], [0, 0, 1, 1], [], []>} : vector<8x128xbf16>, vector<128x512xbf16>, vector<8x512xf32> -> vector<8x512xf32>
    %362 = arith.addf %359, %361 : vector<8x512xf32>
    %363 = arith.index_cast %356 : i32 to index
    %c0_87 = arith.constant 0 : index
    %c0_88 = arith.constant 0 : index
    %364 = vector.load %arg2[%363, %c0_87, %c0_88] : memref<8x8x512xf32, #tpu.memory_space<vmem>>, vector<1x8x512xf32>
    %365 = vector.shape_cast %364 : vector<1x8x512xf32> to vector<8x512xf32>
    %366 = arith.truncf %351 : vector<8x128xf32> to vector<8x128xbf16>
    %cst_89 = arith.constant dense<0.000000e+00> : vector<8x512xf32>
    %367 = tpu.matmul %366, %4, %cst_89 {dimension_numbers = #tpu.dot_dimension_numbers<[1], [0], [0], [1], [0, 0, 1, 1], [], []>} : vector<8x128xbf16>, vector<128x512xbf16>, vector<8x512xf32> -> vector<8x512xf32>
    %368 = arith.addf %365, %367 : vector<8x512xf32>
    %369 = vector.extract_strided_slice %362 {offsets = [0, 0], sizes = [8, 384], strides = [1, 1]} : vector<8x512xf32> to vector<8x384xf32>
    %370 = arith.negf %369 : vector<8x384xf32>
    %371 = math.exp %370 : vector<8x384xf32>
    %cst_90 = arith.constant 1.000000e+00 : f32
    %372 = vector.broadcast %cst_90 : f32 to vector<8x384xf32>
    %373 = arith.addf %372, %371 : vector<8x384xf32>
    %374 = arith.divf %372, %373 : vector<8x384xf32>
    %375 = vector.extract_strided_slice %374 {offsets = [0, 0], sizes = [8, 128], strides = [1, 1]} : vector<8x384xf32> to vector<8x128xf32>
    %376 = vector.extract_strided_slice %374 {offsets = [0, 128], sizes = [8, 128], strides = [1, 1]} : vector<8x384xf32> to vector<8x128xf32>
    %377 = vector.extract_strided_slice %374 {offsets = [0, 256], sizes = [8, 128], strides = [1, 1]} : vector<8x384xf32> to vector<8x128xf32>
    %378 = vector.extract_strided_slice %362 {offsets = [0, 384], sizes = [8, 128], strides = [1, 1]} : vector<8x512xf32> to vector<8x128xf32>
    %379 = math.tanh %378 : vector<8x128xf32>
    %380 = arith.mulf %376, %333 : vector<8x128xf32>
    %381 = arith.mulf %375, %379 : vector<8x128xf32>
    %382 = arith.addf %380, %381 : vector<8x128xf32>
    %383 = math.tanh %382 : vector<8x128xf32>
    %384 = arith.mulf %377, %383 : vector<8x128xf32>
    %385 = vector.extract_strided_slice %368 {offsets = [0, 0], sizes = [8, 384], strides = [1, 1]} : vector<8x512xf32> to vector<8x384xf32>
    %386 = arith.negf %385 : vector<8x384xf32>
    %387 = math.exp %386 : vector<8x384xf32>
    %cst_91 = arith.constant 1.000000e+00 : f32
    %388 = vector.broadcast %cst_91 : f32 to vector<8x384xf32>
    %389 = arith.addf %388, %387 : vector<8x384xf32>
    %390 = arith.divf %388, %389 : vector<8x384xf32>
    %391 = vector.extract_strided_slice %390 {offsets = [0, 0], sizes = [8, 128], strides = [1, 1]} : vector<8x384xf32> to vector<8x128xf32>
    %392 = vector.extract_strided_slice %390 {offsets = [0, 128], sizes = [8, 128], strides = [1, 1]} : vector<8x384xf32> to vector<8x128xf32>
    %393 = vector.extract_strided_slice %390 {offsets = [0, 256], sizes = [8, 128], strides = [1, 1]} : vector<8x384xf32> to vector<8x128xf32>
    %394 = vector.extract_strided_slice %368 {offsets = [0, 384], sizes = [8, 128], strides = [1, 1]} : vector<8x512xf32> to vector<8x128xf32>
    %395 = math.tanh %394 : vector<8x128xf32>
    %396 = arith.mulf %392, %349 : vector<8x128xf32>
    %397 = arith.mulf %391, %395 : vector<8x128xf32>
    %398 = arith.addf %396, %397 : vector<8x128xf32>
    %399 = math.tanh %398 : vector<8x128xf32>
    %400 = arith.mulf %393, %399 : vector<8x128xf32>
    %401 = arith.maximumf %352, %384 : vector<8x128xf32>
    %402 = arith.maximumf %353, %400 : vector<8x128xf32>
    %403 = arith.addf %354, %384 : vector<8x128xf32>
    %404 = arith.addf %355, %400 : vector<8x128xf32>
    %c8_i32 = arith.constant 8 : i32
    %c0_92 = arith.constant 0 : index
    %c0_93 = arith.constant 0 : index
    %405 = vector.load %arg6[%c0_92, %c0_93] : memref<8x128xf32, #tpu.memory_space<vmem>>, vector<8x128xf32>
    tpu.vector_store %arg6[%c0_92, %c0_93], %384 {strides = array<i32>} : memref<8x128xf32, #tpu.memory_space<vmem>>, vector<8x128xf32>,
    %c0_94 = arith.constant 0 : index
    %c0_95 = arith.constant 0 : index
    %406 = vector.load %arg7[%c0_94, %c0_95] : memref<8x128xf32, #tpu.memory_space<vmem>>, vector<8x128xf32>
    tpu.vector_store %arg7[%c0_94, %c0_95], %382 {strides = array<i32>} : memref<8x128xf32, #tpu.memory_space<vmem>>, vector<8x128xf32>,
    %c0_96 = arith.constant 0 : index
    %c0_97 = arith.constant 0 : index
    %407 = vector.load %arg8[%c0_96, %c0_97] : memref<8x128xf32, #tpu.memory_space<vmem>>, vector<8x128xf32>
    tpu.vector_store %arg8[%c0_96, %c0_97], %400 {strides = array<i32>} : memref<8x128xf32, #tpu.memory_space<vmem>>, vector<8x128xf32>,
    %c0_98 = arith.constant 0 : index
    %c0_99 = arith.constant 0 : index
    %408 = vector.load %arg9[%c0_98, %c0_99] : memref<8x128xf32, #tpu.memory_space<vmem>>, vector<8x128xf32>
    tpu.vector_store %arg9[%c0_98, %c0_99], %398 {strides = array<i32>} : memref<8x128xf32, #tpu.memory_space<vmem>>, vector<8x128xf32>,
    %c0_100 = arith.constant 0 : index
    %c0_101 = arith.constant 0 : index
    %409 = vector.load %arg10[%c0_100, %c0_101] : memref<8x128xf32, #tpu.memory_space<vmem>>, vector<8x128xf32>
    tpu.vector_store %arg10[%c0_100, %c0_101], %401 {strides = array<i32>} : memref<8x128xf32, #tpu.memory_space<vmem>>, vector<8x128xf32>,
    %c0_102 = arith.constant 0 : index
    %c0_103 = arith.constant 0 : index
    %410 = vector.load %arg11[%c0_102, %c0_103] : memref<8x128xf32, #tpu.memory_space<vmem>>, vector<8x128xf32>
    tpu.vector_store %arg11[%c0_102, %c0_103], %402 {strides = array<i32>} : memref<8x128xf32, #tpu.memory_space<vmem>>, vector<8x128xf32>,
    %c0_104 = arith.constant 0 : index
    %c0_105 = arith.constant 0 : index
    %411 = vector.load %arg12[%c0_104, %c0_105] : memref<8x128xf32, #tpu.memory_space<vmem>>, vector<8x128xf32>
    tpu.vector_store %arg12[%c0_104, %c0_105], %403 {strides = array<i32>} : memref<8x128xf32, #tpu.memory_space<vmem>>, vector<8x128xf32>,
    %c0_106 = arith.constant 0 : index
    %c0_107 = arith.constant 0 : index
    %412 = vector.load %arg13[%c0_106, %c0_107] : memref<8x128xf32, #tpu.memory_space<vmem>>, vector<8x128xf32>
    tpu.vector_store %arg13[%c0_106, %c0_107], %404 {strides = array<i32>} : memref<8x128xf32, #tpu.memory_space<vmem>>, vector<8x128xf32>,
    %c1_i32_108 = arith.constant 1 : i32
    %413 = arith.cmpi eq, %arg0, %c1_i32_108 : i32
    %414 = arith.extui %413 : i1 to i32
    %c0_i32_109 = arith.constant 0 : i32
    %415 = arith.cmpi ne, %414, %c0_i32_109 : i32
    scf.if %415 {
      %c0_110 = arith.constant 0 : index
      %c0_111 = arith.constant 0 : index
      %416 = vector.load %arg5[%c0_110, %c0_111] : memref<8x768xf32, #tpu.memory_space<vmem>>, vector<8x128xf32>
      tpu.vector_store %arg5[%c0_110, %c0_111], %400 {strides = array<i32>} : memref<8x768xf32, #tpu.memory_space<vmem>>, vector<8x128xf32>,
      %c0_112 = arith.constant 0 : index
      %c128 = arith.constant 128 : index
      %417 = vector.load %arg5[%c0_112, %c128] : memref<8x768xf32, #tpu.memory_space<vmem>>, vector<8x128xf32>
      tpu.vector_store %arg5[%c0_112, %c128], %384 {strides = array<i32>} : memref<8x768xf32, #tpu.memory_space<vmem>>, vector<8x128xf32>,
      %c0_113 = arith.constant 0 : index
      %c256 = arith.constant 256 : index
      %418 = vector.load %arg5[%c0_113, %c256] : memref<8x768xf32, #tpu.memory_space<vmem>>, vector<8x128xf32>
      tpu.vector_store %arg5[%c0_113, %c256], %401 {strides = array<i32>} : memref<8x768xf32, #tpu.memory_space<vmem>>, vector<8x128xf32>,
      %c0_114 = arith.constant 0 : index
      %c384 = arith.constant 384 : index
      %419 = vector.load %arg5[%c0_114, %c384] : memref<8x768xf32, #tpu.memory_space<vmem>>, vector<8x128xf32>
      tpu.vector_store %arg5[%c0_114, %c384], %402 {strides = array<i32>} : memref<8x768xf32, #tpu.memory_space<vmem>>, vector<8x128xf32>,
      %cst_115 = arith.constant 6.250000e-02 : f32
      %420 = vector.broadcast %cst_115 : f32 to vector<8x128xf32>
      %421 = arith.mulf %403, %420 : vector<8x128xf32>
      %c0_116 = arith.constant 0 : index
      %c512 = arith.constant 512 : index
      %422 = vector.load %arg5[%c0_116, %c512] : memref<8x768xf32, #tpu.memory_space<vmem>>, vector<8x128xf32>
      tpu.vector_store %arg5[%c0_116, %c512], %421 {strides = array<i32>} : memref<8x768xf32, #tpu.memory_space<vmem>>, vector<8x128xf32>,
      %cst_117 = arith.constant 6.250000e-02 : f32
      %423 = vector.broadcast %cst_117 : f32 to vector<8x128xf32>
      %424 = arith.mulf %404, %423 : vector<8x128xf32>
      %c0_118 = arith.constant 0 : index
      %c640 = arith.constant 640 : index
      %425 = vector.load %arg5[%c0_118, %c640] : memref<8x768xf32, #tpu.memory_space<vmem>>, vector<8x128xf32>
      tpu.vector_store %arg5[%c0_118, %c640], %424 {strides = array<i32>} : memref<8x768xf32, #tpu.memory_space<vmem>>, vector<8x128xf32>,
    } else {
    }
    return
  }
  func.func @transform_0(%arg0: i32) -> (i32, i32, i32) {
    %c0_i32 = arith.constant 0 : i32
    %c0_i32_0 = arith.constant 0 : i32
    %c0_i32_1 = arith.constant 0 : i32
    return %arg0, %c0_i32, %c0_i32_0 : i32, i32, i32
  }
  func.func @transform_1(%arg0: i32) -> (i32, i32, i32) {
    %c1_i32 = arith.constant 1 : i32
    %0 = arith.subi %c1_i32, %arg0 : i32
    %c0_i32 = arith.constant 0 : i32
    %c0_i32_0 = arith.constant 0 : i32
    %c0_i32_1 = arith.constant 0 : i32
    return %0, %c0_i32, %c0_i32_0 : i32, i32, i32
  }
  func.func @transform_2(%arg0: i32) -> (i32, i32) {
    %c0_i32 = arith.constant 0 : i32
    %c0_i32_0 = arith.constant 0 : i32
    %c0_i32_1 = arith.constant 0 : i32
    return %c0_i32, %c0_i32_0 : i32, i32
  }
  func.func @transform_3(%arg0: i32) -> (i32, i32) {
    %c0_i32 = arith.constant 0 : i32
    %c0_i32_0 = arith.constant 0 : i32
    %c0_i32_1 = arith.constant 0 : i32
    return %c0_i32, %c0_i32_0 : i32, i32
  }
  func.func @transform_4(%arg0: i32) -> (i32, i32) {
    %c0_i32 = arith.constant 0 : i32
    %c0_i32_0 = arith.constant 0 : i32
    %c0_i32_1 = arith.constant 0 : i32
    return %c0_i32, %c0_i32_0 : i32, i32
  }
}

</mosaic_0001>

<bundles_post_ra>
// kernel: lstm_model_forward.4
= control target key start
LH: loop header
LB: loop body
LE: loop exit
PB: predicated region body
PF: predicated region fallthrough
CT: control target
= control target key end

     0   :  { %s3237_s15 = smov 0   ;;  %s4744_s0 = inlined_call_operand.vmem [shape: f32[16,8,512], index: 0, kind: input, shape index: {}]   ;;  %s4745_s1 = inlined_call_operand.vmem [shape: f32[16,8,512], index: 1, kind: input, shape index: {}]   ;;  %s4746_s2 = inlined_call_operand.vmem [shape: bf16[128,512], index: 2, kind: input, shape index: {}]   ;;  %s4747_s3 = inlined_call_operand.vmem [shape: bf16[128,512], index: 3, kind: input, shape index: {}]   ;;  %s4748_s4 = inlined_call_operand.vmem [shape: f32[8,768], index: 4, kind: output, shape index: {}]  }
   0x1 LB: > { %s3243_s16 = sadd.s32 4294967295, %s3207_s15   ;;  %p2574_p0 = scmp.ge.s32.totalorder %s3207_s15, 1  ;;  %s3207_s15 = sphi %s3237_s15, %s14_s15  }
   0x2   : > { %p175_p1 = scmp.lt.s32.totalorder %s3207_s15, 3 }
   0x4   : > { %p176_p2 = pnand %p2574_p0, %p175_p1 }
   0x6   : > { %179 = sbr.rel (%p176_p2) target bundleno = 2105 (0x839), region = 36 }
   0xb   : > { %s2575_s17 = sshll.u32 %s3243_s16, 3  ;;  %s211_s18 = ssub.s32 1, %s3243_s16 }
   0xc   : > { %p205_p3 = scmp.lt.s32.totalorder %s2575_s17, 15  ;;  %s2578_s19 = sshll.u32 %s211_s18, 3 }
   0xd   : > { %p213_p4 = scmp.lt.s32.totalorder %s2578_s19, 15  ;;  %p2581_p5 = scmp.ne.s32.totalorder %s3243_s16, 0 }
   0xe   : > { %s5005_s17 = smov (!%p205_p3, %s2575_s17), 15 }
   0xf   : > { %s5007_s19 = smov (!%p213_p4, %s2578_s19), 15  ;;  %s2753_s20 = sshll.u32 %s5005_s17, 5 }
  0x10   : > { %s3252_s23 = scalar_lea.vmem %s4744_s0, %s2753_s20  ;;  %s2754_s24 = sshll.u32 %s5007_s19, 5 }
  0x11   : > { %s3257_s27 = scalar_lea.vmem %s4745_s1, %s2754_s24  ;;  %224 = sbr.rel (%p2581_p5) target bundleno = 27 (0x1b), region = 40 }
  0x16   : > { %v3209_v0 = vmov 0.0   ;;  %v3210_v1 = vmov -inf  }
  0x17   : > { %225 = vst [vmem:[#allocation2] sm:$0xff] %v3209_v0  ;;  %226 = vst [vmem:[#allocation3] sm:$0xff] %v3209_v0 }
  0x18   : > { %227 = vst [vmem:[#allocation4] sm:$0xff] %v3209_v0  ;;  %228 = vst [vmem:[#allocation5] sm:$0xff] %v3209_v0 }
  0x19   : > { %229 = vst [vmem:[#allocation8] sm:$0xff] %v3209_v0  ;;  %230 = vst [vmem:[#allocation9] sm:$0xff] %v3209_v0 }
  0x1a   : > { %231 = vst [vmem:[#allocation6] sm:$0xff] %v3210_v1  ;;  %232 = vst [vmem:[#allocation7] sm:$0xff] %v3210_v1 }
  0x1b PF: > { %v3263_v2 = vld [vmem:[%s4746_s2 + $0xe4] ss:$16 sps:$4 sm:$0xff]   ;;  %v3268_v3 = vld [vmem:[%s4746_s2 + $0xe0] ss:$16 sps:$4 sm:$0xff]   ;;  %v4749_v4 = vmov 0   ;;  %p2750_p6 = scmp.ne.s32.totalorder %s3243_s16, 1 }
  0x1c   : > { %502 = vmatprep.mubr.bf16.mxu0 %v4749_v4  ;;  %543 = vmatprep.mubr.bf16.mxu1 %v4749_v4  ;;  %v3276_v5 = vld [vmem:[%s4746_s2 + $0xc4] ss:$16 sps:$4 sm:$0xff]   ;;  %v3282_v6 = vld [vmem:[%s4746_s2 + $0xc0] ss:$16 sps:$4 sm:$0xff]   ;;  %v3293_v8 = vld [vmem:[%s4746_s2 + $0xec] ss:$16 sps:$4 sm:$0xff]  }
  0x1d   : > { %470 = vmatprep.subr.bf16.mxu0 %v3263_v2  ;;  %v3288_v7 = vld [vmem:[%s4746_s2 + $0xa4] ss:$16 sps:$4 sm:$0xff]   ;;  %v3298_v9 = vld [vmem:[%s4746_s2 + $0xe8] ss:$16 sps:$4 sm:$0xff]   ;;  %v3304_v10 = vld [vmem:[%s4746_s2 + $0xa0] ss:$16 sps:$4 sm:$0xff]   ;;  %511 = vmatprep.subr.bf16.mxu1 %v3293_v8 }
  0x1e   : > { %471 = vmatpush1.bf16.msra.mxu0 %v3268_v3  ;;  %v3311_v11 = vld [vmem:[%s4746_s2 + $0x84] ss:$16 sps:$4 sm:$0xff]   ;;  %512 = vmatpush1.bf16.msra.mxu1 %v3298_v9  ;;  %v3317_v12 = vld [vmem:[%s4746_s2 + $0xcc] ss:$16 sps:$4 sm:$0xff]   ;;  %v3322_v13 = vld [vmem:[%s4746_s2 + $0xc8] ss:$16 sps:$4 sm:$0xff]  }
  0x1f   : > { %472 = vmatprep.subr.bf16.mxu0 %v3276_v5  ;;  %513 = vmatprep.subr.bf16.mxu1 %v3317_v12  ;;  %v3329_v14 = vld [vmem:[%s4746_s2 + $0x80] ss:$16 sps:$4 sm:$0xff]   ;;  %v3334_v15 = vld [vmem:[%s4746_s2 + $0x64] ss:$16 sps:$4 sm:$0xff]   ;;  %v3339_v16 = vld [vmem:[%s4746_s2 + $0xac] ss:$16 sps:$4 sm:$0xff]  }
  0x20   : > { %4848 = vst [vmem:[#allocation10_spill] sm:$0xff] %v3334_v15  ;;  %v3346_v17 = vld [vmem:[%s4746_s2 + $0xa8] ss:$16 sps:$4 sm:$0xff]   ;;  %v3352_v18 = vld [vmem:[%s4746_s2 + $0x8c] ss:$16 sps:$4 sm:$0xff]   ;;  %v297_v32 = vld [vmem:[#allocation2] sm:$0xff] }
  0x21   : > { %v3358_v19 = vld [vmem:[%s4746_s2 + $0x60] ss:$16 sps:$4 sm:$0xff]   ;;  %v3364_v20 = vld [vmem:[%s4746_s2 + $0x44] ss:$16 sps:$4 sm:$0xff]   ;;  %v3370_v21 = vld [vmem:[%s4746_s2 + $0x88] ss:$16 sps:$4 sm:$0xff]   ;;  %v309_v36 = vpack.c.bf16 %v297_v32, %v297_v32 }
  0x22   : > { %473 = vmatpush1.bf16.msra.mxu0 %v3282_v6  ;;  %514 = vmatpush1.bf16.msra.mxu1 %v3322_v13  ;;  %4849 = vst [vmem:[#allocation11_spill] sm:$0xff] %v3358_v19  ;;  %4850 = vst [vmem:[#allocation12_spill] sm:$0xff] %v3364_v20  ;;  %v3376_v22 = vld [vmem:[%s4746_s2 + $0x6c] ss:$16 sps:$4 sm:$0xff]   ;;  %v3382_v23 = vld [vmem:[%s4746_s2 + $0x40] ss:$16 sps:$4 sm:$0xff]  }
  0x23   : > { %474 = vmatprep.subr.bf16.mxu0 %v3288_v7  ;;  %515 = vmatprep.subr.bf16.mxu1 %v3339_v16  ;;  %4851 = vst [vmem:[#allocation13_spill] sm:$0xff] %v3376_v22  ;;  %4852 = vst [vmem:[#allocation14_spill] sm:$0xff] %v3382_v23  ;;  %v3387_v24 = vld [vmem:[%s4746_s2 + $0x24] ss:$16 sps:$4 sm:$0xff]   ;;  %v3394_v25 = vld [vmem:[%s4746_s2 + $0x68] ss:$16 sps:$4 sm:$0xff]  }
  0x24   : > { %4853 = vst [vmem:[#allocation15_spill] sm:$0xff] %v3387_v24  ;;  %4854 = vst [vmem:[#allocation16_spill] sm:$0xff] %v3394_v25  ;;  %v3400_v26 = vld [vmem:[%s4746_s2 + $0x4c] ss:$16 sps:$4 sm:$0xff]   ;;  %v3405_v27 = vld [vmem:[%s4746_s2 + $0x20] ss:$16 sps:$4 sm:$0xff]  }
  0x25   : > { %4855 = vst [vmem:[#allocation17_spill] sm:$0xff] %v3400_v26  ;;  %4856 = vst [vmem:[#allocation18_spill] sm:$0xff] %v3405_v27  ;;  %v3411_v28 = vld [vmem:[%s4746_s2 + $0x4] ss:$16 sps:$4 sm:$0xff]   ;;  %v3418_v29 = vld [vmem:[%s4746_s2 + $0x48] ss:$16 sps:$4 sm:$0xff]  }
  0x26   : > { %475 = vmatpush1.bf16.msra.mxu0 %v3304_v10  ;;  %516 = vmatpush1.bf16.msra.mxu1 %v3346_v17  ;;  %4857 = vst [vmem:[#allocation19_spill] sm:$0xff] %v3411_v28  ;;  %4858 = vst [vmem:[#allocation20_spill] sm:$0xff] %v3418_v29  ;;  %v3424_v30 = vld [vmem:[%s4746_s2 + $0x2c] ss:$16 sps:$4 sm:$0xff]   ;;  %v3429_v31 = vld [vmem:[%s4746_s2] ss:$16 sps:$4 sm:$0xff]  }
  0x27   : > { %476 = vmatprep.subr.bf16.mxu0 %v3311_v11  ;;  %517 = vmatprep.subr.bf16.mxu1 %v3352_v18  ;;  %4859 = vst [vmem:[#allocation21_spill] sm:$0xff] %v3424_v30  ;;  %4860 = vst [vmem:[#allocation22_spill] sm:$0xff] %v3429_v31  ;;  %v3435_v33 = vld [vmem:[%s4747_s3 + $0xe4] ss:$16 sps:$4 sm:$0xff]   ;;  %v3442_v34 = vld [vmem:[%s4746_s2 + $0x28] ss:$16 sps:$4 sm:$0xff]  }
  0x28   : > { %4861 = vst [vmem:[#allocation23_spill] sm:$0xff] %v3435_v33  ;;  %4862 = vst [vmem:[#allocation24_spill] sm:$0xff] %v3442_v34  ;;  %v3448_v35 = vld [vmem:[%s4746_s2 + $0xc] ss:$16 sps:$4 sm:$0xff]   ;;  %v3453_v37 = vld [vmem:[%s4747_s3 + $0xe0] ss:$16 sps:$4 sm:$0xff]  }
  0x29   : > { %4863 = vst [vmem:[#allocation25_spill] sm:$0xff] %v3448_v35  ;;  %v3459_v38 = vld [vmem:[%s4747_s3 + $0xc4] ss:$16 sps:$4 sm:$0xff]   ;;  %v3466_v39 = vld [vmem:[%s4746_s2 + $0x8] ss:$16 sps:$4 sm:$0xff]  }
  0x2a   : > { %477 = vmatpush1.bf16.msra.mxu0 %v3329_v14  ;;  %518 = vmatpush1.bf16.msra.mxu1 %v3370_v21  ;;  %4864 = vst [vmem:[#allocation26_spill] sm:$0xff] %v3466_v39  ;;  %v3472_v40 = vld [vmem:[%s4747_s3 + $0xec] ss:$16 sps:$4 sm:$0xff]   ;;  %v3478_v41 = vld [vmem:[%s4747_s3 + $0xc0] ss:$16 sps:$4 sm:$0xff]  }
  0x2b   : > { %478 = vmatprep.subr.bf16.mxu0 %v3334_v15  ;;  %519 = vmatprep.subr.bf16.mxu1 %v3376_v22  ;;  %4865 = vst [vmem:[#allocation27_spill] sm:$0xff] %v3472_v40  ;;  %v3483_v42 = vld [vmem:[%s4747_s3 + $0xa4] ss:$16 sps:$4 sm:$0xff]   ;;  %v3491_v43 = vld [vmem:[%s4747_s3 + $0xe8] ss:$16 sps:$4 sm:$0xff]  }
  0x2c   : > { %v3497_v44 = vld [vmem:[%s4747_s3 + $0xcc] ss:$16 sps:$4 sm:$0xff]   ;;  %v3503_v45 = vld [vmem:[%s4747_s3 + $0xa0] ss:$16 sps:$4 sm:$0xff]   ;;  %v3509_v46 = vld [vmem:[%s4747_s3 + $0x84] ss:$16 sps:$4 sm:$0xff]  }
  0x2d   : > { %v3515_v47 = vld [vmem:[%s4747_s3 + $0xc8] ss:$16 sps:$4 sm:$0xff]   ;;  %v3521_v48 = vld [vmem:[%s4747_s3 + $0xac] ss:$16 sps:$4 sm:$0xff]   ;;  %v3528_v49 = vld [vmem:[%s4747_s3 + $0x80] ss:$16 sps:$4 sm:$0xff]  }
  0x2e   : > { %479 = vmatpush1.bf16.msra.mxu0 %v3358_v19  ;;  %520 = vmatpush1.bf16.msra.mxu1 %v3394_v25  ;;  %v3534_v50 = vld [vmem:[%s4747_s3 + $0x64] ss:$16 sps:$4 sm:$0xff]   ;;  %v3540_v51 = vld [vmem:[%s4747_s3 + $0xa8] ss:$16 sps:$4 sm:$0xff]   ;;  %v3546_v52 = vld [vmem:[%s4747_s3 + $0x8c] ss:$16 sps:$4 sm:$0xff]  }
  0x2f   : > { %480 = vmatprep.subr.bf16.mxu0 %v3364_v20  ;;  %521 = vmatprep.subr.bf16.mxu1 %v3400_v26  ;;  %v3552_v53 = vld [vmem:[%s4747_s3 + $0x60] ss:$16 sps:$4 sm:$0xff]   ;;  %v3558_v54 = vld [vmem:[%s4747_s3 + $0x44] ss:$16 sps:$4 sm:$0xff]   ;;  %v3564_v55 = vld [vmem:[%s4747_s3 + $0x88] ss:$16 sps:$4 sm:$0xff]  }
  0x30   : > { %v3570_v56 = vld [vmem:[%s4747_s3 + $0x6c] ss:$16 sps:$4 sm:$0xff]   ;;  %v3576_v57 = vld [vmem:[%s4747_s3 + $0x40] ss:$16 sps:$4 sm:$0xff]   ;;  %v3582_v58 = vld [vmem:[%s4747_s3 + $0x24] ss:$16 sps:$4 sm:$0xff]  }
  0x31   : > { %v3588_v59 = vld [vmem:[%s4747_s3 + $0x68] ss:$16 sps:$4 sm:$0xff]   ;;  %v3594_v60 = vld [vmem:[%s4747_s3 + $0x4c] ss:$16 sps:$4 sm:$0xff]   ;;  %v3600_v61 = vld [vmem:[%s4747_s3 + $0x20] ss:$16 sps:$4 sm:$0xff]  }
  0x32   : > { %481 = vmatpush1.bf16.msra.mxu0 %v3382_v23  ;;  %522 = vmatpush1.bf16.msra.mxu1 %v3418_v29  ;;  %4866 = vst [vmem:[#allocation28_spill] sm:$0xff] %v3600_v61  ;;  %v3606_v62 = vld [vmem:[%s4747_s3 + $0x4] ss:$16 sps:$4 sm:$0xff]   ;;  %v3612_v63 = vld [vmem:[%s4747_s3 + $0x48] ss:$16 sps:$4 sm:$0xff]  }
  0x33   : > { %482 = vmatprep.subr.bf16.mxu0 %v3387_v24  ;;  %523 = vmatprep.subr.bf16.mxu1 %v3424_v30  ;;  %4867 = vst [vmem:[#allocation29_spill] sm:$0xff] %v3606_v62  ;;  %v3618_v0 = vld [vmem:[%s4747_s3 + $0x2c] ss:$16 sps:$4 sm:$0xff]   ;;  %v3624_v1 = vld [vmem:[%s4747_s3] ss:$16 sps:$4 sm:$0xff]  }
  0x34   : > { %4868 = vst [vmem:[#allocation30_spill] sm:$0xff] %v3618_v0  ;;  %v299_v32 = vld [vmem:[#allocation4] sm:$0xff] }
  0x36   : > { %483 = vmatpush1.bf16.msra.mxu0 %v3405_v27  ;;  %524 = vmatpush1.bf16.msra.mxu1 %v3442_v34 }
  0x37   : > { %484 = vmatprep.subr.bf16.mxu0 %v3411_v28  ;;  %525 = vmatprep.subr.bf16.mxu1 %v3448_v35 }
  0x3a   : > { %485 = vmatpush1.bf16.msra.mxu0 %v3429_v31  ;;  %526 = vmatpush1.bf16.msra.mxu1 %v3466_v39 }
  0x3b   : > { %722 = vmatprep.subr.bf16.mxu0 %v3435_v33  ;;  %763 = vmatprep.subr.bf16.mxu1 %v3472_v40 }
  0x3d   : > { %503 = vmatmul.mubr.bf16.vlgmr.msra.gmra.mxu0 %v309_v36  ;;  %544 = vmatmul.mubr.bf16.vlgmr.msra.gmra.mxu1 %v309_v36  ;;  %v3631_v36 = vld [vmem:[%s4747_s3 + $0x28] ss:$16 sps:$4 sm:$0xff]  }
  0x3e   : > { %723 = vmatpush1.bf16.msra.mxu0 %v3453_v37  ;;  %754 = vmatprep.mubr.bf16.mxu0 %v4749_v4 }
  0x3f   : > { %724 = vmatprep.subr.bf16.mxu0 %v3459_v38  ;;  %764 = vmatpush1.bf16.msra.mxu1 %v3491_v43 }
  0x40   : > { %765 = vmatprep.subr.bf16.mxu1 %v3497_v44  ;;  %795 = vmatprep.mubr.bf16.mxu1 %v4749_v4  ;;  %v3637_v4 = vld [vmem:[%s4747_s3 + $0xc] ss:$16 sps:$4 sm:$0xff]  }
  0x42   : > { %725 = vmatpush1.bf16.msra.mxu0 %v3478_v41 }
  0x43   : > { %726 = vmatprep.subr.bf16.mxu0 %v3483_v42  ;;  %766 = vmatpush1.bf16.msra.mxu1 %v3515_v47 }
  0x44   : > { %767 = vmatprep.subr.bf16.mxu1 %v3521_v48 }
  0x46   : > { %727 = vmatpush1.bf16.msra.mxu0 %v3503_v45 }
  0x47   : > { %728 = vmatprep.subr.bf16.mxu0 %v3509_v46  ;;  %768 = vmatpush1.bf16.msra.mxu1 %v3540_v51 }
  0x48   : > { %769 = vmatprep.subr.bf16.mxu1 %v3546_v52 }
  0x4a   : > { %729 = vmatpush1.bf16.msra.mxu0 %v3528_v49 }
  0x4b   : > { %730 = vmatprep.subr.bf16.mxu0 %v3534_v50  ;;  %770 = vmatpush1.bf16.msra.mxu1 %v3564_v55 }
  0x4c   : > { %771 = vmatprep.subr.bf16.mxu1 %v3570_v56 }
  0x4e   : > { %731 = vmatpush1.bf16.msra.mxu0 %v3552_v53 }
  0x4f   : > { %732 = vmatprep.subr.bf16.mxu0 %v3558_v54  ;;  %772 = vmatpush1.bf16.msra.mxu1 %v3588_v59 }
  0x50   : > { %773 = vmatprep.subr.bf16.mxu1 %v3594_v60 }
  0x52   : > { %733 = vmatpush1.bf16.msra.mxu0 %v3576_v57 }
  0x53   : > { %734 = vmatprep.subr.bf16.mxu0 %v3582_v58  ;;  %774 = vmatpush1.bf16.msra.mxu1 %v3612_v63 }
  0x54   : > { %775 = vmatprep.subr.bf16.mxu1 %v3618_v0  ;;  %v4869_v0 = vmov 0  }
  0x56   : > { %735 = vmatpush1.bf16.msra.mxu0 %v3600_v61  ;;  %v561_v61 = vpack.c.bf16 %v299_v32, %v299_v32 }
  0x57   : > { %736 = vmatprep.subr.bf16.mxu0 %v3606_v62  ;;  %776 = vmatpush1.bf16.msra.mxu1 %v3631_v36  ;;  %v3644_v62 = vld [vmem:[%s4747_s3 + $0x8] ss:$16 sps:$4 sm:$0xff]  }
  0x58   : > { %777 = vmatprep.subr.bf16.mxu1 %v3637_v4 }
  0x5a   : > { %737 = vmatpush1.bf16.msra.mxu0 %v3624_v1 }
  0x5b   : > { %866 = vmatprep.subr.bf16.mxu0 %v3263_v2  ;;  %778 = vmatpush1.bf16.msra.mxu1 %v3644_v62 }
  0x5c   : > { %907 = vmatprep.subr.bf16.mxu1 %v3293_v8 }
  0x5d   : > { %755 = vmatmul.mubr.bf16.vlgmr.msra.gmra.mxu0 %v561_v61 }
  0x5e   : > { %867 = vmatpush1.bf16.msra.mxu0 %v3268_v3  ;;  %898 = vmatprep.mubr.bf16.mxu0 %v4869_v0 }
  0x5f   : > { %868 = vmatprep.subr.bf16.mxu0 %v3276_v5  ;;  %796 = vmatmul.mubr.bf16.vlgmr.msra.gmra.mxu1 %v561_v61  ;;  %v305_v61 = vld [vmem:[%s3252_s23] sm:$0xff] }
  0x60   : > { %908 = vmatpush1.bf16.msra.mxu1 %v3298_v9  ;;  %939 = vmatprep.mubr.bf16.mxu1 %v4869_v0 }
  0x61   : > { %909 = vmatprep.subr.bf16.mxu1 %v3317_v12 }
  0x62   : > { %869 = vmatpush1.bf16.msra.mxu0 %v3282_v6 }
  0x63   : > { %870 = vmatprep.subr.bf16.mxu0 %v3288_v7 }
  0x64   : > { %910 = vmatpush1.bf16.msra.mxu1 %v3322_v13 }
  0x65   : > { %911 = vmatprep.subr.bf16.mxu1 %v3339_v16 }
  0x66   : > { %871 = vmatpush1.bf16.msra.mxu0 %v3304_v10 }
  0x67   : > { %872 = vmatprep.subr.bf16.mxu0 %v3311_v11 }
  0x68   : > { %912 = vmatpush1.bf16.msra.mxu1 %v3346_v17 }
  0x69   : > { %913 = vmatprep.subr.bf16.mxu1 %v3352_v18 }
  0x6a   : > { %873 = vmatpush1.bf16.msra.mxu0 %v3329_v14 }
  0x6b   : > { %874 = vmatprep.subr.bf16.mxu0 %v3334_v15 }
  0x6c   : > { %914 = vmatpush1.bf16.msra.mxu1 %v3370_v21 }
  0x6d   : > { %915 = vmatprep.subr.bf16.mxu1 %v3376_v22 }
  0x6e   : > { %875 = vmatpush1.bf16.msra.mxu0 %v3358_v19 }
  0x6f   : > { %876 = vmatprep.subr.bf16.mxu0 %v3364_v20 }
  0x70   : > { %916 = vmatpush1.bf16.msra.mxu1 %v3394_v25  ;;  %v308_v25 = vld [vmem:[%s3252_s23 + $0x18] sm:$0xff] }
  0x71   : > { %917 = vmatprep.subr.bf16.mxu1 %v3400_v26 }
  0x72   : > { %877 = vmatpush1.bf16.msra.mxu0 %v3382_v23 }
  0x73   : > { %878 = vmatprep.subr.bf16.mxu0 %v3387_v24 }
  0x74   : > { %918 = vmatpush1.bf16.msra.mxu1 %v3418_v29 }
  0x75   : > { %919 = vmatprep.subr.bf16.mxu1 %v3424_v30 }
  0x76   : > { %879 = vmatpush1.bf16.msra.mxu0 %v3405_v27  ;;  %v306_v27 = vld [vmem:[%s3252_s23 + $0x8] sm:$0xff] }
  0x77   : > { %880 = vmatprep.subr.bf16.mxu0 %v3411_v28 }
  0x78   : > { %920 = vmatpush1.bf16.msra.mxu1 %v3442_v34 }
  0x79   : > { %921 = vmatprep.subr.bf16.mxu1 %v3448_v35  ;;  %v307_v35 = vld [vmem:[%s3252_s23 + $0x10] sm:$0xff] }
  0x7a   : > { %881 = vmatpush1.bf16.msra.mxu0 %v3429_v31 }
  0x7b   : > { %958 = vmatprep.subr.bf16.mxu0 %v3435_v33 }
  0x7c   : > { %922 = vmatpush1.bf16.msra.mxu1 %v3466_v39 }
  0x7d   : > { %999 = vmatprep.subr.bf16.mxu1 %v3472_v40 }
  0xfd   : > { %v504_v32 = vpop.f32.mrf.mxu0  ;;  %v545_v23 = vpop.f32.mrf.mxu1 }
  0xfe   : > { %v552_v28 = vadd.f32 %v504_v32, %v305_v61  ;;  %v554_v20 = vadd.f32 %v545_v23, %v307_v35 }
  0xff   : > { %v506_v24 = vpop.f32.mrf.mxu0  ;;  %v547_v26 = vpop.f32.mrf.mxu1 }
 0x100   : > { %v2650_v30 = vmul.f32 -1.442695, %v552_v28  ;;  %v553_v29 = vadd.f32 %v506_v24, %v306_v27  ;;  %v2652_v19 = vmul.f32 -1.442695, %v554_v20  ;;  %v555_v22 = vadd.f32 %v547_v26, %v308_v25 }
 0x101   : > { %v508_v31 = vpop.f32.mrf.mxu0  ;;  %v549_v39 = vpop.f32.mrf.mxu1 }
 0x102   : > { %2862 = vpow2.f32 %v2650_v30  ;;  %v2651_v34 = vmul.f32 -1.442695, %v553_v29  ;;  %v2614_v29 = vld [vmem:[%s3257_s27 + $0xe0] sm:$0xff] }
 0x103   : > { %v509_v33 = vpop.f32.mrf.mxu0  ;;  %v550_v40 = vpop.f32.mrf.mxu1 }
 0x104   : > { %2864 = vpow2.f32 %v2651_v34  ;;  %v2615_v34 = vld [vmem:[%s3257_s27 + $0xe8] sm:$0xff] }
 0x105   : > { %2866 = vpow2.f32 %v2652_v19  ;;  %v298_v40 = vld [vmem:[#allocation3] sm:$0xff] }
 0x106   : > { %2868 = vtanh.f32 %v555_v22 }
 0x10f   : > { %v2863_v61 = vpop.eup %2862 }
 0x110   : > { %v817_v28 = vadd.f32 1.0, %v2863_v61 }
 0x111   : > { %v2865_v24 = vpop.eup %2864 }
 0x112   : > { %2870 = vrcp.f32 %v817_v28  ;;  %v818_v27 = vadd.f32 1.0, %v2865_v24  ;;  %v2867_v30 = vpop.eup %2866 }
 0x113   : > { %v2869_v31 = vpop.eup %2868  ;;  %v819_v35 = vadd.f32 1.0, %v2867_v30  ;;  %v2616_v30 = vld [vmem:[%s3257_s27 + $0xf0] sm:$0xff] }
 0x114   : > { %2872 = vrcp.f32 %v818_v27 }
 0x11d   : > { %v756_v33 = vpop.f32.mrf.mxu0 }
 0x11e   : > { %v804_v39 = vadd.f32 %v2614_v29, %v756_v33 }
 0x11f   : > { %v2871_v23 = vpop.eup %2870  ;;  %v758_v20 = vpop.f32.mrf.mxu0 }
 0x120   : > { %v828_v25 = vmul.f32 %v2871_v23, %v2869_v31  ;;  %v2653_v26 = vmul.f32 -1.442695, %v804_v39  ;;  %v805_v19 = vadd.f32 %v2615_v34, %v758_v20  ;;  %v797_v24 = vpop.f32.mrf.mxu1  ;;  %v2617_v34 = vld [vmem:[%s3257_s27 + $0xf8] sm:$0xff] }
 0x121   : > { %v2873_v32 = vpop.eup %2872  ;;  %v760_v22 = vpop.f32.mrf.mxu0  ;;  %v806_v31 = vadd.f32 %v2616_v30, %v797_v24 }
 0x122   : > { %v827_v61 = vmul.f32 %v2873_v32, %v298_v40  ;;  %2874 = vpow2.f32 %v2653_v26  ;;  %v2654_v28 = vmul.f32 -1.442695, %v805_v19  ;;  %v799_v29 = vpop.f32.mrf.mxu1 }
 0x123   : > { %2876 = vrcp.f32 %v819_v35  ;;  %v761_v27 = vpop.f32.mrf.mxu0  ;;  %v2655_v23 = vmul.f32 -1.442695, %v806_v31  ;;  %v807_v20 = vadd.f32 %v2617_v34, %v799_v29  ;;  %v300_v29 = vld [vmem:[#allocation5] sm:$0xff] }
 0x124   : > { %v3690_v15 = vadd.f32 %v828_v25, %v827_v61  ;;  %2878 = vpow2.f32 %v2654_v28  ;;  %v801_v33 = vpop.f32.mrf.mxu1 }
 0x126   : > { %2880 = vtanh.f32 %v3690_v15  ;;  %v802_v39 = vpop.f32.mrf.mxu1 }
 0x127   : > { %2882 = vpow2.f32 %v2655_v23  ;;  %v4870_v23 = vld [vmem:[#allocation30_spill] sm:$0xff] }
 0x128   : > { %2884 = vtanh.f32 %v807_v20  ;;  %v4871_v20 = vld [vmem:[#allocation28_spill] sm:$0xff] }
 0x12f   : > { %v2875_v22 = vpop.eup %2874 }
 0x130   : > { %v2877_v40 = vpop.eup %2876  ;;  %v841_v26 = vadd.f32 1.0, %v2875_v22 }
 0x131   : > { %v2879_v19 = vpop.eup %2878 }
 0x132   : > { %2886 = vrcp.f32 %v841_v26  ;;  %v842_v35 = vadd.f32 1.0, %v2879_v19 }
 0x133   : > { %v2881_v25 = vpop.eup %2880 }
 0x134   : > { %2888 = vrcp.f32 %v842_v35  ;;  %v3695_v32 = vmul.f32 %v2881_v25, %v2877_v40  ;;  %v2883_v28 = vpop.eup %2882  ;;  %v4872_v40 = vld [vmem:[#allocation29_spill] sm:$0xff] }
 0x135   : > { %v2885_v24 = vpop.eup %2884  ;;  %v843_v33 = vadd.f32 1.0, %v2883_v28  ;;  %v4882_v25 = vld [vmem:[#allocation21_spill] sm:$0xff]  ;;  %v4884_v28 = vld [vmem:[#allocation24_spill] sm:$0xff] }
 0x136   : > { %v865_v61 = vpack.c.bf16 %v3695_v32, %v3695_v32 }
 0x137   : > { %2890 = vrcp.f32 %v843_v33  ;;  %v4889_v33 = vld [vmem:[#allocation23_spill] sm:$0xff] }
 0x138   : > { %899 = vmatmul.mubr.bf16.vlgmr.msra.gmra.mxu0 %v865_v61  ;;  %940 = vmatmul.mubr.bf16.vlgmr.msra.gmra.mxu1 %v865_v61  ;;  %v4883_v61 = vld [vmem:[#allocation18_spill] sm:$0xff] }
 0x139   : > { %959 = vmatpush1.bf16.msra.mxu0 %v3453_v37  ;;  %1000 = vmatpush1.bf16.msra.mxu1 %v3491_v43 }
 0x13a   : > { %960 = vmatprep.subr.bf16.mxu0 %v3459_v38  ;;  %1001 = vmatprep.subr.bf16.mxu1 %v3497_v44 }
 0x13b   : > { %990 = vmatprep.mubr.bf16.mxu0 %v4869_v0  ;;  %1031 = vmatprep.mubr.bf16.mxu1 %v4869_v0 }
 0x13d   : > { %961 = vmatpush1.bf16.msra.mxu0 %v3478_v41  ;;  %1002 = vmatpush1.bf16.msra.mxu1 %v3515_v47 }
 0x13e   : > { %962 = vmatprep.subr.bf16.mxu0 %v3483_v42  ;;  %1003 = vmatprep.subr.bf16.mxu1 %v3521_v48 }
 0x13f   : > { %v2887_v27 = vpop.eup %2886 }
 0x140   : > { %v852_v39 = vmul.f32 %v2887_v27, %v2885_v24  ;;  %v4885_v24 = vld [vmem:[#allocation19_spill] sm:$0xff]  ;;  %v4886_v27 = vld [vmem:[#allocation25_spill] sm:$0xff] }
 0x141   : > { %v2889_v30 = vpop.eup %2888  ;;  %963 = vmatpush1.bf16.msra.mxu0 %v3503_v45  ;;  %1004 = vmatpush1.bf16.msra.mxu1 %v3540_v51 }
 0x142   : > { %v851_v31 = vmul.f32 %v2889_v30, %v300_v29  ;;  %964 = vmatprep.subr.bf16.mxu0 %v3509_v46  ;;  %1005 = vmatprep.subr.bf16.mxu1 %v3546_v52  ;;  %v4887_v29 = vld [vmem:[#allocation22_spill] sm:$0xff] }
 0x143   : > { %v4888_v30 = vld [vmem:[#allocation26_spill] sm:$0xff] }
 0x144   : > { %v3713_v34 = vadd.f32 %v852_v39, %v851_v31  ;;  %v2891_v22 = vpop.eup %2890  ;;  %v4890_v31 = vld [vmem:[#allocation27_spill] sm:$0xff]  ;;  %v2656_v39 = vld [vmem:[%s3252_s23 + $0x20] sm:$0xff] }
 0x145   : > { %965 = vmatpush1.bf16.msra.mxu0 %v3528_v49  ;;  %1006 = vmatpush1.bf16.msra.mxu1 %v3564_v55 }
 0x146   : > { %2892 = vtanh.f32 %v3713_v34  ;;  %966 = vmatprep.subr.bf16.mxu0 %v3534_v50  ;;  %1007 = vmatprep.subr.bf16.mxu1 %v3570_v56 }
 0x149   : > { %967 = vmatpush1.bf16.msra.mxu0 %v3552_v53  ;;  %1008 = vmatpush1.bf16.msra.mxu1 %v3588_v59 }
 0x14a   : > { %968 = vmatprep.subr.bf16.mxu0 %v3558_v54  ;;  %1009 = vmatprep.subr.bf16.mxu1 %v3594_v60 }
 0x14d   : > { %969 = vmatpush1.bf16.msra.mxu0 %v3576_v57  ;;  %1010 = vmatpush1.bf16.msra.mxu1 %v3612_v63 }
 0x14e   : > { %970 = vmatprep.subr.bf16.mxu0 %v3582_v58  ;;  %1011 = vmatprep.subr.bf16.mxu1 %v4870_v23 }
 0x151   : > { %971 = vmatpush1.bf16.msra.mxu0 %v4871_v20  ;;  %1012 = vmatpush1.bf16.msra.mxu1 %v3631_v36 }
 0x152   : > { %972 = vmatprep.subr.bf16.mxu0 %v4872_v40  ;;  %1013 = vmatprep.subr.bf16.mxu1 %v3637_v4 }
 0x153   : > { %v2893_v26 = vpop.eup %2892 }
 0x154   : > { %v3732_v19 = vmul.f32 %v2893_v26, %v2891_v22 }
 0x155   : > { %973 = vmatpush1.bf16.msra.mxu0 %v3624_v1  ;;  %1014 = vmatpush1.bf16.msra.mxu1 %v3644_v62 }
 0x156   : > { %v957_v35 = vpack.c.bf16 %v3732_v19, %v3732_v19  ;;  %1102 = vmatprep.subr.bf16.mxu0 %v3263_v2  ;;  %1143 = vmatprep.subr.bf16.mxu1 %v3293_v8  ;;  %v4873_v2 = vld [vmem:[#allocation10_spill] sm:$0xff]  ;;  %v4878_v8 = vld [vmem:[#allocation17_spill] sm:$0xff] }
 0x158   : > { %991 = vmatmul.mubr.bf16.vlgmr.msra.gmra.mxu0 %v957_v35  ;;  %1032 = vmatmul.mubr.bf16.vlgmr.msra.gmra.mxu1 %v957_v35  ;;  %v2657_v35 = vld [vmem:[%s3252_s23 + $0x28] sm:$0xff] }
 0x159   : > { %1103 = vmatpush1.bf16.msra.mxu0 %v3268_v3  ;;  %1144 = vmatpush1.bf16.msra.mxu1 %v3298_v9  ;;  %v4874_v3 = vld [vmem:[#allocation13_spill] sm:$0xff]  ;;  %v4879_v9 = vld [vmem:[#allocation14_spill] sm:$0xff] }
 0x15a   : > { %1104 = vmatprep.subr.bf16.mxu0 %v3276_v5  ;;  %1145 = vmatprep.subr.bf16.mxu1 %v3317_v12  ;;  %v4875_v5 = vld [vmem:[#allocation11_spill] sm:$0xff] }
 0x15b   : > { %1134 = vmatprep.mubr.bf16.mxu0 %v4869_v0  ;;  %1175 = vmatprep.mubr.bf16.mxu1 %v4869_v0 }
 0x15d   : > { %1105 = vmatpush1.bf16.msra.mxu0 %v3282_v6  ;;  %1146 = vmatpush1.bf16.msra.mxu1 %v3322_v13  ;;  %v4876_v6 = vld [vmem:[#allocation16_spill] sm:$0xff] }
 0x15e   : > { %1106 = vmatprep.subr.bf16.mxu0 %v3288_v7  ;;  %1147 = vmatprep.subr.bf16.mxu1 %v3339_v16  ;;  %v4877_v7 = vld [vmem:[#allocation12_spill] sm:$0xff] }
 0x161   : > { %1107 = vmatpush1.bf16.msra.mxu0 %v3304_v10  ;;  %1148 = vmatpush1.bf16.msra.mxu1 %v3346_v17  ;;  %v4880_v10 = vld [vmem:[#allocation20_spill] sm:$0xff] }
 0x162   : > { %1108 = vmatprep.subr.bf16.mxu0 %v3311_v11  ;;  %1149 = vmatprep.subr.bf16.mxu1 %v3352_v18  ;;  %v4881_v11 = vld [vmem:[#allocation15_spill] sm:$0xff] }
 0x165   : > { %1109 = vmatpush1.bf16.msra.mxu0 %v3329_v14  ;;  %1150 = vmatpush1.bf16.msra.mxu1 %v3370_v21 }
 0x166   : > { %1110 = vmatprep.subr.bf16.mxu0 %v4873_v2  ;;  %1151 = vmatprep.subr.bf16.mxu1 %v4874_v3 }
 0x169   : > { %1111 = vmatpush1.bf16.msra.mxu0 %v4875_v5  ;;  %1152 = vmatpush1.bf16.msra.mxu1 %v4876_v6 }
 0x16a   : > { %1112 = vmatprep.subr.bf16.mxu0 %v4877_v7  ;;  %1153 = vmatprep.subr.bf16.mxu1 %v4878_v8  ;;  %v2659_v8 = vld [vmem:[%s3252_s23 + $0x38] sm:$0xff] }
 0x16d   : > { %1113 = vmatpush1.bf16.msra.mxu0 %v4879_v9  ;;  %1154 = vmatpush1.bf16.msra.mxu1 %v4880_v10 }
 0x16e   : > { %1114 = vmatprep.subr.bf16.mxu0 %v4881_v11  ;;  %1155 = vmatprep.subr.bf16.mxu1 %v4882_v25 }
 0x171   : > { %1115 = vmatpush1.bf16.msra.mxu0 %v4883_v61  ;;  %1156 = vmatpush1.bf16.msra.mxu1 %v4884_v28 }
 0x172   : > { %1116 = vmatprep.subr.bf16.mxu0 %v4885_v24  ;;  %1157 = vmatprep.subr.bf16.mxu1 %v4886_v27 }
 0x175   : > { %1117 = vmatpush1.bf16.msra.mxu0 %v4887_v29  ;;  %1158 = vmatpush1.bf16.msra.mxu1 %v4888_v30 }
 0x176   : > { %1194 = vmatprep.subr.bf16.mxu0 %v4889_v33  ;;  %1235 = vmatprep.subr.bf16.mxu1 %v4890_v31  ;;  %v2658_v31 = vld [vmem:[%s3252_s23 + $0x30] sm:$0xff] }
 0x1f8   : > { %v900_v22 = vpop.f32.mrf.mxu0  ;;  %v941_v26 = vpop.f32.mrf.mxu1 }
 0x1f9   : > { %v948_v61 = vadd.f32 %v2656_v39, %v900_v22  ;;  %v950_v9 = vadd.f32 %v2658_v31, %v941_v26 }
 0x1fa   : > { %v902_v28 = vpop.f32.mrf.mxu0  ;;  %v943_v25 = vpop.f32.mrf.mxu1 }
 0x1fb   : > { %v2664_v24 = vmul.f32 -1.442695, %v948_v61  ;;  %v949_v11 = vadd.f32 %v2657_v35, %v902_v28  ;;  %v2666_v7 = vmul.f32 -1.442695, %v950_v9  ;;  %v951_v5 = vadd.f32 %v2659_v8, %v943_v25 }
 0x1fc   : > { %v904_v27 = vpop.f32.mrf.mxu0  ;;  %v945_v10 = vpop.f32.mrf.mxu1 }
 0x1fd   : > { %2894 = vpow2.f32 %v2664_v24  ;;  %v2665_v29 = vmul.f32 -1.442695, %v949_v11  ;;  %v2660_v10 = vld [vmem:[%s3257_s27 + $0xc0] sm:$0xff]  ;;  %v2661_v24 = vld [vmem:[%s3257_s27 + $0xc8] sm:$0xff] }
 0x1fe   : > { %v905_v30 = vpop.f32.mrf.mxu0  ;;  %v946_v33 = vpop.f32.mrf.mxu1 }
 0x1ff   : > { %2896 = vpow2.f32 %v2665_v29 }
 0x200   : > { %2898 = vpow2.f32 %v2666_v7 }
 0x20a   : > { %v2895_v6 = vpop.eup %2894 }
 0x20b   : > { %v1053_v39 = vadd.f32 1.0, %v2895_v6 }
 0x20c   : > { %v2897_v22 = vpop.eup %2896 }
 0x20d   : > { %2900 = vrcp.f32 %v1053_v39  ;;  %v1054_v61 = vadd.f32 1.0, %v2897_v22  ;;  %v2899_v27 = vpop.eup %2898 }
 0x20e   : > { %2902 = vtanh.f32 %v951_v5  ;;  %v1055_v7 = vadd.f32 1.0, %v2899_v27 }
 0x20f   : > { %2904 = vrcp.f32 %v1054_v61 }
 0x218   : > { %v992_v11 = vpop.f32.mrf.mxu0  ;;  %v1033_v28 = vpop.f32.mrf.mxu1 }
 0x219   : > { %v1040_v29 = vadd.f32 %v2660_v10, %v992_v11  ;;  %v2662_v11 = vld [vmem:[%s3257_s27 + $0xd0] sm:$0xff] }
 0x21a   : > { %v2901_v30 = vpop.eup %2900  ;;  %v994_v33 = vpop.f32.mrf.mxu0 }
 0x21b   : > { %v1035_v31 = vpop.f32.mrf.mxu1  ;;  %v2903_v26 = vpop.eup %2902  ;;  %v2667_v9 = vmul.f32 -1.442695, %v1040_v29  ;;  %v1041_v8 = vadd.f32 %v2661_v24, %v994_v33  ;;  %v1042_v24 = vadd.f32 %v2662_v11, %v1033_v28  ;;  %v2663_v29 = vld [vmem:[%s3257_s27 + $0xd8] sm:$0xff] }
 0x21c   : > { %v2905_v6 = vpop.eup %2904  ;;  %v996_v25 = vpop.f32.mrf.mxu0  ;;  %v1064_v39 = vmul.f32 %v2903_v26, %v2901_v30  ;;  %v303_v30 = vld [vmem:[#allocation8] sm:$0xff] }
 0x21d   : > { %v1037_v35 = vpop.f32.mrf.mxu1  ;;  %v1063_v5 = vmul.f32 %v2905_v6, %v3690_v15  ;;  %2906 = vpow2.f32 %v2667_v9  ;;  %v2668_v22 = vmul.f32 -1.442695, %v1041_v8  ;;  %v2669_v33 = vmul.f32 -1.442695, %v1042_v24  ;;  %v301_v15 = vld [vmem:[#allocation6] sm:$0xff] }
 0x21e   : > { %v997_v61 = vpop.f32.mrf.mxu0  ;;  %v1043_v25 = vadd.f32 %v2663_v29, %v1035_v31  ;;  %v856_v8 = vmax.f32 %v301_v15, %v3695_v32  ;;  %v858_v6 = vadd.f32 %v3695_v32, %v303_v30  ;;  %v3837_v29 = vld [vmem:[%s4746_s2 + $0xe4] ss:$16 sps:$4 sm:$0xff]   ;;  %v4895_v30 = vld [vmem:[#allocation13_spill] sm:$0xff] }
 0x21f   : > { %v1038_v3 = vpop.f32.mrf.mxu1  ;;  %v3781_v10 = vadd.f32 %v1064_v39, %v1063_v5  ;;  %2908 = vpow2.f32 %v2668_v22  ;;  %v3877_v15 = vld [vmem:[%s4746_s2 + $0xa4] ss:$16 sps:$4 sm:$0xff]  }
 0x220   : > { %2910 = vrcp.f32 %v1055_v7  ;;  %4891 = vst [vmem:[#allocation30_spill] sm:$0xff] %v3877_v15 }
 0x221   : > { %2912 = vtanh.f32 %v3781_v10 }
 0x222   : > { %2914 = vpow2.f32 %v2669_v33  ;;  %v3849_v33 = vld [vmem:[%s4746_s2 + $0xe0] ss:$16 sps:$4 sm:$0xff]  }
 0x22a   : > { %v2907_v27 = vpop.eup %2906 }
 0x22b   : > { %v1077_v35 = vadd.f32 1.0, %v2907_v27  ;;  %v3855_v27 = vld [vmem:[%s4746_s2 + $0xe8] ss:$16 sps:$4 sm:$0xff]  }
 0x22c   : > { %v2909_v2 = vpop.eup %2908 }
 0x22d   : > { %v2911_v26 = vpop.eup %2910  ;;  %2916 = vrcp.f32 %v1077_v35  ;;  %v1078_v3 = vadd.f32 1.0, %v2909_v2  ;;  %v3870_v35 = vld [vmem:[%s4746_s2 + $0xc0] ss:$16 sps:$4 sm:$0xff]  }
 0x22e   : > { %v2913_v9 = vpop.eup %2912  ;;  %2918 = vtanh.f32 %v1043_v25  ;;  %v3861_v25 = vld [vmem:[%s4746_s2 + $0xc4] ss:$16 sps:$4 sm:$0xff]  }
 0x22f   : > { %2920 = vrcp.f32 %v1078_v3  ;;  %v1067_v28 = vmul.f32 %v2913_v9, %v2911_v26  ;;  %v2915_v32 = vpop.eup %2914  ;;  %v4896_v26 = vld [vmem:[#allocation11_spill] sm:$0xff]  ;;  %v4898_v3 = vld [vmem:[#allocation12_spill] sm:$0xff]  ;;  %v4899_v9 = vld [vmem:[#allocation17_spill] sm:$0xff] }
 0x230   : > { %v1079_v39 = vadd.f32 1.0, %v2915_v32  ;;  %v4907_v32 = vld [vmem:[#allocation25_spill] sm:$0xff] }
 0x231   : > { %v3788_v7 = vmax.f32 %v856_v8, %v1067_v28  ;;  %v3790_v5 = vadd.f32 %v1067_v28, %v858_v6  ;;  %v1101_v31 = vpack.c.bf16 %v1067_v28, %v1067_v28  ;;  %v4900_v8 = vld [vmem:[#allocation14_spill] sm:$0xff]  ;;  %v4905_v28 = vld [vmem:[#allocation24_spill] sm:$0xff] }
 0x232   : > { %2922 = vrcp.f32 %v1079_v39  ;;  %v4904_v6 = vld [vmem:[#allocation18_spill] sm:$0xff]  ;;  %v4911_v39 = vld [vmem:[#allocation27_spill] sm:$0xff] }
 0x233   : > { %1135 = vmatmul.mubr.bf16.vlgmr.msra.gmra.mxu0 %v1101_v31  ;;  %1176 = vmatmul.mubr.bf16.vlgmr.msra.gmra.mxu1 %v1101_v31  ;;  %v4906_v31 = vld [vmem:[#allocation19_spill] sm:$0xff] }
 0x234   : > { %1195 = vmatpush1.bf16.msra.mxu0 %v3453_v37  ;;  %1236 = vmatpush1.bf16.msra.mxu1 %v3491_v43 }
 0x235   : > { %1196 = vmatprep.subr.bf16.mxu0 %v3459_v38  ;;  %1237 = vmatprep.subr.bf16.mxu1 %v3497_v44 }
 0x236   : > { %1226 = vmatprep.mubr.bf16.mxu0 %v4869_v0  ;;  %1267 = vmatprep.mubr.bf16.mxu1 %v4869_v0 }
 0x238   : > { %1197 = vmatpush1.bf16.msra.mxu0 %v3478_v41  ;;  %1238 = vmatpush1.bf16.msra.mxu1 %v3515_v47 }
 0x239   : > { %1198 = vmatprep.subr.bf16.mxu0 %v3483_v42  ;;  %1239 = vmatprep.subr.bf16.mxu1 %v3521_v48  ;;  %v302_v42 = vld [vmem:[#allocation7] sm:$0xff] }
 0x23a   : > { %v2917_v37 = vpop.eup %2916 }
 0x23b   : > { %v2919_v2 = vpop.eup %2918 }
 0x23c   : > { %v2921_v43 = vpop.eup %2920  ;;  %1199 = vmatpush1.bf16.msra.mxu0 %v3503_v45  ;;  %1240 = vmatpush1.bf16.msra.mxu1 %v3540_v51  ;;  %v1088_v44 = vmul.f32 %v2919_v2, %v2917_v37  ;;  %v304_v45 = vld [vmem:[#allocation9] sm:$0xff]  ;;  %v4908_v37 = vld [vmem:[#allocation22_spill] sm:$0xff] }
 0x23d   : > { %v1087_v38 = vmul.f32 %v2921_v43, %v3713_v34  ;;  %1200 = vmatprep.subr.bf16.mxu0 %v3509_v46  ;;  %1241 = vmatprep.subr.bf16.mxu1 %v3546_v52  ;;  %v859_v34 = vadd.f32 %v3732_v19, %v304_v45  ;;  %v4909_v2 = vld [vmem:[#allocation26_spill] sm:$0xff]  ;;  %v4910_v43 = vld [vmem:[#allocation23_spill] sm:$0xff] }
 0x23e   : > { %v2671_v45 = vld [vmem:[%s3252_s23 + $0x48] sm:$0xff] }
 0x23f   : > { %v3807_v41 = vadd.f32 %v1088_v44, %v1087_v38  ;;  %v2923_v46 = vpop.eup %2922  ;;  %v2670_v38 = vld [vmem:[%s3252_s23 + $0x40] sm:$0xff] }
 0x240   : > { %1201 = vmatpush1.bf16.msra.mxu0 %v3528_v49  ;;  %1242 = vmatpush1.bf16.msra.mxu1 %v3564_v55 }
 0x241   : > { %2924 = vtanh.f32 %v3807_v41  ;;  %1202 = vmatprep.subr.bf16.mxu0 %v3534_v50  ;;  %1243 = vmatprep.subr.bf16.mxu1 %v3570_v56  ;;  %v857_v50 = vmax.f32 %v302_v42, %v3732_v19  ;;  %v3843_v19 = vld [vmem:[%s4746_s2 + $0xec] ss:$16 sps:$4 sm:$0xff]  }
 0x244   : > { %1203 = vmatpush1.bf16.msra.mxu0 %v3552_v53  ;;  %1244 = vmatpush1.bf16.msra.mxu1 %v3588_v59 }
 0x245   : > { %1204 = vmatprep.subr.bf16.mxu0 %v3558_v54  ;;  %1245 = vmatprep.subr.bf16.mxu1 %v3594_v60 }
 0x248   : > { %1205 = vmatpush1.bf16.msra.mxu0 %v3576_v57  ;;  %1246 = vmatpush1.bf16.msra.mxu1 %v3612_v63 }
 0x249   : > { %1206 = vmatprep.subr.bf16.mxu0 %v3582_v58  ;;  %1247 = vmatprep.subr.bf16.mxu1 %v4870_v23 }
 0x24c   : > { %1207 = vmatpush1.bf16.msra.mxu0 %v4871_v20  ;;  %1248 = vmatpush1.bf16.msra.mxu1 %v3631_v36 }
 0x24d   : > { %1208 = vmatprep.subr.bf16.mxu0 %v4872_v40  ;;  %1249 = vmatprep.subr.bf16.mxu1 %v3637_v4 }
 0x24e   : > { %v2925_v49 = vpop.eup %2924 }
 0x24f   : > { %v1091_v22 = vmul.f32 %v2925_v49, %v2923_v46 }
 0x250   : > { %1209 = vmatpush1.bf16.msra.mxu0 %v3624_v1  ;;  %1250 = vmatpush1.bf16.msra.mxu1 %v3644_v62 }
 0x251   : > { %v3830_v61 = vmax.f32 %v857_v50, %v1091_v22  ;;  %v3832_v11 = vadd.f32 %v1091_v22, %v859_v34  ;;  %v1193_v24 = vpack.c.bf16 %v1091_v22, %v1091_v22  ;;  %1338 = vmatprep.subr.bf16.mxu0 %v3837_v29  ;;  %1379 = vmatprep.subr.bf16.mxu1 %v3843_v19 }
 0x253   : > { %1227 = vmatmul.mubr.bf16.vlgmr.msra.gmra.mxu0 %v1193_v24  ;;  %1268 = vmatmul.mubr.bf16.vlgmr.msra.gmra.mxu1 %v1193_v24 }
 0x254   : > { %1339 = vmatpush1.bf16.msra.mxu0 %v3849_v33  ;;  %1380 = vmatpush1.bf16.msra.mxu1 %v3855_v27 }
 0x255   : > { %1340 = vmatprep.subr.bf16.mxu0 %v3861_v25  ;;  %1381 = vmatprep.subr.bf16.mxu1 %v3317_v12  ;;  %v3884_v12 = vld [vmem:[%s4746_s2 + $0xa0] ss:$16 sps:$4 sm:$0xff]  }
 0x256   : > { %1370 = vmatprep.mubr.bf16.mxu0 %v4869_v0  ;;  %1411 = vmatprep.mubr.bf16.mxu1 %v4869_v0  ;;  %4892 = vst [vmem:[#allocation28_spill] sm:$0xff] %v3884_v12 }
 0x258   : > { %1341 = vmatpush1.bf16.msra.mxu0 %v3870_v35  ;;  %1382 = vmatpush1.bf16.msra.mxu1 %v3322_v13  ;;  %v3891_v13 = vld [vmem:[%s4746_s2 + $0x84] ss:$16 sps:$4 sm:$0xff]  }
 0x259   : > { %1342 = vmatprep.subr.bf16.mxu0 %v3877_v15  ;;  %1383 = vmatprep.subr.bf16.mxu1 %v3339_v16  ;;  %4893 = vst [vmem:[#allocation29_spill] sm:$0xff] %v3891_v13  ;;  %v4894_v16 = vld [vmem:[#allocation10_spill] sm:$0xff] }
 0x25c   : > { %1343 = vmatpush1.bf16.msra.mxu0 %v3884_v12  ;;  %1384 = vmatpush1.bf16.msra.mxu1 %v3346_v17  ;;  %v4897_v17 = vld [vmem:[#allocation16_spill] sm:$0xff] }
 0x25d   : > { %1344 = vmatprep.subr.bf16.mxu0 %v3891_v13  ;;  %1385 = vmatprep.subr.bf16.mxu1 %v3352_v18  ;;  %v4901_v18 = vld [vmem:[#allocation20_spill] sm:$0xff] }
 0x260   : > { %1345 = vmatpush1.bf16.msra.mxu0 %v3329_v14  ;;  %1386 = vmatpush1.bf16.msra.mxu1 %v3370_v21  ;;  %v4902_v14 = vld [vmem:[#allocation15_spill] sm:$0xff]  ;;  %v4903_v21 = vld [vmem:[#allocation21_spill] sm:$0xff] }
 0x261   : > { %1346 = vmatprep.subr.bf16.mxu0 %v4894_v16  ;;  %1387 = vmatprep.subr.bf16.mxu1 %v4895_v30 }
 0x264   : > { %1347 = vmatpush1.bf16.msra.mxu0 %v4896_v26  ;;  %1388 = vmatpush1.bf16.msra.mxu1 %v4897_v17 }
 0x265   : > { %1348 = vmatprep.subr.bf16.mxu0 %v4898_v3  ;;  %1389 = vmatprep.subr.bf16.mxu1 %v4899_v9  ;;  %v2672_v3 = vld [vmem:[%s3252_s23 + $0x50] sm:$0xff] }
 0x268   : > { %1349 = vmatpush1.bf16.msra.mxu0 %v4900_v8  ;;  %1390 = vmatpush1.bf16.msra.mxu1 %v4901_v18  ;;  %v2673_v8 = vld [vmem:[%s3252_s23 + $0x58] sm:$0xff] }
 0x269   : > { %1350 = vmatprep.subr.bf16.mxu0 %v4902_v14  ;;  %1391 = vmatprep.subr.bf16.mxu1 %v4903_v21 }
 0x26c   : > { %1351 = vmatpush1.bf16.msra.mxu0 %v4904_v6  ;;  %1392 = vmatpush1.bf16.msra.mxu1 %v4905_v28 }
 0x26d   : > { %1352 = vmatprep.subr.bf16.mxu0 %v4906_v31  ;;  %1393 = vmatprep.subr.bf16.mxu1 %v4907_v32  ;;  %v2674_v32 = vld [vmem:[%s3257_s27 + $0xa0] sm:$0xff] }
 0x270   : > { %1353 = vmatpush1.bf16.msra.mxu0 %v4908_v37  ;;  %1394 = vmatpush1.bf16.msra.mxu1 %v4909_v2 }
 0x271   : > { %1430 = vmatprep.subr.bf16.mxu0 %v4910_v43  ;;  %1471 = vmatprep.subr.bf16.mxu1 %v4911_v39  ;;  %v2675_v43 = vld [vmem:[%s3257_s27 + $0xa8] sm:$0xff] }
 0x2f3   : > { %v1136_v44 = vpop.f32.mrf.mxu0  ;;  %v1177_v42 = vpop.f32.mrf.mxu1 }
 0x2f4   : > { %v1184_v46 = vadd.f32 %v2670_v38, %v1136_v44  ;;  %v1186_v9 = vadd.f32 %v2672_v3, %v1177_v42 }
 0x2f5   : > { %v1138_v49 = vpop.f32.mrf.mxu0  ;;  %v1179_v50 = vpop.f32.mrf.mxu1 }
 0x2f6   : > { %v2678_v34 = vmul.f32 -1.442695, %v1184_v46  ;;  %v1185_v22 = vadd.f32 %v2671_v45, %v1138_v49  ;;  %v2680_v18 = vmul.f32 -1.442695, %v1186_v9  ;;  %v1187_v21 = vadd.f32 %v2673_v8, %v1179_v50 }
 0x2f7   : > { %v1140_v24 = vpop.f32.mrf.mxu0  ;;  %v1181_v16 = vpop.f32.mrf.mxu1 }
 0x2f8   : > { %2926 = vpow2.f32 %v2678_v34  ;;  %v2679_v30 = vmul.f32 -1.442695, %v1185_v22 }
 0x2f9   : > { %v1141_v26 = vpop.f32.mrf.mxu0  ;;  %v1182_v17 = vpop.f32.mrf.mxu1 }
 0x2fa   : > { %2928 = vpow2.f32 %v2679_v30 }
 0x2fb   : > { %2930 = vpow2.f32 %v2680_v18  ;;  %v2676_v18 = vld [vmem:[%s3257_s27 + $0xb0] sm:$0xff] }
 0x305   : > { %v2927_v14 = vpop.eup %2926 }
 0x306   : > { %v1289_v6 = vadd.f32 1.0, %v2927_v14 }
 0x307   : > { %v2929_v28 = vpop.eup %2928 }
 0x308   : > { %2932 = vrcp.f32 %v1289_v6  ;;  %v1290_v31 = vadd.f32 1.0, %v2929_v28  ;;  %v2931_v39 = vpop.eup %2930 }
 0x309   : > { %2934 = vtanh.f32 %v1187_v21  ;;  %v1291_v22 = vadd.f32 1.0, %v2931_v39  ;;  %v2677_v21 = vld [vmem:[%s3257_s27 + $0xb8] sm:$0xff] }
 0x30a   : > { %2936 = vrcp.f32 %v1290_v31 }
 0x313   : > { %v1228_v37 = vpop.f32.mrf.mxu0  ;;  %v1269_v2 = vpop.f32.mrf.mxu1 }
 0x314   : > { %v1276_v38 = vadd.f32 %v2674_v32, %v1228_v37  ;;  %v1278_v14 = vadd.f32 %v2676_v18, %v1269_v2  ;;  %v3997_v18 = vld [vmem:[%s4747_s3 + $0x80] ss:$16 sps:$4 sm:$0xff]  }
 0x315   : > { %v2933_v44 = vpop.eup %2932  ;;  %v1230_v45 = vpop.f32.mrf.mxu0 }
 0x316   : > { %v1271_v42 = vpop.f32.mrf.mxu1  ;;  %v2935_v46 = vpop.eup %2934  ;;  %v2681_v49 = vmul.f32 -1.442695, %v1276_v38  ;;  %v1277_v50 = vadd.f32 %v2675_v43, %v1230_v45  ;;  %v2683_v6 = vmul.f32 -1.442695, %v1278_v14  ;;  %v4125_v14 = vld [vmem:[%s4746_s2 + $0x40] ss:$16 sps:$4 sm:$0xff]  }
 0x317   : > { %v2937_v34 = vpop.eup %2936  ;;  %v1232_v24 = vpop.f32.mrf.mxu0  ;;  %v1300_v26 = vmul.f32 %v2935_v46, %v2933_v44  ;;  %v1279_v31 = vadd.f32 %v2677_v21, %v1271_v42  ;;  %v3940_v42 = vld [vmem:[%s4747_s3 + $0xe0] ss:$16 sps:$4 sm:$0xff]   ;;  %v3946_v46 = vld [vmem:[%s4747_s3 + $0xe8] ss:$16 sps:$4 sm:$0xff]   ;;  %4924 = vst [vmem:[#allocation19_spill] sm:$0xff] %v4125_v14 }
 0x318   : > { %v1273_v16 = vpop.f32.mrf.mxu1  ;;  %v1299_v30 = vmul.f32 %v2937_v34, %v3781_v10  ;;  %2938 = vpow2.f32 %v2681_v49  ;;  %v2682_v17 = vmul.f32 -1.442695, %v1277_v50  ;;  %v3958_v49 = vld [vmem:[%s4747_s3 + $0xcc] ss:$16 sps:$4 sm:$0xff]   ;;  %v3966_v50 = vld [vmem:[%s4747_s3 + $0xc0] ss:$16 sps:$4 sm:$0xff]  }
 0x319   : > { %v1233_v3 = vpop.f32.mrf.mxu0  ;;  %v4131_v21 = vld [vmem:[%s4746_s2 + $0x48] ss:$16 sps:$4 sm:$0xff]  }
 0x31a   : > { %v1274_v9 = vpop.f32.mrf.mxu1  ;;  %v3922_v8 = vadd.f32 %v1300_v26, %v1299_v30  ;;  %2940 = vpow2.f32 %v2682_v17  ;;  %v3980_v17 = vld [vmem:[%s4747_s3 + $0xa0] ss:$16 sps:$4 sm:$0xff]   ;;  %4925 = vst [vmem:[#allocation25_spill] sm:$0xff] %v4131_v21 }
 0x31b   : > { %2942 = vrcp.f32 %v1291_v22  ;;  %v3973_v22 = vld [vmem:[%s4747_s3 + $0xa4] ss:$16 sps:$4 sm:$0xff]  }
 0x31c   : > { %2944 = vtanh.f32 %v3922_v8 }
 0x31d   : > { %2946 = vpow2.f32 %v2683_v6  ;;  %v4137_v6 = vld [vmem:[%s4746_s2 + $0x24] ss:$16 sps:$4 sm:$0xff]  }
 0x31e   : > { %4926 = vst [vmem:[#allocation22_spill] sm:$0xff] %v4137_v6 }
 0x325   : > { %v2939_v28 = vpop.eup %2938 }
 0x326   : > { %v1313_v32 = vadd.f32 1.0, %v2939_v28  ;;  %v4143_v28 = vld [vmem:[%s4746_s2 + $0x2c] ss:$16 sps:$4 sm:$0xff]  }
 0x327   : > { %v2941_v37 = vpop.eup %2940  ;;  %4927 = vst [vmem:[#allocation26_spill] sm:$0xff] %v4143_v28 }
 0x328   : > { %v2943_v10 = vpop.eup %2942  ;;  %2948 = vrcp.f32 %v1313_v32  ;;  %v1314_v43 = vadd.f32 1.0, %v2941_v37  ;;  %v4155_v32 = vld [vmem:[%s4746_s2 + $0x28] ss:$16 sps:$4 sm:$0xff]   ;;  %v4161_v37 = vld [vmem:[%s4746_s2 + $0x4] ss:$16 sps:$4 sm:$0xff]  }
 0x329   : > { %v2945_v39 = vpop.eup %2944  ;;  %2950 = vtanh.f32 %v1279_v31  ;;  %v4149_v31 = vld [vmem:[%s4746_s2 + $0x20] ss:$16 sps:$4 sm:$0xff]   ;;  %4929 = vst [vmem:[#allocation27_spill] sm:$0xff] %v4155_v32  ;;  %4930 = vst [vmem:[#allocation31_spill] sm:$0xff] %v4161_v37 }
 0x32a   : > { %2952 = vrcp.f32 %v1314_v43  ;;  %v3927_v38 = vmul.f32 %v2945_v39, %v2943_v10  ;;  %v2947_v34 = vpop.eup %2946  ;;  %4928 = vst [vmem:[#allocation23_spill] sm:$0xff] %v4149_v31  ;;  %v4167_v10 = vld [vmem:[%s4746_s2 + $0xc] ss:$16 sps:$4 sm:$0xff]   ;;  %v4173_v43 = vld [vmem:[%s4746_s2] ss:$16 sps:$4 sm:$0xff]  }
 0x32b   : > { %v1315_v26 = vadd.f32 1.0, %v2947_v34  ;;  %4931 = vst [vmem:[#allocation32_spill] sm:$0xff] %v4167_v10  ;;  %4932 = vst [vmem:[#allocation33_spill] sm:$0xff] %v4173_v43  ;;  %v4179_v39 = vld [vmem:[%s4746_s2 + $0x8] ss:$16 sps:$4 sm:$0xff]  }
 0x32c   : > { %v3933_v2 = vadd.f32 %v3927_v38, %v3790_v5  ;;  %v1337_v45 = vpack.c.bf16 %v3927_v38, %v3927_v38  ;;  %v3952_v5 = vld [vmem:[%s4747_s3 + $0xc4] ss:$16 sps:$4 sm:$0xff]   ;;  %4933 = vst [vmem:[#allocation34_spill] sm:$0xff] %v4179_v39  ;;  %v4191_v34 = vld [vmem:[%s4747_s3 + $0xec] ss:$16 sps:$4 sm:$0xff]  }
 0x32d   : > { %2954 = vrcp.f32 %v1315_v26  ;;  %4935 = vst [vmem:[#allocation36_spill] sm:$0xff] %v4191_v34  ;;  %v2685_v26 = vld [vmem:[%s3252_s23 + $0x68] sm:$0xff] }
 0x32e   : > { %1371 = vmatmul.mubr.bf16.vlgmr.msra.gmra.mxu0 %v1337_v45  ;;  %1412 = vmatmul.mubr.bf16.vlgmr.msra.gmra.mxu1 %v1337_v45  ;;  %v4185_v45 = vld [vmem:[%s4747_s3 + $0xe4] ss:$16 sps:$4 sm:$0xff]  }
 0x32f   : > { %1431 = vmatpush1.bf16.msra.mxu0 %v3940_v42  ;;  %1472 = vmatpush1.bf16.msra.mxu1 %v3946_v46  ;;  %4934 = vst [vmem:[#allocation35_spill] sm:$0xff] %v4185_v45 }
 0x330   : > { %1432 = vmatprep.subr.bf16.mxu0 %v3952_v5  ;;  %1473 = vmatprep.subr.bf16.mxu1 %v3958_v49 }
 0x331   : > { %1462 = vmatprep.mubr.bf16.mxu0 %v4869_v0  ;;  %1503 = vmatprep.mubr.bf16.mxu1 %v4869_v0 }
 0x333   : > { %1433 = vmatpush1.bf16.msra.mxu0 %v3966_v50  ;;  %1474 = vmatpush1.bf16.msra.mxu1 %v3515_v47 }
 0x334   : > { %1434 = vmatprep.subr.bf16.mxu0 %v3973_v22  ;;  %1475 = vmatprep.subr.bf16.mxu1 %v3521_v48  ;;  %v3988_v48 = vld [vmem:[%s4747_s3 + $0x84] ss:$16 sps:$4 sm:$0xff]  }
 0x335   : > { %v2949_v24 = vpop.eup %2948 }
 0x336   : > { %v2951_v16 = vpop.eup %2950 }
 0x337   : > { %v2953_v30 = vpop.eup %2952  ;;  %1435 = vmatpush1.bf16.msra.mxu0 %v3980_v17  ;;  %1476 = vmatpush1.bf16.msra.mxu1 %v3540_v51  ;;  %v1324_v3 = vmul.f32 %v2951_v16, %v2949_v24  ;;  %v4005_v51 = vld [vmem:[%s4747_s3 + $0x64] ss:$16 sps:$4 sm:$0xff]  }
 0x338   : > { %v1323_v47 = vmul.f32 %v2953_v30, %v3807_v41  ;;  %1436 = vmatprep.subr.bf16.mxu0 %v3988_v48  ;;  %1477 = vmatprep.subr.bf16.mxu1 %v3546_v52  ;;  %v4113_v41 = vld [vmem:[%s4746_s2 + $0x44] ss:$16 sps:$4 sm:$0xff]  }
 0x339   : > { %4922 = vst [vmem:[#allocation18_spill] sm:$0xff] %v4113_v41  ;;  %v2684_v24 = vld [vmem:[%s3252_s23 + $0x60] sm:$0xff] }
 0x33a   : > { %v3992_v9 = vadd.f32 %v1324_v3, %v1323_v47  ;;  %v2955_v52 = vpop.eup %2954 }
 0x33b   : > { %1437 = vmatpush1.bf16.msra.mxu0 %v3997_v18  ;;  %1478 = vmatpush1.bf16.msra.mxu1 %v3564_v55 }
 0x33c   : > { %2956 = vtanh.f32 %v3992_v9  ;;  %1438 = vmatprep.subr.bf16.mxu0 %v4005_v51  ;;  %1479 = vmatprep.subr.bf16.mxu1 %v3570_v56 }
 0x33f   : > { %1439 = vmatpush1.bf16.msra.mxu0 %v3552_v53  ;;  %1480 = vmatpush1.bf16.msra.mxu1 %v3588_v59  ;;  %v4057_v59 = vld [vmem:[%s4746_s2 + $0xac] ss:$16 sps:$4 sm:$0xff]  }
 0x340   : > { %1440 = vmatprep.subr.bf16.mxu0 %v3558_v54  ;;  %1481 = vmatprep.subr.bf16.mxu1 %v3594_v60  ;;  %4913 = vst [vmem:[#allocation13_spill] sm:$0xff] %v4057_v59  ;;  %v4064_v60 = vld [vmem:[%s4746_s2 + $0xa8] ss:$16 sps:$4 sm:$0xff]  }
 0x341   : > { %4914 = vst [vmem:[#allocation11_spill] sm:$0xff] %v4064_v60 }
 0x343   : > { %1441 = vmatpush1.bf16.msra.mxu0 %v3576_v57  ;;  %1482 = vmatpush1.bf16.msra.mxu1 %v3612_v63  ;;  %v4077_v63 = vld [vmem:[%s4746_s2 + $0x80] ss:$16 sps:$4 sm:$0xff]  }
 0x344   : > { %1442 = vmatprep.subr.bf16.mxu0 %v3582_v58  ;;  %1483 = vmatprep.subr.bf16.mxu1 %v4870_v23  ;;  %v4050_v58 = vld [vmem:[%s4746_s2 + $0xc8] ss:$16 sps:$4 sm:$0xff]   ;;  %4916 = vst [vmem:[#allocation12_spill] sm:$0xff] %v4077_v63  ;;  %v4095_v23 = vld [vmem:[%s4746_s2 + $0x6c] ss:$16 sps:$4 sm:$0xff]  }
 0x345   : > { %4912 = vst [vmem:[#allocation10_spill] sm:$0xff] %v4050_v58  ;;  %4919 = vst [vmem:[#allocation20_spill] sm:$0xff] %v4095_v23 }
 0x347   : > { %1443 = vmatpush1.bf16.msra.mxu0 %v4871_v20  ;;  %1484 = vmatpush1.bf16.msra.mxu1 %v3631_v36  ;;  %v4089_v36 = vld [vmem:[%s4746_s2 + $0x64] ss:$16 sps:$4 sm:$0xff]   ;;  %v4101_v20 = vld [vmem:[%s4746_s2 + $0x60] ss:$16 sps:$4 sm:$0xff]  }
 0x348   : > { %1444 = vmatprep.subr.bf16.mxu0 %v4872_v40  ;;  %1485 = vmatprep.subr.bf16.mxu1 %v3637_v4  ;;  %v4041_v4 = vld [vmem:[%s4746_s2 + $0xcc] ss:$16 sps:$4 sm:$0xff]   ;;  %4918 = vst [vmem:[#allocation14_spill] sm:$0xff] %v4089_v36  ;;  %4920 = vst [vmem:[#allocation15_spill] sm:$0xff] %v4101_v20  ;;  %v4107_v40 = vld [vmem:[%s4746_s2 + $0x68] ss:$16 sps:$4 sm:$0xff]  }
 0x349   : > { %v2957_v53 = vpop.eup %2956  ;;  %4921 = vst [vmem:[#allocation21_spill] sm:$0xff] %v4107_v40 }
 0x34a   : > { %v4021_v54 = vmul.f32 %v2957_v53, %v2955_v52 }
 0x34b   : > { %1445 = vmatpush1.bf16.msra.mxu0 %v3624_v1  ;;  %1486 = vmatpush1.bf16.msra.mxu1 %v3644_v62  ;;  %v4071_v62 = vld [vmem:[%s4746_s2 + $0x8c] ss:$16 sps:$4 sm:$0xff]   ;;  %v4083_v1 = vld [vmem:[%s4746_s2 + $0x88] ss:$16 sps:$4 sm:$0xff]  }
 0x34c   : > { %v4029_v56 = vadd.f32 %v4021_v54, %v3832_v11  ;;  %v1429_v57 = vpack.c.bf16 %v4021_v54, %v4021_v54  ;;  %1574 = vmatprep.subr.bf16.mxu0 %v3837_v29  ;;  %1615 = vmatprep.subr.bf16.mxu1 %v3843_v19  ;;  %4915 = vst [vmem:[#allocation16_spill] sm:$0xff] %v4071_v62  ;;  %4917 = vst [vmem:[#allocation17_spill] sm:$0xff] %v4083_v1  ;;  %v4119_v11 = vld [vmem:[%s4746_s2 + $0x4c] ss:$16 sps:$4 sm:$0xff]  }
 0x34d   : > { %4923 = vst [vmem:[#allocation24_spill] sm:$0xff] %v4119_v11 }
 0x34e   : > { %1463 = vmatmul.mubr.bf16.vlgmr.msra.gmra.mxu0 %v1429_v57  ;;  %1504 = vmatmul.mubr.bf16.vlgmr.msra.gmra.mxu1 %v1429_v57 }
 0x34f   : > { %1575 = vmatpush1.bf16.msra.mxu0 %v3849_v33  ;;  %1616 = vmatpush1.bf16.msra.mxu1 %v3855_v27 }
 0x350   : > { %1576 = vmatprep.subr.bf16.mxu0 %v3861_v25  ;;  %1617 = vmatprep.subr.bf16.mxu1 %v4041_v4 }
 0x351   : > { %1606 = vmatprep.mubr.bf16.mxu0 %v4869_v0  ;;  %1647 = vmatprep.mubr.bf16.mxu1 %v4869_v0 }
 0x353   : > { %1577 = vmatpush1.bf16.msra.mxu0 %v3870_v35  ;;  %1618 = vmatpush1.bf16.msra.mxu1 %v4050_v58 }
 0x354   : > { %1578 = vmatprep.subr.bf16.mxu0 %v3877_v15  ;;  %1619 = vmatprep.subr.bf16.mxu1 %v4057_v59 }
 0x357   : > { %1579 = vmatpush1.bf16.msra.mxu0 %v3884_v12  ;;  %1620 = vmatpush1.bf16.msra.mxu1 %v4064_v60 }
 0x358   : > { %1580 = vmatprep.subr.bf16.mxu0 %v3891_v13  ;;  %1621 = vmatprep.subr.bf16.mxu1 %v4071_v62 }
 0x35b   : > { %1581 = vmatpush1.bf16.msra.mxu0 %v4077_v63  ;;  %1622 = vmatpush1.bf16.msra.mxu1 %v4083_v1 }
 0x35c   : > { %1582 = vmatprep.subr.bf16.mxu0 %v4089_v36  ;;  %1623 = vmatprep.subr.bf16.mxu1 %v4095_v23 }
 0x35f   : > { %1583 = vmatpush1.bf16.msra.mxu0 %v4101_v20  ;;  %1624 = vmatpush1.bf16.msra.mxu1 %v4107_v40 }
 0x360   : > { %1584 = vmatprep.subr.bf16.mxu0 %v4113_v41  ;;  %1625 = vmatprep.subr.bf16.mxu1 %v4119_v11 }
 0x363   : > { %1585 = vmatpush1.bf16.msra.mxu0 %v4125_v14  ;;  %1626 = vmatpush1.bf16.msra.mxu1 %v4131_v21 }
 0x364   : > { %1586 = vmatprep.subr.bf16.mxu0 %v4137_v6  ;;  %1627 = vmatprep.subr.bf16.mxu1 %v4143_v28 }
 0x367   : > { %1587 = vmatpush1.bf16.msra.mxu0 %v4149_v31  ;;  %1628 = vmatpush1.bf16.msra.mxu1 %v4155_v32 }
 0x368   : > { %1588 = vmatprep.subr.bf16.mxu0 %v4161_v37  ;;  %1629 = vmatprep.subr.bf16.mxu1 %v4167_v10  ;;  %v2687_v37 = vld [vmem:[%s3252_s23 + $0x78] sm:$0xff] }
 0x36b   : > { %1589 = vmatpush1.bf16.msra.mxu0 %v4173_v43  ;;  %1630 = vmatpush1.bf16.msra.mxu1 %v4179_v39 }
 0x36c   : > { %1666 = vmatprep.subr.bf16.mxu0 %v4185_v45  ;;  %1707 = vmatprep.subr.bf16.mxu1 %v4191_v34  ;;  %v2686_v34 = vld [vmem:[%s3252_s23 + $0x70] sm:$0xff] }
 0x3ee   : > { %v1372_v16 = vpop.f32.mrf.mxu0  ;;  %v1413_v30 = vpop.f32.mrf.mxu1 }
 0x3ef   : > { %v1420_v47 = vadd.f32 %v2684_v24, %v1372_v16  ;;  %v1422_v10 = vadd.f32 %v2686_v34, %v1413_v30 }
 0x3f0   : > { %v1374_v3 = vpop.f32.mrf.mxu0  ;;  %v1415_v52 = vpop.f32.mrf.mxu1 }
 0x3f1   : > { %v2692_v53 = vmul.f32 -1.442695, %v1420_v47  ;;  %v1421_v57 = vadd.f32 %v2685_v26, %v1374_v3  ;;  %v2694_v32 = vmul.f32 -1.442695, %v1422_v10  ;;  %v1423_v28 = vadd.f32 %v2687_v37, %v1415_v52  ;;  %v2689_v47 = vld [vmem:[%s3257_s27 + $0x88] sm:$0xff] }
 0x3f2   : > { %v1376_v55 = vpop.f32.mrf.mxu0  ;;  %v1417_v44 = vpop.f32.mrf.mxu1 }
 0x3f3   : > { %2958 = vpow2.f32 %v2692_v53  ;;  %v2693_v45 = vmul.f32 -1.442695, %v1421_v57  ;;  %v2688_v44 = vld [vmem:[%s3257_s27 + $0x80] sm:$0xff] }
 0x3f4   : > { %v1377_v39 = vpop.f32.mrf.mxu0  ;;  %v1418_v43 = vpop.f32.mrf.mxu1 }
 0x3f5   : > { %2960 = vpow2.f32 %v2693_v45 }
 0x3f6   : > { %2962 = vpow2.f32 %v2694_v32 }
 0x400   : > { %v2959_v31 = vpop.eup %2958 }
 0x401   : > { %v1525_v24 = vadd.f32 1.0, %v2959_v31 }
 0x402   : > { %v2961_v16 = vpop.eup %2960 }
 0x403   : > { %2964 = vrcp.f32 %v1525_v24  ;;  %v1526_v26 = vadd.f32 1.0, %v2961_v16  ;;  %v2963_v43 = vpop.eup %2962 }
 0x404   : > { %2966 = vtanh.f32 %v1423_v28  ;;  %v1527_v32 = vadd.f32 1.0, %v2963_v43 }
 0x405   : > { %2968 = vrcp.f32 %v1526_v26 }
 0x40e   : > { %v1464_v55 = vpop.f32.mrf.mxu0  ;;  %v1505_v39 = vpop.f32.mrf.mxu1 }
 0x40f   : > { %v1512_v45 = vadd.f32 %v2688_v44, %v1464_v55  ;;  %v2690_v55 = vld [vmem:[%s3257_s27 + $0x90] sm:$0xff] }
 0x410   : > { %v2965_v3 = vpop.eup %2964  ;;  %v1466_v53 = vpop.f32.mrf.mxu0 }
 0x411   : > { %v1507_v34 = vpop.f32.mrf.mxu1  ;;  %v2967_v30 = vpop.eup %2966  ;;  %v2695_v10 = vmul.f32 -1.442695, %v1512_v45  ;;  %v1513_v37 = vadd.f32 %v2689_v47, %v1466_v53  ;;  %v1514_v47 = vadd.f32 %v2690_v55, %v1505_v39  ;;  %v2691_v45 = vld [vmem:[%s3257_s27 + $0x98] sm:$0xff] }
 0x412   : > { %v2969_v31 = vpop.eup %2968  ;;  %v1468_v52 = vpop.f32.mrf.mxu0  ;;  %v1536_v24 = vmul.f32 %v2967_v30, %v2965_v3  ;;  %v4246_v55 = vld [vmem:[%s4747_s3 + $0x8c] ss:$16 sps:$4 sm:$0xff]  }
 0x413   : > { %v1509_v57 = vpop.f32.mrf.mxu1  ;;  %v1535_v28 = vmul.f32 %v2969_v31, %v3922_v8  ;;  %2970 = vpow2.f32 %v2695_v10  ;;  %v2696_v16 = vmul.f32 -1.442695, %v1513_v37  ;;  %v2697_v53 = vmul.f32 -1.442695, %v1514_v47 }
 0x414   : > { %v1469_v26 = vpop.f32.mrf.mxu0  ;;  %v1515_v52 = vadd.f32 %v2691_v45, %v1507_v34  ;;  %v4936_v10 = vmax.f32 %v3788_v7, %v3927_v38  ;;  %v4224_v7 = vld [vmem:[%s4747_s3 + $0xc8] ss:$16 sps:$4 sm:$0xff]  }
 0x415   : > { %v1510_v6 = vpop.f32.mrf.mxu1  ;;  %v4201_v44 = vadd.f32 %v1536_v24, %v1535_v28  ;;  %2972 = vpow2.f32 %v2696_v16  ;;  %v4238_v24 = vld [vmem:[%s4747_s3 + $0xa8] ss:$16 sps:$4 sm:$0xff]  }
 0x416   : > { %2974 = vrcp.f32 %v1527_v32  ;;  %v4255_v45 = vld [vmem:[%s4747_s3 + $0x88] ss:$16 sps:$4 sm:$0xff]  }
 0x417   : > { %2976 = vtanh.f32 %v4201_v44 }
 0x418   : > { %2978 = vpow2.f32 %v2697_v53  ;;  %v4269_v53 = vld [vmem:[%s4747_s3 + $0x60] ss:$16 sps:$4 sm:$0xff]  }
 0x420   : > { %v2971_v43 = vpop.eup %2970 }
 0x421   : > { %v1549_v57 = vadd.f32 1.0, %v2971_v43  ;;  %v4275_v43 = vld [vmem:[%s4747_s3 + $0x68] ss:$16 sps:$4 sm:$0xff]  }
 0x422   : > { %v2973_v21 = vpop.eup %2972 }
 0x423   : > { %v2975_v8 = vpop.eup %2974  ;;  %2980 = vrcp.f32 %v1549_v57  ;;  %v1550_v3 = vadd.f32 1.0, %v2973_v21  ;;  %v4287_v57 = vld [vmem:[%s4747_s3 + $0x4c] ss:$16 sps:$4 sm:$0xff]  }
 0x424   : > { %v2977_v30 = vpop.eup %2976  ;;  %2982 = vtanh.f32 %v1515_v52  ;;  %v4281_v52 = vld [vmem:[%s4747_s3 + $0x44] ss:$16 sps:$4 sm:$0xff]  }
 0x425   : > { %2984 = vrcp.f32 %v1550_v3  ;;  %v1539_v6 = vmul.f32 %v2977_v30, %v2975_v8  ;;  %v2979_v38 = vpop.eup %2978  ;;  %v4293_v8 = vld [vmem:[%s4747_s3 + $0x40] ss:$16 sps:$4 sm:$0xff]   ;;  %v4299_v3 = vld [vmem:[%s4747_s3 + $0x48] ss:$16 sps:$4 sm:$0xff]   ;;  %v4305_v30 = vld [vmem:[%s4747_s3 + $0x24] ss:$16 sps:$4 sm:$0xff]  }
 0x426   : > { %v1551_v28 = vadd.f32 1.0, %v2979_v38 }
 0x427   : > { %v4209_v37 = vmax.f32 %v4936_v10, %v1539_v6  ;;  %v4212_v39 = vadd.f32 %v1539_v6, %v3933_v2  ;;  %v1573_v31 = vpack.c.bf16 %v1539_v6, %v1539_v6  ;;  %v4231_v2 = vld [vmem:[%s4747_s3 + $0xac] ss:$16 sps:$4 sm:$0xff]   ;;  %v4317_v10 = vld [vmem:[%s4747_s3 + $0x20] ss:$16 sps:$4 sm:$0xff]  }
 0x428   : > { %2986 = vrcp.f32 %v1551_v28  ;;  %v4311_v6 = vld [vmem:[%s4747_s3 + $0x2c] ss:$16 sps:$4 sm:$0xff]  }
 0x429   : > { %1607 = vmatmul.mubr.bf16.vlgmr.msra.gmra.mxu0 %v1573_v31  ;;  %1648 = vmatmul.mubr.bf16.vlgmr.msra.gmra.mxu1 %v1573_v31  ;;  %v4323_v31 = vld [vmem:[%s4747_s3 + $0x28] ss:$16 sps:$4 sm:$0xff]  }
 0x42a   : > { %1667 = vmatpush1.bf16.msra.mxu0 %v3940_v42  ;;  %1708 = vmatpush1.bf16.msra.mxu1 %v3946_v46 }
 0x42b   : > { %1668 = vmatprep.subr.bf16.mxu0 %v3952_v5  ;;  %1709 = vmatprep.subr.bf16.mxu1 %v3958_v49 }
 0x42c   : > { %1698 = vmatprep.mubr.bf16.mxu0 %v4869_v0  ;;  %1739 = vmatprep.mubr.bf16.mxu1 %v4869_v0 }
 0x42e   : > { %1669 = vmatpush1.bf16.msra.mxu0 %v3966_v50  ;;  %1710 = vmatpush1.bf16.msra.mxu1 %v4224_v7 }
 0x42f   : > { %1670 = vmatprep.subr.bf16.mxu0 %v3973_v22  ;;  %1711 = vmatprep.subr.bf16.mxu1 %v4231_v2 }
 0x430   : > { %v2981_v21 = vpop.eup %2980 }
 0x431   : > { %v2983_v34 = vpop.eup %2982 }
 0x432   : > { %v2985_v32 = vpop.eup %2984  ;;  %1671 = vmatpush1.bf16.msra.mxu0 %v3980_v17  ;;  %1712 = vmatpush1.bf16.msra.mxu1 %v4238_v24  ;;  %v1560_v26 = vmul.f32 %v2983_v34, %v2981_v21  ;;  %v4329_v21 = vld [vmem:[%s4747_s3 + $0x4] ss:$16 sps:$4 sm:$0xff]   ;;  %v4335_v34 = vld [vmem:[%s4747_s3 + $0xc] ss:$16 sps:$4 sm:$0xff]  }
 0x433   : > { %v1559_v16 = vmul.f32 %v2985_v32, %v3992_v9  ;;  %1672 = vmatprep.subr.bf16.mxu0 %v3988_v48  ;;  %1713 = vmatprep.subr.bf16.mxu1 %v4246_v55  ;;  %v4263_v9 = vld [vmem:[%s4747_s3 + $0x6c] ss:$16 sps:$4 sm:$0xff]   ;;  %4937 = vst [vmem:[#allocation37_spill] sm:$0xff] %v4329_v21  ;;  %4938 = vst [vmem:[#allocation38_spill] sm:$0xff] %v4335_v34 }
 0x435   : > { %v4249_v47 = vadd.f32 %v1560_v26, %v1559_v16  ;;  %v2987_v38 = vpop.eup %2986  ;;  %v4341_v16 = vld [vmem:[%s4747_s3] ss:$16 sps:$4 sm:$0xff]   ;;  %v4347_v26 = vld [vmem:[%s4747_s3 + $0x8] ss:$16 sps:$4 sm:$0xff]  }
 0x436   : > { %1673 = vmatpush1.bf16.msra.mxu0 %v3997_v18  ;;  %1714 = vmatpush1.bf16.msra.mxu1 %v4255_v45 }
 0x437   : > { %2988 = vtanh.f32 %v4249_v47  ;;  %1674 = vmatprep.subr.bf16.mxu0 %v4005_v51  ;;  %1715 = vmatprep.subr.bf16.mxu1 %v4263_v9 }
 0x43a   : > { %1675 = vmatpush1.bf16.msra.mxu0 %v4269_v53  ;;  %1716 = vmatpush1.bf16.msra.mxu1 %v4275_v43 }
 0x43b   : > { %1676 = vmatprep.subr.bf16.mxu0 %v4281_v52  ;;  %1717 = vmatprep.subr.bf16.mxu1 %v4287_v57 }
 0x43e   : > { %1677 = vmatpush1.bf16.msra.mxu0 %v4293_v8  ;;  %1718 = vmatpush1.bf16.msra.mxu1 %v4299_v3 }
 0x43f   : > { %1678 = vmatprep.subr.bf16.mxu0 %v4305_v30  ;;  %1719 = vmatprep.subr.bf16.mxu1 %v4311_v6 }
 0x442   : > { %1679 = vmatpush1.bf16.msra.mxu0 %v4317_v10  ;;  %1720 = vmatpush1.bf16.msra.mxu1 %v4323_v31 }
 0x443   : > { %1680 = vmatprep.subr.bf16.mxu0 %v4329_v21  ;;  %1721 = vmatprep.subr.bf16.mxu1 %v4335_v34  ;;  %v4939_v21 = vmax.f32 %v3830_v61, %v4021_v54  ;;  %v4940_v61 = vld [vmem:[#allocation25_spill] sm:$0xff]  ;;  %v4941_v54 = vld [vmem:[#allocation22_spill] sm:$0xff] }
 0x444   : > { %v2989_v32 = vpop.eup %2988 }
 0x445   : > { %v1563_v28 = vmul.f32 %v2989_v32, %v2987_v38 }
 0x446   : > { %1681 = vmatpush1.bf16.msra.mxu0 %v4341_v16  ;;  %1722 = vmatpush1.bf16.msra.mxu1 %v4347_v26 }
 0x447   : > { %v4353_v34 = vmax.f32 %v4939_v21, %v1563_v28  ;;  %v4356_v38 = vadd.f32 %v1563_v28, %v4029_v56  ;;  %v1665_v32 = vpack.c.bf16 %v1563_v28, %v1563_v28  ;;  %1810 = vmatprep.subr.bf16.mxu0 %v3837_v29  ;;  %1851 = vmatprep.subr.bf16.mxu1 %v3843_v19  ;;  %v4942_v56 = vld [vmem:[#allocation26_spill] sm:$0xff]  ;;  %v4943_v21 = vld [vmem:[#allocation23_spill] sm:$0xff] }
 0x448   : > { %v4944_v28 = vld [vmem:[#allocation27_spill] sm:$0xff] }
 0x449   : > { %1699 = vmatmul.mubr.bf16.vlgmr.msra.gmra.mxu0 %v1665_v32  ;;  %1740 = vmatmul.mubr.bf16.vlgmr.msra.gmra.mxu1 %v1665_v32  ;;  %v4945_v32 = vld [vmem:[#allocation31_spill] sm:$0xff] }
 0x44a   : > { %1811 = vmatpush1.bf16.msra.mxu0 %v3849_v33  ;;  %1852 = vmatpush1.bf16.msra.mxu1 %v3855_v27 }
 0x44b   : > { %1812 = vmatprep.subr.bf16.mxu0 %v3861_v25  ;;  %1853 = vmatprep.subr.bf16.mxu1 %v4041_v4 }
 0x44c   : > { %1842 = vmatprep.mubr.bf16.mxu0 %v4869_v0  ;;  %1883 = vmatprep.mubr.bf16.mxu1 %v4869_v0 }
 0x44e   : > { %1813 = vmatpush1.bf16.msra.mxu0 %v3870_v35  ;;  %1854 = vmatpush1.bf16.msra.mxu1 %v4050_v58 }
 0x44f   : > { %1814 = vmatprep.subr.bf16.mxu0 %v3877_v15  ;;  %1855 = vmatprep.subr.bf16.mxu1 %v4057_v59 }
 0x452   : > { %1815 = vmatpush1.bf16.msra.mxu0 %v3884_v12  ;;  %1856 = vmatpush1.bf16.msra.mxu1 %v4064_v60 }
 0x453   : > { %1816 = vmatprep.subr.bf16.mxu0 %v3891_v13  ;;  %1857 = vmatprep.subr.bf16.mxu1 %v4071_v62  ;;  %v2701_v13 = vld [vmem:[%s3252_s23 + $0x98] sm:$0xff] }
 0x456   : > { %1817 = vmatpush1.bf16.msra.mxu0 %v4077_v63  ;;  %1858 = vmatpush1.bf16.msra.mxu1 %v4083_v1 }
 0x457   : > { %1818 = vmatprep.subr.bf16.mxu0 %v4089_v36  ;;  %1859 = vmatprep.subr.bf16.mxu1 %v4095_v23 }
 0x45a   : > { %1819 = vmatpush1.bf16.msra.mxu0 %v4101_v20  ;;  %1860 = vmatpush1.bf16.msra.mxu1 %v4107_v40  ;;  %v4946_v40 = vld [vmem:[#allocation32_spill] sm:$0xff]  ;;  %v4949_v20 = vld [vmem:[#allocation35_spill] sm:$0xff] }
 0x45b   : > { %1820 = vmatprep.subr.bf16.mxu0 %v4113_v41  ;;  %1861 = vmatprep.subr.bf16.mxu1 %v4119_v11  ;;  %v4947_v41 = vld [vmem:[#allocation33_spill] sm:$0xff]  ;;  %v4948_v11 = vld [vmem:[#allocation34_spill] sm:$0xff] }
 0x45e   : > { %1821 = vmatpush1.bf16.msra.mxu0 %v4125_v14  ;;  %1862 = vmatpush1.bf16.msra.mxu1 %v4940_v61  ;;  %v4950_v14 = vld [vmem:[#allocation36_spill] sm:$0xff]  ;;  %v2698_v61 = vld [vmem:[%s3252_s23 + $0x80] sm:$0xff] }
 0x45f   : > { %1822 = vmatprep.subr.bf16.mxu0 %v4941_v54  ;;  %1863 = vmatprep.subr.bf16.mxu1 %v4942_v56 }
 0x462   : > { %1823 = vmatpush1.bf16.msra.mxu0 %v4943_v21  ;;  %1864 = vmatpush1.bf16.msra.mxu1 %v4944_v28  ;;  %v2699_v21 = vld [vmem:[%s3252_s23 + $0x88] sm:$0xff] }
 0x463   : > { %1824 = vmatprep.subr.bf16.mxu0 %v4945_v32  ;;  %1865 = vmatprep.subr.bf16.mxu1 %v4946_v40 }
 0x466   : > { %1825 = vmatpush1.bf16.msra.mxu0 %v4947_v41  ;;  %1866 = vmatpush1.bf16.msra.mxu1 %v4948_v11 }
 0x467   : > { %1902 = vmatprep.subr.bf16.mxu0 %v4949_v20  ;;  %1943 = vmatprep.subr.bf16.mxu1 %v4950_v14  ;;  %v2700_v14 = vld [vmem:[%s3252_s23 + $0x90] sm:$0xff] }
 0x4e9   : > { %v1608_v54 = vpop.f32.mrf.mxu0  ;;  %v1649_v56 = vpop.f32.mrf.mxu1 }
 0x4ea   : > { %v1656_v23 = vadd.f32 %v2698_v61, %v1608_v54  ;;  %v1658_v62 = vadd.f32 %v2700_v14, %v1649_v56 }
 0x4eb   : > { %v1610_v28 = vpop.f32.mrf.mxu0  ;;  %v1651_v36 = vpop.f32.mrf.mxu1 }
 0x4ec   : > { %v2706_v32 = vmul.f32 -1.442695, %v1656_v23  ;;  %v1657_v1 = vadd.f32 %v2699_v21, %v1610_v28  ;;  %v2708_v60 = vmul.f32 -1.442695, %v1658_v62  ;;  %v1659_v59 = vadd.f32 %v2701_v13, %v1651_v36 }
 0x4ed   : > { %v1612_v40 = vpop.f32.mrf.mxu0  ;;  %v1653_v63 = vpop.f32.mrf.mxu1 }
 0x4ee   : > { %2990 = vpow2.f32 %v2706_v32  ;;  %v2707_v41 = vmul.f32 -1.442695, %v1657_v1  ;;  %v2702_v63 = vld [vmem:[%s3257_s27 + $0x60] sm:$0xff] }
 0x4ef   : > { %v1613_v11 = vpop.f32.mrf.mxu0  ;;  %v1654_v20 = vpop.f32.mrf.mxu1 }
 0x4f0   : > { %2992 = vpow2.f32 %v2707_v41  ;;  %v2703_v11 = vld [vmem:[%s3257_s27 + $0x68] sm:$0xff] }
 0x4f1   : > { %2994 = vpow2.f32 %v2708_v60 }
 0x4fb   : > { %v2991_v12 = vpop.eup %2990 }
 0x4fc   : > { %v1761_v61 = vadd.f32 1.0, %v2991_v12 }
 0x4fd   : > { %v2993_v54 = vpop.eup %2992 }
 0x4fe   : > { %2996 = vrcp.f32 %v1761_v61  ;;  %v1762_v23 = vadd.f32 1.0, %v2993_v54  ;;  %v2995_v20 = vpop.eup %2994 }
 0x4ff   : > { %2998 = vtanh.f32 %v1659_v59  ;;  %v1763_v60 = vadd.f32 1.0, %v2995_v20 }
 0x500   : > { %3000 = vrcp.f32 %v1762_v23 }
 0x509   : > { %v1700_v1 = vpop.f32.mrf.mxu0  ;;  %v1741_v40 = vpop.f32.mrf.mxu1 }
 0x50a   : > { %v1748_v41 = vadd.f32 %v2702_v63, %v1700_v1  ;;  %v2704_v1 = vld [vmem:[%s3257_s27 + $0x70] sm:$0xff] }
 0x50b   : > { %v2997_v21 = vpop.eup %2996  ;;  %v1702_v28 = vpop.f32.mrf.mxu0 }
 0x50c   : > { %v1743_v14 = vpop.f32.mrf.mxu1  ;;  %v2999_v56 = vpop.eup %2998  ;;  %v2709_v62 = vmul.f32 -1.442695, %v1748_v41  ;;  %v1749_v13 = vadd.f32 %v2703_v11, %v1702_v28  ;;  %v1750_v11 = vadd.f32 %v2704_v1, %v1741_v40  ;;  %v2705_v41 = vld [vmem:[%s3257_s27 + $0x78] sm:$0xff]  ;;  %v4952_v1 = vld [vmem:[#allocation38_spill] sm:$0xff] }
 0x50d   : > { %v3001_v12 = vpop.eup %3000  ;;  %v1704_v36 = vpop.f32.mrf.mxu0  ;;  %v1772_v61 = vmul.f32 %v2999_v56, %v2997_v21 }
 0x50e   : > { %v1745_v32 = vpop.f32.mrf.mxu1  ;;  %v1771_v59 = vmul.f32 %v3001_v12, %v4201_v44  ;;  %3002 = vpow2.f32 %v2709_v62  ;;  %v2710_v54 = vmul.f32 -1.442695, %v1749_v13  ;;  %v2711_v28 = vmul.f32 -1.442695, %v1750_v11  ;;  %v4979_v62 = vld [vmem:[#allocation36_spill] sm:$0xff] }
 0x50f   : > { %v1705_v23 = vpop.f32.mrf.mxu0  ;;  %v1751_v36 = vadd.f32 %v2705_v41, %v1743_v14 }
 0x510   : > { %v1746_v15 = vpop.f32.mrf.mxu1  ;;  %v4401_v63 = vadd.f32 %v1772_v61, %v1771_v59  ;;  %3004 = vpow2.f32 %v2710_v54  ;;  %v4951_v23 = vld [vmem:[#allocation37_spill] sm:$0xff] }
 0x511   : > { %3006 = vrcp.f32 %v1763_v60 }
 0x512   : > { %3008 = vtanh.f32 %v4401_v63 }
 0x513   : > { %3010 = vpow2.f32 %v2711_v28  ;;  %v4978_v28 = vld [vmem:[#allocation35_spill] sm:$0xff] }
 0x51b   : > { %v3003_v20 = vpop.eup %3002 }
 0x51c   : > { %v1785_v32 = vadd.f32 1.0, %v3003_v20 }
 0x51d   : > { %v3005_v58 = vpop.eup %3004 }
 0x51e   : > { %v3007_v44 = vpop.eup %3006  ;;  %3012 = vrcp.f32 %v1785_v32  ;;  %v1786_v21 = vadd.f32 1.0, %v3005_v58  ;;  %v4956_v32 = vld [vmem:[#allocation28_spill] sm:$0xff] }
 0x51f   : > { %v3009_v56 = vpop.eup %3008  ;;  %3014 = vtanh.f32 %v1751_v36 }
 0x520   : > { %3016 = vrcp.f32 %v1786_v21  ;;  %v4406_v15 = vmul.f32 %v3009_v56, %v3007_v44  ;;  %v3011_v58 = vpop.eup %3010  ;;  %v4960_v44 = vld [vmem:[#allocation12_spill] sm:$0xff]  ;;  %v4961_v21 = vld [vmem:[#allocation17_spill] sm:$0xff]  ;;  %v4962_v56 = vld [vmem:[#allocation14_spill] sm:$0xff] }
 0x521   : > { %v1787_v60 = vadd.f32 1.0, %v3011_v58  ;;  %v4965_v58 = vld [vmem:[#allocation21_spill] sm:$0xff] }
 0x522   : > { %v4412_v40 = vadd.f32 %v4406_v15, %v4212_v39  ;;  %v1809_v14 = vpack.c.bf16 %v4406_v15, %v4406_v15 }
 0x523   : > { %3018 = vrcp.f32 %v1787_v60  ;;  %v4969_v60 = vld [vmem:[#allocation25_spill] sm:$0xff] }
 0x524   : > { %1843 = vmatmul.mubr.bf16.vlgmr.msra.gmra.mxu0 %v1809_v14  ;;  %1884 = vmatmul.mubr.bf16.vlgmr.msra.gmra.mxu1 %v1809_v14  ;;  %v4964_v14 = vld [vmem:[#allocation15_spill] sm:$0xff] }
 0x525   : > { %1903 = vmatpush1.bf16.msra.mxu0 %v3940_v42  ;;  %1944 = vmatpush1.bf16.msra.mxu1 %v3946_v46 }
 0x526   : > { %1904 = vmatprep.subr.bf16.mxu0 %v3952_v5  ;;  %1945 = vmatprep.subr.bf16.mxu1 %v3958_v49 }
 0x527   : > { %1934 = vmatprep.mubr.bf16.mxu0 %v4869_v0  ;;  %1975 = vmatprep.mubr.bf16.mxu1 %v4869_v0 }
 0x529   : > { %1905 = vmatpush1.bf16.msra.mxu0 %v3966_v50  ;;  %1946 = vmatpush1.bf16.msra.mxu1 %v4224_v7 }
 0x52a   : > { %1906 = vmatprep.subr.bf16.mxu0 %v3973_v22  ;;  %1947 = vmatprep.subr.bf16.mxu1 %v4231_v2 }
 0x52b   : > { %v3013_v39 = vpop.eup %3012 }
 0x52c   : > { %v3015_v13 = vpop.eup %3014 }
 0x52d   : > { %v3017_v12 = vpop.eup %3016  ;;  %1907 = vmatpush1.bf16.msra.mxu0 %v3980_v17  ;;  %1948 = vmatpush1.bf16.msra.mxu1 %v4238_v24  ;;  %v1796_v61 = vmul.f32 %v3015_v13, %v3013_v39  ;;  %v4966_v39 = vld [vmem:[#allocation18_spill] sm:$0xff]  ;;  %v4967_v13 = vld [vmem:[#allocation24_spill] sm:$0xff] }
 0x52e   : > { %v1795_v59 = vmul.f32 %v3017_v12, %v4249_v47  ;;  %1908 = vmatprep.subr.bf16.mxu0 %v3988_v48  ;;  %1949 = vmatprep.subr.bf16.mxu1 %v4246_v55  ;;  %v4968_v12 = vld [vmem:[#allocation19_spill] sm:$0xff] }
 0x530   : > { %v4431_v54 = vadd.f32 %v1796_v61, %v1795_v59  ;;  %v3019_v47 = vpop.eup %3018  ;;  %v4970_v59 = vld [vmem:[#allocation22_spill] sm:$0xff] }
 0x531   : > { %1909 = vmatpush1.bf16.msra.mxu0 %v3997_v18  ;;  %1950 = vmatpush1.bf16.msra.mxu1 %v4255_v45  ;;  %v4971_v61 = vld [vmem:[#allocation26_spill] sm:$0xff] }
 0x532   : > { %3020 = vtanh.f32 %v4431_v54  ;;  %1910 = vmatprep.subr.bf16.mxu0 %v4005_v51  ;;  %1951 = vmatprep.subr.bf16.mxu1 %v4263_v9 }
 0x535   : > { %1911 = vmatpush1.bf16.msra.mxu0 %v4269_v53  ;;  %1952 = vmatpush1.bf16.msra.mxu1 %v4275_v43 }
 0x536   : > { %1912 = vmatprep.subr.bf16.mxu0 %v4281_v52  ;;  %1953 = vmatprep.subr.bf16.mxu1 %v4287_v57 }
 0x539   : > { %1913 = vmatpush1.bf16.msra.mxu0 %v4293_v8  ;;  %1954 = vmatpush1.bf16.msra.mxu1 %v4299_v3 }
 0x53a   : > { %1914 = vmatprep.subr.bf16.mxu0 %v4305_v30  ;;  %1955 = vmatprep.subr.bf16.mxu1 %v4311_v6 }
 0x53d   : > { %1915 = vmatpush1.bf16.msra.mxu0 %v4317_v10  ;;  %1956 = vmatpush1.bf16.msra.mxu1 %v4323_v31 }
 0x53e   : > { %1916 = vmatprep.subr.bf16.mxu0 %v4951_v23  ;;  %1957 = vmatprep.subr.bf16.mxu1 %v4952_v1 }
 0x53f   : > { %v3021_v11 = vpop.eup %3020 }
 0x540   : > { %v4450_v41 = vmul.f32 %v3021_v11, %v3019_v47  ;;  %v4972_v47 = vld [vmem:[#allocation23_spill] sm:$0xff] }
 0x541   : > { %1917 = vmatpush1.bf16.msra.mxu0 %v4341_v16  ;;  %1958 = vmatpush1.bf16.msra.mxu1 %v4347_v26  ;;  %v4973_v11 = vld [vmem:[#allocation27_spill] sm:$0xff] }
 0x542   : > { %v4458_v20 = vadd.f32 %v4450_v41, %v4356_v38  ;;  %v1901_v36 = vpack.c.bf16 %v4450_v41, %v4450_v41  ;;  %2046 = vmatprep.subr.bf16.mxu0 %v3837_v29  ;;  %2087 = vmatprep.subr.bf16.mxu1 %v3843_v19  ;;  %v4953_v38 = vld [vmem:[#allocation10_spill] sm:$0xff]  ;;  %v4955_v19 = vld [vmem:[#allocation13_spill] sm:$0xff] }
 0x543   : > { %v4954_v29 = vld [vmem:[#allocation30_spill] sm:$0xff] }
 0x544   : > { %1935 = vmatmul.mubr.bf16.vlgmr.msra.gmra.mxu0 %v1901_v36  ;;  %1976 = vmatmul.mubr.bf16.vlgmr.msra.gmra.mxu1 %v1901_v36  ;;  %v4974_v36 = vld [vmem:[#allocation31_spill] sm:$0xff] }
 0x545   : > { %2047 = vmatpush1.bf16.msra.mxu0 %v3849_v33  ;;  %2088 = vmatpush1.bf16.msra.mxu1 %v3855_v27  ;;  %v4957_v33 = vld [vmem:[#allocation11_spill] sm:$0xff]  ;;  %v4958_v27 = vld [vmem:[#allocation29_spill] sm:$0xff] }
 0x546   : > { %2048 = vmatprep.subr.bf16.mxu0 %v3861_v25  ;;  %2089 = vmatprep.subr.bf16.mxu1 %v4041_v4  ;;  %v4959_v25 = vld [vmem:[#allocation16_spill] sm:$0xff] }
 0x547   : > { %2078 = vmatprep.mubr.bf16.mxu0 %v4869_v0  ;;  %2119 = vmatprep.mubr.bf16.mxu1 %v4869_v0 }
 0x549   : > { %2049 = vmatpush1.bf16.msra.mxu0 %v3870_v35  ;;  %2090 = vmatpush1.bf16.msra.mxu1 %v4953_v38  ;;  %v4963_v35 = vld [vmem:[#allocation20_spill] sm:$0xff] }
 0x54a   : > { %2050 = vmatprep.subr.bf16.mxu0 %v4954_v29  ;;  %2091 = vmatprep.subr.bf16.mxu1 %v4955_v19  ;;  %v4975_v29 = vld [vmem:[#allocation32_spill] sm:$0xff] }
 0x54d   : > { %2051 = vmatpush1.bf16.msra.mxu0 %v4956_v32  ;;  %2092 = vmatpush1.bf16.msra.mxu1 %v4957_v33  ;;  %v4976_v32 = vld [vmem:[#allocation33_spill] sm:$0xff] }
 0x54e   : > { %2052 = vmatprep.subr.bf16.mxu0 %v4958_v27  ;;  %2093 = vmatprep.subr.bf16.mxu1 %v4959_v25  ;;  %v4977_v27 = vld [vmem:[#allocation34_spill] sm:$0xff] }
 0x551   : > { %2053 = vmatpush1.bf16.msra.mxu0 %v4960_v44  ;;  %2094 = vmatpush1.bf16.msra.mxu1 %v4961_v21 }
 0x552   : > { %2054 = vmatprep.subr.bf16.mxu0 %v4962_v56  ;;  %2095 = vmatprep.subr.bf16.mxu1 %v4963_v35  ;;  %v2715_v35 = vld [vmem:[%s3252_s23 + $0xb8] sm:$0xff] }
 0x555   : > { %2055 = vmatpush1.bf16.msra.mxu0 %v4964_v14  ;;  %2096 = vmatpush1.bf16.msra.mxu1 %v4965_v58 }
 0x556   : > { %2056 = vmatprep.subr.bf16.mxu0 %v4966_v39  ;;  %2097 = vmatprep.subr.bf16.mxu1 %v4967_v13 }
 0x559   : > { %2057 = vmatpush1.bf16.msra.mxu0 %v4968_v12  ;;  %2098 = vmatpush1.bf16.msra.mxu1 %v4969_v60  ;;  %v2712_v60 = vld [vmem:[%s3252_s23 + $0xa0] sm:$0xff] }
 0x55a   : > { %2058 = vmatprep.subr.bf16.mxu0 %v4970_v59  ;;  %2099 = vmatprep.subr.bf16.mxu1 %v4971_v61 }
 0x55d   : > { %2059 = vmatpush1.bf16.msra.mxu0 %v4972_v47  ;;  %2100 = vmatpush1.bf16.msra.mxu1 %v4973_v11  ;;  %v2713_v47 = vld [vmem:[%s3252_s23 + $0xa8] sm:$0xff] }
 0x55e   : > { %2060 = vmatprep.subr.bf16.mxu0 %v4974_v36  ;;  %2101 = vmatprep.subr.bf16.mxu1 %v4975_v29 }
 0x561   : > { %2061 = vmatpush1.bf16.msra.mxu0 %v4976_v32  ;;  %2102 = vmatpush1.bf16.msra.mxu1 %v4977_v27 }
 0x562   : > { %2138 = vmatprep.subr.bf16.mxu0 %v4978_v28  ;;  %2179 = vmatprep.subr.bf16.mxu1 %v4979_v62  ;;  %v2714_v62 = vld [vmem:[%s3252_s23 + $0xb0] sm:$0xff] }
 0x5e4   : > { %v1844_v59 = vpop.f32.mrf.mxu0  ;;  %v1885_v61 = vpop.f32.mrf.mxu1 }
 0x5e5   : > { %v1892_v12 = vadd.f32 %v2712_v60, %v1844_v59  ;;  %v1894_v14 = vadd.f32 %v2714_v62, %v1885_v61 }
 0x5e6   : > { %v1846_v11 = vpop.f32.mrf.mxu0  ;;  %v1887_v13 = vpop.f32.mrf.mxu1 }
 0x5e7   : > { %v2720_v36 = vmul.f32 -1.442695, %v1892_v12  ;;  %v1893_v39 = vadd.f32 %v2713_v47, %v1846_v11  ;;  %v2722_v56 = vmul.f32 -1.442695, %v1894_v14  ;;  %v1895_v44 = vadd.f32 %v2715_v35, %v1887_v13  ;;  %v2717_v11 = vld [vmem:[%s3257_s27 + $0x48] sm:$0xff] }
 0x5e8   : > { %v1848_v29 = vpop.f32.mrf.mxu0  ;;  %v1889_v58 = vpop.f32.mrf.mxu1 }
 0x5e9   : > { %3022 = vpow2.f32 %v2720_v36  ;;  %v2721_v32 = vmul.f32 -1.442695, %v1893_v39  ;;  %v2716_v58 = vld [vmem:[%s3257_s27 + $0x40] sm:$0xff] }
 0x5ea   : > { %v1849_v27 = vpop.f32.mrf.mxu0  ;;  %v1890_v28 = vpop.f32.mrf.mxu1 }
 0x5eb   : > { %3024 = vpow2.f32 %v2721_v32 }
 0x5ec   : > { %3026 = vpow2.f32 %v2722_v56 }
 0x5f6   : > { %v3023_v21 = vpop.eup %3022 }
 0x5f7   : > { %v1997_v60 = vadd.f32 1.0, %v3023_v21 }
 0x5f8   : > { %v3025_v59 = vpop.eup %3024 }
 0x5f9   : > { %3028 = vrcp.f32 %v1997_v60  ;;  %v1998_v12 = vadd.f32 1.0, %v3025_v59  ;;  %v3027_v28 = vpop.eup %3026 }
 0x5fa   : > { %3030 = vtanh.f32 %v1895_v44  ;;  %v1999_v56 = vadd.f32 1.0, %v3027_v28 }
 0x5fb   : > { %3032 = vrcp.f32 %v1998_v12 }
 0x604   : > { %v1936_v39 = vpop.f32.mrf.mxu0  ;;  %v1977_v47 = vpop.f32.mrf.mxu1 }
 0x605   : > { %v1984_v36 = vadd.f32 %v2716_v58, %v1936_v39  ;;  %v2718_v39 = vld [vmem:[%s3257_s27 + $0x50] sm:$0xff] }
 0x606   : > { %v3029_v29 = vpop.eup %3028  ;;  %v1938_v32 = vpop.f32.mrf.mxu0 }
 0x607   : > { %v1979_v62 = vpop.f32.mrf.mxu1  ;;  %v3031_v61 = vpop.eup %3030  ;;  %v2723_v14 = vmul.f32 -1.442695, %v1984_v36  ;;  %v1985_v35 = vadd.f32 %v2717_v11, %v1938_v32  ;;  %v1986_v11 = vadd.f32 %v2718_v39, %v1977_v47  ;;  %v2719_v36 = vld [vmem:[%s3257_s27 + $0x58] sm:$0xff]  ;;  %v4984_v39 = vld [vmem:[#allocation12_spill] sm:$0xff] }
 0x608   : > { %v3033_v21 = vpop.eup %3032  ;;  %v1940_v13 = vpop.f32.mrf.mxu0  ;;  %v2008_v60 = vmul.f32 %v3031_v61, %v3029_v29 }
 0x609   : > { %v1981_v27 = vpop.f32.mrf.mxu1  ;;  %v2007_v44 = vmul.f32 %v3033_v21, %v4401_v63  ;;  %3034 = vpow2.f32 %v2723_v14  ;;  %v2724_v59 = vmul.f32 -1.442695, %v1985_v35  ;;  %v2725_v32 = vmul.f32 -1.442695, %v1986_v11  ;;  %v4985_v11 = vld [vmem:[#allocation17_spill] sm:$0xff] }
 0x60a   : > { %v1941_v12 = vpop.f32.mrf.mxu0  ;;  %v1987_v13 = vadd.f32 %v2719_v36, %v1979_v62  ;;  %v4980_v14 = vmax.f32 %v4209_v37, %v4406_v15  ;;  %v3182_v62 = vld [vmem:[%s4746_s2 + $0xe4] ss:$16 sps:$4 sm:$0xff]  }
 0x60b   : > { %v1982_v25 = vpop.f32.mrf.mxu1  ;;  %v4505_v58 = vadd.f32 %v2008_v60, %v2007_v44  ;;  %3036 = vpow2.f32 %v2724_v59  ;;  %v3187_v44 = vld [vmem:[%s4746_s2 + $0xc0] ss:$16 sps:$4 sm:$0xff]   ;;  %v3188_v60 = vld [vmem:[%s4746_s2 + $0xa4] ss:$16 sps:$4 sm:$0xff]   ;;  %v4982_v59 = vld [vmem:[#allocation11_spill] sm:$0xff] }
 0x60c   : > { %3038 = vrcp.f32 %v1999_v56  ;;  %v3183_v56 = vld [vmem:[%s4746_s2 + $0xec] ss:$16 sps:$4 sm:$0xff]   ;;  %v3190_v12 = vld [vmem:[%s4746_s2 + $0x84] ss:$16 sps:$4 sm:$0xff]  }
 0x60d   : > { %3040 = vtanh.f32 %v4505_v58  ;;  %v4986_v36 = vld [vmem:[#allocation14_spill] sm:$0xff] }
 0x60e   : > { %3042 = vpow2.f32 %v2725_v32  ;;  %v4988_v32 = vld [vmem:[#allocation15_spill] sm:$0xff] }
 0x616   : > { %v3035_v28 = vpop.eup %3034 }
 0x617   : > { %v2021_v27 = vadd.f32 1.0, %v3035_v28  ;;  %v4989_v28 = vld [vmem:[#allocation21_spill] sm:$0xff] }
 0x618   : > { %v3037_v33 = vpop.eup %3036 }
 0x619   : > { %v3039_v63 = vpop.eup %3038  ;;  %3044 = vrcp.f32 %v2021_v27  ;;  %v2022_v29 = vadd.f32 1.0, %v3037_v33  ;;  %v4991_v27 = vld [vmem:[#allocation24_spill] sm:$0xff] }
 0x61a   : > { %v3041_v61 = vpop.eup %3040  ;;  %3046 = vtanh.f32 %v1987_v13  ;;  %v4990_v13 = vld [vmem:[#allocation18_spill] sm:$0xff] }
 0x61b   : > { %3048 = vrcp.f32 %v2022_v29  ;;  %v2011_v25 = vmul.f32 %v3041_v61, %v3039_v63  ;;  %v3043_v37 = vpop.eup %3042  ;;  %v4992_v63 = vld [vmem:[#allocation19_spill] sm:$0xff]  ;;  %v4993_v29 = vld [vmem:[#allocation25_spill] sm:$0xff]  ;;  %v4994_v61 = vld [vmem:[#allocation22_spill] sm:$0xff] }
 0x61d   : > { %v4513_v35 = vmax.f32 %v4980_v14, %v2011_v25  ;;  %v4516_v47 = vadd.f32 %v2011_v25, %v4412_v40  ;;  %v2045_v21 = vpack.c.bf16 %v2011_v25, %v2011_v25  ;;  %v2023_v40 = vadd.f32 1.0, %v3043_v37  ;;  %v4995_v25 = vld [vmem:[#allocation26_spill] sm:$0xff]  ;;  %v4996_v14 = vld [vmem:[#allocation23_spill] sm:$0xff] }
 0x61e   : > { %v4998_v37 = vld [vmem:[#allocation31_spill] sm:$0xff] }
 0x61f   : > { %2079 = vmatmul.mubr.bf16.vlgmr.msra.gmra.mxu0 %v2045_v21  ;;  %2120 = vmatmul.mubr.bf16.vlgmr.msra.gmra.mxu1 %v2045_v21  ;;  %3050 = vrcp.f32 %v2023_v40  ;;  %v4997_v21 = vld [vmem:[#allocation27_spill] sm:$0xff] }
 0x620   : > { %2139 = vmatpush1.bf16.msra.mxu0 %v3940_v42  ;;  %2180 = vmatpush1.bf16.msra.mxu1 %v3946_v46  ;;  %v5002_v40 = vld [vmem:[#allocation35_spill] sm:$0xff] }
 0x621   : > { %2140 = vmatprep.subr.bf16.mxu0 %v3952_v5  ;;  %2181 = vmatprep.subr.bf16.mxu1 %v3958_v49 }
 0x622   : > { %2170 = vmatprep.mubr.bf16.mxu0 %v4869_v0  ;;  %2211 = vmatprep.mubr.bf16.mxu1 %v4869_v0 }
 0x624   : > { %2141 = vmatpush1.bf16.msra.mxu0 %v3966_v50  ;;  %2182 = vmatpush1.bf16.msra.mxu1 %v4224_v7 }
 0x625   : > { %2142 = vmatprep.subr.bf16.mxu0 %v3973_v22  ;;  %2183 = vmatprep.subr.bf16.mxu1 %v4231_v2 }
 0x626   : > { %v3045_v42 = vpop.eup %3044 }
 0x627   : > { %v3047_v15 = vpop.eup %3046 }
 0x628   : > { %v3049_v46 = vpop.eup %3048  ;;  %2143 = vmatpush1.bf16.msra.mxu0 %v3980_v17  ;;  %2184 = vmatpush1.bf16.msra.mxu1 %v4238_v24  ;;  %v2032_v49 = vmul.f32 %v3047_v15, %v3045_v42  ;;  %v4999_v42 = vld [vmem:[#allocation32_spill] sm:$0xff]  ;;  %v5000_v15 = vld [vmem:[#allocation33_spill] sm:$0xff] }
 0x629   : > { %v2031_v5 = vmul.f32 %v3049_v46, %v4431_v54  ;;  %2144 = vmatprep.subr.bf16.mxu0 %v3988_v48  ;;  %2185 = vmatprep.subr.bf16.mxu1 %v4246_v55  ;;  %v5001_v46 = vld [vmem:[#allocation34_spill] sm:$0xff] }
 0x62b   : > { %v4533_v50 = vadd.f32 %v2032_v49, %v2031_v5  ;;  %v5003_v5 = vld [vmem:[#allocation36_spill] sm:$0xff]  ;;  %v2726_v49 = vld [vmem:[%s3252_s23 + $0xc0] sm:$0xff] }
 0x62c   : > { %2145 = vmatpush1.bf16.msra.mxu0 %v3997_v18  ;;  %2186 = vmatpush1.bf16.msra.mxu1 %v4255_v45  ;;  %v3051_v22 = vpop.eup %3050  ;;  %v4981_v18 = vmax.f32 %v4353_v34, %v4450_v41  ;;  %v3184_v34 = vld [vmem:[%s4746_s2 + $0xe0] ss:$16 sps:$4 sm:$0xff]   ;;  %v3185_v41 = vld [vmem:[%s4746_s2 + $0xe8] ss:$16 sps:$4 sm:$0xff]  }
 0x62d   : > { %3052 = vtanh.f32 %v4533_v50  ;;  %2146 = vmatprep.subr.bf16.mxu0 %v4005_v51  ;;  %2187 = vmatprep.subr.bf16.mxu1 %v4263_v9 }
 0x630   : > { %2147 = vmatpush1.bf16.msra.mxu0 %v4269_v53  ;;  %2188 = vmatpush1.bf16.msra.mxu1 %v4275_v43 }
 0x631   : > { %2148 = vmatprep.subr.bf16.mxu0 %v4281_v52  ;;  %2189 = vmatprep.subr.bf16.mxu1 %v4287_v57 }
 0x634   : > { %2149 = vmatpush1.bf16.msra.mxu0 %v4293_v8  ;;  %2190 = vmatpush1.bf16.msra.mxu1 %v4299_v3 }
 0x635   : > { %2150 = vmatprep.subr.bf16.mxu0 %v4305_v30  ;;  %2191 = vmatprep.subr.bf16.mxu1 %v4311_v6 }
 0x638   : > { %2151 = vmatpush1.bf16.msra.mxu0 %v4317_v10  ;;  %2192 = vmatpush1.bf16.msra.mxu1 %v4323_v31 }
 0x639   : > { %2152 = vmatprep.subr.bf16.mxu0 %v4951_v23  ;;  %2193 = vmatprep.subr.bf16.mxu1 %v4952_v1 }
 0x63a   : > { %v3053_v17 = vpop.eup %3052 }
 0x63b   : > { %v2035_v48 = vmul.f32 %v3053_v17, %v3051_v22 }
 0x63c   : > { %2153 = vmatpush1.bf16.msra.mxu0 %v4341_v16  ;;  %2194 = vmatpush1.bf16.msra.mxu1 %v4347_v26 }
 0x63d   : > { %v4557_v51 = vmax.f32 %v4981_v18, %v2035_v48  ;;  %v4560_v54 = vadd.f32 %v2035_v48, %v4458_v20  ;;  %v2137_v33 = vpack.c.bf16 %v2035_v48, %v2035_v48  ;;  %2282 = vmatprep.subr.bf16.mxu0 %v3182_v62  ;;  %2323 = vmatprep.subr.bf16.mxu1 %v3183_v56  ;;  %v3186_v20 = vld [vmem:[%s4746_s2 + $0xc4] ss:$16 sps:$4 sm:$0xff]   ;;  %v2727_v48 = vld [vmem:[%s3252_s23 + $0xc8] sm:$0xff] }
 0x63f   : > { %2171 = vmatmul.mubr.bf16.vlgmr.msra.gmra.mxu0 %v2137_v33  ;;  %2212 = vmatmul.mubr.bf16.vlgmr.msra.gmra.mxu1 %v2137_v33 }
 0x640   : > { %2283 = vmatpush1.bf16.msra.mxu0 %v3184_v34  ;;  %2324 = vmatpush1.bf16.msra.mxu1 %v3185_v41 }
 0x641   : > { %2284 = vmatprep.subr.bf16.mxu0 %v3186_v20  ;;  %2325 = vmatprep.subr.bf16.mxu1 %v4041_v4  ;;  %v3189_v4 = vld [vmem:[%s4746_s2 + $0xa0] ss:$16 sps:$4 sm:$0xff]  }
 0x642   : > { %2314 = vmatprep.mubr.bf16.mxu0 %v4869_v0  ;;  %2355 = vmatprep.mubr.bf16.mxu1 %v4869_v0 }
 0x644   : > { %2285 = vmatpush1.bf16.msra.mxu0 %v3187_v44  ;;  %2326 = vmatpush1.bf16.msra.mxu1 %v4953_v38  ;;  %v4983_v38 = vld [vmem:[#allocation16_spill] sm:$0xff] }
 0x645   : > { %2286 = vmatprep.subr.bf16.mxu0 %v3188_v60  ;;  %2327 = vmatprep.subr.bf16.mxu1 %v4955_v19  ;;  %v4987_v19 = vld [vmem:[#allocation20_spill] sm:$0xff] }
 0x648   : > { %2287 = vmatpush1.bf16.msra.mxu0 %v3189_v4  ;;  %2328 = vmatpush1.bf16.msra.mxu1 %v4982_v59  ;;  %v2728_v59 = vld [vmem:[%s3252_s23 + $0xd0] sm:$0xff] }
 0x649   : > { %2288 = vmatprep.subr.bf16.mxu0 %v3190_v12  ;;  %2329 = vmatprep.subr.bf16.mxu1 %v4983_v38  ;;  %v2729_v38 = vld [vmem:[%s3252_s23 + $0xd8] sm:$0xff] }
 0x64c   : > { %2289 = vmatpush1.bf16.msra.mxu0 %v4984_v39  ;;  %2330 = vmatpush1.bf16.msra.mxu1 %v4985_v11 }
 0x64d   : > { %2290 = vmatprep.subr.bf16.mxu0 %v4986_v36  ;;  %2331 = vmatprep.subr.bf16.mxu1 %v4987_v19 }
 0x650   : > { %2291 = vmatpush1.bf16.msra.mxu0 %v4988_v32  ;;  %2332 = vmatpush1.bf16.msra.mxu1 %v4989_v28 }
 0x651   : > { %2292 = vmatprep.subr.bf16.mxu0 %v4990_v13  ;;  %2333 = vmatprep.subr.bf16.mxu1 %v4991_v27  ;;  %v2730_v13 = vld [vmem:[%s3257_s27 + $0x20] sm:$0xff] }
 0x654   : > { %2293 = vmatpush1.bf16.msra.mxu0 %v4992_v63  ;;  %2334 = vmatpush1.bf16.msra.mxu1 %v4993_v29  ;;  %v2731_v29 = vld [vmem:[%s3257_s27 + $0x28] sm:$0xff] }
 0x655   : > { %2294 = vmatprep.subr.bf16.mxu0 %v4994_v61  ;;  %2335 = vmatprep.subr.bf16.mxu1 %v4995_v25 }
 0x658   : > { %2295 = vmatpush1.bf16.msra.mxu0 %v4996_v14  ;;  %2336 = vmatpush1.bf16.msra.mxu1 %v4997_v21 }
 0x659   : > { %2296 = vmatprep.subr.bf16.mxu0 %v4998_v37  ;;  %2337 = vmatprep.subr.bf16.mxu1 %v4999_v42 }
 0x65c   : > { %2297 = vmatpush1.bf16.msra.mxu0 %v5000_v15  ;;  %2338 = vmatpush1.bf16.msra.mxu1 %v5001_v46 }
 0x65d   : > { %2373 = vmatprep.subr.bf16.mxu0 %v5002_v40  ;;  %2414 = vmatprep.subr.bf16.mxu1 %v5003_v5 }
 0x6df   : > { %v2080_v22 = vpop.f32.mrf.mxu0  ;;  %v2121_v17 = vpop.f32.mrf.mxu1 }
 0x6e0   : > { %v2128_v18 = vadd.f32 %v2726_v49, %v2080_v22  ;;  %v2130_v12 = vadd.f32 %v2728_v59, %v2121_v17 }
 0x6e1   : > { %v2082_v33 = vpop.f32.mrf.mxu0  ;;  %v2123_v62 = vpop.f32.mrf.mxu1 }
 0x6e2   : > { %v2734_v56 = vmul.f32 -1.442695, %v2128_v18  ;;  %v2129_v34 = vadd.f32 %v2727_v48, %v2082_v33  ;;  %v2736_v39 = vmul.f32 -1.442695, %v2130_v12  ;;  %v2131_v36 = vadd.f32 %v2729_v38, %v2123_v62 }
 0x6e3   : > { %v2084_v41 = vpop.f32.mrf.mxu0  ;;  %v2125_v20 = vpop.f32.mrf.mxu1 }
 0x6e4   : > { %3054 = vpow2.f32 %v2734_v56  ;;  %v2735_v44 = vmul.f32 -1.442695, %v2129_v34  ;;  %v2732_v34 = vld [vmem:[%s3257_s27 + $0x30] sm:$0xff]  ;;  %v2733_v20 = vld [vmem:[%s3257_s27 + $0x38] sm:$0xff] }
 0x6e5   : > { %v2085_v60 = vpop.f32.mrf.mxu0  ;;  %v2126_v4 = vpop.f32.mrf.mxu1 }
 0x6e6   : > { %3056 = vpow2.f32 %v2735_v44 }
 0x6e7   : > { %3058 = vpow2.f32 %v2736_v39 }
 0x6f1   : > { %v3055_v11 = vpop.eup %3054 }
 0x6f2   : > { %v2233_v19 = vadd.f32 1.0, %v3055_v11 }
 0x6f3   : > { %v3057_v32 = vpop.eup %3056 }
 0x6f4   : > { %3060 = vrcp.f32 %v2233_v19  ;;  %v2234_v28 = vadd.f32 1.0, %v3057_v32  ;;  %v3059_v61 = vpop.eup %3058 }
 0x6f5   : > { %3062 = vtanh.f32 %v2131_v36  ;;  %v2235_v5 = vadd.f32 1.0, %v3059_v61  ;;  %v3196_v61 = vld [vmem:[%s4747_s3 + $0xa4] ss:$16 sps:$4 sm:$0xff]  }
 0x6f6   : > { %3064 = vrcp.f32 %v2234_v28  ;;  %v3191_v28 = vld [vmem:[%s4747_s3 + $0xe0] ss:$16 sps:$4 sm:$0xff]  }
 0x6ff   : > { %v2172_v27 = vpop.f32.mrf.mxu0  ;;  %v2213_v63 = vpop.f32.mrf.mxu1 }
 0x700   : > { %v2220_v25 = vadd.f32 %v2730_v13, %v2172_v27  ;;  %v2222_v41 = vadd.f32 %v2732_v34, %v2213_v63  ;;  %v3192_v13 = vld [vmem:[%s4747_s3 + $0xe8] ss:$16 sps:$4 sm:$0xff]   ;;  %v3194_v27 = vld [vmem:[%s4747_s3 + $0xcc] ss:$16 sps:$4 sm:$0xff]   ;;  %v3195_v63 = vld [vmem:[%s4747_s3 + $0xc0] ss:$16 sps:$4 sm:$0xff]  }
 0x701   : > { %v3061_v14 = vpop.eup %3060  ;;  %v2174_v21 = vpop.f32.mrf.mxu0 }
 0x702   : > { %v2215_v37 = vpop.f32.mrf.mxu1  ;;  %v3063_v42 = vpop.eup %3062  ;;  %v2737_v15 = vmul.f32 -1.442695, %v2220_v25  ;;  %v2221_v46 = vadd.f32 %v2731_v29, %v2174_v21  ;;  %v2739_v44 = vmul.f32 -1.442695, %v2222_v41  ;;  %v2368_v41 = vld [vmem:[%s3257_s27] sm:$0xff] }
 0x703   : > { %v3065_v40 = vpop.eup %3064  ;;  %v2176_v49 = vpop.f32.mrf.mxu0  ;;  %v2244_v48 = vmul.f32 %v3063_v42, %v3061_v14  ;;  %v2223_v4 = vadd.f32 %v2733_v20, %v2215_v37 }
 0x704   : > { %v2217_v22 = vpop.f32.mrf.mxu1  ;;  %v2243_v17 = vmul.f32 %v3065_v40, %v4505_v58  ;;  %3066 = vpow2.f32 %v2737_v15  ;;  %v2738_v18 = vmul.f32 -1.442695, %v2221_v46  ;;  %v3198_v15 = vld [vmem:[%s4747_s3 + $0x84] ss:$16 sps:$4 sm:$0xff]   ;;  %v3199_v46 = vld [vmem:[%s4747_s3 + $0x80] ss:$16 sps:$4 sm:$0xff]  }
 0x705   : > { %v2177_v33 = vpop.f32.mrf.mxu0  ;;  %v2743_v22 = vld [vmem:[%s3252_s23 + $0xf8] sm:$0xff] }
 0x706   : > { %v2218_v62 = vpop.f32.mrf.mxu1  ;;  %v4623_v56 = vadd.f32 %v2244_v48, %v2243_v17  ;;  %3068 = vpow2.f32 %v2738_v18 }
 0x707   : > { %3070 = vrcp.f32 %v2235_v5  ;;  %v2742_v5 = vld [vmem:[%s3252_s23 + $0xf0] sm:$0xff] }
 0x708   : > { %3072 = vtanh.f32 %v4623_v56 }
 0x709   : > { %3074 = vpow2.f32 %v2739_v44 }
 0x711   : > { %v3067_v60 = vpop.eup %3066 }
 0x712   : > { %v2257_v59 = vadd.f32 1.0, %v3067_v60  ;;  %v2369_v60 = vld [vmem:[%s3257_s27 + $0x8] sm:$0xff] }
 0x713   : > { %v3069_v12 = vpop.eup %3068 }
 0x714   : > { %v3071_v58 = vpop.eup %3070  ;;  %3076 = vrcp.f32 %v2257_v59  ;;  %v2258_v38 = vadd.f32 1.0, %v3069_v12 }
 0x715   : > { %v3073_v39 = vpop.eup %3072  ;;  %3078 = vtanh.f32 %v2223_v4 }
 0x716   : > { %3080 = vrcp.f32 %v2258_v38  ;;  %v4628_v11 = vmul.f32 %v3073_v39, %v3071_v58  ;;  %v3075_v29 = vpop.eup %3074 }
 0x717   : > { %v2259_v37 = vadd.f32 1.0, %v3075_v29 }
 0x718   : > { %v2272_v36 = vmax.f32 %v4513_v35, %v4628_v11  ;;  %v4634_v19 = vadd.f32 %v4628_v11, %v4516_v47  ;;  %v2281_v32 = vpack.c.bf16 %v4628_v11, %v4628_v11  ;;  %v3193_v47 = vld [vmem:[%s4747_s3 + $0xc4] ss:$16 sps:$4 sm:$0xff]  }
 0x719   : > { %3082 = vrcp.f32 %v2259_v37 }
 0x71a   : > { %2315 = vmatmul.mubr.bf16.vlgmr.msra.gmra.mxu0 %v2281_v32  ;;  %2356 = vmatmul.mubr.bf16.vlgmr.msra.gmra.mxu1 %v2281_v32 }
 0x71b   : > { %2374 = vmatpush1.bf16.msra.mxu0 %v3191_v28  ;;  %2415 = vmatpush1.bf16.msra.mxu1 %v3192_v13 }
 0x71c   : > { %2375 = vmatprep.subr.bf16.mxu0 %v3193_v47  ;;  %2416 = vmatprep.subr.bf16.mxu1 %v3194_v27 }
 0x71d   : > { %2405 = vmatprep.mubr.bf16.mxu0 %v4869_v0  ;;  %2446 = vmatprep.mubr.bf16.mxu1 %v4869_v0  ;;  %v3197_v0 = vld [vmem:[%s4747_s3 + $0xa0] ss:$16 sps:$4 sm:$0xff]  }
 0x71f   : > { %2376 = vmatpush1.bf16.msra.mxu0 %v3195_v63  ;;  %2417 = vmatpush1.bf16.msra.mxu1 %v4224_v7 }
 0x720   : > { %2377 = vmatprep.subr.bf16.mxu0 %v3196_v61  ;;  %2418 = vmatprep.subr.bf16.mxu1 %v4231_v2 }
 0x721   : > { %v3077_v25 = vpop.eup %3076 }
 0x722   : > { %v3079_v14 = vpop.eup %3078 }
 0x723   : > { %v3081_v21 = vpop.eup %3080  ;;  %2378 = vmatpush1.bf16.msra.mxu0 %v3197_v0  ;;  %2419 = vmatpush1.bf16.msra.mxu1 %v4238_v24  ;;  %v2268_v42 = vmul.f32 %v3079_v14, %v3077_v25  ;;  %v3200_v24 = vld [vmem:[%s4747_s3 + $0x64] ss:$16 sps:$4 sm:$0xff]  }
 0x724   : > { %v2267_v7 = vmul.f32 %v3081_v21, %v4533_v50  ;;  %2379 = vmatprep.subr.bf16.mxu0 %v3198_v15  ;;  %2420 = vmatprep.subr.bf16.mxu1 %v4246_v55  ;;  %v2370_v0 = vld [vmem:[%s3257_s27 + $0x10] sm:$0xff] }
 0x726   : > { %v4669_v2 = vadd.f32 %v2268_v42, %v2267_v7  ;;  %v3083_v55 = vpop.eup %3082  ;;  %v2371_v42 = vld [vmem:[%s3257_s27 + $0x18] sm:$0xff] }
 0x727   : > { %2380 = vmatpush1.bf16.msra.mxu0 %v3199_v46  ;;  %2421 = vmatpush1.bf16.msra.mxu1 %v4255_v45 }
 0x728   : > { %3084 = vtanh.f32 %v4669_v2  ;;  %2381 = vmatprep.subr.bf16.mxu0 %v3200_v24  ;;  %2422 = vmatprep.subr.bf16.mxu1 %v4263_v9 }
 0x72b   : > { %2382 = vmatpush1.bf16.msra.mxu0 %v4269_v53  ;;  %2423 = vmatpush1.bf16.msra.mxu1 %v4275_v43 }
 0x72c   : > { %2383 = vmatprep.subr.bf16.mxu0 %v4281_v52  ;;  %2424 = vmatprep.subr.bf16.mxu1 %v4287_v57  ;;  %v2740_v57 = vld [vmem:[%s3252_s23 + $0xe0] sm:$0xff] }
 0x72f   : > { %2384 = vmatpush1.bf16.msra.mxu0 %v4293_v8  ;;  %2425 = vmatpush1.bf16.msra.mxu1 %v4299_v3 }
 0x730   : > { %2385 = vmatprep.subr.bf16.mxu0 %v4305_v30  ;;  %2426 = vmatprep.subr.bf16.mxu1 %v4311_v6  ;;  %v2741_v30 = vld [vmem:[%s3252_s23 + $0xe8] sm:$0xff] }
 0x733   : > { %2386 = vmatpush1.bf16.msra.mxu0 %v4317_v10  ;;  %2427 = vmatpush1.bf16.msra.mxu1 %v4323_v31 }
 0x734   : > { %2387 = vmatprep.subr.bf16.mxu0 %v4951_v23  ;;  %2428 = vmatprep.subr.bf16.mxu1 %v4952_v1 }
 0x735   : > { %v3085_v45 = vpop.eup %3084 }
 0x736   : > { %v4692_v9 = vmul.f32 %v3085_v45, %v3083_v55 }
 0x737   : > { %2388 = vmatpush1.bf16.msra.mxu0 %v4341_v16  ;;  %2429 = vmatpush1.bf16.msra.mxu1 %v4347_v26 }
 0x738   : > { %v2273_v53 = vmax.f32 %v4557_v51, %v4692_v9  ;;  %v4700_v43 = vadd.f32 %v4692_v9, %v4560_v54  ;;  %v2372_v52 = vpack.c.bf16 %v4692_v9, %v4692_v9 }
 0x73a   : > { %2406 = vmatmul.mubr.bf16.vlgmr.msra.gmra.mxu0 %v2372_v52  ;;  %2447 = vmatmul.mubr.bf16.vlgmr.msra.gmra.mxu1 %v2372_v52 }
 0x7da   : > { %v2316_v8 = vpop.f32.mrf.mxu0  ;;  %v2357_v3 = vpop.f32.mrf.mxu1 }
 0x7db   : > { %v2364_v6 = vadd.f32 %v2740_v57, %v2316_v8  ;;  %v2366_v49 = vadd.f32 %v2742_v5, %v2357_v3 }
 0x7dc   : > { %v2318_v10 = vpop.f32.mrf.mxu0  ;;  %v2359_v31 = vpop.f32.mrf.mxu1 }
 0x7dd   : > { %v2744_v16 = vmul.f32 -1.442695, %v2364_v6  ;;  %v2365_v26 = vadd.f32 %v2741_v30, %v2318_v10  ;;  %v2746_v17 = vmul.f32 -1.442695, %v2366_v49  ;;  %v2367_v18 = vadd.f32 %v2743_v22, %v2359_v31 }
 0x7de   : > { %v2320_v23 = vpop.f32.mrf.mxu0  ;;  %v2361_v1 = vpop.f32.mrf.mxu1 }
 0x7df   : > { %3086 = vpow2.f32 %v2744_v16  ;;  %v2745_v50 = vmul.f32 -1.442695, %v2365_v26 }
 0x7e0   : > { %v2321_v54 = vpop.f32.mrf.mxu0  ;;  %v2362_v40 = vpop.f32.mrf.mxu1 }
 0x7e1   : > { %3088 = vpow2.f32 %v2745_v50 }
 0x7e2   : > { %3090 = vpow2.f32 %v2746_v17 }
 0x7ec   : > { %v3087_v48 = vpop.eup %3086 }
 0x7ed   : > { %v2468_v33 = vadd.f32 1.0, %v3087_v48 }
 0x7ee   : > { %v3089_v62 = vpop.eup %3088 }
 0x7ef   : > { %3092 = vrcp.f32 %v2468_v33  ;;  %v2469_v34 = vadd.f32 1.0, %v3089_v62  ;;  %v3091_v4 = vpop.eup %3090 }
 0x7f0   : > { %3094 = vtanh.f32 %v2367_v18  ;;  %v2470_v47 = vadd.f32 1.0, %v3091_v4 }
 0x7f1   : > { %3096 = vrcp.f32 %v2469_v34 }
 0x7fa   : > { %v2407_v20 = vpop.f32.mrf.mxu0  ;;  %v2448_v44 = vpop.f32.mrf.mxu1 }
 0x7fb   : > { %v2455_v59 = vadd.f32 %v2407_v20, %v2368_v41  ;;  %v2457_v7 = vadd.f32 %v2448_v44, %v2370_v0 }
 0x7fc   : > { %v3093_v12 = vpop.eup %3092  ;;  %v2409_v58 = vpop.f32.mrf.mxu0 }
 0x7fd   : > { %v2450_v38 = vpop.f32.mrf.mxu1  ;;  %v3095_v39 = vpop.eup %3094  ;;  %v2747_v32 = vmul.f32 -1.442695, %v2455_v59  ;;  %v2456_v28 = vadd.f32 %v2409_v58, %v2369_v60  ;;  %v2749_v15 = vmul.f32 -1.442695, %v2457_v7 }
 0x7fe   : > { %v3097_v13 = vpop.eup %3096  ;;  %v2411_v27 = vpop.f32.mrf.mxu0  ;;  %v2479_v61 = vmul.f32 %v3095_v39, %v3093_v12  ;;  %v2458_v24 = vadd.f32 %v2450_v38, %v2371_v42 }
 0x7ff   : > { %v2452_v63 = vpop.f32.mrf.mxu1  ;;  %v2478_v29 = vmul.f32 %v3097_v13, %v4623_v56  ;;  %3098 = vpow2.f32 %v2747_v32  ;;  %v2748_v25 = vmul.f32 -1.442695, %v2456_v28 }
 0x800   : > { %v2412_v14 = vpop.f32.mrf.mxu0 }
 0x801   : > { %v2453_v21 = vpop.f32.mrf.mxu1  ;;  %v2480_v37 = vadd.f32 %v2479_v61, %v2478_v29  ;;  %3100 = vpow2.f32 %v2748_v25 }
 0x802   : > { %3102 = vrcp.f32 %v2470_v47 }
 0x803   : > { %3104 = vtanh.f32 %v2480_v37  ;;  %2512 = vst [vmem:[#allocation3] sm:$0xff] %v2480_v37 }
 0x804   : > { %3106 = vpow2.f32 %v2749_v15 }
 0x80c   : > { %v3099_v46 = vpop.eup %3098 }
 0x80d   : > { %v2492_v55 = vadd.f32 1.0, %v3099_v46 }
 0x80e   : > { %v3101_v45 = vpop.eup %3100 }
 0x80f   : > { %v3103_v56 = vpop.eup %3102  ;;  %3108 = vrcp.f32 %v2492_v55  ;;  %v2493_v52 = vadd.f32 1.0, %v3101_v45 }
 0x810   : > { %v3105_v57 = vpop.eup %3104  ;;  %3110 = vtanh.f32 %v2458_v24 }
 0x811   : > { %v2482_v8 = vmul.f32 %v3105_v57, %v3103_v56  ;;  %3112 = vrcp.f32 %v2493_v52  ;;  %v3107_v6 = vpop.eup %3106 }
 0x812   : > { %v2494_v26 = vadd.f32 1.0, %v3107_v6 }
 0x813   : > { %v2507_v3 = vmax.f32 %v2272_v36, %v2482_v8  ;;  %v2509_v30 = vadd.f32 %v2482_v8, %v4634_v19  ;;  %2511 = vst [vmem:[#allocation2] sm:$0xff] %v2482_v8 }
 0x814   : > { %3114 = vrcp.f32 %v2494_v26 }
 0x815   : > { %2515 = vst [vmem:[#allocation6] sm:$0xff] %v2507_v3  ;;  %2517 = vst [vmem:[#allocation8] sm:$0xff] %v2509_v30 }
 0x81c   : > { %v3109_v10 = vpop.eup %3108 }
 0x81d   : > { %v3111_v31 = vpop.eup %3110 }
 0x81e   : > { %v3113_v16 = vpop.eup %3112  ;;  %v2503_v1 = vmul.f32 %v3111_v31, %v3109_v10 }
 0x81f   : > { %v2502_v23 = vmul.f32 %v3113_v16, %v4669_v2 }
 0x821   : > { %v2504_v50 = vadd.f32 %v2503_v1, %v2502_v23  ;;  %v3115_v54 = vpop.eup %3114 }
 0x823   : > { %3116 = vtanh.f32 %v2504_v50  ;;  %2514 = vst [vmem:[#allocation5] sm:$0xff] %v2504_v50 }
 0x830   : > { %v3117_v35 = vpop.eup %3116 }
 0x831   : > { %v2506_v11 = vmul.f32 %v3117_v35, %v3115_v54  ;;  %2522 = sbr.rel (%p2750_p6) target bundleno = 2105 (0x839), region = 44 }
 0x833   : > { %v2508_v36 = vmax.f32 %v2273_v53, %v2506_v11  ;;  %v2510_v19 = vadd.f32 %v2506_v11, %v4700_v43  ;;  %2513 = vst [vmem:[#allocation4] sm:$0xff] %v2506_v11 }
 0x835   : > { %2516 = vst [vmem:[#allocation7] sm:$0xff] %v2508_v36  ;;  %2518 = vst [vmem:[#allocation9] sm:$0xff] %v2510_v19 }
 0x836   : > { %2523 = vst [vmem:[%s4748_s4] sm:$0xff] %v2506_v11  ;;  %2524 = vst [vmem:[%s4748_s4 + $0x8] sm:$0xff] %v2482_v8  ;;  %v2527_v51 = vmul.f32 0.0625, %v2509_v30  ;;  %v2529_v2 = vmul.f32 0.0625, %v2510_v19 }
 0x837   : > { %2525 = vst [vmem:[%s4748_s4 + $0x10] sm:$0xff] %v2507_v3  ;;  %2526 = vst [vmem:[%s4748_s4 + $0x18] sm:$0xff] %v2508_v36 }
 0x838   : > { %2528 = vst [vmem:[%s4748_s4 + $0x20] sm:$0xff] %v2527_v51  ;;  %2530 = vst [vmem:[%s4748_s4 + $0x28] sm:$0xff] %v2529_v2 }
 0x839 PF: > { %s14_s15 = sadd.s32 1, %s3207_s15  }
 0x83a   : > { %p11_p7 = scmp.ge.s32.totalorder %s14_s15, 4  }
 0x83c   :  { %13 = sbr.rel (!%p11_p7) target bundleno = 1 (0x1), region = 87 }

// kernel: lstm_model_forward.3
= control target key start
LH: loop header
LB: loop body
LE: loop exit
PB: predicated region body
PF: predicated region fallthrough
CT: control target
= control target key end

     0   :  { %11 = vsyncpa [#allocation7], 0  ;;  %s4500_s0 = inlined_call_operand.vmem [shape: f32[16,8,512], index: 0, kind: input, shape index: {}]   ;;  %s4501_s1 = inlined_call_operand.vmem [shape: f32[16,8,512], index: 1, kind: input, shape index: {}]   ;;  %s4502_s2 = inlined_call_operand.hbm [shape: bf16[128,512], index: 2, kind: input, shape index: {}]   ;;  %s4503_s3 = inlined_call_operand.hbm [shape: bf16[128,512], index: 3, kind: input, shape index: {}]   ;;  %s4504_s4 = inlined_call_operand.vmem [shape: bf16[16,8,128], index: 4, kind: output, shape index: {0}]   ;;  %s4505_s5 = inlined_call_operand.vmem [shape: bf16[16,8,128], index: 5, kind: output, shape index: {1}]  }
   0x1   :  { %12 = vsyncpa [#allocation9], 0  ;;  %s3495_s18 = smov 0  }
   0x2 LB: > { %s3501_s19 = sadd.s32 4294967295, %s3457_s18   ;;  %p2728_p0 = scmp.ge.s32.totalorder %s3457_s18, 1  ;;  %s3457_s18 = sphi %s3495_s18, %s18_s18  }
   0x3   : > { %p173_p1 = scmp.lt.s32.totalorder %s3457_s18, 3  ;;  %s3459_s20 = smov [#allocation6]  }
   0x4   : > { %s185_s21 = sshll.u32 %s3459_s20, 4  ;;  %p2947_p4 = scmp.eq.s32.totalorder %s3501_s19, 0  ;;  %s186_s21 = int_to_ptr.vmem [resolvable:$true] %s185_s21 }
   0x5   : > { %p3506_p3 = pnand %p2728_p0, %p173_p1  ;;  %s3460_s23 = smov [#allocation8]  }
   0x6   : > { %s198_s24 = sshll.u32 %s3460_s23, 4  ;;  %s3402_s26 = scalar_lea.vmem %s186_s21, 4096  ;;  %s199_s24 = int_to_ptr.vmem [resolvable:$true] %s198_s24 }
   0x7   : > { %p2940_p5 = pneg %p3506_p3  ;;  %p3403_p8 = scmp.ne.s32.totalorder %s186_s21, %s3402_s26 }
   0x8   : > { %p3410_p11 = scmp.lt.s32.totalorder %s186_s21, %s186_s21  ;;  %p3411_p12 = scmp.lt.s32.totalorder %s3402_s26, %s3402_s26 }
   0x9   : > { %p3515_p6 = pnand %p2947_p4, %p2940_p5 }
   0xa   : > { %p3412_p13 = por %p3411_p12, %p3410_p11 }
   0xb   : > { %p3393_p7 = pneg %p3515_p6 }
   0xd   : > { %p3405_p9 = pnand %p3403_p8, %p3393_p7 }
   0xf   : > { %p3406_p10 = pneg %p3405_p9 }
  0x11   : > { %p3413_p0 = pnand %p3412_p13, %p3406_p10 }
  0x13   : > { %3416 = shalt.err (!%p3413_p0)
}
  0x14   : > { %s3461_s27 = smov 256   ;;  %s3462_s28 = smov 16  }
  0x15   : > { %2943 = dma.hbm_to_vmem [thread:$0]  (!%p3515_p6), %s4502_s2, 4096, %s186_s21, [#allocation7], %s3461_s27, %s3461_s27, %s3462_s28  }
  0x16   : > { %s3428_s6 = scalar_lea.vmem %s199_s24, 4096  ;;  %p3436_p9 = scmp.lt.s32.totalorder %s199_s24, %s199_s24 }
  0x17   : > { %p3429_p1 = scmp.ne.s32.totalorder %s199_s24, %s3428_s6  ;;  %p3437_p2 = scmp.lt.s32.totalorder %s3428_s6, %s3428_s6 }
  0x19   : > { %p3431_p5 = pnand %p3429_p1, %p3393_p7  ;;  %p3438_p11 = por %p3437_p2, %p3436_p9 }
  0x1b   : > { %p3432_p8 = pneg %p3431_p5 }
  0x1d   : > { %p3439_p10 = pnand %p3438_p11, %p3432_p8 }
  0x1f   : > { %3442 = shalt.err (!%p3439_p10)
}
  0x20   : > { %2946 = dma.hbm_to_vmem [thread:$0]  (!%p3515_p6), %s4503_s3, 4096, %s199_s24, [#allocation9], %s3461_s27, %s3461_s27, %s3462_s28  }
  0x21   : > { %236 = sbr.rel (%p3506_p3) target bundleno = 2132 (0x854), region = 36 }
  0x26   : > { %3448 = dma.done.wait (%p2947_p4), [#allocation7], 4096  }
  0x27   : > { %3450 = vsyncadd (%p2947_p4), [#allocation7], 4294963200 }
  0x28   : > { %3452 = dma.done.wait (%p2947_p4), [#allocation9], 4096  }
  0x29   : > { %3454 = vsyncadd (%p2947_p4), [#allocation9], 4294963200  ;;  %s2735_s9 = sshll.u32 %s3501_s19, 3  ;;  %s289_s10 = ssub.s32 1, %s3501_s19 }
  0x2a   : > { %p283_p2 = scmp.lt.s32.totalorder %s2735_s9, 15  ;;  %s2738_s11 = sshll.u32 %s289_s10, 3 }
  0x2b   : > { %p291_p6 = scmp.lt.s32.totalorder %s2738_s11, 15  ;;  %p4601_p3 = scmp.ne.s32.totalorder %s3501_s19, 0 }
  0x2c   : > { %s4731_s9 = smov (!%p283_p2, %s2735_s9), 15 }
  0x2d   : > { %s4733_s11 = smov (!%p291_p6, %s2738_s11), 15  ;;  %s2930_s12 = sshll.u32 %s4731_s9, 5 }
  0x2e   : > { %s2742_s13 = sshll.u32 %s4731_s9, 2  ;;  %s3552_s16 = scalar_lea.vmem %s4500_s0, %s2930_s12 }
  0x2f   : > { %s2931_s17 = sshll.u32 %s4733_s11, 5  ;;  %s3562_s25 = scalar_lea.vmem %s4504_s4, %s2742_s13 }
  0x30   : > { %s3557_s22 = scalar_lea.vmem %s4501_s1, %s2931_s17  ;;  %s2744_s26 = sshll.u32 %s4733_s11, 2 }
  0x31   : > { %s3567_s29 = scalar_lea.vmem %s4505_s5, %s2744_s26  ;;  %316 = sbr.rel (%p4601_p3) target bundleno = 57 (0x39), region = 48 }
  0x36   : > { %v3463_v0 = vmov 0.0  }
  0x37   : > { %317 = vst [vmem:[#allocation2] sm:$0xff] %v3463_v0  ;;  %318 = vst [vmem:[#allocation3] sm:$0xff] %v3463_v0 }
  0x38   : > { %319 = vst [vmem:[#allocation4] sm:$0xff] %v3463_v0  ;;  %320 = vst [vmem:[#allocation5] sm:$0xff] %v3463_v0 }
  0x39 PF: > { %v3571_v1 = vld [vmem:[#allocation6 + $0xe4] ss:$16 sps:$4 sm:$0xff]   ;;  %v3573_v2 = vld [vmem:[#allocation6 + $0xe0] ss:$16 sps:$4 sm:$0xff]   ;;  %v4506_v3 = vmov 0  }
  0x3a   : > { %586 = vmatprep.mubr.bf16.mxu0 %v4506_v3  ;;  %627 = vmatprep.mubr.bf16.mxu1 %v4506_v3  ;;  %v3578_v4 = vld [vmem:[#allocation6 + $0xc4] ss:$16 sps:$4 sm:$0xff]   ;;  %v3581_v5 = vld [vmem:[#allocation6 + $0xc0] ss:$16 sps:$4 sm:$0xff]   ;;  %v3586_v7 = vld [vmem:[#allocation6 + $0xec] ss:$16 sps:$4 sm:$0xff]  }
  0x3b   : > { %554 = vmatprep.subr.bf16.mxu0 %v3571_v1  ;;  %v3584_v6 = vld [vmem:[#allocation6 + $0xa4] ss:$16 sps:$4 sm:$0xff]   ;;  %v3588_v8 = vld [vmem:[#allocation6 + $0xe8] ss:$16 sps:$4 sm:$0xff]   ;;  %v3591_v9 = vld [vmem:[#allocation6 + $0xa0] ss:$16 sps:$4 sm:$0xff]   ;;  %595 = vmatprep.subr.bf16.mxu1 %v3586_v7 }
  0x3c   : > { %555 = vmatpush1.bf16.msra.mxu0 %v3573_v2  ;;  %v3595_v10 = vld [vmem:[#allocation6 + $0x84] ss:$16 sps:$4 sm:$0xff]   ;;  %596 = vmatpush1.bf16.msra.mxu1 %v3588_v8  ;;  %v3598_v11 = vld [vmem:[#allocation6 + $0xcc] ss:$16 sps:$4 sm:$0xff]   ;;  %v3600_v12 = vld [vmem:[#allocation6 + $0xc8] ss:$16 sps:$4 sm:$0xff]  }
  0x3d   : > { %556 = vmatprep.subr.bf16.mxu0 %v3578_v4  ;;  %597 = vmatprep.subr.bf16.mxu1 %v3598_v11  ;;  %v3604_v13 = vld [vmem:[#allocation6 + $0x80] ss:$16 sps:$4 sm:$0xff]   ;;  %v3606_v14 = vld [vmem:[#allocation6 + $0x64] ss:$16 sps:$4 sm:$0xff]   ;;  %v3608_v15 = vld [vmem:[#allocation6 + $0xac] ss:$16 sps:$4 sm:$0xff]  }
  0x3e   : > { %4602 = vst [vmem:[#allocation12_spill] sm:$0xff] %v3606_v14  ;;  %v3612_v16 = vld [vmem:[#allocation6 + $0xa8] ss:$16 sps:$4 sm:$0xff]   ;;  %v3615_v17 = vld [vmem:[#allocation6 + $0x8c] ss:$16 sps:$4 sm:$0xff]   ;;  %v385_v31 = vld [vmem:[#allocation2] sm:$0xff] }
  0x3f   : > { %v3618_v18 = vld [vmem:[#allocation6 + $0x60] ss:$16 sps:$4 sm:$0xff]   ;;  %v3621_v19 = vld [vmem:[#allocation6 + $0x44] ss:$16 sps:$4 sm:$0xff]   ;;  %v3624_v20 = vld [vmem:[#allocation6 + $0x88] ss:$16 sps:$4 sm:$0xff]   ;;  %v393_v35 = vpack.c.bf16 %v385_v31, %v385_v31 }
  0x40   : > { %557 = vmatpush1.bf16.msra.mxu0 %v3581_v5  ;;  %598 = vmatpush1.bf16.msra.mxu1 %v3600_v12  ;;  %4603 = vst [vmem:[#allocation13_spill] sm:$0xff] %v3618_v18  ;;  %4604 = vst [vmem:[#allocation14_spill] sm:$0xff] %v3621_v19  ;;  %v3627_v21 = vld [vmem:[#allocation6 + $0x6c] ss:$16 sps:$4 sm:$0xff]   ;;  %v3630_v22 = vld [vmem:[#allocation6 + $0x40] ss:$16 sps:$4 sm:$0xff]  }
  0x41   : > { %558 = vmatprep.subr.bf16.mxu0 %v3584_v6  ;;  %599 = vmatprep.subr.bf16.mxu1 %v3608_v15  ;;  %4605 = vst [vmem:[#allocation15_spill] sm:$0xff] %v3627_v21  ;;  %4606 = vst [vmem:[#allocation16_spill] sm:$0xff] %v3630_v22  ;;  %v3632_v23 = vld [vmem:[#allocation6 + $0x24] ss:$16 sps:$4 sm:$0xff]   ;;  %v3636_v24 = vld [vmem:[#allocation6 + $0x68] ss:$16 sps:$4 sm:$0xff]  }
  0x42   : > { %4607 = vst [vmem:[#allocation17_spill] sm:$0xff] %v3632_v23  ;;  %4608 = vst [vmem:[#allocation18_spill] sm:$0xff] %v3636_v24  ;;  %v3639_v25 = vld [vmem:[#allocation6 + $0x4c] ss:$16 sps:$4 sm:$0xff]   ;;  %v3641_v26 = vld [vmem:[#allocation6 + $0x20] ss:$16 sps:$4 sm:$0xff]  }
  0x43   : > { %4609 = vst [vmem:[#allocation19_spill] sm:$0xff] %v3639_v25  ;;  %4610 = vst [vmem:[#allocation20_spill] sm:$0xff] %v3641_v26  ;;  %v3644_v27 = vld [vmem:[#allocation6 + $0x4] ss:$16 sps:$4 sm:$0xff]   ;;  %v3648_v28 = vld [vmem:[#allocation6 + $0x48] ss:$16 sps:$4 sm:$0xff]  }
  0x44   : > { %559 = vmatpush1.bf16.msra.mxu0 %v3591_v9  ;;  %600 = vmatpush1.bf16.msra.mxu1 %v3612_v16  ;;  %4611 = vst [vmem:[#allocation21_spill] sm:$0xff] %v3644_v27  ;;  %4612 = vst [vmem:[#allocation22_spill] sm:$0xff] %v3648_v28  ;;  %v3651_v29 = vld [vmem:[#allocation6 + $0x2c] ss:$16 sps:$4 sm:$0xff]   ;;  %v3653_v30 = vld [vmem:[#allocation6] ss:$16 sps:$4 sm:$0xff]  }
  0x45   : > { %560 = vmatprep.subr.bf16.mxu0 %v3595_v10  ;;  %601 = vmatprep.subr.bf16.mxu1 %v3615_v17  ;;  %4613 = vst [vmem:[#allocation23_spill] sm:$0xff] %v3651_v29  ;;  %4614 = vst [vmem:[#allocation24_spill] sm:$0xff] %v3653_v30  ;;  %v3656_v32 = vld [vmem:[#allocation8 + $0xe4] ss:$16 sps:$4 sm:$0xff]   ;;  %v3660_v33 = vld [vmem:[#allocation6 + $0x28] ss:$16 sps:$4 sm:$0xff]  }
  0x46   : > { %4615 = vst [vmem:[#allocation25_spill] sm:$0xff] %v3656_v32  ;;  %4616 = vst [vmem:[#allocation26_spill] sm:$0xff] %v3660_v33  ;;  %v3663_v34 = vld [vmem:[#allocation6 + $0xc] ss:$16 sps:$4 sm:$0xff]   ;;  %v3665_v36 = vld [vmem:[#allocation8 + $0xe0] ss:$16 sps:$4 sm:$0xff]  }
  0x47   : > { %4617 = vst [vmem:[#allocation27_spill] sm:$0xff] %v3663_v34  ;;  %v3668_v37 = vld [vmem:[#allocation8 + $0xc4] ss:$16 sps:$4 sm:$0xff]   ;;  %v3672_v38 = vld [vmem:[#allocation6 + $0x8] ss:$16 sps:$4 sm:$0xff]  }
  0x48   : > { %561 = vmatpush1.bf16.msra.mxu0 %v3604_v13  ;;  %602 = vmatpush1.bf16.msra.mxu1 %v3624_v20  ;;  %4618 = vst [vmem:[#allocation28_spill] sm:$0xff] %v3672_v38  ;;  %v3675_v39 = vld [vmem:[#allocation8 + $0xec] ss:$16 sps:$4 sm:$0xff]   ;;  %v3678_v40 = vld [vmem:[#allocation8 + $0xc0] ss:$16 sps:$4 sm:$0xff]  }
  0x49   : > { %562 = vmatprep.subr.bf16.mxu0 %v3606_v14  ;;  %603 = vmatprep.subr.bf16.mxu1 %v3627_v21  ;;  %4619 = vst [vmem:[#allocation29_spill] sm:$0xff] %v3675_v39  ;;  %v3680_v41 = vld [vmem:[#allocation8 + $0xa4] ss:$16 sps:$4 sm:$0xff]   ;;  %v3685_v42 = vld [vmem:[#allocation8 + $0xe8] ss:$16 sps:$4 sm:$0xff]  }
  0x4a   : > { %v3688_v43 = vld [vmem:[#allocation8 + $0xcc] ss:$16 sps:$4 sm:$0xff]   ;;  %v3691_v44 = vld [vmem:[#allocation8 + $0xa0] ss:$16 sps:$4 sm:$0xff]   ;;  %v3694_v45 = vld [vmem:[#allocation8 + $0x84] ss:$16 sps:$4 sm:$0xff]  }
  0x4b   : > { %v3697_v46 = vld [vmem:[#allocation8 + $0xc8] ss:$16 sps:$4 sm:$0xff]   ;;  %v3700_v47 = vld [vmem:[#allocation8 + $0xac] ss:$16 sps:$4 sm:$0xff]   ;;  %v3704_v48 = vld [vmem:[#allocation8 + $0x80] ss:$16 sps:$4 sm:$0xff]  }
  0x4c   : > { %563 = vmatpush1.bf16.msra.mxu0 %v3618_v18  ;;  %604 = vmatpush1.bf16.msra.mxu1 %v3636_v24  ;;  %v3707_v49 = vld [vmem:[#allocation8 + $0x64] ss:$16 sps:$4 sm:$0xff]   ;;  %v3710_v50 = vld [vmem:[#allocation8 + $0xa8] ss:$16 sps:$4 sm:$0xff]   ;;  %v3713_v51 = vld [vmem:[#allocation8 + $0x8c] ss:$16 sps:$4 sm:$0xff]  }
  0x4d   : > { %564 = vmatprep.subr.bf16.mxu0 %v3621_v19  ;;  %605 = vmatprep.subr.bf16.mxu1 %v3639_v25  ;;  %v3716_v52 = vld [vmem:[#allocation8 + $0x60] ss:$16 sps:$4 sm:$0xff]   ;;  %v3719_v53 = vld [vmem:[#allocation8 + $0x44] ss:$16 sps:$4 sm:$0xff]   ;;  %v3722_v54 = vld [vmem:[#allocation8 + $0x88] ss:$16 sps:$4 sm:$0xff]  }
  0x4e   : > { %v3725_v55 = vld [vmem:[#allocation8 + $0x6c] ss:$16 sps:$4 sm:$0xff]   ;;  %v3728_v56 = vld [vmem:[#allocation8 + $0x40] ss:$16 sps:$4 sm:$0xff]   ;;  %v3731_v57 = vld [vmem:[#allocation8 + $0x24] ss:$16 sps:$4 sm:$0xff]  }
  0x4f   : > { %4620 = vst [vmem:[#allocation30_spill] sm:$0xff] %v3728_v56  ;;  %4621 = vst [vmem:[#allocation31_spill] sm:$0xff] %v3731_v57  ;;  %v3734_v58 = vld [vmem:[#allocation8 + $0x68] ss:$16 sps:$4 sm:$0xff]   ;;  %v3737_v59 = vld [vmem:[#allocation8 + $0x4c] ss:$16 sps:$4 sm:$0xff]  }
  0x50   : > { %565 = vmatpush1.bf16.msra.mxu0 %v3630_v22  ;;  %606 = vmatpush1.bf16.msra.mxu1 %v3648_v28  ;;  %v3740_v60 = vld [vmem:[#allocation8 + $0x20] ss:$16 sps:$4 sm:$0xff]   ;;  %v3743_v61 = vld [vmem:[#allocation8 + $0x4] ss:$16 sps:$4 sm:$0xff]   ;;  %v3746_v62 = vld [vmem:[#allocation8 + $0x48] ss:$16 sps:$4 sm:$0xff]  }
  0x51   : > { %566 = vmatprep.subr.bf16.mxu0 %v3632_v23  ;;  %607 = vmatprep.subr.bf16.mxu1 %v3651_v29  ;;  %4622 = vst [vmem:[#allocation32_spill] sm:$0xff] %v3743_v61  ;;  %v3749_v63 = vld [vmem:[#allocation8 + $0x2c] ss:$16 sps:$4 sm:$0xff]   ;;  %v3752_v0 = vld [vmem:[#allocation8] ss:$16 sps:$4 sm:$0xff]  }
  0x52   : > { %v387_v31 = vld [vmem:[#allocation4] sm:$0xff] }
  0x54   : > { %567 = vmatpush1.bf16.msra.mxu0 %v3641_v26  ;;  %608 = vmatpush1.bf16.msra.mxu1 %v3660_v33 }
  0x55   : > { %568 = vmatprep.subr.bf16.mxu0 %v3644_v27  ;;  %609 = vmatprep.subr.bf16.mxu1 %v3663_v34 }
  0x58   : > { %569 = vmatpush1.bf16.msra.mxu0 %v3653_v30  ;;  %610 = vmatpush1.bf16.msra.mxu1 %v3672_v38 }
  0x59   : > { %806 = vmatprep.subr.bf16.mxu0 %v3656_v32  ;;  %847 = vmatprep.subr.bf16.mxu1 %v3675_v39 }
  0x5b   : > { %587 = vmatmul.mubr.bf16.vlgmr.msra.gmra.mxu0 %v393_v35  ;;  %628 = vmatmul.mubr.bf16.vlgmr.msra.gmra.mxu1 %v393_v35  ;;  %v3756_v35 = vld [vmem:[#allocation8 + $0x28] ss:$16 sps:$4 sm:$0xff]  }
  0x5c   : > { %807 = vmatpush1.bf16.msra.mxu0 %v3665_v36  ;;  %838 = vmatprep.mubr.bf16.mxu0 %v4506_v3 }
  0x5d   : > { %808 = vmatprep.subr.bf16.mxu0 %v3668_v37  ;;  %848 = vmatpush1.bf16.msra.mxu1 %v3685_v42 }
  0x5e   : > { %849 = vmatprep.subr.bf16.mxu1 %v3688_v43  ;;  %879 = vmatprep.mubr.bf16.mxu1 %v4506_v3  ;;  %v3759_v3 = vld [vmem:[#allocation8 + $0xc] ss:$16 sps:$4 sm:$0xff]  }
  0x60   : > { %809 = vmatpush1.bf16.msra.mxu0 %v3678_v40 }
  0x61   : > { %810 = vmatprep.subr.bf16.mxu0 %v3680_v41  ;;  %850 = vmatpush1.bf16.msra.mxu1 %v3697_v46 }
  0x62   : > { %851 = vmatprep.subr.bf16.mxu1 %v3700_v47 }
  0x64   : > { %811 = vmatpush1.bf16.msra.mxu0 %v3691_v44 }
  0x65   : > { %812 = vmatprep.subr.bf16.mxu0 %v3694_v45  ;;  %852 = vmatpush1.bf16.msra.mxu1 %v3710_v50 }
  0x66   : > { %853 = vmatprep.subr.bf16.mxu1 %v3713_v51 }
  0x68   : > { %813 = vmatpush1.bf16.msra.mxu0 %v3704_v48 }
  0x69   : > { %814 = vmatprep.subr.bf16.mxu0 %v3707_v49  ;;  %854 = vmatpush1.bf16.msra.mxu1 %v3722_v54 }
  0x6a   : > { %855 = vmatprep.subr.bf16.mxu1 %v3725_v55 }
  0x6c   : > { %815 = vmatpush1.bf16.msra.mxu0 %v3716_v52 }
  0x6d   : > { %816 = vmatprep.subr.bf16.mxu0 %v3719_v53  ;;  %856 = vmatpush1.bf16.msra.mxu1 %v3734_v58 }
  0x6e   : > { %857 = vmatprep.subr.bf16.mxu1 %v3737_v59 }
  0x70   : > { %817 = vmatpush1.bf16.msra.mxu0 %v3728_v56  ;;  %v3763_v56 = vld [vmem:[#allocation8 + $0x8] ss:$16 sps:$4 sm:$0xff]  }
  0x71   : > { %818 = vmatprep.subr.bf16.mxu0 %v3731_v57  ;;  %858 = vmatpush1.bf16.msra.mxu1 %v3746_v62  ;;  %v645_v57 = vpack.c.bf16 %v387_v31, %v387_v31 }
  0x72   : > { %859 = vmatprep.subr.bf16.mxu1 %v3749_v63 }
  0x74   : > { %819 = vmatpush1.bf16.msra.mxu0 %v3740_v60 }
  0x75   : > { %820 = vmatprep.subr.bf16.mxu0 %v3743_v61  ;;  %860 = vmatpush1.bf16.msra.mxu1 %v3756_v35  ;;  %v4623_v61 = vmov 0  }
  0x76   : > { %861 = vmatprep.subr.bf16.mxu1 %v3759_v3 }
  0x78   : > { %821 = vmatpush1.bf16.msra.mxu0 %v3752_v0 }
  0x79   : > { %950 = vmatprep.subr.bf16.mxu0 %v3571_v1  ;;  %862 = vmatpush1.bf16.msra.mxu1 %v3763_v56 }
  0x7a   : > { %991 = vmatprep.subr.bf16.mxu1 %v3586_v7 }
  0x7b   : > { %839 = vmatmul.mubr.bf16.vlgmr.msra.gmra.mxu0 %v645_v57 }
  0x7c   : > { %951 = vmatpush1.bf16.msra.mxu0 %v3573_v2  ;;  %982 = vmatprep.mubr.bf16.mxu0 %v4623_v61 }
  0x7d   : > { %952 = vmatprep.subr.bf16.mxu0 %v3578_v4  ;;  %880 = vmatmul.mubr.bf16.vlgmr.msra.gmra.mxu1 %v645_v57  ;;  %v389_v57 = vld [vmem:[%s3552_s16] sm:$0xff] }
  0x7e   : > { %992 = vmatpush1.bf16.msra.mxu1 %v3588_v8  ;;  %1023 = vmatprep.mubr.bf16.mxu1 %v4623_v61 }
  0x7f   : > { %993 = vmatprep.subr.bf16.mxu1 %v3598_v11 }
  0x80   : > { %953 = vmatpush1.bf16.msra.mxu0 %v3581_v5 }
  0x81   : > { %954 = vmatprep.subr.bf16.mxu0 %v3584_v6 }
  0x82   : > { %994 = vmatpush1.bf16.msra.mxu1 %v3600_v12 }
  0x83   : > { %995 = vmatprep.subr.bf16.mxu1 %v3608_v15 }
  0x84   : > { %955 = vmatpush1.bf16.msra.mxu0 %v3591_v9 }
  0x85   : > { %956 = vmatprep.subr.bf16.mxu0 %v3595_v10 }
  0x86   : > { %996 = vmatpush1.bf16.msra.mxu1 %v3612_v16 }
  0x87   : > { %997 = vmatprep.subr.bf16.mxu1 %v3615_v17 }
  0x88   : > { %957 = vmatpush1.bf16.msra.mxu0 %v3604_v13 }
  0x89   : > { %958 = vmatprep.subr.bf16.mxu0 %v3606_v14 }
  0x8a   : > { %998 = vmatpush1.bf16.msra.mxu1 %v3624_v20 }
  0x8b   : > { %999 = vmatprep.subr.bf16.mxu1 %v3627_v21 }
  0x8c   : > { %959 = vmatpush1.bf16.msra.mxu0 %v3618_v18 }
  0x8d   : > { %960 = vmatprep.subr.bf16.mxu0 %v3621_v19 }
  0x8e   : > { %1000 = vmatpush1.bf16.msra.mxu1 %v3636_v24  ;;  %v392_v24 = vld [vmem:[%s3552_s16 + $0x18] sm:$0xff] }
  0x8f   : > { %1001 = vmatprep.subr.bf16.mxu1 %v3639_v25 }
  0x90   : > { %961 = vmatpush1.bf16.msra.mxu0 %v3630_v22 }
  0x91   : > { %962 = vmatprep.subr.bf16.mxu0 %v3632_v23 }
  0x92   : > { %1002 = vmatpush1.bf16.msra.mxu1 %v3648_v28 }
  0x93   : > { %1003 = vmatprep.subr.bf16.mxu1 %v3651_v29 }
  0x94   : > { %963 = vmatpush1.bf16.msra.mxu0 %v3641_v26  ;;  %v390_v26 = vld [vmem:[%s3552_s16 + $0x8] sm:$0xff] }
  0x95   : > { %964 = vmatprep.subr.bf16.mxu0 %v3644_v27 }
  0x96   : > { %1004 = vmatpush1.bf16.msra.mxu1 %v3660_v33 }
  0x97   : > { %1005 = vmatprep.subr.bf16.mxu1 %v3663_v34  ;;  %v391_v34 = vld [vmem:[%s3552_s16 + $0x10] sm:$0xff] }
  0x98   : > { %965 = vmatpush1.bf16.msra.mxu0 %v3653_v30 }
  0x99   : > { %1041 = vmatprep.subr.bf16.mxu0 %v3656_v32 }
  0x9a   : > { %1006 = vmatpush1.bf16.msra.mxu1 %v3672_v38 }
  0x9b   : > { %1082 = vmatprep.subr.bf16.mxu1 %v3675_v39 }
 0x11b   : > { %v588_v31 = vpop.f32.mrf.mxu0  ;;  %v629_v22 = vpop.f32.mrf.mxu1 }
 0x11c   : > { %v636_v27 = vadd.f32 %v588_v31, %v389_v57  ;;  %v638_v19 = vadd.f32 %v629_v22, %v391_v34 }
 0x11d   : > { %v590_v23 = vpop.f32.mrf.mxu0  ;;  %v631_v25 = vpop.f32.mrf.mxu1 }
 0x11e   : > { %v2814_v29 = vmul.f32 -1.442695, %v636_v27  ;;  %v637_v28 = vadd.f32 %v590_v23, %v390_v26  ;;  %v2816_v18 = vmul.f32 -1.442695, %v638_v19  ;;  %v639_v21 = vadd.f32 %v631_v25, %v392_v24 }
 0x11f   : > { %v592_v30 = vpop.f32.mrf.mxu0  ;;  %v633_v38 = vpop.f32.mrf.mxu1 }
 0x120   : > { %3061 = vpow2.f32 %v2814_v29  ;;  %v2815_v33 = vmul.f32 -1.442695, %v637_v28  ;;  %v2778_v28 = vld [vmem:[%s3557_s22 + $0xe0] sm:$0xff] }
 0x121   : > { %v593_v32 = vpop.f32.mrf.mxu0  ;;  %v634_v39 = vpop.f32.mrf.mxu1 }
 0x122   : > { %3063 = vpow2.f32 %v2815_v33  ;;  %v2779_v33 = vld [vmem:[%s3557_s22 + $0xe8] sm:$0xff] }
 0x123   : > { %3065 = vpow2.f32 %v2816_v18  ;;  %v386_v39 = vld [vmem:[#allocation3] sm:$0xff] }
 0x124   : > { %3067 = vtanh.f32 %v639_v21 }
 0x12d   : > { %v3062_v57 = vpop.eup %3061 }
 0x12e   : > { %v901_v27 = vadd.f32 1.0, %v3062_v57 }
 0x12f   : > { %v3064_v23 = vpop.eup %3063 }
 0x130   : > { %3069 = vrcp.f32 %v901_v27  ;;  %v902_v26 = vadd.f32 1.0, %v3064_v23  ;;  %v3066_v29 = vpop.eup %3065 }
 0x131   : > { %v3068_v30 = vpop.eup %3067  ;;  %v903_v34 = vadd.f32 1.0, %v3066_v29  ;;  %v2780_v29 = vld [vmem:[%s3557_s22 + $0xf0] sm:$0xff] }
 0x132   : > { %3071 = vrcp.f32 %v902_v26 }
 0x13b   : > { %v840_v32 = vpop.f32.mrf.mxu0 }
 0x13c   : > { %v888_v38 = vadd.f32 %v2778_v28, %v840_v32 }
 0x13d   : > { %v3070_v22 = vpop.eup %3069  ;;  %v842_v19 = vpop.f32.mrf.mxu0 }
 0x13e   : > { %v912_v24 = vmul.f32 %v3070_v22, %v3068_v30  ;;  %v2817_v25 = vmul.f32 -1.442695, %v888_v38  ;;  %v889_v18 = vadd.f32 %v2779_v33, %v842_v19  ;;  %v881_v23 = vpop.f32.mrf.mxu1  ;;  %v2781_v33 = vld [vmem:[%s3557_s22 + $0xf8] sm:$0xff] }
 0x13f   : > { %v3072_v31 = vpop.eup %3071  ;;  %v844_v21 = vpop.f32.mrf.mxu0  ;;  %v890_v30 = vadd.f32 %v2780_v29, %v881_v23 }
 0x140   : > { %v911_v57 = vmul.f32 %v3072_v31, %v386_v39  ;;  %3073 = vpow2.f32 %v2817_v25  ;;  %v2818_v27 = vmul.f32 -1.442695, %v889_v18  ;;  %v883_v28 = vpop.f32.mrf.mxu1 }
 0x141   : > { %3075 = vrcp.f32 %v903_v34  ;;  %v845_v26 = vpop.f32.mrf.mxu0  ;;  %v2819_v22 = vmul.f32 -1.442695, %v890_v30  ;;  %v891_v19 = vadd.f32 %v2781_v33, %v883_v28  ;;  %v388_v28 = vld [vmem:[#allocation5] sm:$0xff] }
 0x142   : > { %v3809_v14 = vadd.f32 %v912_v24, %v911_v57  ;;  %3077 = vpow2.f32 %v2818_v27  ;;  %v885_v32 = vpop.f32.mrf.mxu1 }
 0x144   : > { %3079 = vtanh.f32 %v3809_v14  ;;  %v886_v38 = vpop.f32.mrf.mxu1 }
 0x145   : > { %3081 = vpow2.f32 %v2819_v22  ;;  %v4624_v22 = vld [vmem:[#allocation30_spill] sm:$0xff] }
 0x146   : > { %3083 = vtanh.f32 %v891_v19  ;;  %v4625_v19 = vld [vmem:[#allocation31_spill] sm:$0xff] }
 0x14d   : > { %v3074_v39 = vpop.eup %3073 }
 0x14e   : > { %v3076_v25 = vpop.eup %3075  ;;  %v925_v18 = vadd.f32 1.0, %v3074_v39 }
 0x14f   : > { %v3078_v34 = vpop.eup %3077 }
 0x150   : > { %3085 = vrcp.f32 %v925_v18  ;;  %v926_v24 = vadd.f32 1.0, %v3078_v34 }
 0x151   : > { %v3080_v31 = vpop.eup %3079 }
 0x152   : > { %3087 = vrcp.f32 %v926_v24  ;;  %v915_v21 = vmul.f32 %v3080_v31, %v3076_v25  ;;  %v3082_v27 = vpop.eup %3081  ;;  %v4626_v25 = vld [vmem:[#allocation32_spill] sm:$0xff] }
 0x153   : > { %v3084_v23 = vpop.eup %3083  ;;  %v927_v32 = vadd.f32 1.0, %v3082_v27  ;;  %v4633_v31 = vld [vmem:[#allocation16_spill] sm:$0xff]  ;;  %v4636_v27 = vld [vmem:[#allocation23_spill] sm:$0xff] }
 0x154   : > { %v940_v57 = vpack.c.bf16 %v915_v21, %v915_v21  ;;  %v4634_v21 = vld [vmem:[#allocation22_spill] sm:$0xff] }
 0x155   : > { %3089 = vrcp.f32 %v927_v32  ;;  %v4641_v32 = vld [vmem:[#allocation24_spill] sm:$0xff] }
 0x156   : > { %941 = vst [vmem:[%s3562_s25] sm:$0xf] %v940_v57  ;;  %983 = vmatmul.mubr.bf16.vlgmr.msra.gmra.mxu0 %v940_v57  ;;  %1024 = vmatmul.mubr.bf16.vlgmr.msra.gmra.mxu1 %v940_v57  ;;  %v4635_v57 = vld [vmem:[#allocation17_spill] sm:$0xff] }
 0x157   : > { %1042 = vmatpush1.bf16.msra.mxu0 %v3665_v36  ;;  %1083 = vmatpush1.bf16.msra.mxu1 %v3685_v42 }
 0x158   : > { %1043 = vmatprep.subr.bf16.mxu0 %v3668_v37  ;;  %1084 = vmatprep.subr.bf16.mxu1 %v3688_v43 }
 0x159   : > { %1073 = vmatprep.mubr.bf16.mxu0 %v4623_v61  ;;  %1114 = vmatprep.mubr.bf16.mxu1 %v4623_v61 }
 0x15b   : > { %1044 = vmatpush1.bf16.msra.mxu0 %v3678_v40  ;;  %1085 = vmatpush1.bf16.msra.mxu1 %v3697_v46 }
 0x15c   : > { %1045 = vmatprep.subr.bf16.mxu0 %v3680_v41  ;;  %1086 = vmatprep.subr.bf16.mxu1 %v3700_v47 }
 0x15d   : > { %v3086_v26 = vpop.eup %3085 }
 0x15e   : > { %v936_v38 = vmul.f32 %v3086_v26, %v3084_v23  ;;  %v4637_v23 = vld [vmem:[#allocation20_spill] sm:$0xff]  ;;  %v4638_v26 = vld [vmem:[#allocation26_spill] sm:$0xff] }
 0x15f   : > { %v3088_v29 = vpop.eup %3087  ;;  %1046 = vmatpush1.bf16.msra.mxu0 %v3691_v44  ;;  %1087 = vmatpush1.bf16.msra.mxu1 %v3710_v50 }
 0x160   : > { %v935_v30 = vmul.f32 %v3088_v29, %v388_v28  ;;  %1047 = vmatprep.subr.bf16.mxu0 %v3694_v45  ;;  %1088 = vmatprep.subr.bf16.mxu1 %v3713_v51  ;;  %v4639_v28 = vld [vmem:[#allocation21_spill] sm:$0xff]  ;;  %v4640_v29 = vld [vmem:[#allocation27_spill] sm:$0xff] }
 0x162   : > { %v3829_v33 = vadd.f32 %v936_v38, %v935_v30  ;;  %v3090_v39 = vpop.eup %3089  ;;  %v4642_v30 = vld [vmem:[#allocation28_spill] sm:$0xff]  ;;  %v4643_v38 = vld [vmem:[#allocation25_spill] sm:$0xff] }
 0x163   : > { %1048 = vmatpush1.bf16.msra.mxu0 %v3704_v48  ;;  %1089 = vmatpush1.bf16.msra.mxu1 %v3722_v54 }
 0x164   : > { %3091 = vtanh.f32 %v3829_v33  ;;  %1049 = vmatprep.subr.bf16.mxu0 %v3707_v49  ;;  %1090 = vmatprep.subr.bf16.mxu1 %v3725_v55 }
 0x167   : > { %1050 = vmatpush1.bf16.msra.mxu0 %v3716_v52  ;;  %1091 = vmatpush1.bf16.msra.mxu1 %v3734_v58 }
 0x168   : > { %1051 = vmatprep.subr.bf16.mxu0 %v3719_v53  ;;  %1092 = vmatprep.subr.bf16.mxu1 %v3737_v59 }
 0x16b   : > { %1052 = vmatpush1.bf16.msra.mxu0 %v4624_v22  ;;  %1093 = vmatpush1.bf16.msra.mxu1 %v3746_v62 }
 0x16c   : > { %1053 = vmatprep.subr.bf16.mxu0 %v4625_v19  ;;  %1094 = vmatprep.subr.bf16.mxu1 %v3749_v63 }
 0x16f   : > { %1054 = vmatpush1.bf16.msra.mxu0 %v3740_v60  ;;  %1095 = vmatpush1.bf16.msra.mxu1 %v3756_v35 }
 0x170   : > { %1055 = vmatprep.subr.bf16.mxu0 %v4626_v25  ;;  %1096 = vmatprep.subr.bf16.mxu1 %v3759_v3 }
 0x171   : > { %v3092_v18 = vpop.eup %3091 }
 0x172   : > { %v939_v34 = vmul.f32 %v3092_v18, %v3090_v39  ;;  %v4644_v39 = vld [vmem:[#allocation29_spill] sm:$0xff]  ;;  %v2821_v18 = vld [vmem:[%s3552_s16 + $0x20] sm:$0xff] }
 0x173   : > { %1056 = vmatpush1.bf16.msra.mxu0 %v3752_v0  ;;  %1097 = vmatpush1.bf16.msra.mxu1 %v3763_v56 }
 0x174   : > { %v942_v24 = vpack.c.bf16 %v939_v34, %v939_v34  ;;  %1186 = vmatprep.subr.bf16.mxu0 %v3571_v1  ;;  %1227 = vmatprep.subr.bf16.mxu1 %v3586_v7  ;;  %v4627_v1 = vld [vmem:[#allocation12_spill] sm:$0xff] }
 0x176   : > { %2820 = vst [vmem:[%s3567_s29 + $0x1c] sm:$0xf] %v942_v24  ;;  %1074 = vmatmul.mubr.bf16.vlgmr.msra.gmra.mxu0 %v942_v24  ;;  %1115 = vmatmul.mubr.bf16.vlgmr.msra.gmra.mxu1 %v942_v24 }
 0x177   : > { %1187 = vmatpush1.bf16.msra.mxu0 %v3573_v2  ;;  %1228 = vmatpush1.bf16.msra.mxu1 %v3588_v8  ;;  %v4628_v2 = vld [vmem:[#allocation15_spill] sm:$0xff] }
 0x178   : > { %1188 = vmatprep.subr.bf16.mxu0 %v3578_v4  ;;  %1229 = vmatprep.subr.bf16.mxu1 %v3598_v11  ;;  %v4629_v4 = vld [vmem:[#allocation13_spill] sm:$0xff] }
 0x179   : > { %1218 = vmatprep.mubr.bf16.mxu0 %v4623_v61  ;;  %1259 = vmatprep.mubr.bf16.mxu1 %v4623_v61 }
 0x17b   : > { %1189 = vmatpush1.bf16.msra.mxu0 %v3581_v5  ;;  %1230 = vmatpush1.bf16.msra.mxu1 %v3600_v12  ;;  %v4630_v5 = vld [vmem:[#allocation18_spill] sm:$0xff] }
 0x17c   : > { %1190 = vmatprep.subr.bf16.mxu0 %v3584_v6  ;;  %1231 = vmatprep.subr.bf16.mxu1 %v3608_v15  ;;  %v4631_v6 = vld [vmem:[#allocation14_spill] sm:$0xff] }
 0x17f   : > { %1191 = vmatpush1.bf16.msra.mxu0 %v3591_v9  ;;  %1232 = vmatpush1.bf16.msra.mxu1 %v3612_v16  ;;  %v4632_v9 = vld [vmem:[#allocation19_spill] sm:$0xff] }
 0x180   : > { %1192 = vmatprep.subr.bf16.mxu0 %v3595_v10  ;;  %1233 = vmatprep.subr.bf16.mxu1 %v3615_v17 }
 0x183   : > { %1193 = vmatpush1.bf16.msra.mxu0 %v3604_v13  ;;  %1234 = vmatpush1.bf16.msra.mxu1 %v3624_v20 }
 0x184   : > { %1194 = vmatprep.subr.bf16.mxu0 %v4627_v1  ;;  %1235 = vmatprep.subr.bf16.mxu1 %v4628_v2 }
 0x187   : > { %1195 = vmatpush1.bf16.msra.mxu0 %v4629_v4  ;;  %1236 = vmatpush1.bf16.msra.mxu1 %v4630_v5 }
 0x188   : > { %1196 = vmatprep.subr.bf16.mxu0 %v4631_v6  ;;  %1237 = vmatprep.subr.bf16.mxu1 %v4632_v9  ;;  %v2824_v6 = vld [vmem:[%s3552_s16 + $0x38] sm:$0xff] }
 0x18b   : > { %1197 = vmatpush1.bf16.msra.mxu0 %v4633_v31  ;;  %1238 = vmatpush1.bf16.msra.mxu1 %v4634_v21 }
 0x18c   : > { %1198 = vmatprep.subr.bf16.mxu0 %v4635_v57  ;;  %1239 = vmatprep.subr.bf16.mxu1 %v4636_v27 }
 0x18f   : > { %1199 = vmatpush1.bf16.msra.mxu0 %v4637_v23  ;;  %1240 = vmatpush1.bf16.msra.mxu1 %v4638_v26  ;;  %v2822_v23 = vld [vmem:[%s3552_s16 + $0x28] sm:$0xff] }
 0x190   : > { %1200 = vmatprep.subr.bf16.mxu0 %v4639_v28  ;;  %1241 = vmatprep.subr.bf16.mxu1 %v4640_v29 }
 0x193   : > { %1201 = vmatpush1.bf16.msra.mxu0 %v4641_v32  ;;  %1242 = vmatpush1.bf16.msra.mxu1 %v4642_v30 }
 0x194   : > { %1277 = vmatprep.subr.bf16.mxu0 %v4643_v38  ;;  %1318 = vmatprep.subr.bf16.mxu1 %v4644_v39  ;;  %v2823_v39 = vld [vmem:[%s3552_s16 + $0x30] sm:$0xff] }
 0x216   : > { %v984_v34 = vpop.f32.mrf.mxu0  ;;  %v1025_v24 = vpop.f32.mrf.mxu1 }
 0x217   : > { %v1032_v27 = vadd.f32 %v2821_v18, %v984_v34  ;;  %v1034_v9 = vadd.f32 %v2823_v39, %v1025_v24 }
 0x218   : > { %v986_v26 = vpop.f32.mrf.mxu0  ;;  %v1027_v57 = vpop.f32.mrf.mxu1 }
 0x219   : > { %v2829_v28 = vmul.f32 -1.442695, %v1032_v27  ;;  %v1033_v21 = vadd.f32 %v2822_v23, %v986_v26  ;;  %v2831_v5 = vmul.f32 -1.442695, %v1034_v9  ;;  %v1035_v2 = vadd.f32 %v2824_v6, %v1027_v57  ;;  %v2826_v26 = vld [vmem:[%s3557_s22 + $0xc8] sm:$0xff] }
 0x21a   : > { %v988_v29 = vpop.f32.mrf.mxu0  ;;  %v1029_v31 = vpop.f32.mrf.mxu1 }
 0x21b   : > { %3093 = vpow2.f32 %v2829_v28  ;;  %v2830_v32 = vmul.f32 -1.442695, %v1033_v21  ;;  %v2825_v31 = vld [vmem:[%s3557_s22 + $0xc0] sm:$0xff] }
 0x21c   : > { %v989_v30 = vpop.f32.mrf.mxu0  ;;  %v1030_v38 = vpop.f32.mrf.mxu1 }
 0x21d   : > { %3095 = vpow2.f32 %v2830_v32 }
 0x21e   : > { %3097 = vpow2.f32 %v2831_v5 }
 0x228   : > { %v3094_v4 = vpop.eup %3093 }
 0x229   : > { %v1136_v18 = vadd.f32 1.0, %v3094_v4 }
 0x22a   : > { %v3096_v34 = vpop.eup %3095 }
 0x22b   : > { %3099 = vrcp.f32 %v1136_v18  ;;  %v1137_v27 = vadd.f32 1.0, %v3096_v34  ;;  %v3098_v28 = vpop.eup %3097 }
 0x22c   : > { %3101 = vtanh.f32 %v1035_v2  ;;  %v1138_v5 = vadd.f32 1.0, %v3098_v28 }
 0x22d   : > { %3103 = vrcp.f32 %v1137_v27 }
 0x236   : > { %v1075_v21 = vpop.f32.mrf.mxu0  ;;  %v1116_v23 = vpop.f32.mrf.mxu1 }
 0x237   : > { %v1123_v29 = vadd.f32 %v2825_v31, %v1075_v21  ;;  %v2827_v21 = vld [vmem:[%s3557_s22 + $0xd0] sm:$0xff] }
 0x238   : > { %v3100_v32 = vpop.eup %3099  ;;  %v1077_v30 = vpop.f32.mrf.mxu0 }
 0x239   : > { %v1118_v38 = vpop.f32.mrf.mxu1  ;;  %v3102_v39 = vpop.eup %3101  ;;  %v2832_v9 = vmul.f32 -1.442695, %v1123_v29  ;;  %v1124_v6 = vadd.f32 %v2826_v26, %v1077_v30  ;;  %v1125_v26 = vadd.f32 %v2827_v21, %v1116_v23  ;;  %v2828_v29 = vld [vmem:[%s3557_s22 + $0xd8] sm:$0xff]  ;;  %v3941_v21 = vld [vmem:[#allocation6 + $0xe0] ss:$16 sps:$4 sm:$0xff]  }
 0x23a   : > { %v3104_v4 = vpop.eup %3103  ;;  %v1079_v57 = vpop.f32.mrf.mxu0  ;;  %v1147_v18 = vmul.f32 %v3102_v39, %v3100_v32 }
 0x23b   : > { %v1120_v24 = vpop.f32.mrf.mxu1  ;;  %v1146_v2 = vmul.f32 %v3104_v4, %v3809_v14  ;;  %3105 = vpow2.f32 %v2832_v9  ;;  %v2833_v34 = vmul.f32 -1.442695, %v1124_v6  ;;  %v2834_v28 = vmul.f32 -1.442695, %v1125_v26  ;;  %v3945_v26 = vld [vmem:[#allocation6 + $0xc4] ss:$16 sps:$4 sm:$0xff]  }
 0x23c   : > { %v1080_v27 = vpop.f32.mrf.mxu0  ;;  %v1126_v57 = vadd.f32 %v2828_v29, %v1118_v38  ;;  %v3955_v29 = vld [vmem:[#allocation6 + $0xa4] ss:$16 sps:$4 sm:$0xff]  }
 0x23d   : > { %v1121_v1 = vpop.f32.mrf.mxu1  ;;  %v3894_v31 = vadd.f32 %v1147_v18, %v1146_v2  ;;  %3107 = vpow2.f32 %v2833_v34  ;;  %v3936_v27 = vld [vmem:[#allocation6 + $0xe4] ss:$16 sps:$4 sm:$0xff]  }
 0x23e   : > { %3109 = vrcp.f32 %v1138_v5 }
 0x23f   : > { %3111 = vtanh.f32 %v3894_v31 }
 0x240   : > { %3113 = vpow2.f32 %v2834_v28  ;;  %v4647_v28 = vld [vmem:[#allocation13_spill] sm:$0xff] }
 0x248   : > { %v3106_v30 = vpop.eup %3105 }
 0x249   : > { %v1160_v24 = vadd.f32 1.0, %v3106_v30  ;;  %v4649_v30 = vld [vmem:[#allocation14_spill] sm:$0xff] }
 0x24a   : > { %v3108_v14 = vpop.eup %3107 }
 0x24b   : > { %v3110_v32 = vpop.eup %3109  ;;  %3115 = vrcp.f32 %v1160_v24  ;;  %v1161_v39 = vadd.f32 1.0, %v3108_v14  ;;  %v4656_v24 = vld [vmem:[#allocation26_spill] sm:$0xff]  ;;  %v4657_v14 = vld [vmem:[#allocation21_spill] sm:$0xff] }
 0x24c   : > { %v3112_v1 = vpop.eup %3111  ;;  %3117 = vtanh.f32 %v1126_v57  ;;  %v4655_v57 = vld [vmem:[#allocation20_spill] sm:$0xff] }
 0x24d   : > { %3119 = vrcp.f32 %v1161_v39  ;;  %v1150_v9 = vmul.f32 %v3112_v1, %v3110_v32  ;;  %v3114_v23 = vpop.eup %3113  ;;  %v4658_v32 = vld [vmem:[#allocation27_spill] sm:$0xff]  ;;  %v4659_v39 = vld [vmem:[#allocation24_spill] sm:$0xff] }
 0x24e   : > { %v1162_v5 = vadd.f32 1.0, %v3114_v23  ;;  %v4660_v1 = vld [vmem:[#allocation28_spill] sm:$0xff] }
 0x24f   : > { %v1175_v6 = vpack.c.bf16 %v1150_v9, %v1150_v9  ;;  %v4661_v9 = vld [vmem:[#allocation25_spill] sm:$0xff]  ;;  %v2837_v23 = vld [vmem:[%s3552_s16 + $0x40] sm:$0xff] }
 0x250   : > { %3121 = vrcp.f32 %v1162_v5 }
 0x251   : > { %2835 = vst [vmem:[%s3562_s25 + $0x4] sm:$0xf] %v1175_v6  ;;  %1219 = vmatmul.mubr.bf16.vlgmr.msra.gmra.mxu0 %v1175_v6  ;;  %1260 = vmatmul.mubr.bf16.vlgmr.msra.gmra.mxu1 %v1175_v6  ;;  %v4662_v6 = vld [vmem:[#allocation29_spill] sm:$0xff] }
 0x252   : > { %1278 = vmatpush1.bf16.msra.mxu0 %v3665_v36  ;;  %1319 = vmatpush1.bf16.msra.mxu1 %v3685_v42 }
 0x253   : > { %1279 = vmatprep.subr.bf16.mxu0 %v3668_v37  ;;  %1320 = vmatprep.subr.bf16.mxu1 %v3688_v43 }
 0x254   : > { %1309 = vmatprep.mubr.bf16.mxu0 %v4623_v61  ;;  %1350 = vmatprep.mubr.bf16.mxu1 %v4623_v61 }
 0x256   : > { %1280 = vmatpush1.bf16.msra.mxu0 %v3678_v40  ;;  %1321 = vmatpush1.bf16.msra.mxu1 %v3697_v46 }
 0x257   : > { %1281 = vmatprep.subr.bf16.mxu0 %v3680_v41  ;;  %1322 = vmatprep.subr.bf16.mxu1 %v3700_v47 }
 0x258   : > { %v3116_v36 = vpop.eup %3115 }
 0x259   : > { %v3118_v38 = vpop.eup %3117 }
 0x25a   : > { %v3120_v4 = vpop.eup %3119  ;;  %1282 = vmatpush1.bf16.msra.mxu0 %v3691_v44  ;;  %1323 = vmatpush1.bf16.msra.mxu1 %v3710_v50  ;;  %v1171_v2 = vmul.f32 %v3118_v38, %v3116_v36 }
 0x25b   : > { %v1170_v37 = vmul.f32 %v3120_v4, %v3829_v33  ;;  %1283 = vmatprep.subr.bf16.mxu0 %v3694_v45  ;;  %1324 = vmatprep.subr.bf16.mxu1 %v3713_v51  ;;  %v2838_v4 = vld [vmem:[%s3552_s16 + $0x48] sm:$0xff] }
 0x25d   : > { %v3915_v40 = vadd.f32 %v1171_v2, %v1170_v37  ;;  %v3122_v41 = vpop.eup %3121 }
 0x25e   : > { %1284 = vmatpush1.bf16.msra.mxu0 %v3704_v48  ;;  %1325 = vmatpush1.bf16.msra.mxu1 %v3722_v54 }
 0x25f   : > { %3123 = vtanh.f32 %v3915_v40  ;;  %1285 = vmatprep.subr.bf16.mxu0 %v3707_v49  ;;  %1326 = vmatprep.subr.bf16.mxu1 %v3725_v55 }
 0x262   : > { %1286 = vmatpush1.bf16.msra.mxu0 %v3716_v52  ;;  %1327 = vmatpush1.bf16.msra.mxu1 %v3734_v58 }
 0x263   : > { %1287 = vmatprep.subr.bf16.mxu0 %v3719_v53  ;;  %1328 = vmatprep.subr.bf16.mxu1 %v3737_v59 }
 0x266   : > { %1288 = vmatpush1.bf16.msra.mxu0 %v4624_v22  ;;  %1329 = vmatpush1.bf16.msra.mxu1 %v3746_v62 }
 0x267   : > { %1289 = vmatprep.subr.bf16.mxu0 %v4625_v19  ;;  %1330 = vmatprep.subr.bf16.mxu1 %v3749_v63 }
 0x26a   : > { %1290 = vmatpush1.bf16.msra.mxu0 %v3740_v60  ;;  %1331 = vmatpush1.bf16.msra.mxu1 %v3756_v35 }
 0x26b   : > { %1291 = vmatprep.subr.bf16.mxu0 %v4626_v25  ;;  %1332 = vmatprep.subr.bf16.mxu1 %v3759_v3 }
 0x26c   : > { %v3124_v33 = vpop.eup %3123 }
 0x26d   : > { %v1174_v18 = vmul.f32 %v3124_v33, %v3122_v41 }
 0x26e   : > { %1292 = vmatpush1.bf16.msra.mxu0 %v3752_v0  ;;  %1333 = vmatpush1.bf16.msra.mxu1 %v3763_v56 }
 0x26f   : > { %v1178_v34 = vpack.c.bf16 %v1174_v18, %v1174_v18  ;;  %1422 = vmatprep.subr.bf16.mxu0 %v3936_v27  ;;  %1463 = vmatprep.subr.bf16.mxu1 %v3586_v7  ;;  %v3951_v7 = vld [vmem:[#allocation6 + $0xc0] ss:$16 sps:$4 sm:$0xff]  }
 0x271   : > { %2836 = vst [vmem:[%s3567_s29 + $0x18] sm:$0xf] %v1178_v34  ;;  %1310 = vmatmul.mubr.bf16.vlgmr.msra.gmra.mxu0 %v1178_v34  ;;  %1351 = vmatmul.mubr.bf16.vlgmr.msra.gmra.mxu1 %v1178_v34 }
 0x272   : > { %1423 = vmatpush1.bf16.msra.mxu0 %v3941_v21  ;;  %1464 = vmatpush1.bf16.msra.mxu1 %v3588_v8  ;;  %v3959_v8 = vld [vmem:[#allocation6 + $0xa0] ss:$16 sps:$4 sm:$0xff]  }
 0x273   : > { %1424 = vmatprep.subr.bf16.mxu0 %v3945_v26  ;;  %1465 = vmatprep.subr.bf16.mxu1 %v3598_v11  ;;  %v4645_v11 = vld [vmem:[#allocation12_spill] sm:$0xff] }
 0x274   : > { %1454 = vmatprep.mubr.bf16.mxu0 %v4623_v61  ;;  %1495 = vmatprep.mubr.bf16.mxu1 %v4623_v61 }
 0x276   : > { %1425 = vmatpush1.bf16.msra.mxu0 %v3951_v7  ;;  %1466 = vmatpush1.bf16.msra.mxu1 %v3600_v12  ;;  %v4646_v12 = vld [vmem:[#allocation15_spill] sm:$0xff] }
 0x277   : > { %1426 = vmatprep.subr.bf16.mxu0 %v3955_v29  ;;  %1467 = vmatprep.subr.bf16.mxu1 %v3608_v15  ;;  %v4648_v15 = vld [vmem:[#allocation18_spill] sm:$0xff] }
 0x27a   : > { %1427 = vmatpush1.bf16.msra.mxu0 %v3959_v8  ;;  %1468 = vmatpush1.bf16.msra.mxu1 %v3612_v16  ;;  %v4650_v16 = vld [vmem:[#allocation19_spill] sm:$0xff] }
 0x27b   : > { %1428 = vmatprep.subr.bf16.mxu0 %v3595_v10  ;;  %1469 = vmatprep.subr.bf16.mxu1 %v3615_v17  ;;  %v4651_v10 = vld [vmem:[#allocation16_spill] sm:$0xff]  ;;  %v4652_v17 = vld [vmem:[#allocation22_spill] sm:$0xff] }
 0x27e   : > { %1429 = vmatpush1.bf16.msra.mxu0 %v3604_v13  ;;  %1470 = vmatpush1.bf16.msra.mxu1 %v3624_v20  ;;  %v4653_v13 = vld [vmem:[#allocation17_spill] sm:$0xff]  ;;  %v4654_v20 = vld [vmem:[#allocation23_spill] sm:$0xff] }
 0x27f   : > { %1430 = vmatprep.subr.bf16.mxu0 %v4645_v11  ;;  %1471 = vmatprep.subr.bf16.mxu1 %v4646_v12 }
 0x282   : > { %1431 = vmatpush1.bf16.msra.mxu0 %v4647_v28  ;;  %1472 = vmatpush1.bf16.msra.mxu1 %v4648_v15  ;;  %v2839_v15 = vld [vmem:[%s3552_s16 + $0x50] sm:$0xff] }
 0x283   : > { %1432 = vmatprep.subr.bf16.mxu0 %v4649_v30  ;;  %1473 = vmatprep.subr.bf16.mxu1 %v4650_v16  ;;  %v2840_v16 = vld [vmem:[%s3552_s16 + $0x58] sm:$0xff] }
 0x286   : > { %1433 = vmatpush1.bf16.msra.mxu0 %v4651_v10  ;;  %1474 = vmatpush1.bf16.msra.mxu1 %v4652_v17 }
 0x287   : > { %1434 = vmatprep.subr.bf16.mxu0 %v4653_v13  ;;  %1475 = vmatprep.subr.bf16.mxu1 %v4654_v20 }
 0x28a   : > { %1435 = vmatpush1.bf16.msra.mxu0 %v4655_v57  ;;  %1476 = vmatpush1.bf16.msra.mxu1 %v4656_v24 }
 0x28b   : > { %1436 = vmatprep.subr.bf16.mxu0 %v4657_v14  ;;  %1477 = vmatprep.subr.bf16.mxu1 %v4658_v32  ;;  %v2841_v14 = vld [vmem:[%s3557_s22 + $0xa0] sm:$0xff] }
 0x28e   : > { %1437 = vmatpush1.bf16.msra.mxu0 %v4659_v39  ;;  %1478 = vmatpush1.bf16.msra.mxu1 %v4660_v1  ;;  %v2842_v1 = vld [vmem:[%s3557_s22 + $0xa8] sm:$0xff] }
 0x28f   : > { %1513 = vmatprep.subr.bf16.mxu0 %v4661_v9  ;;  %1554 = vmatprep.subr.bf16.mxu1 %v4662_v6 }
 0x311   : > { %v1220_v36 = vpop.f32.mrf.mxu0  ;;  %v1261_v38 = vpop.f32.mrf.mxu1 }
 0x312   : > { %v1268_v5 = vadd.f32 %v2837_v23, %v1220_v36  ;;  %v1270_v30 = vadd.f32 %v2839_v15, %v1261_v38 }
 0x313   : > { %v1222_v37 = vpop.f32.mrf.mxu0  ;;  %v1263_v2 = vpop.f32.mrf.mxu1 }
 0x314   : > { %v2845_v41 = vmul.f32 -1.442695, %v1268_v5  ;;  %v1269_v33 = vadd.f32 %v2838_v4, %v1222_v37  ;;  %v2847_v10 = vmul.f32 -1.442695, %v1270_v30  ;;  %v1271_v13 = vadd.f32 %v2840_v16, %v1263_v2  ;;  %v2843_v16 = vld [vmem:[%s3557_s22 + $0xb0] sm:$0xff] }
 0x315   : > { %v1224_v18 = vpop.f32.mrf.mxu0  ;;  %v1265_v34 = vpop.f32.mrf.mxu1 }
 0x316   : > { %3125 = vpow2.f32 %v2845_v41  ;;  %v2846_v11 = vmul.f32 -1.442695, %v1269_v33 }
 0x317   : > { %v1225_v12 = vpop.f32.mrf.mxu0  ;;  %v1266_v28 = vpop.f32.mrf.mxu1 }
 0x318   : > { %3127 = vpow2.f32 %v2846_v11 }
 0x319   : > { %3129 = vpow2.f32 %v2847_v10 }
 0x323   : > { %v3126_v17 = vpop.eup %3125 }
 0x324   : > { %v1372_v20 = vadd.f32 1.0, %v3126_v17  ;;  %v2844_v17 = vld [vmem:[%s3557_s22 + $0xb8] sm:$0xff] }
 0x325   : > { %v3128_v57 = vpop.eup %3127 }
 0x326   : > { %3131 = vrcp.f32 %v1372_v20  ;;  %v1373_v24 = vadd.f32 1.0, %v3128_v57  ;;  %v3130_v9 = vpop.eup %3129 }
 0x327   : > { %3133 = vtanh.f32 %v1271_v13  ;;  %v1374_v41 = vadd.f32 1.0, %v3130_v9 }
 0x328   : > { %3135 = vrcp.f32 %v1373_v24 }
 0x331   : > { %v1311_v32 = vpop.f32.mrf.mxu0  ;;  %v1352_v39 = vpop.f32.mrf.mxu1 }
 0x332   : > { %v1359_v6 = vadd.f32 %v2841_v14, %v1311_v32  ;;  %v1361_v10 = vadd.f32 %v2843_v16, %v1352_v39  ;;  %v3998_v39 = vld [vmem:[#allocation8 + $0xe0] ss:$16 sps:$4 sm:$0xff]   ;;  %v4132_v16 = vld [vmem:[#allocation8 + $0xec] ss:$16 sps:$4 sm:$0xff]  }
 0x333   : > { %v3132_v23 = vpop.eup %3131  ;;  %v1313_v36 = vpop.f32.mrf.mxu0  ;;  %4680 = vst [vmem:[#allocation24_spill] sm:$0xff] %v4132_v16 }
 0x334   : > { %v1354_v38 = vpop.f32.mrf.mxu1  ;;  %v3134_v4 = vpop.eup %3133  ;;  %v2848_v5 = vmul.f32 -1.442695, %v1359_v6  ;;  %v1360_v37 = vadd.f32 %v2842_v1, %v1313_v36  ;;  %v2850_v13 = vmul.f32 -1.442695, %v1361_v10  ;;  %v4008_v36 = vld [vmem:[#allocation8 + $0xc0] ss:$16 sps:$4 sm:$0xff]  }
 0x335   : > { %v3136_v2 = vpop.eup %3135  ;;  %v1315_v33 = vpop.f32.mrf.mxu0  ;;  %v1383_v11 = vmul.f32 %v3134_v4, %v3132_v23  ;;  %v1362_v57 = vadd.f32 %v2844_v17, %v1354_v38  ;;  %v4002_v23 = vld [vmem:[#allocation8 + $0xc4] ss:$16 sps:$4 sm:$0xff]  }
 0x336   : > { %v1356_v18 = vpop.f32.mrf.mxu1  ;;  %v1382_v34 = vmul.f32 %v3136_v2, %v3894_v31  ;;  %3137 = vpow2.f32 %v2848_v5  ;;  %v2849_v12 = vmul.f32 -1.442695, %v1360_v37  ;;  %v4012_v4 = vld [vmem:[#allocation8 + $0xa4] ss:$16 sps:$4 sm:$0xff]   ;;  %v4111_v33 = vld [vmem:[#allocation6 + $0x20] ss:$16 sps:$4 sm:$0xff]  }
 0x337   : > { %v1316_v28 = vpop.f32.mrf.mxu0  ;;  %4673 = vst [vmem:[#allocation22_spill] sm:$0xff] %v4111_v33  ;;  %v4114_v18 = vld [vmem:[#allocation6 + $0x28] ss:$16 sps:$4 sm:$0xff]   ;;  %v2853_v10 = vld [vmem:[%s3552_s16 + $0x60] sm:$0xff] }
 0x338   : > { %v1357_v15 = vpop.f32.mrf.mxu1  ;;  %v3992_v30 = vadd.f32 %v1383_v11, %v1382_v34  ;;  %3139 = vpow2.f32 %v2849_v12  ;;  %4674 = vst [vmem:[#allocation17_spill] sm:$0xff] %v4114_v18  ;;  %v4117_v34 = vld [vmem:[#allocation6 + $0x4] ss:$16 sps:$4 sm:$0xff]   ;;  %v4120_v11 = vld [vmem:[#allocation6 + $0xc] ss:$16 sps:$4 sm:$0xff]  }
 0x339   : > { %3141 = vrcp.f32 %v1374_v41  ;;  %4675 = vst [vmem:[#allocation23_spill] sm:$0xff] %v4117_v34  ;;  %4676 = vst [vmem:[#allocation20_spill] sm:$0xff] %v4120_v11  ;;  %v4123_v12 = vld [vmem:[#allocation6] ss:$16 sps:$4 sm:$0xff]   ;;  %v4126_v28 = vld [vmem:[#allocation6 + $0x8] ss:$16 sps:$4 sm:$0xff]  }
 0x33a   : > { %3143 = vtanh.f32 %v3992_v30  ;;  %4677 = vst [vmem:[#allocation26_spill] sm:$0xff] %v4123_v12  ;;  %4678 = vst [vmem:[#allocation21_spill] sm:$0xff] %v4126_v28  ;;  %v4129_v15 = vld [vmem:[#allocation8 + $0xe4] ss:$16 sps:$4 sm:$0xff]  }
 0x33b   : > { %3145 = vpow2.f32 %v2850_v13  ;;  %4679 = vst [vmem:[#allocation27_spill] sm:$0xff] %v4129_v15 }
 0x343   : > { %v3138_v20 = vpop.eup %3137 }
 0x344   : > { %v1396_v24 = vadd.f32 1.0, %v3138_v20  ;;  %v2854_v20 = vld [vmem:[%s3552_s16 + $0x68] sm:$0xff] }
 0x345   : > { %v3140_v31 = vpop.eup %3139 }
 0x346   : > { %v3142_v14 = vpop.eup %3141  ;;  %3147 = vrcp.f32 %v1396_v24  ;;  %v1397_v32 = vadd.f32 1.0, %v3140_v31 }
 0x347   : > { %v3144_v1 = vpop.eup %3143  ;;  %3149 = vtanh.f32 %v1362_v57 }
 0x348   : > { %3151 = vrcp.f32 %v1397_v32  ;;  %v1386_v9 = vmul.f32 %v3144_v1, %v3142_v14  ;;  %v3146_v38 = vpop.eup %3145 }
 0x349   : > { %v1398_v37 = vadd.f32 1.0, %v3146_v38 }
 0x34a   : > { %v1411_v6 = vpack.c.bf16 %v1386_v9, %v1386_v9 }
 0x34b   : > { %3153 = vrcp.f32 %v1398_v37  ;;  %v2856_v37 = vld [vmem:[%s3552_s16 + $0x78] sm:$0xff] }
 0x34c   : > { %2851 = vst [vmem:[%s3562_s25 + $0x8] sm:$0xf] %v1411_v6  ;;  %1455 = vmatmul.mubr.bf16.vlgmr.msra.gmra.mxu0 %v1411_v6  ;;  %1496 = vmatmul.mubr.bf16.vlgmr.msra.gmra.mxu1 %v1411_v6 }
 0x34d   : > { %1514 = vmatpush1.bf16.msra.mxu0 %v3998_v39  ;;  %1555 = vmatpush1.bf16.msra.mxu1 %v3685_v42 }
 0x34e   : > { %1515 = vmatprep.subr.bf16.mxu0 %v4002_v23  ;;  %1556 = vmatprep.subr.bf16.mxu1 %v3688_v43 }
 0x34f   : > { %1545 = vmatprep.mubr.bf16.mxu0 %v4623_v61  ;;  %1586 = vmatprep.mubr.bf16.mxu1 %v4623_v61 }
 0x351   : > { %1516 = vmatpush1.bf16.msra.mxu0 %v4008_v36  ;;  %1557 = vmatpush1.bf16.msra.mxu1 %v3697_v46 }
 0x352   : > { %1517 = vmatprep.subr.bf16.mxu0 %v4012_v4  ;;  %1558 = vmatprep.subr.bf16.mxu1 %v3700_v47 }
 0x353   : > { %v3148_v42 = vpop.eup %3147 }
 0x354   : > { %v3150_v5 = vpop.eup %3149 }
 0x355   : > { %v3152_v43 = vpop.eup %3151  ;;  %1518 = vmatpush1.bf16.msra.mxu0 %v3691_v44  ;;  %1559 = vmatpush1.bf16.msra.mxu1 %v3710_v50  ;;  %v1407_v41 = vmul.f32 %v3150_v5, %v3148_v42  ;;  %v4048_v50 = vld [vmem:[#allocation6 + $0xe8] ss:$16 sps:$4 sm:$0xff]   ;;  %v2855_v5 = vld [vmem:[%s3552_s16 + $0x70] sm:$0xff] }
 0x356   : > { %v1406_v2 = vmul.f32 %v3152_v43, %v3915_v40  ;;  %1519 = vmatprep.subr.bf16.mxu0 %v3694_v45  ;;  %1560 = vmatprep.subr.bf16.mxu1 %v3713_v51  ;;  %v4058_v51 = vld [vmem:[#allocation6 + $0xc8] ss:$16 sps:$4 sm:$0xff]   ;;  %v4108_v40 = vld [vmem:[#allocation6 + $0x2c] ss:$16 sps:$4 sm:$0xff]  }
 0x357   : > { %4672 = vst [vmem:[#allocation16_spill] sm:$0xff] %v4108_v40 }
 0x358   : > { %v4021_v46 = vadd.f32 %v1407_v41, %v1406_v2  ;;  %v3154_v44 = vpop.eup %3153 }
 0x359   : > { %1520 = vmatpush1.bf16.msra.mxu0 %v3704_v48  ;;  %1561 = vmatpush1.bf16.msra.mxu1 %v3722_v54  ;;  %v4069_v54 = vld [vmem:[#allocation6 + $0x84] ss:$16 sps:$4 sm:$0xff]  }
 0x35a   : > { %3155 = vtanh.f32 %v4021_v46  ;;  %1521 = vmatprep.subr.bf16.mxu0 %v3707_v49  ;;  %1562 = vmatprep.subr.bf16.mxu1 %v3725_v55  ;;  %v4043_v49 = vld [vmem:[#allocation6 + $0xec] ss:$16 sps:$4 sm:$0xff]  }
 0x35b   : > { %v4072_v55 = vld [vmem:[#allocation6 + $0x8c] ss:$16 sps:$4 sm:$0xff]  }
 0x35d   : > { %1522 = vmatpush1.bf16.msra.mxu0 %v3716_v52  ;;  %1563 = vmatpush1.bf16.msra.mxu1 %v3734_v58  ;;  %v4062_v52 = vld [vmem:[#allocation6 + $0xac] ss:$16 sps:$4 sm:$0xff]   ;;  %v4078_v58 = vld [vmem:[#allocation6 + $0x88] ss:$16 sps:$4 sm:$0xff]  }
 0x35e   : > { %1523 = vmatprep.subr.bf16.mxu0 %v3719_v53  ;;  %1564 = vmatprep.subr.bf16.mxu1 %v3737_v59  ;;  %v4066_v53 = vld [vmem:[#allocation6 + $0xa8] ss:$16 sps:$4 sm:$0xff]   ;;  %v4081_v59 = vld [vmem:[#allocation6 + $0x64] ss:$16 sps:$4 sm:$0xff]  }
 0x35f   : > { %4663 = vst [vmem:[#allocation30_spill] sm:$0xff] %v4081_v59 }
 0x361   : > { %1524 = vmatpush1.bf16.msra.mxu0 %v4624_v22  ;;  %1565 = vmatpush1.bf16.msra.mxu1 %v3746_v62  ;;  %v4087_v62 = vld [vmem:[#allocation6 + $0x60] ss:$16 sps:$4 sm:$0xff]  }
 0x362   : > { %1525 = vmatprep.subr.bf16.mxu0 %v4625_v19  ;;  %1566 = vmatprep.subr.bf16.mxu1 %v3749_v63  ;;  %4665 = vst [vmem:[#allocation32_spill] sm:$0xff] %v4087_v62  ;;  %v4090_v63 = vld [vmem:[#allocation6 + $0x68] ss:$16 sps:$4 sm:$0xff]   ;;  %v4099_v22 = vld [vmem:[#allocation6 + $0x40] ss:$16 sps:$4 sm:$0xff]  }
 0x363   : > { %4666 = vst [vmem:[#allocation12_spill] sm:$0xff] %v4090_v63  ;;  %4669 = vst [vmem:[#allocation18_spill] sm:$0xff] %v4099_v22  ;;  %v4102_v19 = vld [vmem:[#allocation6 + $0x48] ss:$16 sps:$4 sm:$0xff]  }
 0x364   : > { %4670 = vst [vmem:[#allocation14_spill] sm:$0xff] %v4102_v19 }
 0x365   : > { %1526 = vmatpush1.bf16.msra.mxu0 %v3740_v60  ;;  %1567 = vmatpush1.bf16.msra.mxu1 %v3756_v35  ;;  %v4084_v60 = vld [vmem:[#allocation6 + $0x6c] ss:$16 sps:$4 sm:$0xff]  }
 0x366   : > { %1527 = vmatprep.subr.bf16.mxu0 %v4626_v25  ;;  %1568 = vmatprep.subr.bf16.mxu1 %v3759_v3  ;;  %v4052_v3 = vld [vmem:[#allocation6 + $0xcc] ss:$16 sps:$4 sm:$0xff]   ;;  %4664 = vst [vmem:[#allocation31_spill] sm:$0xff] %v4084_v60  ;;  %v4105_v25 = vld [vmem:[#allocation6 + $0x24] ss:$16 sps:$4 sm:$0xff]  }
 0x367   : > { %v3156_v45 = vpop.eup %3155  ;;  %v4096_v35 = vld [vmem:[#allocation6 + $0x4c] ss:$16 sps:$4 sm:$0xff]   ;;  %4671 = vst [vmem:[#allocation19_spill] sm:$0xff] %v4105_v25 }
 0x368   : > { %v1410_v47 = vmul.f32 %v3156_v45, %v3154_v44  ;;  %4668 = vst [vmem:[#allocation13_spill] sm:$0xff] %v4096_v35 }
 0x369   : > { %1528 = vmatpush1.bf16.msra.mxu0 %v3752_v0  ;;  %1569 = vmatpush1.bf16.msra.mxu1 %v3763_v56  ;;  %v4075_v56 = vld [vmem:[#allocation6 + $0x80] ss:$16 sps:$4 sm:$0xff]   ;;  %v4093_v0 = vld [vmem:[#allocation6 + $0x44] ss:$16 sps:$4 sm:$0xff]  }
 0x36a   : > { %v1414_v48 = vpack.c.bf16 %v1410_v47, %v1410_v47  ;;  %1658 = vmatprep.subr.bf16.mxu0 %v3936_v27  ;;  %1699 = vmatprep.subr.bf16.mxu1 %v4043_v49  ;;  %4667 = vst [vmem:[#allocation15_spill] sm:$0xff] %v4093_v0 }
 0x36c   : > { %2852 = vst [vmem:[%s3567_s29 + $0x14] sm:$0xf] %v1414_v48  ;;  %1546 = vmatmul.mubr.bf16.vlgmr.msra.gmra.mxu0 %v1414_v48  ;;  %1587 = vmatmul.mubr.bf16.vlgmr.msra.gmra.mxu1 %v1414_v48 }
 0x36d   : > { %1659 = vmatpush1.bf16.msra.mxu0 %v3941_v21  ;;  %1700 = vmatpush1.bf16.msra.mxu1 %v4048_v50 }
 0x36e   : > { %1660 = vmatprep.subr.bf16.mxu0 %v3945_v26  ;;  %1701 = vmatprep.subr.bf16.mxu1 %v4052_v3 }
 0x36f   : > { %1690 = vmatprep.mubr.bf16.mxu0 %v4623_v61  ;;  %1731 = vmatprep.mubr.bf16.mxu1 %v4623_v61 }
 0x371   : > { %1661 = vmatpush1.bf16.msra.mxu0 %v3951_v7  ;;  %1702 = vmatpush1.bf16.msra.mxu1 %v4058_v51 }
 0x372   : > { %1662 = vmatprep.subr.bf16.mxu0 %v3955_v29  ;;  %1703 = vmatprep.subr.bf16.mxu1 %v4062_v52 }
 0x375   : > { %1663 = vmatpush1.bf16.msra.mxu0 %v3959_v8  ;;  %1704 = vmatpush1.bf16.msra.mxu1 %v4066_v53 }
 0x376   : > { %1664 = vmatprep.subr.bf16.mxu0 %v4069_v54  ;;  %1705 = vmatprep.subr.bf16.mxu1 %v4072_v55 }
 0x379   : > { %1665 = vmatpush1.bf16.msra.mxu0 %v4075_v56  ;;  %1706 = vmatpush1.bf16.msra.mxu1 %v4078_v58 }
 0x37a   : > { %1666 = vmatprep.subr.bf16.mxu0 %v4081_v59  ;;  %1707 = vmatprep.subr.bf16.mxu1 %v4084_v60 }
 0x37d   : > { %1667 = vmatpush1.bf16.msra.mxu0 %v4087_v62  ;;  %1708 = vmatpush1.bf16.msra.mxu1 %v4090_v63 }
 0x37e   : > { %1668 = vmatprep.subr.bf16.mxu0 %v4093_v0  ;;  %1709 = vmatprep.subr.bf16.mxu1 %v4096_v35 }
 0x381   : > { %1669 = vmatpush1.bf16.msra.mxu0 %v4099_v22  ;;  %1710 = vmatpush1.bf16.msra.mxu1 %v4102_v19 }
 0x382   : > { %1670 = vmatprep.subr.bf16.mxu0 %v4105_v25  ;;  %1711 = vmatprep.subr.bf16.mxu1 %v4108_v40 }
 0x385   : > { %1671 = vmatpush1.bf16.msra.mxu0 %v4111_v33  ;;  %1712 = vmatpush1.bf16.msra.mxu1 %v4114_v18 }
 0x386   : > { %1672 = vmatprep.subr.bf16.mxu0 %v4117_v34  ;;  %1713 = vmatprep.subr.bf16.mxu1 %v4120_v11 }
 0x389   : > { %1673 = vmatpush1.bf16.msra.mxu0 %v4123_v12  ;;  %1714 = vmatpush1.bf16.msra.mxu1 %v4126_v28 }
 0x38a   : > { %1749 = vmatprep.subr.bf16.mxu0 %v4129_v15  ;;  %1790 = vmatprep.subr.bf16.mxu1 %v4132_v16 }
 0x40c   : > { %v1456_v17 = vpop.f32.mrf.mxu0  ;;  %v1497_v13 = vpop.f32.mrf.mxu1 }
 0x40d   : > { %v1504_v57 = vadd.f32 %v2853_v10, %v1456_v17  ;;  %v1506_v43 = vadd.f32 %v2855_v5, %v1497_v13  ;;  %v2857_v10 = vld [vmem:[%s3557_s22 + $0x80] sm:$0xff] }
 0x40e   : > { %v1458_v24 = vpop.f32.mrf.mxu0  ;;  %v1499_v31 = vpop.f32.mrf.mxu1 }
 0x40f   : > { %v2861_v14 = vmul.f32 -1.442695, %v1504_v57  ;;  %v1505_v32 = vadd.f32 %v2854_v20, %v1458_v24  ;;  %v2863_v2 = vmul.f32 -1.442695, %v1506_v43  ;;  %v1507_v44 = vadd.f32 %v2856_v37, %v1499_v31  ;;  %v2858_v57 = vld [vmem:[%s3557_s22 + $0x88] sm:$0xff] }
 0x410   : > { %v1460_v1 = vpop.f32.mrf.mxu0  ;;  %v1501_v9 = vpop.f32.mrf.mxu1 }
 0x411   : > { %3157 = vpow2.f32 %v2861_v14  ;;  %v2862_v6 = vmul.f32 -1.442695, %v1505_v32 }
 0x412   : > { %v1461_v38 = vpop.f32.mrf.mxu0  ;;  %v1502_v42 = vpop.f32.mrf.mxu1 }
 0x413   : > { %3159 = vpow2.f32 %v2862_v6 }
 0x414   : > { %3161 = vpow2.f32 %v2863_v2 }
 0x41e   : > { %v3158_v41 = vpop.eup %3157 }
 0x41f   : > { %v1608_v45 = vadd.f32 1.0, %v3158_v41 }
 0x420   : > { %v3160_v47 = vpop.eup %3159 }
 0x421   : > { %3163 = vrcp.f32 %v1608_v45  ;;  %v1609_v48 = vadd.f32 1.0, %v3160_v47  ;;  %v3162_v24 = vpop.eup %3161 }
 0x422   : > { %3165 = vtanh.f32 %v1507_v44  ;;  %v1610_v42 = vadd.f32 1.0, %v3162_v24 }
 0x423   : > { %3167 = vrcp.f32 %v1609_v48  ;;  %v2859_v48 = vld [vmem:[%s3557_s22 + $0x90] sm:$0xff] }
 0x42c   : > { %v1547_v17 = vpop.f32.mrf.mxu0  ;;  %v1588_v20 = vpop.f32.mrf.mxu1 }
 0x42d   : > { %v1595_v14 = vadd.f32 %v2857_v10, %v1547_v17  ;;  %v1597_v10 = vadd.f32 %v2859_v48, %v1588_v20  ;;  %v2860_v17 = vld [vmem:[%s3557_s22 + $0x98] sm:$0xff] }
 0x42e   : > { %v3164_v32 = vpop.eup %3163  ;;  %v1549_v1 = vpop.f32.mrf.mxu0  ;;  %v4149_v20 = vld [vmem:[#allocation8 + $0xe8] ss:$16 sps:$4 sm:$0xff]  }
 0x42f   : > { %v1590_v13 = vpop.f32.mrf.mxu1  ;;  %v3166_v9 = vpop.eup %3165  ;;  %v2864_v6 = vmul.f32 -1.442695, %v1595_v14  ;;  %v1596_v31 = vadd.f32 %v2858_v57, %v1549_v1  ;;  %v2866_v57 = vmul.f32 -1.442695, %v1597_v10  ;;  %v4169_v48 = vld [vmem:[#allocation8 + $0xa8] ss:$16 sps:$4 sm:$0xff]  }
 0x430   : > { %v3168_v38 = vpop.eup %3167  ;;  %v1551_v5 = vpop.f32.mrf.mxu0  ;;  %v1619_v2 = vmul.f32 %v3166_v9, %v3164_v32  ;;  %v1598_v14 = vadd.f32 %v2860_v17, %v1590_v13  ;;  %v4153_v13 = vld [vmem:[#allocation8 + $0xcc] ss:$16 sps:$4 sm:$0xff]  }
 0x431   : > { %v1592_v43 = vpop.f32.mrf.mxu1  ;;  %v1618_v37 = vmul.f32 %v3168_v38, %v3992_v30  ;;  %3169 = vpow2.f32 %v2864_v6  ;;  %v2865_v41 = vmul.f32 -1.442695, %v1596_v31 }
 0x432   : > { %v1552_v44 = vpop.f32.mrf.mxu0  ;;  %v4163_v43 = vld [vmem:[#allocation8 + $0xac] ss:$16 sps:$4 sm:$0xff]  }
 0x433   : > { %v1593_v45 = vpop.f32.mrf.mxu1  ;;  %v4142_v47 = vadd.f32 %v1619_v2, %v1618_v37  ;;  %3171 = vpow2.f32 %v2865_v41 }
 0x434   : > { %3173 = vrcp.f32 %v1610_v42  ;;  %v4159_v42 = vld [vmem:[#allocation8 + $0xc8] ss:$16 sps:$4 sm:$0xff]   ;;  %v4166_v45 = vld [vmem:[#allocation8 + $0xa0] ss:$16 sps:$4 sm:$0xff]  }
 0x435   : > { %3175 = vtanh.f32 %v4142_v47 }
 0x436   : > { %3177 = vpow2.f32 %v2866_v57  ;;  %v4173_v57 = vld [vmem:[#allocation8 + $0x84] ss:$16 sps:$4 sm:$0xff]  }
 0x43e   : > { %v3170_v24 = vpop.eup %3169 }
 0x43f   : > { %v1632_v1 = vadd.f32 1.0, %v3170_v24  ;;  %v4176_v24 = vld [vmem:[#allocation8 + $0x8c] ss:$16 sps:$4 sm:$0xff]  }
 0x440   : > { %v3172_v30 = vpop.eup %3171 }
 0x441   : > { %v3174_v32 = vpop.eup %3173  ;;  %3179 = vrcp.f32 %v1632_v1  ;;  %v1633_v9 = vadd.f32 1.0, %v3172_v30  ;;  %v4181_v1 = vld [vmem:[#allocation8 + $0x80] ss:$16 sps:$4 sm:$0xff]   ;;  %v4184_v30 = vld [vmem:[#allocation8 + $0x88] ss:$16 sps:$4 sm:$0xff]  }
 0x442   : > { %v3176_v6 = vpop.eup %3175  ;;  %3181 = vtanh.f32 %v1598_v14 }
 0x443   : > { %3183 = vrcp.f32 %v1633_v9  ;;  %v1622_v31 = vmul.f32 %v3176_v6, %v3174_v32  ;;  %v3178_v5 = vpop.eup %3177  ;;  %v4191_v32 = vld [vmem:[#allocation8 + $0x6c] ss:$16 sps:$4 sm:$0xff]   ;;  %v4194_v9 = vld [vmem:[#allocation8 + $0x60] ss:$16 sps:$4 sm:$0xff]   ;;  %v4197_v6 = vld [vmem:[#allocation8 + $0x68] ss:$16 sps:$4 sm:$0xff]  }
 0x444   : > { %v1634_v44 = vadd.f32 1.0, %v3178_v5  ;;  %v4206_v5 = vld [vmem:[#allocation8 + $0x40] ss:$16 sps:$4 sm:$0xff]  }
 0x445   : > { %v1647_v38 = vpack.c.bf16 %v1622_v31, %v1622_v31  ;;  %v4200_v31 = vld [vmem:[#allocation8 + $0x44] ss:$16 sps:$4 sm:$0xff]   ;;  %4682 = vst [vmem:[#allocation25_spill] sm:$0xff] %v4206_v5 }
 0x446   : > { %3185 = vrcp.f32 %v1634_v44  ;;  %v4218_v44 = vld [vmem:[#allocation8 + $0x20] ss:$16 sps:$4 sm:$0xff]  }
 0x447   : > { %2867 = vst [vmem:[%s3562_s25 + $0xc] sm:$0xf] %v1647_v38  ;;  %1691 = vmatmul.mubr.bf16.vlgmr.msra.gmra.mxu0 %v1647_v38  ;;  %1732 = vmatmul.mubr.bf16.vlgmr.msra.gmra.mxu1 %v1647_v38  ;;  %v4203_v38 = vld [vmem:[#allocation8 + $0x4c] ss:$16 sps:$4 sm:$0xff]   ;;  %4686 = vst [vmem:[#allocation35_spill] sm:$0xff] %v4218_v44 }
 0x448   : > { %1750 = vmatpush1.bf16.msra.mxu0 %v3998_v39  ;;  %1791 = vmatpush1.bf16.msra.mxu1 %v4149_v20  ;;  %4681 = vst [vmem:[#allocation28_spill] sm:$0xff] %v4203_v38 }
 0x449   : > { %1751 = vmatprep.subr.bf16.mxu0 %v4002_v23  ;;  %1792 = vmatprep.subr.bf16.mxu1 %v4153_v13 }
 0x44a   : > { %1781 = vmatprep.mubr.bf16.mxu0 %v4623_v61  ;;  %1822 = vmatprep.mubr.bf16.mxu1 %v4623_v61 }
 0x44c   : > { %1752 = vmatpush1.bf16.msra.mxu0 %v4008_v36  ;;  %1793 = vmatpush1.bf16.msra.mxu1 %v4159_v42 }
 0x44d   : > { %1753 = vmatprep.subr.bf16.mxu0 %v4012_v4  ;;  %1794 = vmatprep.subr.bf16.mxu1 %v4163_v43 }
 0x44e   : > { %v3180_v37 = vpop.eup %3179 }
 0x44f   : > { %v3182_v2 = vpop.eup %3181 }
 0x450   : > { %v3184_v41 = vpop.eup %3183  ;;  %1754 = vmatpush1.bf16.msra.mxu0 %v4166_v45  ;;  %1795 = vmatpush1.bf16.msra.mxu1 %v4169_v48  ;;  %v1643_v17 = vmul.f32 %v3182_v2, %v3180_v37  ;;  %v4209_v37 = vld [vmem:[#allocation8 + $0x48] ss:$16 sps:$4 sm:$0xff]   ;;  %v4212_v2 = vld [vmem:[#allocation8 + $0x24] ss:$16 sps:$4 sm:$0xff]  }
 0x451   : > { %v1642_v10 = vmul.f32 %v3184_v41, %v4021_v46  ;;  %1755 = vmatprep.subr.bf16.mxu0 %v4173_v57  ;;  %1796 = vmatprep.subr.bf16.mxu1 %v4176_v24  ;;  %v4188_v46 = vld [vmem:[#allocation8 + $0x64] ss:$16 sps:$4 sm:$0xff]   ;;  %4683 = vst [vmem:[#allocation29_spill] sm:$0xff] %v4209_v37  ;;  %4684 = vst [vmem:[#allocation33_spill] sm:$0xff] %v4212_v2  ;;  %v4215_v41 = vld [vmem:[#allocation8 + $0x2c] ss:$16 sps:$4 sm:$0xff]  }
 0x452   : > { %4685 = vst [vmem:[#allocation34_spill] sm:$0xff] %v4215_v41 }
 0x453   : > { %v4179_v14 = vadd.f32 %v1643_v17, %v1642_v10  ;;  %v4221_v10 = vld [vmem:[#allocation8 + $0x28] ss:$16 sps:$4 sm:$0xff]   ;;  %v3186_v17 = vpop.eup %3185 }
 0x454   : > { %1756 = vmatpush1.bf16.msra.mxu0 %v4181_v1  ;;  %1797 = vmatpush1.bf16.msra.mxu1 %v4184_v30  ;;  %4687 = vst [vmem:[#allocation36_spill] sm:$0xff] %v4221_v10 }
 0x455   : > { %3187 = vtanh.f32 %v4179_v14  ;;  %1757 = vmatprep.subr.bf16.mxu0 %v4188_v46  ;;  %1798 = vmatprep.subr.bf16.mxu1 %v4191_v32 }
 0x458   : > { %1758 = vmatpush1.bf16.msra.mxu0 %v4194_v9  ;;  %1799 = vmatpush1.bf16.msra.mxu1 %v4197_v6 }
 0x459   : > { %1759 = vmatprep.subr.bf16.mxu0 %v4200_v31  ;;  %1800 = vmatprep.subr.bf16.mxu1 %v4203_v38  ;;  %v4230_v38 = vld [vmem:[#allocation8] ss:$16 sps:$4 sm:$0xff]  }
 0x45c   : > { %1760 = vmatpush1.bf16.msra.mxu0 %v4206_v5  ;;  %1801 = vmatpush1.bf16.msra.mxu1 %v4209_v37  ;;  %v4224_v5 = vld [vmem:[#allocation8 + $0x4] ss:$16 sps:$4 sm:$0xff]   ;;  %v4227_v37 = vld [vmem:[#allocation8 + $0xc] ss:$16 sps:$4 sm:$0xff]  }
 0x45d   : > { %1761 = vmatprep.subr.bf16.mxu0 %v4212_v2  ;;  %1802 = vmatprep.subr.bf16.mxu1 %v4215_v41 }
 0x460   : > { %1762 = vmatpush1.bf16.msra.mxu0 %v4218_v44  ;;  %1803 = vmatpush1.bf16.msra.mxu1 %v4221_v10  ;;  %v4233_v44 = vld [vmem:[#allocation8 + $0x8] ss:$16 sps:$4 sm:$0xff]  }
 0x461   : > { %1763 = vmatprep.subr.bf16.mxu0 %v4224_v5  ;;  %1804 = vmatprep.subr.bf16.mxu1 %v4227_v37 }
 0x462   : > { %v3188_v2 = vpop.eup %3187 }
 0x463   : > { %v1646_v41 = vmul.f32 %v3188_v2, %v3186_v17  ;;  %v2869_v2 = vld [vmem:[%s3552_s16 + $0x80] sm:$0xff]  ;;  %v2870_v17 = vld [vmem:[%s3552_s16 + $0x88] sm:$0xff] }
 0x464   : > { %1764 = vmatpush1.bf16.msra.mxu0 %v4230_v38  ;;  %1805 = vmatpush1.bf16.msra.mxu1 %v4233_v44 }
 0x465   : > { %v1650_v10 = vpack.c.bf16 %v1646_v41, %v1646_v41  ;;  %1894 = vmatprep.subr.bf16.mxu0 %v3936_v27  ;;  %1935 = vmatprep.subr.bf16.mxu1 %v4043_v49 }
 0x467   : > { %2868 = vst [vmem:[%s3567_s29 + $0x10] sm:$0xf] %v1650_v10  ;;  %1782 = vmatmul.mubr.bf16.vlgmr.msra.gmra.mxu0 %v1650_v10  ;;  %1823 = vmatmul.mubr.bf16.vlgmr.msra.gmra.mxu1 %v1650_v10 }
 0x468   : > { %1895 = vmatpush1.bf16.msra.mxu0 %v3941_v21  ;;  %1936 = vmatpush1.bf16.msra.mxu1 %v4048_v50 }
 0x469   : > { %1896 = vmatprep.subr.bf16.mxu0 %v3945_v26  ;;  %1937 = vmatprep.subr.bf16.mxu1 %v4052_v3 }
 0x46a   : > { %1926 = vmatprep.mubr.bf16.mxu0 %v4623_v61  ;;  %1967 = vmatprep.mubr.bf16.mxu1 %v4623_v61 }
 0x46c   : > { %1897 = vmatpush1.bf16.msra.mxu0 %v3951_v7  ;;  %1938 = vmatpush1.bf16.msra.mxu1 %v4058_v51 }
 0x46d   : > { %1898 = vmatprep.subr.bf16.mxu0 %v3955_v29  ;;  %1939 = vmatprep.subr.bf16.mxu1 %v4062_v52 }
 0x470   : > { %1899 = vmatpush1.bf16.msra.mxu0 %v3959_v8  ;;  %1940 = vmatpush1.bf16.msra.mxu1 %v4066_v53 }
 0x471   : > { %1900 = vmatprep.subr.bf16.mxu0 %v4069_v54  ;;  %1941 = vmatprep.subr.bf16.mxu1 %v4072_v55 }
 0x474   : > { %1901 = vmatpush1.bf16.msra.mxu0 %v4075_v56  ;;  %1942 = vmatpush1.bf16.msra.mxu1 %v4078_v58 }
 0x475   : > { %1902 = vmatprep.subr.bf16.mxu0 %v4081_v59  ;;  %1943 = vmatprep.subr.bf16.mxu1 %v4084_v60 }
 0x478   : > { %1903 = vmatpush1.bf16.msra.mxu0 %v4087_v62  ;;  %1944 = vmatpush1.bf16.msra.mxu1 %v4090_v63 }
 0x479   : > { %1904 = vmatprep.subr.bf16.mxu0 %v4093_v0  ;;  %1945 = vmatprep.subr.bf16.mxu1 %v4096_v35  ;;  %v2872_v35 = vld [vmem:[%s3552_s16 + $0x98] sm:$0xff] }
 0x47c   : > { %1905 = vmatpush1.bf16.msra.mxu0 %v4099_v22  ;;  %1946 = vmatpush1.bf16.msra.mxu1 %v4102_v19 }
 0x47d   : > { %1906 = vmatprep.subr.bf16.mxu0 %v4105_v25  ;;  %1947 = vmatprep.subr.bf16.mxu1 %v4108_v40 }
 0x480   : > { %1907 = vmatpush1.bf16.msra.mxu0 %v4111_v33  ;;  %1948 = vmatpush1.bf16.msra.mxu1 %v4114_v18 }
 0x481   : > { %1908 = vmatprep.subr.bf16.mxu0 %v4117_v34  ;;  %1949 = vmatprep.subr.bf16.mxu1 %v4120_v11 }
 0x484   : > { %1909 = vmatpush1.bf16.msra.mxu0 %v4123_v12  ;;  %1950 = vmatpush1.bf16.msra.mxu1 %v4126_v28 }
 0x485   : > { %1985 = vmatprep.subr.bf16.mxu0 %v4129_v15  ;;  %2026 = vmatprep.subr.bf16.mxu1 %v4132_v16  ;;  %v2871_v16 = vld [vmem:[%s3552_s16 + $0x90] sm:$0xff] }
 0x507   : > { %v1692_v41 = vpop.f32.mrf.mxu0  ;;  %v1733_v10 = vpop.f32.mrf.mxu1 }
 0x508   : > { %v1740_v33 = vadd.f32 %v2869_v2, %v1692_v41  ;;  %v1742_v22 = vadd.f32 %v2871_v16, %v1733_v10 }
 0x509   : > { %v1694_v18 = vpop.f32.mrf.mxu0  ;;  %v1735_v40 = vpop.f32.mrf.mxu1 }
 0x50a   : > { %v2877_v34 = vmul.f32 -1.442695, %v1740_v33  ;;  %v1741_v25 = vadd.f32 %v2870_v17, %v1694_v18  ;;  %v2879_v0 = vmul.f32 -1.442695, %v1742_v22  ;;  %v1743_v62 = vadd.f32 %v2872_v35, %v1735_v40 }
 0x50b   : > { %v1696_v11 = vpop.f32.mrf.mxu0  ;;  %v1737_v19 = vpop.f32.mrf.mxu1 }
 0x50c   : > { %3189 = vpow2.f32 %v2877_v34  ;;  %v2878_v12 = vmul.f32 -1.442695, %v1741_v25  ;;  %v2873_v19 = vld [vmem:[%s3557_s22 + $0x60] sm:$0xff]  ;;  %v2874_v34 = vld [vmem:[%s3557_s22 + $0x68] sm:$0xff] }
 0x50d   : > { %v1697_v28 = vpop.f32.mrf.mxu0  ;;  %v1738_v15 = vpop.f32.mrf.mxu1 }
 0x50e   : > { %3191 = vpow2.f32 %v2878_v12 }
 0x50f   : > { %3193 = vpow2.f32 %v2879_v0 }
 0x519   : > { %v3190_v63 = vpop.eup %3189 }
 0x51a   : > { %v1844_v2 = vadd.f32 1.0, %v3190_v63 }
 0x51b   : > { %v3192_v41 = vpop.eup %3191 }
 0x51c   : > { %3195 = vrcp.f32 %v1844_v2  ;;  %v1845_v33 = vadd.f32 1.0, %v3192_v41  ;;  %v3194_v11 = vpop.eup %3193 }
 0x51d   : > { %3197 = vtanh.f32 %v1743_v62  ;;  %v1846_v0 = vadd.f32 1.0, %v3194_v11 }
 0x51e   : > { %3199 = vrcp.f32 %v1845_v33 }
 0x527   : > { %v1783_v25 = vpop.f32.mrf.mxu0  ;;  %v1824_v18 = vpop.f32.mrf.mxu1 }
 0x528   : > { %v1831_v12 = vadd.f32 %v2873_v19, %v1783_v25  ;;  %v2875_v25 = vld [vmem:[%s3557_s22 + $0x70] sm:$0xff] }
 0x529   : > { %v3196_v28 = vpop.eup %3195  ;;  %v1785_v15 = vpop.f32.mrf.mxu0 }
 0x52a   : > { %v1826_v16 = vpop.f32.mrf.mxu1  ;;  %v3198_v10 = vpop.eup %3197  ;;  %v2880_v22 = vmul.f32 -1.442695, %v1831_v12  ;;  %v1832_v35 = vadd.f32 %v2874_v34, %v1785_v15  ;;  %v1833_v34 = vadd.f32 %v2875_v25, %v1824_v18  ;;  %v2876_v12 = vld [vmem:[%s3557_s22 + $0x78] sm:$0xff]  ;;  %v4689_v25 = vld [vmem:[#allocation25_spill] sm:$0xff] }
 0x52b   : > { %v3200_v63 = vpop.eup %3199  ;;  %v1787_v40 = vpop.f32.mrf.mxu0  ;;  %v1855_v2 = vmul.f32 %v3198_v10, %v3196_v28 }
 0x52c   : > { %v1828_v17 = vpop.f32.mrf.mxu1  ;;  %v1854_v62 = vmul.f32 %v3200_v63, %v4142_v47  ;;  %3201 = vpow2.f32 %v2880_v22  ;;  %v2881_v41 = vmul.f32 -1.442695, %v1832_v35  ;;  %v2882_v11 = vmul.f32 -1.442695, %v1833_v34  ;;  %v4690_v34 = vld [vmem:[#allocation29_spill] sm:$0xff] }
 0x52d   : > { %v1788_v33 = vpop.f32.mrf.mxu0  ;;  %v1834_v40 = vadd.f32 %v2876_v12, %v1826_v16  ;;  %v4691_v12 = vld [vmem:[#allocation33_spill] sm:$0xff] }
 0x52e   : > { %v1829_v60 = vpop.f32.mrf.mxu1  ;;  %v4280_v19 = vadd.f32 %v1855_v2, %v1854_v62  ;;  %3203 = vpow2.f32 %v2881_v41 }
 0x52f   : > { %3205 = vrcp.f32 %v1846_v0 }
 0x530   : > { %3207 = vtanh.f32 %v4280_v19 }
 0x531   : > { %3209 = vpow2.f32 %v2882_v11  ;;  %v4692_v11 = vld [vmem:[#allocation34_spill] sm:$0xff] }
 0x539   : > { %v3202_v15 = vpop.eup %3201 }
 0x53a   : > { %v1868_v17 = vadd.f32 1.0, %v3202_v15  ;;  %v4693_v15 = vld [vmem:[#allocation35_spill] sm:$0xff] }
 0x53b   : > { %v3204_v47 = vpop.eup %3203 }
 0x53c   : > { %v3206_v28 = vpop.eup %3205  ;;  %3211 = vrcp.f32 %v1868_v17  ;;  %v1869_v10 = vadd.f32 1.0, %v3204_v47 }
 0x53d   : > { %v3208_v60 = vpop.eup %3207  ;;  %3213 = vtanh.f32 %v1834_v40  ;;  %v4694_v40 = vld [vmem:[#allocation36_spill] sm:$0xff] }
 0x53e   : > { %3215 = vrcp.f32 %v1869_v10  ;;  %v1858_v22 = vmul.f32 %v3208_v60, %v3206_v28  ;;  %v3210_v18 = vpop.eup %3209  ;;  %v4701_v60 = vld [vmem:[#allocation14_spill] sm:$0xff] }
 0x53f   : > { %v1870_v62 = vadd.f32 1.0, %v3210_v18  ;;  %v4704_v18 = vld [vmem:[#allocation22_spill] sm:$0xff] }
 0x540   : > { %v1883_v35 = vpack.c.bf16 %v1858_v22, %v1858_v22  ;;  %v4702_v22 = vld [vmem:[#allocation19_spill] sm:$0xff] }
 0x541   : > { %3217 = vrcp.f32 %v1870_v62  ;;  %v4708_v62 = vld [vmem:[#allocation26_spill] sm:$0xff] }
 0x542   : > { %2883 = vst [vmem:[%s3562_s25 + $0x10] sm:$0xf] %v1883_v35  ;;  %1927 = vmatmul.mubr.bf16.vlgmr.msra.gmra.mxu0 %v1883_v35  ;;  %1968 = vmatmul.mubr.bf16.vlgmr.msra.gmra.mxu1 %v1883_v35  ;;  %v4703_v35 = vld [vmem:[#allocation16_spill] sm:$0xff] }
 0x543   : > { %1986 = vmatpush1.bf16.msra.mxu0 %v3998_v39  ;;  %2027 = vmatpush1.bf16.msra.mxu1 %v4149_v20 }
 0x544   : > { %1987 = vmatprep.subr.bf16.mxu0 %v4002_v23  ;;  %2028 = vmatprep.subr.bf16.mxu1 %v4153_v13 }
 0x545   : > { %2017 = vmatprep.mubr.bf16.mxu0 %v4623_v61  ;;  %2058 = vmatprep.mubr.bf16.mxu1 %v4623_v61 }
 0x547   : > { %1988 = vmatpush1.bf16.msra.mxu0 %v4008_v36  ;;  %2029 = vmatpush1.bf16.msra.mxu1 %v4159_v42 }
 0x548   : > { %1989 = vmatprep.subr.bf16.mxu0 %v4012_v4  ;;  %2030 = vmatprep.subr.bf16.mxu1 %v4163_v43 }
 0x549   : > { %v3212_v16 = vpop.eup %3211 }
 0x54a   : > { %v3214_v63 = vpop.eup %3213 }
 0x54b   : > { %v3216_v0 = vpop.eup %3215  ;;  %1990 = vmatpush1.bf16.msra.mxu0 %v4166_v45  ;;  %2031 = vmatpush1.bf16.msra.mxu1 %v4169_v48  ;;  %v1879_v41 = vmul.f32 %v3214_v63, %v3212_v16  ;;  %v4705_v16 = vld [vmem:[#allocation17_spill] sm:$0xff]  ;;  %v4706_v63 = vld [vmem:[#allocation23_spill] sm:$0xff] }
 0x54c   : > { %v1878_v2 = vmul.f32 %v3216_v0, %v4179_v14  ;;  %1991 = vmatprep.subr.bf16.mxu0 %v4173_v57  ;;  %2032 = vmatprep.subr.bf16.mxu1 %v4176_v24  ;;  %v4688_v14 = vld [vmem:[#allocation28_spill] sm:$0xff] }
 0x54d   : > { %v4707_v0 = vld [vmem:[#allocation20_spill] sm:$0xff] }
 0x54e   : > { %v4301_v33 = vadd.f32 %v1879_v41, %v1878_v2  ;;  %v3218_v17 = vpop.eup %3217  ;;  %v4709_v2 = vld [vmem:[#allocation21_spill] sm:$0xff]  ;;  %v4710_v41 = vld [vmem:[#allocation27_spill] sm:$0xff] }
 0x54f   : > { %1992 = vmatpush1.bf16.msra.mxu0 %v4181_v1  ;;  %2033 = vmatpush1.bf16.msra.mxu1 %v4184_v30 }
 0x550   : > { %3219 = vtanh.f32 %v4301_v33  ;;  %1993 = vmatprep.subr.bf16.mxu0 %v4188_v46  ;;  %2034 = vmatprep.subr.bf16.mxu1 %v4191_v32 }
 0x553   : > { %1994 = vmatpush1.bf16.msra.mxu0 %v4194_v9  ;;  %2035 = vmatpush1.bf16.msra.mxu1 %v4197_v6 }
 0x554   : > { %1995 = vmatprep.subr.bf16.mxu0 %v4200_v31  ;;  %2036 = vmatprep.subr.bf16.mxu1 %v4688_v14 }
 0x557   : > { %1996 = vmatpush1.bf16.msra.mxu0 %v4689_v25  ;;  %2037 = vmatpush1.bf16.msra.mxu1 %v4690_v34 }
 0x558   : > { %1997 = vmatprep.subr.bf16.mxu0 %v4691_v12  ;;  %2038 = vmatprep.subr.bf16.mxu1 %v4692_v11 }
 0x55b   : > { %1998 = vmatpush1.bf16.msra.mxu0 %v4693_v15  ;;  %2039 = vmatpush1.bf16.msra.mxu1 %v4694_v40 }
 0x55c   : > { %1999 = vmatprep.subr.bf16.mxu0 %v4224_v5  ;;  %2040 = vmatprep.subr.bf16.mxu1 %v4227_v37 }
 0x55d   : > { %v3220_v47 = vpop.eup %3219 }
 0x55e   : > { %v1882_v28 = vmul.f32 %v3220_v47, %v3218_v17  ;;  %v4711_v17 = vld [vmem:[#allocation24_spill] sm:$0xff] }
 0x55f   : > { %2000 = vmatpush1.bf16.msra.mxu0 %v4230_v38  ;;  %2041 = vmatpush1.bf16.msra.mxu1 %v4233_v44  ;;  %v2885_v47 = vld [vmem:[%s3552_s16 + $0xa0] sm:$0xff] }
 0x560   : > { %v1886_v10 = vpack.c.bf16 %v1882_v28, %v1882_v28  ;;  %2130 = vmatprep.subr.bf16.mxu0 %v3936_v27  ;;  %2171 = vmatprep.subr.bf16.mxu1 %v4043_v49  ;;  %v4695_v27 = vld [vmem:[#allocation31_spill] sm:$0xff] }
 0x562   : > { %2884 = vst [vmem:[%s3567_s29 + $0xc] sm:$0xf] %v1886_v10  ;;  %2018 = vmatmul.mubr.bf16.vlgmr.msra.gmra.mxu0 %v1886_v10  ;;  %2059 = vmatmul.mubr.bf16.vlgmr.msra.gmra.mxu1 %v1886_v10 }
 0x563   : > { %2131 = vmatpush1.bf16.msra.mxu0 %v3941_v21  ;;  %2172 = vmatpush1.bf16.msra.mxu1 %v4048_v50  ;;  %v4696_v21 = vld [vmem:[#allocation32_spill] sm:$0xff] }
 0x564   : > { %2132 = vmatprep.subr.bf16.mxu0 %v3945_v26  ;;  %2173 = vmatprep.subr.bf16.mxu1 %v4052_v3  ;;  %v4697_v26 = vld [vmem:[#allocation12_spill] sm:$0xff] }
 0x565   : > { %2162 = vmatprep.mubr.bf16.mxu0 %v4623_v61  ;;  %2203 = vmatprep.mubr.bf16.mxu1 %v4623_v61 }
 0x567   : > { %2133 = vmatpush1.bf16.msra.mxu0 %v3951_v7  ;;  %2174 = vmatpush1.bf16.msra.mxu1 %v4058_v51  ;;  %v4698_v7 = vld [vmem:[#allocation15_spill] sm:$0xff] }
 0x568   : > { %2134 = vmatprep.subr.bf16.mxu0 %v3955_v29  ;;  %2175 = vmatprep.subr.bf16.mxu1 %v4062_v52  ;;  %v4699_v29 = vld [vmem:[#allocation13_spill] sm:$0xff] }
 0x56b   : > { %2135 = vmatpush1.bf16.msra.mxu0 %v3959_v8  ;;  %2176 = vmatpush1.bf16.msra.mxu1 %v4066_v53  ;;  %v4700_v8 = vld [vmem:[#allocation18_spill] sm:$0xff] }
 0x56c   : > { %2136 = vmatprep.subr.bf16.mxu0 %v4069_v54  ;;  %2177 = vmatprep.subr.bf16.mxu1 %v4072_v55 }
 0x56f   : > { %2137 = vmatpush1.bf16.msra.mxu0 %v4075_v56  ;;  %2178 = vmatpush1.bf16.msra.mxu1 %v4078_v58 }
 0x570   : > { %2138 = vmatprep.subr.bf16.mxu0 %v4081_v59  ;;  %2179 = vmatprep.subr.bf16.mxu1 %v4695_v27 }
 0x573   : > { %2139 = vmatpush1.bf16.msra.mxu0 %v4696_v21  ;;  %2180 = vmatpush1.bf16.msra.mxu1 %v4697_v26 }
 0x574   : > { %2140 = vmatprep.subr.bf16.mxu0 %v4698_v7  ;;  %2181 = vmatprep.subr.bf16.mxu1 %v4699_v29  ;;  %v2888_v7 = vld [vmem:[%s3552_s16 + $0xb8] sm:$0xff] }
 0x577   : > { %2141 = vmatpush1.bf16.msra.mxu0 %v4700_v8  ;;  %2182 = vmatpush1.bf16.msra.mxu1 %v4701_v60 }
 0x578   : > { %2142 = vmatprep.subr.bf16.mxu0 %v4702_v22  ;;  %2183 = vmatprep.subr.bf16.mxu1 %v4703_v35 }
 0x57b   : > { %2143 = vmatpush1.bf16.msra.mxu0 %v4704_v18  ;;  %2184 = vmatpush1.bf16.msra.mxu1 %v4705_v16  ;;  %v2886_v18 = vld [vmem:[%s3552_s16 + $0xa8] sm:$0xff] }
 0x57c   : > { %2144 = vmatprep.subr.bf16.mxu0 %v4706_v63  ;;  %2185 = vmatprep.subr.bf16.mxu1 %v4707_v0 }
 0x57f   : > { %2145 = vmatpush1.bf16.msra.mxu0 %v4708_v62  ;;  %2186 = vmatpush1.bf16.msra.mxu1 %v4709_v2 }
 0x580   : > { %2221 = vmatprep.subr.bf16.mxu0 %v4710_v41  ;;  %2262 = vmatprep.subr.bf16.mxu1 %v4711_v17  ;;  %v2887_v17 = vld [vmem:[%s3552_s16 + $0xb0] sm:$0xff] }
 0x602   : > { %v1928_v28 = vpop.f32.mrf.mxu0  ;;  %v1969_v10 = vpop.f32.mrf.mxu1 }
 0x603   : > { %v1976_v35 = vadd.f32 %v2885_v47, %v1928_v28  ;;  %v1978_v29 = vadd.f32 %v2887_v17, %v1969_v10 }
 0x604   : > { %v1930_v16 = vpop.f32.mrf.mxu0  ;;  %v1971_v22 = vpop.f32.mrf.mxu1 }
 0x605   : > { %v2893_v63 = vmul.f32 -1.442695, %v1976_v35  ;;  %v1977_v60 = vadd.f32 %v2886_v18, %v1930_v16  ;;  %v2895_v26 = vmul.f32 -1.442695, %v1978_v29  ;;  %v1979_v27 = vadd.f32 %v2888_v7, %v1971_v22  ;;  %v2890_v16 = vld [vmem:[%s3557_s22 + $0x48] sm:$0xff] }
 0x606   : > { %v1932_v0 = vpop.f32.mrf.mxu0  ;;  %v1973_v8 = vpop.f32.mrf.mxu1 }
 0x607   : > { %3221 = vpow2.f32 %v2893_v63  ;;  %v2894_v62 = vmul.f32 -1.442695, %v1977_v60  ;;  %v2889_v8 = vld [vmem:[%s3557_s22 + $0x40] sm:$0xff] }
 0x608   : > { %v1933_v2 = vpop.f32.mrf.mxu0  ;;  %v1974_v41 = vpop.f32.mrf.mxu1 }
 0x609   : > { %3223 = vpow2.f32 %v2894_v62 }
 0x60a   : > { %3225 = vpow2.f32 %v2895_v26 }
 0x614   : > { %v3222_v21 = vpop.eup %3221 }
 0x615   : > { %v2080_v47 = vadd.f32 1.0, %v3222_v21 }
 0x616   : > { %v3224_v28 = vpop.eup %3223 }
 0x617   : > { %3227 = vrcp.f32 %v2080_v47  ;;  %v2081_v35 = vadd.f32 1.0, %v3224_v28  ;;  %v3226_v63 = vpop.eup %3225 }
 0x618   : > { %3229 = vtanh.f32 %v1979_v27  ;;  %v2082_v26 = vadd.f32 1.0, %v3226_v63 }
 0x619   : > { %3231 = vrcp.f32 %v2081_v35 }
 0x622   : > { %v2019_v60 = vpop.f32.mrf.mxu0  ;;  %v2060_v18 = vpop.f32.mrf.mxu1 }
 0x623   : > { %v2067_v0 = vadd.f32 %v2889_v8, %v2019_v60  ;;  %v2891_v60 = vld [vmem:[%s3557_s22 + $0x50] sm:$0xff] }
 0x624   : > { %v3228_v62 = vpop.eup %3227  ;;  %v2021_v2 = vpop.f32.mrf.mxu0 }
 0x625   : > { %v2062_v41 = vpop.f32.mrf.mxu1  ;;  %v3230_v17 = vpop.eup %3229  ;;  %v2896_v29 = vmul.f32 -1.442695, %v2067_v0  ;;  %v2068_v7 = vadd.f32 %v2890_v16, %v2021_v2  ;;  %v2069_v16 = vadd.f32 %v2891_v60, %v2060_v18  ;;  %v2892_v0 = vld [vmem:[%s3557_s22 + $0x58] sm:$0xff]  ;;  %v3382_v60 = vld [vmem:[#allocation6 + $0xe0] ss:$16 sps:$4 sm:$0xff]  }
 0x626   : > { %v3232_v21 = vpop.eup %3231  ;;  %v2023_v22 = vpop.f32.mrf.mxu0  ;;  %v2091_v47 = vmul.f32 %v3230_v17, %v3228_v62 }
 0x627   : > { %v2064_v10 = vpop.f32.mrf.mxu1  ;;  %v2090_v27 = vmul.f32 %v3232_v21, %v4280_v19  ;;  %3233 = vpow2.f32 %v2896_v29  ;;  %v2897_v28 = vmul.f32 -1.442695, %v2068_v7  ;;  %v2898_v63 = vmul.f32 -1.442695, %v2069_v16  ;;  %v3383_v16 = vld [vmem:[#allocation6 + $0xc4] ss:$16 sps:$4 sm:$0xff]  }
 0x628   : > { %v2024_v35 = vpop.f32.mrf.mxu0  ;;  %v2070_v22 = vadd.f32 %v2892_v0, %v2062_v41  ;;  %v3384_v0 = vld [vmem:[#allocation6 + $0xc0] ss:$16 sps:$4 sm:$0xff]  }
 0x629   : > { %v2065_v59 = vpop.f32.mrf.mxu1  ;;  %v4366_v8 = vadd.f32 %v2091_v47, %v2090_v27  ;;  %3235 = vpow2.f32 %v2897_v28  ;;  %v3381_v35 = vld [vmem:[#allocation6 + $0xe4] ss:$16 sps:$4 sm:$0xff]  }
 0x62a   : > { %3237 = vrcp.f32 %v2082_v26 }
 0x62b   : > { %3239 = vtanh.f32 %v4366_v8 }
 0x62c   : > { %3241 = vpow2.f32 %v2898_v63  ;;  %v3386_v63 = vld [vmem:[#allocation6 + $0xa0] ss:$16 sps:$4 sm:$0xff]  }
 0x634   : > { %v3234_v2 = vpop.eup %3233 }
 0x635   : > { %v2104_v10 = vadd.f32 1.0, %v3234_v2  ;;  %v4715_v2 = vld [vmem:[#allocation12_spill] sm:$0xff] }
 0x636   : > { %v3236_v19 = vpop.eup %3235 }
 0x637   : > { %v3238_v62 = vpop.eup %3237  ;;  %3243 = vrcp.f32 %v2104_v10  ;;  %v2105_v17 = vadd.f32 1.0, %v3236_v19  ;;  %v4723_v10 = vld [vmem:[#allocation17_spill] sm:$0xff]  ;;  %v4724_v19 = vld [vmem:[#allocation23_spill] sm:$0xff] }
 0x638   : > { %v3240_v59 = vpop.eup %3239  ;;  %3245 = vtanh.f32 %v2070_v22  ;;  %v4722_v22 = vld [vmem:[#allocation22_spill] sm:$0xff] }
 0x639   : > { %3247 = vrcp.f32 %v2105_v17  ;;  %v2094_v29 = vmul.f32 %v3240_v59, %v3238_v62  ;;  %v3242_v18 = vpop.eup %3241  ;;  %v4725_v62 = vld [vmem:[#allocation20_spill] sm:$0xff]  ;;  %v4726_v17 = vld [vmem:[#allocation26_spill] sm:$0xff]  ;;  %v4727_v59 = vld [vmem:[#allocation21_spill] sm:$0xff] }
 0x63a   : > { %v2106_v26 = vadd.f32 1.0, %v3242_v18  ;;  %v2901_v18 = vld [vmem:[%s3552_s16 + $0xc0] sm:$0xff] }
 0x63b   : > { %v2119_v7 = vpack.c.bf16 %v2094_v29, %v2094_v29  ;;  %v4728_v29 = vld [vmem:[#allocation27_spill] sm:$0xff] }
 0x63c   : > { %3249 = vrcp.f32 %v2106_v26 }
 0x63d   : > { %2899 = vst [vmem:[%s3562_s25 + $0x14] sm:$0xf] %v2119_v7  ;;  %2163 = vmatmul.mubr.bf16.vlgmr.msra.gmra.mxu0 %v2119_v7  ;;  %2204 = vmatmul.mubr.bf16.vlgmr.msra.gmra.mxu1 %v2119_v7  ;;  %v4729_v7 = vld [vmem:[#allocation24_spill] sm:$0xff] }
 0x63e   : > { %2222 = vmatpush1.bf16.msra.mxu0 %v3998_v39  ;;  %2263 = vmatpush1.bf16.msra.mxu1 %v4149_v20 }
 0x63f   : > { %2223 = vmatprep.subr.bf16.mxu0 %v4002_v23  ;;  %2264 = vmatprep.subr.bf16.mxu1 %v4153_v13 }
 0x640   : > { %2253 = vmatprep.mubr.bf16.mxu0 %v4623_v61  ;;  %2294 = vmatprep.mubr.bf16.mxu1 %v4623_v61 }
 0x642   : > { %2224 = vmatpush1.bf16.msra.mxu0 %v4008_v36  ;;  %2265 = vmatpush1.bf16.msra.mxu1 %v4159_v42 }
 0x643   : > { %2225 = vmatprep.subr.bf16.mxu0 %v4012_v4  ;;  %2266 = vmatprep.subr.bf16.mxu1 %v4163_v43 }
 0x644   : > { %v3244_v39 = vpop.eup %3243 }
 0x645   : > { %v3246_v41 = vpop.eup %3245 }
 0x646   : > { %v3248_v21 = vpop.eup %3247  ;;  %2226 = vmatpush1.bf16.msra.mxu0 %v4166_v45  ;;  %2267 = vmatpush1.bf16.msra.mxu1 %v4169_v48  ;;  %v2115_v27 = vmul.f32 %v3246_v41, %v3244_v39 }
 0x647   : > { %v2114_v23 = vmul.f32 %v3248_v21, %v4301_v33  ;;  %2227 = vmatprep.subr.bf16.mxu0 %v4173_v57  ;;  %2268 = vmatprep.subr.bf16.mxu1 %v4176_v24  ;;  %v2902_v21 = vld [vmem:[%s3552_s16 + $0xc8] sm:$0xff] }
 0x649   : > { %v4387_v36 = vadd.f32 %v2115_v27, %v2114_v23  ;;  %v3250_v4 = vpop.eup %3249 }
 0x64a   : > { %2228 = vmatpush1.bf16.msra.mxu0 %v4181_v1  ;;  %2269 = vmatpush1.bf16.msra.mxu1 %v4184_v30 }
 0x64b   : > { %3251 = vtanh.f32 %v4387_v36  ;;  %2229 = vmatprep.subr.bf16.mxu0 %v4188_v46  ;;  %2270 = vmatprep.subr.bf16.mxu1 %v4191_v32 }
 0x64e   : > { %2230 = vmatpush1.bf16.msra.mxu0 %v4194_v9  ;;  %2271 = vmatpush1.bf16.msra.mxu1 %v4197_v6 }
 0x64f   : > { %2231 = vmatprep.subr.bf16.mxu0 %v4200_v31  ;;  %2272 = vmatprep.subr.bf16.mxu1 %v4688_v14 }
 0x652   : > { %2232 = vmatpush1.bf16.msra.mxu0 %v4689_v25  ;;  %2273 = vmatpush1.bf16.msra.mxu1 %v4690_v34 }
 0x653   : > { %2233 = vmatprep.subr.bf16.mxu0 %v4691_v12  ;;  %2274 = vmatprep.subr.bf16.mxu1 %v4692_v11 }
 0x656   : > { %2234 = vmatpush1.bf16.msra.mxu0 %v4693_v15  ;;  %2275 = vmatpush1.bf16.msra.mxu1 %v4694_v40 }
 0x657   : > { %2235 = vmatprep.subr.bf16.mxu0 %v4224_v5  ;;  %2276 = vmatprep.subr.bf16.mxu1 %v4227_v37 }
 0x658   : > { %v3252_v33 = vpop.eup %3251 }
 0x659   : > { %v2118_v47 = vmul.f32 %v3252_v33, %v3250_v4 }
 0x65a   : > { %2236 = vmatpush1.bf16.msra.mxu0 %v4230_v38  ;;  %2277 = vmatpush1.bf16.msra.mxu1 %v4233_v44 }
 0x65b   : > { %v2122_v28 = vpack.c.bf16 %v2118_v47, %v2118_v47  ;;  %2366 = vmatprep.subr.bf16.mxu0 %v3381_v35  ;;  %2407 = vmatprep.subr.bf16.mxu1 %v4043_v49  ;;  %v3385_v49 = vld [vmem:[#allocation6 + $0xa4] ss:$16 sps:$4 sm:$0xff]  }
 0x65d   : > { %2900 = vst [vmem:[%s3567_s29 + $0x8] sm:$0xf] %v2122_v28  ;;  %2254 = vmatmul.mubr.bf16.vlgmr.msra.gmra.mxu0 %v2122_v28  ;;  %2295 = vmatmul.mubr.bf16.vlgmr.msra.gmra.mxu1 %v2122_v28 }
 0x65e   : > { %2367 = vmatpush1.bf16.msra.mxu0 %v3382_v60  ;;  %2408 = vmatpush1.bf16.msra.mxu1 %v4048_v50  ;;  %v4712_v50 = vld [vmem:[#allocation30_spill] sm:$0xff] }
 0x65f   : > { %2368 = vmatprep.subr.bf16.mxu0 %v3383_v16  ;;  %2409 = vmatprep.subr.bf16.mxu1 %v4052_v3  ;;  %v4713_v3 = vld [vmem:[#allocation31_spill] sm:$0xff] }
 0x660   : > { %2398 = vmatprep.mubr.bf16.mxu0 %v4623_v61  ;;  %2439 = vmatprep.mubr.bf16.mxu1 %v4623_v61 }
 0x662   : > { %2369 = vmatpush1.bf16.msra.mxu0 %v3384_v0  ;;  %2410 = vmatpush1.bf16.msra.mxu1 %v4058_v51  ;;  %v4714_v51 = vld [vmem:[#allocation32_spill] sm:$0xff]  ;;  %v2903_v0 = vld [vmem:[%s3552_s16 + $0xd0] sm:$0xff] }
 0x663   : > { %2370 = vmatprep.subr.bf16.mxu0 %v3385_v49  ;;  %2411 = vmatprep.subr.bf16.mxu1 %v4062_v52  ;;  %v4716_v52 = vld [vmem:[#allocation15_spill] sm:$0xff] }
 0x666   : > { %2371 = vmatpush1.bf16.msra.mxu0 %v3386_v63  ;;  %2412 = vmatpush1.bf16.msra.mxu1 %v4066_v53  ;;  %v4717_v53 = vld [vmem:[#allocation13_spill] sm:$0xff]  ;;  %v2904_v63 = vld [vmem:[%s3552_s16 + $0xd8] sm:$0xff] }
 0x667   : > { %2372 = vmatprep.subr.bf16.mxu0 %v4069_v54  ;;  %2413 = vmatprep.subr.bf16.mxu1 %v4072_v55  ;;  %v4718_v54 = vld [vmem:[#allocation18_spill] sm:$0xff] }
 0x668   : > { %v4719_v55 = vld [vmem:[#allocation14_spill] sm:$0xff] }
 0x66a   : > { %2373 = vmatpush1.bf16.msra.mxu0 %v4075_v56  ;;  %2414 = vmatpush1.bf16.msra.mxu1 %v4078_v58  ;;  %v4720_v56 = vld [vmem:[#allocation19_spill] sm:$0xff]  ;;  %v4721_v58 = vld [vmem:[#allocation16_spill] sm:$0xff] }
 0x66b   : > { %2374 = vmatprep.subr.bf16.mxu0 %v4712_v50  ;;  %2415 = vmatprep.subr.bf16.mxu1 %v4713_v3 }
 0x66e   : > { %2375 = vmatpush1.bf16.msra.mxu0 %v4714_v51  ;;  %2416 = vmatpush1.bf16.msra.mxu1 %v4715_v2 }
 0x66f   : > { %2376 = vmatprep.subr.bf16.mxu0 %v4716_v52  ;;  %2417 = vmatprep.subr.bf16.mxu1 %v4717_v53 }
 0x672   : > { %2377 = vmatpush1.bf16.msra.mxu0 %v4718_v54  ;;  %2418 = vmatpush1.bf16.msra.mxu1 %v4719_v55  ;;  %v2905_v54 = vld [vmem:[%s3557_s22 + $0x20] sm:$0xff] }
 0x673   : > { %2378 = vmatprep.subr.bf16.mxu0 %v4720_v56  ;;  %2419 = vmatprep.subr.bf16.mxu1 %v4721_v58  ;;  %v2906_v58 = vld [vmem:[%s3557_s22 + $0x28] sm:$0xff] }
 0x676   : > { %2379 = vmatpush1.bf16.msra.mxu0 %v4722_v22  ;;  %2420 = vmatpush1.bf16.msra.mxu1 %v4723_v10 }
 0x677   : > { %2380 = vmatprep.subr.bf16.mxu0 %v4724_v19  ;;  %2421 = vmatprep.subr.bf16.mxu1 %v4725_v62 }
 0x67a   : > { %2381 = vmatpush1.bf16.msra.mxu0 %v4726_v17  ;;  %2422 = vmatpush1.bf16.msra.mxu1 %v4727_v59 }
 0x67b   : > { %2456 = vmatprep.subr.bf16.mxu0 %v4728_v29  ;;  %2497 = vmatprep.subr.bf16.mxu1 %v4729_v7 }
 0x6fd   : > { %v2164_v39 = vpop.f32.mrf.mxu0  ;;  %v2205_v41 = vpop.f32.mrf.mxu1 }
 0x6fe   : > { %v2212_v26 = vadd.f32 %v2901_v18, %v2164_v39  ;;  %v2214_v49 = vadd.f32 %v2903_v0, %v2205_v41 }
 0x6ff   : > { %v2166_v23 = vpop.f32.mrf.mxu0  ;;  %v2207_v27 = vpop.f32.mrf.mxu1 }
 0x700   : > { %v2909_v4 = vmul.f32 -1.442695, %v2212_v26  ;;  %v2213_v33 = vadd.f32 %v2902_v21, %v2166_v23  ;;  %v2911_v50 = vmul.f32 -1.442695, %v2214_v49  ;;  %v2215_v51 = vadd.f32 %v2904_v63, %v2207_v27 }
 0x701   : > { %v2168_v47 = vpop.f32.mrf.mxu0  ;;  %v2209_v28 = vpop.f32.mrf.mxu1 }
 0x702   : > { %3253 = vpow2.f32 %v2909_v4  ;;  %v2910_v35 = vmul.f32 -1.442695, %v2213_v33  ;;  %v2907_v28 = vld [vmem:[%s3557_s22 + $0x30] sm:$0xff] }
 0x703   : > { %v2169_v60 = vpop.f32.mrf.mxu0  ;;  %v2210_v16 = vpop.f32.mrf.mxu1 }
 0x704   : > { %3255 = vpow2.f32 %v2910_v35  ;;  %v2908_v60 = vld [vmem:[%s3557_s22 + $0x38] sm:$0xff] }
 0x705   : > { %3257 = vpow2.f32 %v2911_v50 }
 0x70f   : > { %v3254_v3 = vpop.eup %3253 }
 0x710   : > { %v2316_v2 = vadd.f32 1.0, %v3254_v3 }
 0x711   : > { %v3256_v52 = vpop.eup %3255 }
 0x712   : > { %3259 = vrcp.f32 %v2316_v2  ;;  %v2317_v53 = vadd.f32 1.0, %v3256_v52  ;;  %v3258_v22 = vpop.eup %3257 }
 0x713   : > { %3261 = vtanh.f32 %v2215_v51  ;;  %v2318_v39 = vadd.f32 1.0, %v3258_v22 }
 0x714   : > { %3263 = vrcp.f32 %v2317_v53  ;;  %v3387_v53 = vld [vmem:[#allocation8 + $0xe0] ss:$16 sps:$4 sm:$0xff]  }
 0x71d   : > { %v2255_v55 = vpop.f32.mrf.mxu0  ;;  %v2296_v56 = vpop.f32.mrf.mxu1 }
 0x71e   : > { %v2303_v10 = vadd.f32 %v2905_v54, %v2255_v55  ;;  %v2305_v35 = vadd.f32 %v2907_v28, %v2296_v56  ;;  %v3388_v54 = vld [vmem:[#allocation8 + $0xc4] ss:$16 sps:$4 sm:$0xff]   ;;  %v3389_v55 = vld [vmem:[#allocation8 + $0xc0] ss:$16 sps:$4 sm:$0xff]  }
 0x71f   : > { %v3260_v19 = vpop.eup %3259  ;;  %v2257_v62 = vpop.f32.mrf.mxu0 }
 0x720   : > { %v2298_v17 = vpop.f32.mrf.mxu1  ;;  %v3262_v59 = vpop.eup %3261  ;;  %v2912_v29 = vmul.f32 -1.442695, %v2303_v10  ;;  %v2304_v7 = vadd.f32 %v2906_v58, %v2257_v62  ;;  %v2914_v16 = vmul.f32 -1.442695, %v2305_v35  ;;  %v3390_v58 = vld [vmem:[#allocation8 + $0xa4] ss:$16 sps:$4 sm:$0xff]  }
 0x721   : > { %v3264_v18 = vpop.eup %3263  ;;  %v2259_v41 = vpop.f32.mrf.mxu0  ;;  %v2327_v23 = vmul.f32 %v3262_v59, %v3260_v19  ;;  %v2306_v49 = vadd.f32 %v2908_v60, %v2298_v17 }
 0x722   : > { %v2300_v21 = vpop.f32.mrf.mxu1  ;;  %v2326_v26 = vmul.f32 %v3264_v18, %v4366_v8  ;;  %3265 = vpow2.f32 %v2912_v29  ;;  %v2913_v27 = vmul.f32 -1.442695, %v2304_v7  ;;  %v2452_v29 = vld [vmem:[%s3557_s22] sm:$0xff] }
 0x723   : > { %v2260_v4 = vpop.f32.mrf.mxu0 }
 0x724   : > { %v2301_v33 = vpop.f32.mrf.mxu1  ;;  %v4446_v47 = vadd.f32 %v2327_v23, %v2326_v26  ;;  %3267 = vpow2.f32 %v2913_v27 }
 0x725   : > { %3269 = vrcp.f32 %v2318_v39  ;;  %v2453_v39 = vld [vmem:[%s3557_s22 + $0x8] sm:$0xff] }
 0x726   : > { %3271 = vtanh.f32 %v4446_v47 }
 0x727   : > { %3273 = vpow2.f32 %v2914_v16 }
 0x72f   : > { %v3266_v0 = vpop.eup %3265 }
 0x730   : > { %v2340_v63 = vadd.f32 1.0, %v3266_v0 }
 0x731   : > { %v3268_v8 = vpop.eup %3267 }
 0x732   : > { %v3270_v50 = vpop.eup %3269  ;;  %3275 = vrcp.f32 %v2340_v63  ;;  %v2341_v3 = vadd.f32 1.0, %v3268_v8 }
 0x733   : > { %v3272_v51 = vpop.eup %3271  ;;  %3277 = vtanh.f32 %v2306_v49 }
 0x734   : > { %3279 = vrcp.f32 %v2341_v3  ;;  %v2330_v2 = vmul.f32 %v3272_v51, %v3270_v50  ;;  %v3274_v56 = vpop.eup %3273 }
 0x735   : > { %v2342_v19 = vadd.f32 1.0, %v3274_v56 }
 0x736   : > { %v2355_v52 = vpack.c.bf16 %v2330_v2, %v2330_v2  ;;  %v2454_v2 = vld [vmem:[%s3557_s22 + $0x10] sm:$0xff] }
 0x737   : > { %3281 = vrcp.f32 %v2342_v19 }
 0x738   : > { %2915 = vst [vmem:[%s3562_s25 + $0x18] sm:$0xf] %v2355_v52  ;;  %2399 = vmatmul.mubr.bf16.vlgmr.msra.gmra.mxu0 %v2355_v52  ;;  %2440 = vmatmul.mubr.bf16.vlgmr.msra.gmra.mxu1 %v2355_v52 }
 0x739   : > { %2457 = vmatpush1.bf16.msra.mxu0 %v3387_v53  ;;  %2498 = vmatpush1.bf16.msra.mxu1 %v4149_v20  ;;  %v2455_v53 = vld [vmem:[%s3557_s22 + $0x18] sm:$0xff] }
 0x73a   : > { %2458 = vmatprep.subr.bf16.mxu0 %v3388_v54  ;;  %2499 = vmatprep.subr.bf16.mxu1 %v4153_v13 }
 0x73b   : > { %2488 = vmatprep.mubr.bf16.mxu0 %v4623_v61  ;;  %2529 = vmatprep.mubr.bf16.mxu1 %v4623_v61 }
 0x73d   : > { %2459 = vmatpush1.bf16.msra.mxu0 %v3389_v55  ;;  %2500 = vmatpush1.bf16.msra.mxu1 %v4159_v42 }
 0x73e   : > { %2460 = vmatprep.subr.bf16.mxu0 %v3390_v58  ;;  %2501 = vmatprep.subr.bf16.mxu1 %v4163_v43 }
 0x73f   : > { %v3276_v22 = vpop.eup %3275 }
 0x740   : > { %v3278_v10 = vpop.eup %3277 }
 0x741   : > { %v3280_v20 = vpop.eup %3279  ;;  %2461 = vmatpush1.bf16.msra.mxu0 %v4166_v45  ;;  %2502 = vmatpush1.bf16.msra.mxu1 %v4169_v48  ;;  %v2351_v61 = vmul.f32 %v3278_v10, %v3276_v22 }
 0x742   : > { %v2350_v13 = vmul.f32 %v3280_v20, %v4387_v36  ;;  %2462 = vmatprep.subr.bf16.mxu0 %v4173_v57  ;;  %2503 = vmatprep.subr.bf16.mxu1 %v4176_v24  ;;  %v2917_v24 = vld [vmem:[%s3552_s16 + $0xe0] sm:$0xff] }
 0x744   : > { %v4463_v42 = vadd.f32 %v2351_v61, %v2350_v13  ;;  %v3282_v43 = vpop.eup %3281 }
 0x745   : > { %2463 = vmatpush1.bf16.msra.mxu0 %v4181_v1  ;;  %2504 = vmatpush1.bf16.msra.mxu1 %v4184_v30 }
 0x746   : > { %3283 = vtanh.f32 %v4463_v42  ;;  %2464 = vmatprep.subr.bf16.mxu0 %v4188_v46  ;;  %2505 = vmatprep.subr.bf16.mxu1 %v4191_v32  ;;  %v2918_v46 = vld [vmem:[%s3552_s16 + $0xe8] sm:$0xff] }
 0x749   : > { %2465 = vmatpush1.bf16.msra.mxu0 %v4194_v9  ;;  %2506 = vmatpush1.bf16.msra.mxu1 %v4197_v6 }
 0x74a   : > { %2466 = vmatprep.subr.bf16.mxu0 %v4200_v31  ;;  %2507 = vmatprep.subr.bf16.mxu1 %v4688_v14 }
 0x74d   : > { %2467 = vmatpush1.bf16.msra.mxu0 %v4689_v25  ;;  %2508 = vmatpush1.bf16.msra.mxu1 %v4690_v34  ;;  %v2919_v34 = vld [vmem:[%s3552_s16 + $0xf0] sm:$0xff] }
 0x74e   : > { %2468 = vmatprep.subr.bf16.mxu0 %v4691_v12  ;;  %2509 = vmatprep.subr.bf16.mxu1 %v4692_v11  ;;  %v2920_v11 = vld [vmem:[%s3552_s16 + $0xf8] sm:$0xff] }
 0x751   : > { %2469 = vmatpush1.bf16.msra.mxu0 %v4693_v15  ;;  %2510 = vmatpush1.bf16.msra.mxu1 %v4694_v40 }
 0x752   : > { %2470 = vmatprep.subr.bf16.mxu0 %v4224_v5  ;;  %2511 = vmatprep.subr.bf16.mxu1 %v4227_v37 }
 0x753   : > { %v3284_v45 = vpop.eup %3283 }
 0x754   : > { %v2354_v48 = vmul.f32 %v3284_v45, %v3282_v43 }
 0x755   : > { %2471 = vmatpush1.bf16.msra.mxu0 %v4230_v38  ;;  %2512 = vmatpush1.bf16.msra.mxu1 %v4233_v44 }
 0x756   : > { %v2358_v57 = vpack.c.bf16 %v2354_v48, %v2354_v48 }
 0x758   : > { %2916 = vst [vmem:[%s3567_s29 + $0x4] sm:$0xf] %v2358_v57  ;;  %2489 = vmatmul.mubr.bf16.vlgmr.msra.gmra.mxu0 %v2358_v57  ;;  %2530 = vmatmul.mubr.bf16.vlgmr.msra.gmra.mxu1 %v2358_v57 }
 0x7f8   : > { %v2400_v1 = vpop.f32.mrf.mxu0  ;;  %v2441_v30 = vpop.f32.mrf.mxu1 }
 0x7f9   : > { %v2448_v32 = vadd.f32 %v2917_v24, %v2400_v1  ;;  %v2450_v12 = vadd.f32 %v2919_v34, %v2441_v30 }
 0x7fa   : > { %v2402_v9 = vpop.f32.mrf.mxu0  ;;  %v2443_v6 = vpop.f32.mrf.mxu1 }
 0x7fb   : > { %v2921_v31 = vmul.f32 -1.442695, %v2448_v32  ;;  %v2449_v5 = vadd.f32 %v2918_v46, %v2402_v9  ;;  %v2923_v15 = vmul.f32 -1.442695, %v2450_v12  ;;  %v2451_v36 = vadd.f32 %v2920_v11, %v2443_v6 }
 0x7fc   : > { %v2404_v37 = vpop.f32.mrf.mxu0  ;;  %v2445_v14 = vpop.f32.mrf.mxu1 }
 0x7fd   : > { %3285 = vpow2.f32 %v2921_v31  ;;  %v2922_v38 = vmul.f32 -1.442695, %v2449_v5 }
 0x7fe   : > { %v2405_v44 = vpop.f32.mrf.mxu0  ;;  %v2446_v25 = vpop.f32.mrf.mxu1 }
 0x7ff   : > { %3287 = vpow2.f32 %v2922_v38 }
 0x800   : > { %3289 = vpow2.f32 %v2923_v15 }
 0x80a   : > { %v3286_v40 = vpop.eup %3285 }
 0x80b   : > { %v2551_v62 = vadd.f32 1.0, %v3286_v40 }
 0x80c   : > { %v3288_v17 = vpop.eup %3287 }
 0x80d   : > { %3291 = vrcp.f32 %v2551_v62  ;;  %v2552_v59 = vadd.f32 1.0, %v3288_v17  ;;  %v3290_v41 = vpop.eup %3289 }
 0x80e   : > { %3293 = vtanh.f32 %v2451_v36  ;;  %v2553_v60 = vadd.f32 1.0, %v3290_v41 }
 0x80f   : > { %3295 = vrcp.f32 %v2552_v59 }
 0x818   : > { %v2490_v7 = vpop.f32.mrf.mxu0  ;;  %v2531_v18 = vpop.f32.mrf.mxu1 }
 0x819   : > { %v2538_v21 = vadd.f32 %v2490_v7, %v2452_v29  ;;  %v2540_v52 = vadd.f32 %v2531_v18, %v2454_v2 }
 0x81a   : > { %v3292_v26 = vpop.eup %3291  ;;  %v2492_v23 = vpop.f32.mrf.mxu0 }
 0x81b   : > { %v2533_v27 = vpop.f32.mrf.mxu1  ;;  %v3294_v4 = vpop.eup %3293  ;;  %v2924_v33 = vmul.f32 -1.442695, %v2538_v21  ;;  %v2539_v28 = vadd.f32 %v2492_v23, %v2453_v39  ;;  %v2926_v54 = vmul.f32 -1.442695, %v2540_v52 }
 0x81c   : > { %v3296_v35 = vpop.eup %3295  ;;  %v2494_v16 = vpop.f32.mrf.mxu0  ;;  %v2562_v63 = vmul.f32 %v3294_v4, %v3292_v26  ;;  %v2541_v56 = vadd.f32 %v2533_v27, %v2455_v53 }
 0x81d   : > { %v2535_v0 = vpop.f32.mrf.mxu1  ;;  %v2561_v49 = vmul.f32 %v3296_v35, %v4446_v47  ;;  %3297 = vpow2.f32 %v2924_v33  ;;  %v2925_v8 = vmul.f32 -1.442695, %v2539_v28 }
 0x81e   : > { %v2495_v50 = vpop.f32.mrf.mxu0 }
 0x81f   : > { %v2536_v3 = vpop.f32.mrf.mxu1  ;;  %v2563_v51 = vadd.f32 %v2562_v63, %v2561_v49  ;;  %3299 = vpow2.f32 %v2925_v8 }
 0x820   : > { %3301 = vrcp.f32 %v2553_v60 }
 0x821   : > { %3303 = vtanh.f32 %v2563_v51  ;;  %2596 = vst [vmem:[#allocation3] sm:$0xff] %v2563_v51 }
 0x822   : > { %3305 = vpow2.f32 %v2926_v54 }
 0x82a   : > { %v3298_v55 = vpop.eup %3297 }
 0x82b   : > { %v2575_v58 = vadd.f32 1.0, %v3298_v55 }
 0x82c   : > { %v3300_v22 = vpop.eup %3299 }
 0x82d   : > { %v3302_v47 = vpop.eup %3301  ;;  %3307 = vrcp.f32 %v2575_v58  ;;  %v2576_v10 = vadd.f32 1.0, %v3300_v22 }
 0x82e   : > { %v3304_v20 = vpop.eup %3303  ;;  %3309 = vtanh.f32 %v2541_v56 }
 0x82f   : > { %v2565_v19 = vmul.f32 %v3304_v20, %v3302_v47  ;;  %3311 = vrcp.f32 %v2576_v10  ;;  %v3306_v61 = vpop.eup %3305 }
 0x830   : > { %v2577_v57 = vadd.f32 1.0, %v3306_v61 }
 0x831   : > { %v2590_v13 = vpack.c.bf16 %v2565_v19, %v2565_v19  ;;  %2595 = vst [vmem:[#allocation2] sm:$0xff] %v2565_v19 }
 0x832   : > { %3313 = vrcp.f32 %v2577_v57 }
 0x833   : > { %2927 = vst [vmem:[%s3562_s25 + $0x1c] sm:$0xf] %v2590_v13 }
 0x83a   : > { %v3308_v43 = vpop.eup %3307 }
 0x83b   : > { %v3310_v45 = vpop.eup %3309 }
 0x83c   : > { %v3312_v48 = vpop.eup %3311  ;;  %v2586_v1 = vmul.f32 %v3310_v45, %v3308_v43 }
 0x83d   : > { %v2585_v24 = vmul.f32 %v3312_v48, %v4463_v42 }
 0x83f   : > { %v2587_v30 = vadd.f32 %v2586_v1, %v2585_v24  ;;  %v3314_v46 = vpop.eup %3313 }
 0x841   : > { %3315 = vtanh.f32 %v2587_v30  ;;  %2598 = vst [vmem:[#allocation5] sm:$0xff] %v2587_v30 }
 0x84e   : > { %v3316_v32 = vpop.eup %3315 }
 0x84f   : > { %v2589_v9 = vmul.f32 %v3316_v32, %v3314_v46 }
 0x851   : > { %v2593_v6 = vpack.c.bf16 %v2589_v9, %v2589_v9  ;;  %2597 = vst [vmem:[#allocation4] sm:$0xff] %v2589_v9 }
 0x853   : > { %2594 = vst [vmem:[%s3567_s29] sm:$0xf] %v2593_v6 }
 0x854 PF: > { %s18_s18 = sadd.s32 1, %s3457_s18  }
 0x855   : > { %p15_p4 = scmp.ge.s32.totalorder %s18_s18, 4  }
 0x857   :  { %17 = sbr.rel (!%p15_p4) target bundleno = 2 (0x2), region = 122 }
 0x85c   :  { %2641 = vsyncpa [#allocation7], 1 }
 0x85d   :  { %2643 = vsyncpa [#allocation7 + $0x1], 1 }
 0x85e   :  { %2644 = vsyncpa [#allocation9], 1 }

// kernel: lstm_model_forward.5
= control target key start
LH: loop header
LB: loop body
LE: loop exit
PB: predicated region body
PF: predicated region fallthrough
CT: control target
= control target key end

     0   :  { %s8528_s1 = inlined_call_operand.vmem [shape: bf16[768,1536], index: 1, kind: input, shape index: {}]   ;;  %s8529_s0 = inlined_call_operand.vmem [shape: f32[8,768], index: 0, kind: input, shape index: {}]   ;;  %s8530_s2 = inlined_call_operand.vmem [shape: f32[1,1536], index: 2, kind: input, shape index: {}]   ;;  %s8531_s3 = inlined_call_operand.vmem [shape: bf16[768,128], index: 3, kind: input, shape index: {}]   ;;  %s8532_s4 = inlined_call_operand.vmem [shape: f32[1,128], index: 4, kind: input, shape index: {}]   ;;  %s8533_s5 = inlined_call_operand.vmem [shape: f32[8,128], index: 5, kind: output, shape index: {}]  }
   0x1   :  { %v5528_v0 = vld [vmem:[%s8528_s1 + $0x2a4] ss:$48 sps:$4 sm:$0xff]   ;;  %v5532_v2 = vld [vmem:[%s8528_s1 + $0x2a0] ss:$48 sps:$4 sm:$0xff]   ;;  %v22_v46 = vld [vmem:[%s8529_s0 + $0x8] sm:$0xff] }
   0x2   :  { %v5530_v1 = vld [vmem:[%s8528_s1 + $0x8a4] ss:$48 sps:$4 sm:$0xff]   ;;  %3553 = vmatprep.subr.bf16.mxu0 %v5528_v0  ;;  %v5533_v3 = vld [vmem:[%s8528_s1 + $0x8a0] ss:$48 sps:$4 sm:$0xff]   ;;  %v6624_v49 = vpack.c.bf16 %v22_v46, %v22_v46  ;;  %v24_v50 = vld [vmem:[%s8529_s0 + $0x18] sm:$0xff] }
   0x3   :  { %3594 = vmatprep.subr.bf16.mxu1 %v5530_v1  ;;  %v5534_v4 = vld [vmem:[%s8528_s1 + $0x244] ss:$48 sps:$4 sm:$0xff]   ;;  %3554 = vmatpush1.bf16.msra.mxu0 %v5532_v2  ;;  %v5538_v6 = vld [vmem:[%s8528_s1 + $0x240] ss:$48 sps:$4 sm:$0xff]   ;;  %v6632_v52 = vpack.c.bf16 %v24_v50, %v24_v50  ;;  %v5681_v50 = vld [vmem:[%s8528_s1 + $0x548] ss:$48 sps:$4 sm:$0xff]  }
   0x4   :  { %3595 = vmatpush1.bf16.msra.mxu1 %v5533_v3  ;;  %v5536_v5 = vld [vmem:[%s8528_s1 + $0x844] ss:$48 sps:$4 sm:$0xff]   ;;  %3555 = vmatprep.subr.bf16.mxu0 %v5534_v4  ;;  %v5539_v7 = vld [vmem:[%s8528_s1 + $0x840] ss:$48 sps:$4 sm:$0xff]  }
   0x5   :  { %3596 = vmatprep.subr.bf16.mxu1 %v5536_v5  ;;  %v5540_v8 = vld [vmem:[%s8528_s1 + $0x1e4] ss:$48 sps:$4 sm:$0xff]   ;;  %v5544_v10 = vld [vmem:[%s8528_s1 + $0x1e0] ss:$48 sps:$4 sm:$0xff]   ;;  %3585 = vmatprep.mubr.bf16.mxu0 %v6624_v49 }
   0x6   :  { %v5542_v9 = vld [vmem:[%s8528_s1 + $0x7e4] ss:$48 sps:$4 sm:$0xff]   ;;  %v5545_v11 = vld [vmem:[%s8528_s1 + $0x7e0] ss:$48 sps:$4 sm:$0xff]   ;;  %3626 = vmatprep.mubr.bf16.mxu1 %v6632_v52 }
   0x7   :  { %3556 = vmatpush1.bf16.msra.mxu0 %v5538_v6  ;;  %v5546_v12 = vld [vmem:[%s8528_s1 + $0x184] ss:$48 sps:$4 sm:$0xff]   ;;  %v5550_v14 = vld [vmem:[%s8528_s1 + $0x180] ss:$48 sps:$4 sm:$0xff]  }
   0x8   :  { %3597 = vmatpush1.bf16.msra.mxu1 %v5539_v7  ;;  %3557 = vmatprep.subr.bf16.mxu0 %v5540_v8  ;;  %v5548_v13 = vld [vmem:[%s8528_s1 + $0x784] ss:$48 sps:$4 sm:$0xff]   ;;  %v5551_v15 = vld [vmem:[%s8528_s1 + $0x780] ss:$48 sps:$4 sm:$0xff]   ;;  %v5629_v7 = vld [vmem:[%s8528_s1 + $0x2ac] ss:$48 sps:$4 sm:$0xff]  }
   0x9   :  { %3598 = vmatprep.subr.bf16.mxu1 %v5542_v9  ;;  %v5552_v16 = vld [vmem:[%s8528_s1 + $0x124] ss:$48 sps:$4 sm:$0xff]   ;;  %v5556_v18 = vld [vmem:[%s8528_s1 + $0x120] ss:$48 sps:$4 sm:$0xff]  }
   0xa   :  { %v5554_v17 = vld [vmem:[%s8528_s1 + $0x724] ss:$48 sps:$4 sm:$0xff]   ;;  %v5557_v19 = vld [vmem:[%s8528_s1 + $0x720] ss:$48 sps:$4 sm:$0xff]  }
   0xb   :  { %3558 = vmatpush1.bf16.msra.mxu0 %v5544_v10  ;;  %v5558_v20 = vld [vmem:[%s8528_s1 + $0xc4] ss:$48 sps:$4 sm:$0xff]   ;;  %v5562_v22 = vld [vmem:[%s8528_s1 + $0xc0] ss:$48 sps:$4 sm:$0xff]  }
   0xc   :  { %3599 = vmatpush1.bf16.msra.mxu1 %v5545_v11  ;;  %3559 = vmatprep.subr.bf16.mxu0 %v5546_v12  ;;  %v5560_v21 = vld [vmem:[%s8528_s1 + $0x6c4] ss:$48 sps:$4 sm:$0xff]   ;;  %v5563_v23 = vld [vmem:[%s8528_s1 + $0x6c0] ss:$48 sps:$4 sm:$0xff]   ;;  %v5627_v11 = vld [vmem:[%s8528_s1 + $0x2a8] ss:$48 sps:$4 sm:$0xff]  }
   0xd   :  { %3600 = vmatprep.subr.bf16.mxu1 %v5548_v13  ;;  %v5564_v24 = vld [vmem:[%s8528_s1 + $0x64] ss:$48 sps:$4 sm:$0xff]   ;;  %v5568_v26 = vld [vmem:[%s8528_s1 + $0x60] ss:$48 sps:$4 sm:$0xff]   ;;  %v5635_v13 = vld [vmem:[%s8528_s1 + $0x24c] ss:$48 sps:$4 sm:$0xff]  }
   0xe   :  { %v5566_v25 = vld [vmem:[%s8528_s1 + $0x664] ss:$48 sps:$4 sm:$0xff]   ;;  %v5569_v27 = vld [vmem:[%s8528_s1 + $0x660] ss:$48 sps:$4 sm:$0xff]  }
   0xf   :  { %3560 = vmatpush1.bf16.msra.mxu0 %v5550_v14  ;;  %v5570_v28 = vld [vmem:[%s8528_s1 + $0x4] ss:$48 sps:$4 sm:$0xff]   ;;  %v5574_v30 = vld [vmem:[%s8528_s1] ss:$48 sps:$4 sm:$0xff]  }
  0x10   :  { %3601 = vmatpush1.bf16.msra.mxu1 %v5551_v15  ;;  %3561 = vmatprep.subr.bf16.mxu0 %v5552_v16  ;;  %v5572_v29 = vld [vmem:[%s8528_s1 + $0x604] ss:$48 sps:$4 sm:$0xff]   ;;  %v5575_v31 = vld [vmem:[%s8528_s1 + $0x600] ss:$48 sps:$4 sm:$0xff]   ;;  %v5633_v15 = vld [vmem:[%s8528_s1 + $0x248] ss:$48 sps:$4 sm:$0xff]  }
  0x11   :  { %3602 = vmatprep.subr.bf16.mxu1 %v5554_v17  ;;  %v5576_v32 = vld [vmem:[%s8528_s1 + $0x5a4] ss:$48 sps:$4 sm:$0xff]   ;;  %v5580_v34 = vld [vmem:[%s8528_s1 + $0x5a0] ss:$48 sps:$4 sm:$0xff]   ;;  %v5641_v17 = vld [vmem:[%s8528_s1 + $0x1ec] ss:$48 sps:$4 sm:$0xff]  }
  0x12   :  { %v5578_v33 = vld [vmem:[%s8528_s1 + $0xba4] ss:$48 sps:$4 sm:$0xff]   ;;  %v5581_v35 = vld [vmem:[%s8528_s1 + $0xba0] ss:$48 sps:$4 sm:$0xff]  }
  0x13   :  { %3562 = vmatpush1.bf16.msra.mxu0 %v5556_v18  ;;  %v5582_v36 = vld [vmem:[%s8528_s1 + $0x544] ss:$48 sps:$4 sm:$0xff]   ;;  %v5586_v38 = vld [vmem:[%s8528_s1 + $0x540] ss:$48 sps:$4 sm:$0xff]  }
  0x14   :  { %3603 = vmatpush1.bf16.msra.mxu1 %v5557_v19  ;;  %3563 = vmatprep.subr.bf16.mxu0 %v5558_v20  ;;  %v5584_v37 = vld [vmem:[%s8528_s1 + $0xb44] ss:$48 sps:$4 sm:$0xff]   ;;  %v5587_v39 = vld [vmem:[%s8528_s1 + $0xb40] ss:$48 sps:$4 sm:$0xff]   ;;  %v5639_v19 = vld [vmem:[%s8528_s1 + $0x1e8] ss:$48 sps:$4 sm:$0xff]  }
  0x15   :  { %3604 = vmatprep.subr.bf16.mxu1 %v5560_v21  ;;  %v5588_v40 = vld [vmem:[%s8528_s1 + $0x4e4] ss:$48 sps:$4 sm:$0xff]   ;;  %v5592_v42 = vld [vmem:[%s8528_s1 + $0x4e0] ss:$48 sps:$4 sm:$0xff]   ;;  %v5647_v21 = vld [vmem:[%s8528_s1 + $0x18c] ss:$48 sps:$4 sm:$0xff]  }
  0x16   :  { %v5590_v41 = vld [vmem:[%s8528_s1 + $0xae4] ss:$48 sps:$4 sm:$0xff]   ;;  %v5593_v43 = vld [vmem:[%s8528_s1 + $0xae0] ss:$48 sps:$4 sm:$0xff]  }
  0x17   :  { %3564 = vmatpush1.bf16.msra.mxu0 %v5562_v22  ;;  %v5594_v44 = vld [vmem:[%s8528_s1 + $0x484] ss:$48 sps:$4 sm:$0xff]   ;;  %v5598_v47 = vld [vmem:[%s8528_s1 + $0x480] ss:$48 sps:$4 sm:$0xff]  }
  0x18   :  { %3605 = vmatpush1.bf16.msra.mxu1 %v5563_v23  ;;  %3565 = vmatprep.subr.bf16.mxu0 %v5564_v24  ;;  %v5596_v45 = vld [vmem:[%s8528_s1 + $0xa84] ss:$48 sps:$4 sm:$0xff]   ;;  %v5599_v48 = vld [vmem:[%s8528_s1 + $0xa80] ss:$48 sps:$4 sm:$0xff]   ;;  %v5645_v23 = vld [vmem:[%s8528_s1 + $0x188] ss:$48 sps:$4 sm:$0xff]  }
  0x19   :  { %3606 = vmatprep.subr.bf16.mxu1 %v5566_v25  ;;  %v5600_v51 = vld [vmem:[%s8528_s1 + $0x424] ss:$48 sps:$4 sm:$0xff]   ;;  %v5604_v54 = vld [vmem:[%s8528_s1 + $0x420] ss:$48 sps:$4 sm:$0xff]   ;;  %v5653_v25 = vld [vmem:[%s8528_s1 + $0x12c] ss:$48 sps:$4 sm:$0xff]  }
  0x1a   :  { %v5602_v53 = vld [vmem:[%s8528_s1 + $0xa24] ss:$48 sps:$4 sm:$0xff]   ;;  %v5605_v55 = vld [vmem:[%s8528_s1 + $0xa20] ss:$48 sps:$4 sm:$0xff]  }
  0x1b   :  { %3566 = vmatpush1.bf16.msra.mxu0 %v5568_v26  ;;  %v5606_v56 = vld [vmem:[%s8528_s1 + $0x3c4] ss:$48 sps:$4 sm:$0xff]   ;;  %v5610_v58 = vld [vmem:[%s8528_s1 + $0x3c0] ss:$48 sps:$4 sm:$0xff]  }
  0x1c   :  { %3607 = vmatpush1.bf16.msra.mxu1 %v5569_v27  ;;  %3567 = vmatprep.subr.bf16.mxu0 %v5570_v28  ;;  %v5608_v57 = vld [vmem:[%s8528_s1 + $0x9c4] ss:$48 sps:$4 sm:$0xff]   ;;  %v5611_v59 = vld [vmem:[%s8528_s1 + $0x9c0] ss:$48 sps:$4 sm:$0xff]   ;;  %v5651_v27 = vld [vmem:[%s8528_s1 + $0x128] ss:$48 sps:$4 sm:$0xff]  }
  0x1d   :  { %3608 = vmatprep.subr.bf16.mxu1 %v5572_v29  ;;  %v5612_v60 = vld [vmem:[%s8528_s1 + $0x364] ss:$48 sps:$4 sm:$0xff]   ;;  %v5616_v62 = vld [vmem:[%s8528_s1 + $0x360] ss:$48 sps:$4 sm:$0xff]   ;;  %v5659_v29 = vld [vmem:[%s8528_s1 + $0xcc] ss:$48 sps:$4 sm:$0xff]  }
  0x1e   :  { %v5614_v61 = vld [vmem:[%s8528_s1 + $0x964] ss:$48 sps:$4 sm:$0xff]   ;;  %v5617_v63 = vld [vmem:[%s8528_s1 + $0x960] ss:$48 sps:$4 sm:$0xff]  }
  0x1f   :  { %3568 = vmatpush1.bf16.msra.mxu0 %v5574_v30  ;;  %v5618_v0 = vld [vmem:[%s8528_s1 + $0x304] ss:$48 sps:$4 sm:$0xff]   ;;  %v5622_v2 = vld [vmem:[%s8528_s1 + $0x300] ss:$48 sps:$4 sm:$0xff]  }
  0x20   :  { %3609 = vmatpush1.bf16.msra.mxu1 %v5575_v31  ;;  %3569 = vmatprep.subr.bf16.mxu0 %v5576_v32  ;;  %v5620_v1 = vld [vmem:[%s8528_s1 + $0x904] ss:$48 sps:$4 sm:$0xff]   ;;  %v5623_v3 = vld [vmem:[%s8528_s1 + $0x900] ss:$48 sps:$4 sm:$0xff]   ;;  %v5657_v31 = vld [vmem:[%s8528_s1 + $0xc8] ss:$48 sps:$4 sm:$0xff]  }
  0x21   :  { %3610 = vmatprep.subr.bf16.mxu1 %v5578_v33  ;;  %v21_v4 = vld [vmem:[%s8529_s0] sm:$0xff]  ;;  %v23_v5 = vld [vmem:[%s8529_s0 + $0x10] sm:$0xff]  ;;  %v5665_v33 = vld [vmem:[%s8528_s1 + $0x6c] ss:$48 sps:$4 sm:$0xff]  }
  0x22   :  { %v5626_v6 = vld [vmem:[%s8528_s1 + $0xea4] ss:$48 sps:$4 sm:$0xff]   ;;  %v6693_v8 = vpack.c.bf16 %v21_v4, %v21_v4  ;;  %v6695_v9 = vpack.c.bf16 %v23_v5, %v23_v5  ;;  %v5624_v10 = vld [vmem:[%s8528_s1 + $0xea0] ss:$48 sps:$4 sm:$0xff]   ;;  %v5713_v5 = vld [vmem:[%s8528_s1 + $0x36c] ss:$48 sps:$4 sm:$0xff]  }
  0x23   :  { %3570 = vmatpush2.bf16.msra.mxu0 %v5580_v34  ;;  %v5632_v12 = vld [vmem:[%s8528_s1 + $0xe44] ss:$48 sps:$4 sm:$0xff]   ;;  %v5630_v14 = vld [vmem:[%s8528_s1 + $0xe40] ss:$48 sps:$4 sm:$0xff]   ;;  %v26_v34 = vld [vmem:[%s8529_s0 + $0x28] sm:$0xff] }
  0x24   :  { %3611 = vmatpush2.bf16.msra.mxu1 %v5581_v35  ;;  %3571 = vmatprep.subr.bf16.mxu0 %v5582_v36  ;;  %v5638_v16 = vld [vmem:[%s8528_s1 + $0xde4] ss:$48 sps:$4 sm:$0xff]   ;;  %v5636_v18 = vld [vmem:[%s8528_s1 + $0xde0] ss:$48 sps:$4 sm:$0xff]   ;;  %v6775_v35 = vpack.c.bf16 %v26_v34, %v26_v34  ;;  %v5744_v34 = vld [vmem:[%s8528_s1 + $0x728] ss:$48 sps:$4 sm:$0xff]  }
  0x25   :  { %3612 = vmatprep.subr.bf16.mxu1 %v5584_v37  ;;  %v5644_v20 = vld [vmem:[%s8528_s1 + $0xd84] ss:$48 sps:$4 sm:$0xff]   ;;  %v5642_v22 = vld [vmem:[%s8528_s1 + $0xd80] ss:$48 sps:$4 sm:$0xff]   ;;  %v5663_v37 = vld [vmem:[%s8528_s1 + $0x68] ss:$48 sps:$4 sm:$0xff]  }
  0x26   :  { %v5650_v24 = vld [vmem:[%s8528_s1 + $0xd24] ss:$48 sps:$4 sm:$0xff]   ;;  %v5648_v26 = vld [vmem:[%s8528_s1 + $0xd20] ss:$48 sps:$4 sm:$0xff]  }
  0x27   :  { %3572 = vmatpush2.bf16.msra.mxu0 %v5586_v38  ;;  %v5656_v28 = vld [vmem:[%s8528_s1 + $0xcc4] ss:$48 sps:$4 sm:$0xff]   ;;  %v5654_v30 = vld [vmem:[%s8528_s1 + $0xcc0] ss:$48 sps:$4 sm:$0xff]  }
  0x28   :  { %3613 = vmatpush2.bf16.msra.mxu1 %v5587_v39  ;;  %3573 = vmatprep.subr.bf16.mxu0 %v5588_v40  ;;  %v5662_v32 = vld [vmem:[%s8528_s1 + $0xc64] ss:$48 sps:$4 sm:$0xff]   ;;  %v5660_v36 = vld [vmem:[%s8528_s1 + $0xc60] ss:$48 sps:$4 sm:$0xff]   ;;  %v5671_v39 = vld [vmem:[%s8528_s1 + $0xc] ss:$48 sps:$4 sm:$0xff]  }
  0x29   :  { %3614 = vmatprep.subr.bf16.mxu1 %v5590_v41  ;;  %v5668_v38 = vld [vmem:[%s8528_s1 + $0xc04] ss:$48 sps:$4 sm:$0xff]   ;;  %v5666_v40 = vld [vmem:[%s8528_s1 + $0xc00] ss:$48 sps:$4 sm:$0xff]   ;;  %v5669_v41 = vld [vmem:[%s8528_s1 + $0x8] ss:$48 sps:$4 sm:$0xff]  }
  0x2a   :  { %v5680_v46 = vld [vmem:[%s8528_s1 + $0x1144] ss:$48 sps:$4 sm:$0xff]  }
  0x2b   :  { %3574 = vmatpush2.bf16.msra.mxu0 %v5592_v42  ;;  %v5674_v42 = vld [vmem:[%s8528_s1 + $0x11a4] ss:$48 sps:$4 sm:$0xff]  }
  0x2c   :  { %3615 = vmatpush2.bf16.msra.mxu1 %v5593_v43  ;;  %3575 = vmatprep.subr.bf16.mxu0 %v5594_v44  ;;  %v5677_v43 = vld [vmem:[%s8528_s1 + $0x5ac] ss:$48 sps:$4 sm:$0xff]   ;;  %v5672_v44 = vld [vmem:[%s8528_s1 + $0x11a0] ss:$48 sps:$4 sm:$0xff]   ;;  %v5710_v4 = vld [vmem:[%s8528_s1 + $0xf64] ss:$48 sps:$4 sm:$0xff]  }
  0x2d   :  { %3616 = vmatprep.subr.bf16.mxu1 %v5596_v45  ;;  %v5675_v45 = vld [vmem:[%s8528_s1 + $0x5a8] ss:$48 sps:$4 sm:$0xff]  }
  0x2f   :  { %3576 = vmatpush2.bf16.msra.mxu0 %v5598_v47  ;;  %v5683_v47 = vld [vmem:[%s8528_s1 + $0x54c] ss:$48 sps:$4 sm:$0xff]  }
  0x30   :  { %3617 = vmatpush2.bf16.msra.mxu1 %v5599_v48  ;;  %3577 = vmatprep.subr.bf16.mxu0 %v5600_v51  ;;  %v5678_v48 = vld [vmem:[%s8528_s1 + $0x1140] ss:$48 sps:$4 sm:$0xff]   ;;  %v5686_v51 = vld [vmem:[%s8528_s1 + $0x10e4] ss:$48 sps:$4 sm:$0xff]  }
  0x31   :  { %3618 = vmatprep.subr.bf16.mxu1 %v5602_v53  ;;  %v5689_v53 = vld [vmem:[%s8528_s1 + $0x4ec] ss:$48 sps:$4 sm:$0xff]  }
  0x33   :  { %3578 = vmatpush2.bf16.msra.mxu0 %v5604_v54  ;;  %v5684_v54 = vld [vmem:[%s8528_s1 + $0x10e0] ss:$48 sps:$4 sm:$0xff]  }
  0x34   :  { %3619 = vmatpush2.bf16.msra.mxu1 %v5605_v55  ;;  %3579 = vmatprep.subr.bf16.mxu0 %v5606_v56  ;;  %v5687_v55 = vld [vmem:[%s8528_s1 + $0x4e8] ss:$48 sps:$4 sm:$0xff]   ;;  %v5692_v56 = vld [vmem:[%s8528_s1 + $0x1084] ss:$48 sps:$4 sm:$0xff]  }
  0x35   :  { %3620 = vmatprep.subr.bf16.mxu1 %v5608_v57  ;;  %v5695_v57 = vld [vmem:[%s8528_s1 + $0x48c] ss:$48 sps:$4 sm:$0xff]  }
  0x37   :  { %3580 = vmatpush2.bf16.msra.mxu0 %v5610_v58  ;;  %v5690_v58 = vld [vmem:[%s8528_s1 + $0x1080] ss:$48 sps:$4 sm:$0xff]  }
  0x38   :  { %3621 = vmatpush2.bf16.msra.mxu1 %v5611_v59  ;;  %3581 = vmatprep.subr.bf16.mxu0 %v5612_v60  ;;  %v5693_v59 = vld [vmem:[%s8528_s1 + $0x488] ss:$48 sps:$4 sm:$0xff]   ;;  %v5698_v60 = vld [vmem:[%s8528_s1 + $0x1024] ss:$48 sps:$4 sm:$0xff]  }
  0x39   :  { %3622 = vmatprep.subr.bf16.mxu1 %v5614_v61  ;;  %v5701_v61 = vld [vmem:[%s8528_s1 + $0x42c] ss:$48 sps:$4 sm:$0xff]  }
  0x3b   :  { %3582 = vmatpush2.bf16.msra.mxu0 %v5616_v62  ;;  %v5696_v62 = vld [vmem:[%s8528_s1 + $0x1020] ss:$48 sps:$4 sm:$0xff]  }
  0x3c   :  { %3623 = vmatpush2.bf16.msra.mxu1 %v5617_v63  ;;  %3583 = vmatprep.subr.bf16.mxu0 %v5618_v0  ;;  %v5699_v63 = vld [vmem:[%s8528_s1 + $0x428] ss:$48 sps:$4 sm:$0xff]   ;;  %v5704_v0 = vld [vmem:[%s8528_s1 + $0xfc4] ss:$48 sps:$4 sm:$0xff]  }
  0x3d   :  { %3624 = vmatprep.subr.bf16.mxu1 %v5620_v1  ;;  %v5707_v1 = vld [vmem:[%s8528_s1 + $0x3cc] ss:$48 sps:$4 sm:$0xff]  }
  0x3f   :  { %3584 = vmatpush2.bf16.msra.mxu0 %v5622_v2  ;;  %v5702_v2 = vld [vmem:[%s8528_s1 + $0xfc0] ss:$48 sps:$4 sm:$0xff]  }
  0x40   :  { %3625 = vmatpush2.bf16.msra.mxu1 %v5623_v3  ;;  %3635 = vmatprep.subr.bf16.mxu0 %v5626_v6  ;;  %v5705_v3 = vld [vmem:[%s8528_s1 + $0x3c8] ss:$48 sps:$4 sm:$0xff]   ;;  %v5708_v6 = vld [vmem:[%s8528_s1 + $0xf60] ss:$48 sps:$4 sm:$0xff]  }
  0x41   :  { %3676 = vmatprep.subr.bf16.mxu1 %v5629_v7  ;;  %v5711_v7 = vld [vmem:[%s8528_s1 + $0x368] ss:$48 sps:$4 sm:$0xff]  }
  0x42   :  { %3586 = vmatmul.mubr.bf16.vlgmr.msra.gmra.mxu0 %v6693_v8 }
  0x43   :  { %3627 = vmatmul.mubr.bf16.vlgmr.msra.gmra.mxu1 %v6695_v9  ;;  %3636 = vmatpush1.bf16.msra.mxu0 %v5624_v10  ;;  %v5716_v10 = vld [vmem:[%s8528_s1 + $0xf04] ss:$48 sps:$4 sm:$0xff]  }
  0x44   :  { %3677 = vmatpush1.bf16.msra.mxu1 %v5627_v11  ;;  %3637 = vmatprep.subr.bf16.mxu0 %v5632_v12  ;;  %v5719_v11 = vld [vmem:[%s8528_s1 + $0x30c] ss:$48 sps:$4 sm:$0xff]   ;;  %v5714_v12 = vld [vmem:[%s8528_s1 + $0xf00] ss:$48 sps:$4 sm:$0xff]  }
  0x45   :  { %3678 = vmatprep.subr.bf16.mxu1 %v5635_v13  ;;  %3708 = vmatprep.mubr.bf16.mxu1 %v6624_v49  ;;  %v5717_v13 = vld [vmem:[%s8528_s1 + $0x308] ss:$48 sps:$4 sm:$0xff]  }
  0x46   :  { %3667 = vmatprep.mubr.bf16.mxu0 %v6775_v35 }
  0x47   :  { %3638 = vmatpush1.bf16.msra.mxu0 %v5630_v14  ;;  %v25_v14 = vld [vmem:[%s8529_s0 + $0x20] sm:$0xff] }
  0x48   :  { %3679 = vmatpush1.bf16.msra.mxu1 %v5633_v15  ;;  %3639 = vmatprep.subr.bf16.mxu0 %v5638_v16  ;;  %v5722_v15 = vld [vmem:[%s8528_s1 + $0x8ac] ss:$48 sps:$4 sm:$0xff]  }
  0x49   :  { %3680 = vmatprep.subr.bf16.mxu1 %v5641_v17  ;;  %v5725_v16 = vld [vmem:[%s8528_s1 + $0xeac] ss:$48 sps:$4 sm:$0xff]   ;;  %v6901_v17 = vpack.c.bf16 %v25_v14, %v25_v14 }
  0x4a   :  { %v5809_v14 = vld [vmem:[%s8528_s1 + $0xf6c] ss:$48 sps:$4 sm:$0xff]  }
  0x4b   :  { %3640 = vmatpush1.bf16.msra.mxu0 %v5636_v18  ;;  %v5720_v18 = vld [vmem:[%s8528_s1 + $0x8a8] ss:$48 sps:$4 sm:$0xff]  }
  0x4c   :  { %3681 = vmatpush1.bf16.msra.mxu1 %v5639_v19  ;;  %3641 = vmatprep.subr.bf16.mxu0 %v5644_v20  ;;  %v5723_v19 = vld [vmem:[%s8528_s1 + $0xea8] ss:$48 sps:$4 sm:$0xff]   ;;  %v5728_v20 = vld [vmem:[%s8528_s1 + $0x84c] ss:$48 sps:$4 sm:$0xff]  }
  0x4d   :  { %3682 = vmatprep.subr.bf16.mxu1 %v5647_v21  ;;  %v5731_v21 = vld [vmem:[%s8528_s1 + $0xe4c] ss:$48 sps:$4 sm:$0xff]  }
  0x4f   :  { %3642 = vmatpush1.bf16.msra.mxu0 %v5642_v22  ;;  %v5726_v22 = vld [vmem:[%s8528_s1 + $0x848] ss:$48 sps:$4 sm:$0xff]  }
  0x50   :  { %3683 = vmatpush1.bf16.msra.mxu1 %v5645_v23  ;;  %3643 = vmatprep.subr.bf16.mxu0 %v5650_v24  ;;  %v5729_v23 = vld [vmem:[%s8528_s1 + $0xe48] ss:$48 sps:$4 sm:$0xff]   ;;  %v5734_v24 = vld [vmem:[%s8528_s1 + $0x7ec] ss:$48 sps:$4 sm:$0xff]  }
  0x51   :  { %3684 = vmatprep.subr.bf16.mxu1 %v5653_v25  ;;  %v5737_v25 = vld [vmem:[%s8528_s1 + $0xdec] ss:$48 sps:$4 sm:$0xff]  }
  0x53   :  { %3644 = vmatpush1.bf16.msra.mxu0 %v5648_v26  ;;  %v5732_v26 = vld [vmem:[%s8528_s1 + $0x7e8] ss:$48 sps:$4 sm:$0xff]  }
  0x54   :  { %3685 = vmatpush1.bf16.msra.mxu1 %v5651_v27  ;;  %3645 = vmatprep.subr.bf16.mxu0 %v5656_v28  ;;  %v5735_v27 = vld [vmem:[%s8528_s1 + $0xde8] ss:$48 sps:$4 sm:$0xff]   ;;  %v5740_v28 = vld [vmem:[%s8528_s1 + $0x78c] ss:$48 sps:$4 sm:$0xff]  }
  0x55   :  { %3686 = vmatprep.subr.bf16.mxu1 %v5659_v29  ;;  %v5743_v29 = vld [vmem:[%s8528_s1 + $0xd8c] ss:$48 sps:$4 sm:$0xff]  }
  0x57   :  { %3646 = vmatpush1.bf16.msra.mxu0 %v5654_v30  ;;  %v5738_v30 = vld [vmem:[%s8528_s1 + $0x788] ss:$48 sps:$4 sm:$0xff]  }
  0x58   :  { %3687 = vmatpush1.bf16.msra.mxu1 %v5657_v31  ;;  %3647 = vmatprep.subr.bf16.mxu0 %v5662_v32  ;;  %v5741_v31 = vld [vmem:[%s8528_s1 + $0xd88] ss:$48 sps:$4 sm:$0xff]   ;;  %v5746_v32 = vld [vmem:[%s8528_s1 + $0x72c] ss:$48 sps:$4 sm:$0xff]  }
  0x59   :  { %3688 = vmatprep.subr.bf16.mxu1 %v5665_v33  ;;  %v5749_v33 = vld [vmem:[%s8528_s1 + $0xd2c] ss:$48 sps:$4 sm:$0xff]  }
  0x5b   :  { %3648 = vmatpush1.bf16.msra.mxu0 %v5660_v36  ;;  %v5747_v36 = vld [vmem:[%s8528_s1 + $0xd28] ss:$48 sps:$4 sm:$0xff]  }
  0x5c   :  { %3689 = vmatpush1.bf16.msra.mxu1 %v5663_v37  ;;  %3649 = vmatprep.subr.bf16.mxu0 %v5668_v38  ;;  %v5752_v37 = vld [vmem:[%s8528_s1 + $0x6cc] ss:$48 sps:$4 sm:$0xff]  }
  0x5d   :  { %3690 = vmatprep.subr.bf16.mxu1 %v5671_v39  ;;  %v5755_v38 = vld [vmem:[%s8528_s1 + $0xccc] ss:$48 sps:$4 sm:$0xff]   ;;  %v5750_v39 = vld [vmem:[%s8528_s1 + $0x6c8] ss:$48 sps:$4 sm:$0xff]  }
  0x5f   :  { %3650 = vmatpush1.bf16.msra.mxu0 %v5666_v40  ;;  %v5753_v40 = vld [vmem:[%s8528_s1 + $0xcc8] ss:$48 sps:$4 sm:$0xff]  }
  0x60   :  { %3691 = vmatpush1.bf16.msra.mxu1 %v5669_v41  ;;  %3651 = vmatprep.subr.bf16.mxu0 %v5674_v42  ;;  %v5758_v41 = vld [vmem:[%s8528_s1 + $0x66c] ss:$48 sps:$4 sm:$0xff]  }
  0x61   :  { %3692 = vmatprep.subr.bf16.mxu1 %v5677_v43  ;;  %v5761_v42 = vld [vmem:[%s8528_s1 + $0xc6c] ss:$48 sps:$4 sm:$0xff]   ;;  %v5756_v43 = vld [vmem:[%s8528_s1 + $0x668] ss:$48 sps:$4 sm:$0xff]  }
  0x63   :  { %3652 = vmatpush2.bf16.msra.mxu0 %v5672_v44  ;;  %v5759_v44 = vld [vmem:[%s8528_s1 + $0xc68] ss:$48 sps:$4 sm:$0xff]  }
  0x64   :  { %3693 = vmatpush2.bf16.msra.mxu1 %v5675_v45  ;;  %3653 = vmatprep.subr.bf16.mxu0 %v5680_v46  ;;  %v5764_v45 = vld [vmem:[%s8528_s1 + $0x60c] ss:$48 sps:$4 sm:$0xff]  }
  0x65   :  { %3694 = vmatprep.subr.bf16.mxu1 %v5683_v47  ;;  %v5767_v46 = vld [vmem:[%s8528_s1 + $0xc0c] ss:$48 sps:$4 sm:$0xff]   ;;  %v5762_v47 = vld [vmem:[%s8528_s1 + $0x608] ss:$48 sps:$4 sm:$0xff]  }
  0x67   :  { %3654 = vmatpush2.bf16.msra.mxu0 %v5678_v48  ;;  %v5765_v48 = vld [vmem:[%s8528_s1 + $0xc08] ss:$48 sps:$4 sm:$0xff]  }
  0x68   :  { %3695 = vmatpush2.bf16.msra.mxu1 %v5681_v50  ;;  %3655 = vmatprep.subr.bf16.mxu0 %v5686_v51  ;;  %v5770_v50 = vld [vmem:[%s8528_s1 + $0xbac] ss:$48 sps:$4 sm:$0xff]  }
  0x69   :  { %3696 = vmatprep.subr.bf16.mxu1 %v5689_v53  ;;  %v5773_v51 = vld [vmem:[%s8528_s1 + $0x11ac] ss:$48 sps:$4 sm:$0xff]   ;;  %v5768_v53 = vld [vmem:[%s8528_s1 + $0xba8] ss:$48 sps:$4 sm:$0xff]  }
  0x6b   :  { %3656 = vmatpush2.bf16.msra.mxu0 %v5684_v54  ;;  %v5771_v54 = vld [vmem:[%s8528_s1 + $0x11a8] ss:$48 sps:$4 sm:$0xff]  }
  0x6c   :  { %3697 = vmatpush2.bf16.msra.mxu1 %v5687_v55  ;;  %3657 = vmatprep.subr.bf16.mxu0 %v5692_v56  ;;  %v5776_v55 = vld [vmem:[%s8528_s1 + $0xb4c] ss:$48 sps:$4 sm:$0xff]  }
  0x6d   :  { %3698 = vmatprep.subr.bf16.mxu1 %v5695_v57  ;;  %v5779_v56 = vld [vmem:[%s8528_s1 + $0x114c] ss:$48 sps:$4 sm:$0xff]   ;;  %v5774_v57 = vld [vmem:[%s8528_s1 + $0xb48] ss:$48 sps:$4 sm:$0xff]  }
  0x6f   :  { %3658 = vmatpush2.bf16.msra.mxu0 %v5690_v58  ;;  %v5777_v58 = vld [vmem:[%s8528_s1 + $0x1148] ss:$48 sps:$4 sm:$0xff]  }
  0x70   :  { %3699 = vmatpush2.bf16.msra.mxu1 %v5693_v59  ;;  %3659 = vmatprep.subr.bf16.mxu0 %v5698_v60  ;;  %v5782_v59 = vld [vmem:[%s8528_s1 + $0xaec] ss:$48 sps:$4 sm:$0xff]  }
  0x71   :  { %3700 = vmatprep.subr.bf16.mxu1 %v5701_v61  ;;  %v5785_v60 = vld [vmem:[%s8528_s1 + $0x10ec] ss:$48 sps:$4 sm:$0xff]   ;;  %v5780_v61 = vld [vmem:[%s8528_s1 + $0xae8] ss:$48 sps:$4 sm:$0xff]  }
  0x73   :  { %3660 = vmatpush2.bf16.msra.mxu0 %v5696_v62  ;;  %v5783_v62 = vld [vmem:[%s8528_s1 + $0x10e8] ss:$48 sps:$4 sm:$0xff]  }
  0x74   :  { %3701 = vmatpush2.bf16.msra.mxu1 %v5699_v63  ;;  %3661 = vmatprep.subr.bf16.mxu0 %v5704_v0  ;;  %v5788_v63 = vld [vmem:[%s8528_s1 + $0xa8c] ss:$48 sps:$4 sm:$0xff]  }
  0x75   :  { %3702 = vmatprep.subr.bf16.mxu1 %v5707_v1  ;;  %v5791_v0 = vld [vmem:[%s8528_s1 + $0x108c] ss:$48 sps:$4 sm:$0xff]   ;;  %v5786_v1 = vld [vmem:[%s8528_s1 + $0xa88] ss:$48 sps:$4 sm:$0xff]  }
  0x77   :  { %3662 = vmatpush2.bf16.msra.mxu0 %v5702_v2  ;;  %v5789_v2 = vld [vmem:[%s8528_s1 + $0x1088] ss:$48 sps:$4 sm:$0xff]  }
  0x78   :  { %3703 = vmatpush2.bf16.msra.mxu1 %v5705_v3  ;;  %3663 = vmatprep.subr.bf16.mxu0 %v5710_v4  ;;  %v5794_v3 = vld [vmem:[%s8528_s1 + $0xa2c] ss:$48 sps:$4 sm:$0xff]  }
  0x79   :  { %3704 = vmatprep.subr.bf16.mxu1 %v5713_v5  ;;  %v5797_v4 = vld [vmem:[%s8528_s1 + $0x102c] ss:$48 sps:$4 sm:$0xff]   ;;  %v5792_v5 = vld [vmem:[%s8528_s1 + $0xa28] ss:$48 sps:$4 sm:$0xff]  }
  0x7b   :  { %3664 = vmatpush2.bf16.msra.mxu0 %v5708_v6  ;;  %v5795_v6 = vld [vmem:[%s8528_s1 + $0x1028] ss:$48 sps:$4 sm:$0xff]  }
  0x7c   :  { %3705 = vmatpush2.bf16.msra.mxu1 %v5711_v7  ;;  %3665 = vmatprep.subr.bf16.mxu0 %v5716_v10  ;;  %v5800_v7 = vld [vmem:[%s8528_s1 + $0x9cc] ss:$48 sps:$4 sm:$0xff]  }
  0x7d   :  { %3706 = vmatprep.subr.bf16.mxu1 %v5719_v11  ;;  %v5803_v10 = vld [vmem:[%s8528_s1 + $0xfcc] ss:$48 sps:$4 sm:$0xff]   ;;  %v5798_v11 = vld [vmem:[%s8528_s1 + $0x9c8] ss:$48 sps:$4 sm:$0xff]  }
  0x7f   :  { %3666 = vmatpush2.bf16.msra.mxu0 %v5714_v12  ;;  %v5801_v12 = vld [vmem:[%s8528_s1 + $0xfc8] ss:$48 sps:$4 sm:$0xff]  }
  0x80   :  { %3707 = vmatpush2.bf16.msra.mxu1 %v5717_v13  ;;  %3717 = vmatprep.subr.bf16.mxu0 %v5722_v15  ;;  %v5806_v13 = vld [vmem:[%s8528_s1 + $0x96c] ss:$48 sps:$4 sm:$0xff]   ;;  %v5804_v15 = vld [vmem:[%s8528_s1 + $0x968] ss:$48 sps:$4 sm:$0xff]  }
  0x81   :  { %3758 = vmatprep.subr.bf16.mxu1 %v5725_v16  ;;  %v5807_v16 = vld [vmem:[%s8528_s1 + $0xf68] ss:$48 sps:$4 sm:$0xff]  }
  0x82   :  { %3668 = vmatmul.mubr.bf16.vlgmr.msra.gmra.mxu0 %v6901_v17 }
  0x83   :  { %3709 = vmatmul.mubr.bf16.vlgmr.msra.gmra.mxu1 %v6693_v8  ;;  %3718 = vmatpush1.bf16.msra.mxu0 %v5720_v18  ;;  %v5812_v18 = vld [vmem:[%s8528_s1 + $0x90c] ss:$48 sps:$4 sm:$0xff]  }
  0x84   :  { %3759 = vmatpush1.bf16.msra.mxu1 %v5723_v19  ;;  %3719 = vmatprep.subr.bf16.mxu0 %v5728_v20  ;;  %v5815_v19 = vld [vmem:[%s8528_s1 + $0xf0c] ss:$48 sps:$4 sm:$0xff]   ;;  %v5810_v20 = vld [vmem:[%s8528_s1 + $0x908] ss:$48 sps:$4 sm:$0xff]  }
  0x85   :  { %3760 = vmatprep.subr.bf16.mxu1 %v5731_v21  ;;  %3749 = vmatprep.mubr.bf16.mxu0 %v6632_v52  ;;  %v5813_v21 = vld [vmem:[%s8528_s1 + $0xf08] ss:$48 sps:$4 sm:$0xff]  }
  0x86   :  { %3790 = vmatprep.mubr.bf16.mxu1 %v6775_v35 }
  0x87   :  { %3720 = vmatpush1.bf16.msra.mxu0 %v5726_v22  ;;  %v5818_v22 = vld [vmem:[%s8528_s1 + $0x2b4] ss:$48 sps:$4 sm:$0xff]  }
  0x88   :  { %3761 = vmatpush1.bf16.msra.mxu1 %v5729_v23  ;;  %3721 = vmatprep.subr.bf16.mxu0 %v5734_v24  ;;  %v5821_v23 = vld [vmem:[%s8528_s1 + $0x8b4] ss:$48 sps:$4 sm:$0xff]   ;;  %v5816_v24 = vld [vmem:[%s8528_s1 + $0x2b0] ss:$48 sps:$4 sm:$0xff]  }
  0x89   :  { %3762 = vmatprep.subr.bf16.mxu1 %v5737_v25  ;;  %v5819_v25 = vld [vmem:[%s8528_s1 + $0x8b0] ss:$48 sps:$4 sm:$0xff]  }
  0x8b   :  { %3722 = vmatpush1.bf16.msra.mxu0 %v5732_v26  ;;  %v5824_v26 = vld [vmem:[%s8528_s1 + $0x254] ss:$48 sps:$4 sm:$0xff]  }
  0x8c   :  { %3763 = vmatpush1.bf16.msra.mxu1 %v5735_v27  ;;  %3723 = vmatprep.subr.bf16.mxu0 %v5740_v28  ;;  %v5827_v27 = vld [vmem:[%s8528_s1 + $0x854] ss:$48 sps:$4 sm:$0xff]   ;;  %v5822_v28 = vld [vmem:[%s8528_s1 + $0x250] ss:$48 sps:$4 sm:$0xff]  }
  0x8d   :  { %3764 = vmatprep.subr.bf16.mxu1 %v5743_v29  ;;  %v5825_v29 = vld [vmem:[%s8528_s1 + $0x850] ss:$48 sps:$4 sm:$0xff]  }
  0x8f   :  { %3724 = vmatpush1.bf16.msra.mxu0 %v5738_v30  ;;  %v5830_v30 = vld [vmem:[%s8528_s1 + $0x1f4] ss:$48 sps:$4 sm:$0xff]  }
  0x90   :  { %3765 = vmatpush1.bf16.msra.mxu1 %v5741_v31  ;;  %3725 = vmatprep.subr.bf16.mxu0 %v5746_v32  ;;  %v5833_v31 = vld [vmem:[%s8528_s1 + $0x7f4] ss:$48 sps:$4 sm:$0xff]   ;;  %v5828_v32 = vld [vmem:[%s8528_s1 + $0x1f0] ss:$48 sps:$4 sm:$0xff]  }
  0x91   :  { %3766 = vmatprep.subr.bf16.mxu1 %v5749_v33  ;;  %v5831_v33 = vld [vmem:[%s8528_s1 + $0x7f0] ss:$48 sps:$4 sm:$0xff]  }
  0x93   :  { %3726 = vmatpush1.bf16.msra.mxu0 %v5744_v34  ;;  %v5836_v34 = vld [vmem:[%s8528_s1 + $0x194] ss:$48 sps:$4 sm:$0xff]  }
  0x94   :  { %3767 = vmatpush1.bf16.msra.mxu1 %v5747_v36  ;;  %3727 = vmatprep.subr.bf16.mxu0 %v5752_v37  ;;  %v5839_v36 = vld [vmem:[%s8528_s1 + $0x794] ss:$48 sps:$4 sm:$0xff]   ;;  %v5834_v37 = vld [vmem:[%s8528_s1 + $0x190] ss:$48 sps:$4 sm:$0xff]  }
  0x95   :  { %3768 = vmatprep.subr.bf16.mxu1 %v5755_v38  ;;  %v5837_v38 = vld [vmem:[%s8528_s1 + $0x790] ss:$48 sps:$4 sm:$0xff]  }
  0x97   :  { %3728 = vmatpush1.bf16.msra.mxu0 %v5750_v39  ;;  %v5842_v39 = vld [vmem:[%s8528_s1 + $0x134] ss:$48 sps:$4 sm:$0xff]  }
  0x98   :  { %3769 = vmatpush1.bf16.msra.mxu1 %v5753_v40  ;;  %3729 = vmatprep.subr.bf16.mxu0 %v5758_v41  ;;  %v5845_v40 = vld [vmem:[%s8528_s1 + $0x734] ss:$48 sps:$4 sm:$0xff]   ;;  %v5840_v41 = vld [vmem:[%s8528_s1 + $0x130] ss:$48 sps:$4 sm:$0xff]  }
  0x99   :  { %3770 = vmatprep.subr.bf16.mxu1 %v5761_v42  ;;  %v5843_v42 = vld [vmem:[%s8528_s1 + $0x730] ss:$48 sps:$4 sm:$0xff]  }
  0x9b   :  { %3730 = vmatpush1.bf16.msra.mxu0 %v5756_v43  ;;  %v5848_v43 = vld [vmem:[%s8528_s1 + $0xd4] ss:$48 sps:$4 sm:$0xff]  }
  0x9c   :  { %3771 = vmatpush1.bf16.msra.mxu1 %v5759_v44  ;;  %3731 = vmatprep.subr.bf16.mxu0 %v5764_v45  ;;  %v5851_v44 = vld [vmem:[%s8528_s1 + $0x6d4] ss:$48 sps:$4 sm:$0xff]   ;;  %v5846_v45 = vld [vmem:[%s8528_s1 + $0xd0] ss:$48 sps:$4 sm:$0xff]  }
  0x9d   :  { %3772 = vmatprep.subr.bf16.mxu1 %v5767_v46  ;;  %v5849_v46 = vld [vmem:[%s8528_s1 + $0x6d0] ss:$48 sps:$4 sm:$0xff]  }
  0x9f   :  { %3732 = vmatpush1.bf16.msra.mxu0 %v5762_v47  ;;  %v5854_v47 = vld [vmem:[%s8528_s1 + $0x74] ss:$48 sps:$4 sm:$0xff]  }
  0xa0   :  { %3773 = vmatpush1.bf16.msra.mxu1 %v5765_v48  ;;  %3733 = vmatprep.subr.bf16.mxu0 %v5770_v50  ;;  %v5857_v48 = vld [vmem:[%s8528_s1 + $0x674] ss:$48 sps:$4 sm:$0xff]   ;;  %v5852_v50 = vld [vmem:[%s8528_s1 + $0x70] ss:$48 sps:$4 sm:$0xff]  }
  0xa1   :  { %3774 = vmatprep.subr.bf16.mxu1 %v5773_v51  ;;  %v5855_v51 = vld [vmem:[%s8528_s1 + $0x670] ss:$48 sps:$4 sm:$0xff]  }
  0xa3   :  { %3734 = vmatpush2.bf16.msra.mxu0 %v5768_v53  ;;  %v5860_v53 = vld [vmem:[%s8528_s1 + $0x14] ss:$48 sps:$4 sm:$0xff]  }
  0xa4   :  { %3775 = vmatpush2.bf16.msra.mxu1 %v5771_v54  ;;  %3735 = vmatprep.subr.bf16.mxu0 %v5776_v55  ;;  %v5863_v54 = vld [vmem:[%s8528_s1 + $0x614] ss:$48 sps:$4 sm:$0xff]   ;;  %v5858_v55 = vld [vmem:[%s8528_s1 + $0x10] ss:$48 sps:$4 sm:$0xff]  }
  0xa5   :  { %3776 = vmatprep.subr.bf16.mxu1 %v5779_v56  ;;  %v5861_v56 = vld [vmem:[%s8528_s1 + $0x610] ss:$48 sps:$4 sm:$0xff]  }
  0xa7   :  { %3736 = vmatpush2.bf16.msra.mxu0 %v5774_v57  ;;  %v5866_v57 = vld [vmem:[%s8528_s1 + $0x5b4] ss:$48 sps:$4 sm:$0xff]  }
  0xa8   :  { %3777 = vmatpush2.bf16.msra.mxu1 %v5777_v58  ;;  %3737 = vmatprep.subr.bf16.mxu0 %v5782_v59  ;;  %v5869_v58 = vld [vmem:[%s8528_s1 + $0xbb4] ss:$48 sps:$4 sm:$0xff]   ;;  %v5864_v59 = vld [vmem:[%s8528_s1 + $0x5b0] ss:$48 sps:$4 sm:$0xff]  }
  0xa9   :  { %3778 = vmatprep.subr.bf16.mxu1 %v5785_v60  ;;  %v5867_v60 = vld [vmem:[%s8528_s1 + $0xbb0] ss:$48 sps:$4 sm:$0xff]  }
  0xab   :  { %3738 = vmatpush2.bf16.msra.mxu0 %v5780_v61  ;;  %v5872_v61 = vld [vmem:[%s8528_s1 + $0x554] ss:$48 sps:$4 sm:$0xff]  }
  0xac   :  { %3779 = vmatpush2.bf16.msra.mxu1 %v5783_v62  ;;  %3739 = vmatprep.subr.bf16.mxu0 %v5788_v63  ;;  %v5875_v62 = vld [vmem:[%s8528_s1 + $0xb54] ss:$48 sps:$4 sm:$0xff]   ;;  %v5870_v63 = vld [vmem:[%s8528_s1 + $0x550] ss:$48 sps:$4 sm:$0xff]  }
  0xad   :  { %3780 = vmatprep.subr.bf16.mxu1 %v5791_v0  ;;  %v5873_v0 = vld [vmem:[%s8528_s1 + $0xb50] ss:$48 sps:$4 sm:$0xff]  }
  0xaf   :  { %3740 = vmatpush2.bf16.msra.mxu0 %v5786_v1  ;;  %v5878_v1 = vld [vmem:[%s8528_s1 + $0x4f4] ss:$48 sps:$4 sm:$0xff]  }
  0xb0   :  { %3781 = vmatpush2.bf16.msra.mxu1 %v5789_v2  ;;  %3741 = vmatprep.subr.bf16.mxu0 %v5794_v3  ;;  %v5881_v2 = vld [vmem:[%s8528_s1 + $0xaf4] ss:$48 sps:$4 sm:$0xff]   ;;  %v5876_v3 = vld [vmem:[%s8528_s1 + $0x4f0] ss:$48 sps:$4 sm:$0xff]  }
  0xb1   :  { %3782 = vmatprep.subr.bf16.mxu1 %v5797_v4  ;;  %v5879_v4 = vld [vmem:[%s8528_s1 + $0xaf0] ss:$48 sps:$4 sm:$0xff]  }
  0xb3   :  { %3742 = vmatpush2.bf16.msra.mxu0 %v5792_v5  ;;  %v5884_v5 = vld [vmem:[%s8528_s1 + $0x494] ss:$48 sps:$4 sm:$0xff]  }
  0xb4   :  { %3783 = vmatpush2.bf16.msra.mxu1 %v5795_v6  ;;  %3743 = vmatprep.subr.bf16.mxu0 %v5800_v7  ;;  %v5887_v6 = vld [vmem:[%s8528_s1 + $0xa94] ss:$48 sps:$4 sm:$0xff]   ;;  %v5882_v7 = vld [vmem:[%s8528_s1 + $0x490] ss:$48 sps:$4 sm:$0xff]  }
  0xb5   :  { %3784 = vmatprep.subr.bf16.mxu1 %v5803_v10  ;;  %v5885_v10 = vld [vmem:[%s8528_s1 + $0xa90] ss:$48 sps:$4 sm:$0xff]  }
  0xb7   :  { %3744 = vmatpush2.bf16.msra.mxu0 %v5798_v11  ;;  %v5890_v11 = vld [vmem:[%s8528_s1 + $0x434] ss:$48 sps:$4 sm:$0xff]  }
  0xb8   :  { %3785 = vmatpush2.bf16.msra.mxu1 %v5801_v12  ;;  %3745 = vmatprep.subr.bf16.mxu0 %v5806_v13  ;;  %v5893_v12 = vld [vmem:[%s8528_s1 + $0xa34] ss:$48 sps:$4 sm:$0xff]   ;;  %v5888_v13 = vld [vmem:[%s8528_s1 + $0x430] ss:$48 sps:$4 sm:$0xff]  }
  0xb9   :  { %3786 = vmatprep.subr.bf16.mxu1 %v5809_v14  ;;  %v5891_v14 = vld [vmem:[%s8528_s1 + $0xa30] ss:$48 sps:$4 sm:$0xff]  }
  0xbb   :  { %3746 = vmatpush2.bf16.msra.mxu0 %v5804_v15  ;;  %v5896_v15 = vld [vmem:[%s8528_s1 + $0x3d4] ss:$48 sps:$4 sm:$0xff]  }
  0xbc   :  { %3787 = vmatpush2.bf16.msra.mxu1 %v5807_v16  ;;  %3747 = vmatprep.subr.bf16.mxu0 %v5812_v18  ;;  %v5899_v16 = vld [vmem:[%s8528_s1 + $0x9d4] ss:$48 sps:$4 sm:$0xff]   ;;  %v5894_v18 = vld [vmem:[%s8528_s1 + $0x3d0] ss:$48 sps:$4 sm:$0xff]  }
  0xbd   :  { %3788 = vmatprep.subr.bf16.mxu1 %v5815_v19  ;;  %v5897_v19 = vld [vmem:[%s8528_s1 + $0x9d0] ss:$48 sps:$4 sm:$0xff]  }
  0xbf   :  { %3748 = vmatpush2.bf16.msra.mxu0 %v5810_v20  ;;  %v5902_v20 = vld [vmem:[%s8528_s1 + $0x374] ss:$48 sps:$4 sm:$0xff]  }
  0xc0   :  { %3789 = vmatpush2.bf16.msra.mxu1 %v5813_v21  ;;  %3799 = vmatprep.subr.bf16.mxu0 %v5818_v22  ;;  %v613_v21 = vlaneseq  ;;  %v5905_v22 = vld [vmem:[%s8528_s1 + $0x974] ss:$48 sps:$4 sm:$0xff]  }
  0xc1   :  { %3840 = vmatprep.subr.bf16.mxu1 %v5821_v23  ;;  %v5900_v23 = vld [vmem:[%s8528_s1 + $0x370] ss:$48 sps:$4 sm:$0xff]  }
  0xc2   :  { %3750 = vmatmul.mubr.bf16.vlgmr.msra.gmra.mxu0 %v6695_v9 }
  0xc3   :  { %3791 = vmatmul.mubr.bf16.vlgmr.msra.gmra.mxu1 %v6901_v17  ;;  %3800 = vmatpush1.bf16.msra.mxu0 %v5816_v24  ;;  %v5903_v24 = vld [vmem:[%s8528_s1 + $0x970] ss:$48 sps:$4 sm:$0xff]  }
  0xc4   :  { %3841 = vmatpush1.bf16.msra.mxu1 %v5819_v25  ;;  %3801 = vmatprep.subr.bf16.mxu0 %v5824_v26  ;;  %v5908_v25 = vld [vmem:[%s8528_s1 + $0x314] ss:$48 sps:$4 sm:$0xff]   ;;  %v7280_v26 = vshrl.u32 %v613_v21, 7 }
  0xc5   :  { %3842 = vmatprep.subr.bf16.mxu1 %v5827_v27  ;;  %3831 = vmatprep.mubr.bf16.mxu0 %v6624_v49  ;;  %v5911_v27 = vld [vmem:[%s8528_s1 + $0x914] ss:$48 sps:$4 sm:$0xff]  }
  0xc6   :  { %3872 = vmatprep.mubr.bf16.mxu1 %v6632_v52  ;;  %v5962_v21 = vld [vmem:[%s8528_s1 + $0x11b4] ss:$48 sps:$4 sm:$0xff]  }
  0xc7   :  { %3802 = vmatpush1.bf16.msra.mxu0 %v5822_v28  ;;  %v5906_v28 = vld [vmem:[%s8528_s1 + $0x310] ss:$48 sps:$4 sm:$0xff]  }
  0xc8   :  { %3843 = vmatpush1.bf16.msra.mxu1 %v5825_v29  ;;  %3803 = vmatprep.subr.bf16.mxu0 %v5830_v30  ;;  %v5909_v29 = vld [vmem:[%s8528_s1 + $0x910] ss:$48 sps:$4 sm:$0xff]  }
  0xc9   :  { %3844 = vmatprep.subr.bf16.mxu1 %v5833_v31  ;;  %v7294_v30 = vld [vmem:[%s8530_s2] sm:$0xff]  ;;  %v615_v31 = vsub.s32 0, %v7280_v26 }
  0xcb   :  { %3804 = vmatpush1.bf16.msra.mxu0 %v5828_v32  ;;  %v5914_v32 = vld [vmem:[%s8528_s1 + $0xeb4] ss:$48 sps:$4 sm:$0xff]  }
  0xcc   :  { %3845 = vmatpush1.bf16.msra.mxu1 %v5831_v33  ;;  %3805 = vmatprep.subr.bf16.mxu0 %v5836_v34  ;;  %v5917_v33 = vld [vmem:[%s8528_s1 + $0x2bc] ss:$48 sps:$4 sm:$0xff]   ;;  %v619_v34 = vsub.s32 1, %v7280_v26 }
  0xcd   :  { %3846 = vmatprep.subr.bf16.mxu1 %v5839_v36  ;;  %v5912_v36 = vld [vmem:[%s8528_s1 + $0xeb0] ss:$48 sps:$4 sm:$0xff]  }
  0xcf   :  { %3806 = vmatpush1.bf16.msra.mxu0 %v5834_v37  ;;  %v616_v37 = vrot.slane %v7294_v30, %v615_v31 }
  0xd0   :  { %3847 = vmatpush1.bf16.msra.mxu1 %v5837_v38  ;;  %3807 = vmatprep.subr.bf16.mxu0 %v5842_v39  ;;  %v5915_v38 = vld [vmem:[%s8528_s1 + $0x2b8] ss:$48 sps:$4 sm:$0xff]   ;;  %v5920_v39 = vld [vmem:[%s8528_s1 + $0xe54] ss:$48 sps:$4 sm:$0xff]  }
  0xd1   :  { %3848 = vmatprep.subr.bf16.mxu1 %v5845_v40  ;;  %v5923_v40 = vld [vmem:[%s8528_s1 + $0x25c] ss:$48 sps:$4 sm:$0xff]  }
  0xd3   :  { %3808 = vmatpush1.bf16.msra.mxu0 %v5840_v41  ;;  %v620_v41 = vrot.slane %v7294_v30, %v619_v34 }
  0xd4   :  { %3849 = vmatpush1.bf16.msra.mxu1 %v5843_v42  ;;  %3809 = vmatprep.subr.bf16.mxu0 %v5848_v43 }
  0xd5   :  { %3850 = vmatprep.subr.bf16.mxu1 %v5851_v44  ;;  %v5918_v44 = vld [vmem:[%s8528_s1 + $0xe50] ss:$48 sps:$4 sm:$0xff]  }
  0xd7   :  { %3810 = vmatpush1.bf16.msra.mxu0 %v5846_v45 }
  0xd8   :  { %3851 = vmatpush1.bf16.msra.mxu1 %v5849_v46  ;;  %3811 = vmatprep.subr.bf16.mxu0 %v5854_v47  ;;  %v5921_v46 = vld [vmem:[%s8528_s1 + $0x258] ss:$48 sps:$4 sm:$0xff]   ;;  %v5926_v47 = vld [vmem:[%s8528_s1 + $0xdf4] ss:$48 sps:$4 sm:$0xff]  }
  0xd9   :  { %3852 = vmatprep.subr.bf16.mxu1 %v5857_v48 }
  0xdb   :  { %3812 = vmatpush1.bf16.msra.mxu0 %v5852_v50 }
  0xdc   :  { %3853 = vmatpush1.bf16.msra.mxu1 %v5855_v51  ;;  %3813 = vmatprep.subr.bf16.mxu0 %v5860_v53  ;;  %v5929_v51 = vld [vmem:[%s8528_s1 + $0x1fc] ss:$48 sps:$4 sm:$0xff]  }
  0xdd   :  { %3854 = vmatprep.subr.bf16.mxu1 %v5863_v54 }
  0xdf   :  { %3814 = vmatpush1.bf16.msra.mxu0 %v5858_v55 }
  0xe0   :  { %3855 = vmatpush1.bf16.msra.mxu1 %v5861_v56  ;;  %3815 = vmatprep.subr.bf16.mxu0 %v5866_v57  ;;  %v5924_v57 = vld [vmem:[%s8528_s1 + $0xdf0] ss:$48 sps:$4 sm:$0xff]  }
  0xe1   :  { %3856 = vmatprep.subr.bf16.mxu1 %v5869_v58  ;;  %v5927_v58 = vld [vmem:[%s8528_s1 + $0x1f8] ss:$48 sps:$4 sm:$0xff]  }
  0xe3   :  { %3816 = vmatpush2.bf16.msra.mxu0 %v5864_v59 }
  0xe4   :  { %3857 = vmatpush2.bf16.msra.mxu1 %v5867_v60  ;;  %3817 = vmatprep.subr.bf16.mxu0 %v5872_v61 }
  0xe5   :  { %3858 = vmatprep.subr.bf16.mxu1 %v5875_v62  ;;  %v5932_v62 = vld [vmem:[%s8528_s1 + $0xd94] ss:$48 sps:$4 sm:$0xff]  }
  0xe7   :  { %3818 = vmatpush2.bf16.msra.mxu0 %v5870_v63  ;;  %v5935_v63 = vld [vmem:[%s8528_s1 + $0x19c] ss:$48 sps:$4 sm:$0xff]  }
  0xe8   :  { %3859 = vmatpush2.bf16.msra.mxu1 %v5873_v0  ;;  %3819 = vmatprep.subr.bf16.mxu0 %v5878_v1  ;;  %v5930_v0 = vld [vmem:[%s8528_s1 + $0xd90] ss:$48 sps:$4 sm:$0xff]   ;;  %v5933_v1 = vld [vmem:[%s8528_s1 + $0x198] ss:$48 sps:$4 sm:$0xff]  }
  0xe9   :  { %3860 = vmatprep.subr.bf16.mxu1 %v5881_v2  ;;  %v5938_v2 = vld [vmem:[%s8528_s1 + $0xd34] ss:$48 sps:$4 sm:$0xff]  }
  0xeb   :  { %3820 = vmatpush2.bf16.msra.mxu0 %v5876_v3  ;;  %v5941_v3 = vld [vmem:[%s8528_s1 + $0x13c] ss:$48 sps:$4 sm:$0xff]  }
  0xec   :  { %3861 = vmatpush2.bf16.msra.mxu1 %v5879_v4  ;;  %3821 = vmatprep.subr.bf16.mxu0 %v5884_v5  ;;  %v5936_v4 = vld [vmem:[%s8528_s1 + $0xd30] ss:$48 sps:$4 sm:$0xff]   ;;  %v5939_v5 = vld [vmem:[%s8528_s1 + $0x138] ss:$48 sps:$4 sm:$0xff]  }
  0xed   :  { %3862 = vmatprep.subr.bf16.mxu1 %v5887_v6  ;;  %v5944_v6 = vld [vmem:[%s8528_s1 + $0xcd4] ss:$48 sps:$4 sm:$0xff]  }
  0xef   :  { %3822 = vmatpush2.bf16.msra.mxu0 %v5882_v7  ;;  %v5947_v7 = vld [vmem:[%s8528_s1 + $0xdc] ss:$48 sps:$4 sm:$0xff]  }
  0xf0   :  { %3863 = vmatpush2.bf16.msra.mxu1 %v5885_v10  ;;  %3823 = vmatprep.subr.bf16.mxu0 %v5890_v11  ;;  %v5942_v10 = vld [vmem:[%s8528_s1 + $0xcd0] ss:$48 sps:$4 sm:$0xff]   ;;  %v5945_v11 = vld [vmem:[%s8528_s1 + $0xd8] ss:$48 sps:$4 sm:$0xff]  }
  0xf1   :  { %3864 = vmatprep.subr.bf16.mxu1 %v5893_v12  ;;  %v5950_v12 = vld [vmem:[%s8528_s1 + $0xc74] ss:$48 sps:$4 sm:$0xff]  }
  0xf3   :  { %3824 = vmatpush2.bf16.msra.mxu0 %v5888_v13  ;;  %v5953_v13 = vld [vmem:[%s8528_s1 + $0x7c] ss:$48 sps:$4 sm:$0xff]  }
  0xf4   :  { %3865 = vmatpush2.bf16.msra.mxu1 %v5891_v14  ;;  %3825 = vmatprep.subr.bf16.mxu0 %v5896_v15  ;;  %v5948_v14 = vld [vmem:[%s8528_s1 + $0xc70] ss:$48 sps:$4 sm:$0xff]   ;;  %v5951_v15 = vld [vmem:[%s8528_s1 + $0x78] ss:$48 sps:$4 sm:$0xff]  }
  0xf5   :  { %3866 = vmatprep.subr.bf16.mxu1 %v5899_v16  ;;  %v5956_v16 = vld [vmem:[%s8528_s1 + $0xc14] ss:$48 sps:$4 sm:$0xff]  }
  0xf7   :  { %3826 = vmatpush2.bf16.msra.mxu0 %v5894_v18  ;;  %v5959_v18 = vld [vmem:[%s8528_s1 + $0x1c] ss:$48 sps:$4 sm:$0xff]  }
  0xf8   :  { %3867 = vmatpush2.bf16.msra.mxu1 %v5897_v19  ;;  %3827 = vmatprep.subr.bf16.mxu0 %v5902_v20  ;;  %v5954_v19 = vld [vmem:[%s8528_s1 + $0xc10] ss:$48 sps:$4 sm:$0xff]   ;;  %v5957_v20 = vld [vmem:[%s8528_s1 + $0x18] ss:$48 sps:$4 sm:$0xff]  }
  0xf9   :  { %3868 = vmatprep.subr.bf16.mxu1 %v5905_v22  ;;  %v5965_v22 = vld [vmem:[%s8528_s1 + $0x5bc] ss:$48 sps:$4 sm:$0xff]  }
  0xfb   :  { %3828 = vmatpush2.bf16.msra.mxu0 %v5900_v23  ;;  %v5960_v23 = vld [vmem:[%s8528_s1 + $0x11b0] ss:$48 sps:$4 sm:$0xff]  }
  0xfc   :  { %3869 = vmatpush2.bf16.msra.mxu1 %v5903_v24  ;;  %3829 = vmatprep.subr.bf16.mxu0 %v5908_v25  ;;  %v5963_v24 = vld [vmem:[%s8528_s1 + $0x5b8] ss:$48 sps:$4 sm:$0xff]   ;;  %v5968_v25 = vld [vmem:[%s8528_s1 + $0x1154] ss:$48 sps:$4 sm:$0xff]  }
  0xfd   :  { %3870 = vmatprep.subr.bf16.mxu1 %v5911_v27  ;;  %v5971_v27 = vld [vmem:[%s8528_s1 + $0x55c] ss:$48 sps:$4 sm:$0xff]  }
  0xff   :  { %3830 = vmatpush2.bf16.msra.mxu0 %v5906_v28  ;;  %v5966_v28 = vld [vmem:[%s8528_s1 + $0x1150] ss:$48 sps:$4 sm:$0xff]  }
 0x100   :  { %3871 = vmatpush2.bf16.msra.mxu1 %v5909_v29  ;;  %3881 = vmatprep.subr.bf16.mxu0 %v5914_v32  ;;  %v5969_v29 = vld [vmem:[%s8528_s1 + $0x558] ss:$48 sps:$4 sm:$0xff]   ;;  %v5974_v32 = vld [vmem:[%s8528_s1 + $0x10f4] ss:$48 sps:$4 sm:$0xff]  }
 0x101   :  { %3922 = vmatprep.subr.bf16.mxu1 %v5917_v33  ;;  %v5977_v33 = vld [vmem:[%s8528_s1 + $0x4fc] ss:$48 sps:$4 sm:$0xff]  }
 0x102   :  { %v3587_v42 = vpop.f32.mrf.mxu0  ;;  %3832 = vmatmul.mubr.bf16.vlgmr.msra.gmra.mxu0 %v6693_v8 }
 0x103   :  { %v3628_v43 = vpop.f32.mrf.mxu1  ;;  %3873 = vmatmul.mubr.bf16.vlgmr.msra.gmra.mxu1 %v6695_v9  ;;  %v3588_v45 = vadd.f32 %v3587_v42, %v616_v37  ;;  %3882 = vmatpush1.bf16.msra.mxu0 %v5912_v36  ;;  %v5972_v36 = vld [vmem:[%s8528_s1 + $0x10f0] ss:$48 sps:$4 sm:$0xff]   ;;  %v5975_v37 = vld [vmem:[%s8528_s1 + $0x4f8] ss:$48 sps:$4 sm:$0xff]   ;;  %v5986_v42 = vld [vmem:[%s8528_s1 + $0x1034] ss:$48 sps:$4 sm:$0xff]  }
 0x104   :  { %3923 = vmatpush1.bf16.msra.mxu1 %v5915_v38  ;;  %v3589_v48 = vpop.f32.mrf.mxu0  ;;  %3883 = vmatprep.subr.bf16.mxu0 %v5920_v39  ;;  %v5980_v38 = vld [vmem:[%s8528_s1 + $0x1094] ss:$48 sps:$4 sm:$0xff]   ;;  %v5983_v39 = vld [vmem:[%s8528_s1 + $0x49c] ss:$48 sps:$4 sm:$0xff]  }
 0x105   :  { %v3630_v50 = vpop.f32.mrf.mxu1  ;;  %3924 = vmatprep.subr.bf16.mxu1 %v5923_v40  ;;  %v7336_v53 = vadd.f32 %v3628_v43, %v3588_v45  ;;  %v3590_v54 = vadd.f32 %v3589_v48, %v620_v41  ;;  %3913 = vmatprep.mubr.bf16.mxu0 %v6775_v35  ;;  %v5978_v40 = vld [vmem:[%s8528_s1 + $0x1090] ss:$48 sps:$4 sm:$0xff]   ;;  %v5981_v41 = vld [vmem:[%s8528_s1 + $0x498] ss:$48 sps:$4 sm:$0xff]   ;;  %v5989_v43 = vld [vmem:[%s8528_s1 + $0x43c] ss:$48 sps:$4 sm:$0xff]  }
 0x106   :  { %3954 = vmatprep.mubr.bf16.mxu1 %v6624_v49  ;;  %v3591_v55 = vpop.f32.mrf.mxu0  ;;  %v5987_v45 = vld [vmem:[%s8528_s1 + $0x438] ss:$48 sps:$4 sm:$0xff]   ;;  %v5990_v48 = vld [vmem:[%s8528_s1 + $0xfd0] ss:$48 sps:$4 sm:$0xff]  }
 0x107   :  { %v3632_v56 = vpop.f32.mrf.mxu1  ;;  %v7346_v59 = vadd.f32 %v3630_v50, %v3590_v54  ;;  %3884 = vmatpush1.bf16.msra.mxu0 %v5918_v44  ;;  %v5984_v44 = vld [vmem:[%s8528_s1 + $0x1030] ss:$48 sps:$4 sm:$0xff]   ;;  %v5993_v50 = vld [vmem:[%s8528_s1 + $0x3d8] ss:$48 sps:$4 sm:$0xff]   ;;  %v6001_v54 = vld [vmem:[%s8528_s1 + $0x37c] ss:$48 sps:$4 sm:$0xff]  }
 0x108   :  { %3925 = vmatpush1.bf16.msra.mxu1 %v5921_v46  ;;  %v3592_v60 = vpop.f32.mrf.mxu0  ;;  %3885 = vmatprep.subr.bf16.mxu0 %v5926_v47  ;;  %v5992_v46 = vld [vmem:[%s8528_s1 + $0xfd4] ss:$48 sps:$4 sm:$0xff]   ;;  %v5995_v47 = vld [vmem:[%s8528_s1 + $0x3dc] ss:$48 sps:$4 sm:$0xff]   ;;  %v5996_v55 = vld [vmem:[%s8528_s1 + $0xf70] ss:$48 sps:$4 sm:$0xff]  }
 0x109   :  { %v3633_v61 = vpop.f32.mrf.mxu1  ;;  %3926 = vmatprep.subr.bf16.mxu1 %v5929_v51  ;;  %v5998_v51 = vld [vmem:[%s8528_s1 + $0xf74] ss:$48 sps:$4 sm:$0xff]   ;;  %v5999_v56 = vld [vmem:[%s8528_s1 + $0x378] ss:$48 sps:$4 sm:$0xff]   ;;  %v6002_v60 = vld [vmem:[%s8528_s1 + $0xf10] ss:$48 sps:$4 sm:$0xff]  }
 0x10a   :  { %v6005_v61 = vld [vmem:[%s8528_s1 + $0x318] ss:$48 sps:$4 sm:$0xff]  }
 0x10b   :  { %3886 = vmatpush1.bf16.msra.mxu0 %v5924_v57  ;;  %v6004_v57 = vld [vmem:[%s8528_s1 + $0xf14] ss:$48 sps:$4 sm:$0xff]  }
 0x10c   :  { %3927 = vmatpush1.bf16.msra.mxu1 %v5927_v58  ;;  %3887 = vmatprep.subr.bf16.mxu0 %v5932_v62  ;;  %v6007_v58 = vld [vmem:[%s8528_s1 + $0x31c] ss:$48 sps:$4 sm:$0xff]  }
 0x10d   :  { %3928 = vmatprep.subr.bf16.mxu1 %v5935_v63  ;;  %v6010_v62 = vld [vmem:[%s8528_s1 + $0x8bc] ss:$48 sps:$4 sm:$0xff]  }
 0x10e   :  { %v6013_v63 = vld [vmem:[%s8528_s1 + $0xebc] ss:$48 sps:$4 sm:$0xff]  }
 0x10f   :  { %3888 = vmatpush1.bf16.msra.mxu0 %v5930_v0  ;;  %v6008_v0 = vld [vmem:[%s8528_s1 + $0x8b8] ss:$48 sps:$4 sm:$0xff]  }
 0x110   :  { %3929 = vmatpush1.bf16.msra.mxu1 %v5933_v1  ;;  %3889 = vmatprep.subr.bf16.mxu0 %v5938_v2  ;;  %v6011_v1 = vld [vmem:[%s8528_s1 + $0xeb8] ss:$48 sps:$4 sm:$0xff]   ;;  %v6016_v2 = vld [vmem:[%s8528_s1 + $0x85c] ss:$48 sps:$4 sm:$0xff]  }
 0x111   :  { %3930 = vmatprep.subr.bf16.mxu1 %v5941_v3  ;;  %v6019_v3 = vld [vmem:[%s8528_s1 + $0xe5c] ss:$48 sps:$4 sm:$0xff]  }
 0x113   :  { %3890 = vmatpush1.bf16.msra.mxu0 %v5936_v4  ;;  %v6014_v4 = vld [vmem:[%s8528_s1 + $0x858] ss:$48 sps:$4 sm:$0xff]  }
 0x114   :  { %3931 = vmatpush1.bf16.msra.mxu1 %v5939_v5  ;;  %3891 = vmatprep.subr.bf16.mxu0 %v5944_v6  ;;  %v6017_v5 = vld [vmem:[%s8528_s1 + $0xe58] ss:$48 sps:$4 sm:$0xff]  }
 0x115   :  { %3932 = vmatprep.subr.bf16.mxu1 %v5947_v7 }
 0x117   :  { %3892 = vmatpush1.bf16.msra.mxu0 %v5942_v10 }
 0x118   :  { %3933 = vmatpush1.bf16.msra.mxu1 %v5945_v11  ;;  %3893 = vmatprep.subr.bf16.mxu0 %v5950_v12 }
 0x119   :  { %3934 = vmatprep.subr.bf16.mxu1 %v5953_v13  ;;  %v6022_v13 = vld [vmem:[%s8528_s1 + $0x7fc] ss:$48 sps:$4 sm:$0xff]  }
 0x11b   :  { %3894 = vmatpush1.bf16.msra.mxu0 %v5948_v14  ;;  %v6025_v14 = vld [vmem:[%s8528_s1 + $0xdfc] ss:$48 sps:$4 sm:$0xff]  }
 0x11c   :  { %3935 = vmatpush1.bf16.msra.mxu1 %v5951_v15  ;;  %3895 = vmatprep.subr.bf16.mxu0 %v5956_v16  ;;  %v6023_v16 = vld [vmem:[%s8528_s1 + $0xdf8] ss:$48 sps:$4 sm:$0xff]  }
 0x11d   :  { %3936 = vmatprep.subr.bf16.mxu1 %v5959_v18 }
 0x11f   :  { %3896 = vmatpush1.bf16.msra.mxu0 %v5954_v19 }
 0x120   :  { %3937 = vmatpush1.bf16.msra.mxu1 %v5957_v20  ;;  %3897 = vmatprep.subr.bf16.mxu0 %v5962_v21 }
 0x121   :  { %3938 = vmatprep.subr.bf16.mxu1 %v5965_v22  ;;  %v6031_v22 = vld [vmem:[%s8528_s1 + $0xd9c] ss:$48 sps:$4 sm:$0xff]  }
 0x123   :  { %3898 = vmatpush2.bf16.msra.mxu0 %v5960_v23  ;;  %v6026_v23 = vld [vmem:[%s8528_s1 + $0x798] ss:$48 sps:$4 sm:$0xff]  }
 0x124   :  { %3939 = vmatpush2.bf16.msra.mxu1 %v5963_v24  ;;  %3899 = vmatprep.subr.bf16.mxu0 %v5968_v25  ;;  %v6029_v24 = vld [vmem:[%s8528_s1 + $0xd98] ss:$48 sps:$4 sm:$0xff]   ;;  %v6034_v25 = vld [vmem:[%s8528_s1 + $0x73c] ss:$48 sps:$4 sm:$0xff]  }
 0x125   :  { %3940 = vmatprep.subr.bf16.mxu1 %v5971_v27  ;;  %v6037_v27 = vld [vmem:[%s8528_s1 + $0xd3c] ss:$48 sps:$4 sm:$0xff]  }
 0x127   :  { %3900 = vmatpush2.bf16.msra.mxu0 %v5966_v28  ;;  %v6032_v28 = vld [vmem:[%s8528_s1 + $0x738] ss:$48 sps:$4 sm:$0xff]  }
 0x128   :  { %3941 = vmatpush2.bf16.msra.mxu1 %v5969_v29  ;;  %3901 = vmatprep.subr.bf16.mxu0 %v5974_v32  ;;  %v6035_v29 = vld [vmem:[%s8528_s1 + $0xd38] ss:$48 sps:$4 sm:$0xff]   ;;  %v6040_v32 = vld [vmem:[%s8528_s1 + $0x6dc] ss:$48 sps:$4 sm:$0xff]  }
 0x129   :  { %3942 = vmatprep.subr.bf16.mxu1 %v5977_v33  ;;  %v6043_v33 = vld [vmem:[%s8528_s1 + $0xcdc] ss:$48 sps:$4 sm:$0xff]  }
 0x12b   :  { %3902 = vmatpush2.bf16.msra.mxu0 %v5972_v36  ;;  %v6038_v36 = vld [vmem:[%s8528_s1 + $0x6d8] ss:$48 sps:$4 sm:$0xff]  }
 0x12c   :  { %3943 = vmatpush2.bf16.msra.mxu1 %v5975_v37  ;;  %3903 = vmatprep.subr.bf16.mxu0 %v5980_v38  ;;  %v6041_v37 = vld [vmem:[%s8528_s1 + $0xcd8] ss:$48 sps:$4 sm:$0xff]   ;;  %v6046_v38 = vld [vmem:[%s8528_s1 + $0x67c] ss:$48 sps:$4 sm:$0xff]  }
 0x12d   :  { %3944 = vmatprep.subr.bf16.mxu1 %v5983_v39  ;;  %v6049_v39 = vld [vmem:[%s8528_s1 + $0xc7c] ss:$48 sps:$4 sm:$0xff]  }
 0x12f   :  { %3904 = vmatpush2.bf16.msra.mxu0 %v5978_v40  ;;  %v6044_v40 = vld [vmem:[%s8528_s1 + $0x678] ss:$48 sps:$4 sm:$0xff]  }
 0x130   :  { %3945 = vmatpush2.bf16.msra.mxu1 %v5981_v41  ;;  %3905 = vmatprep.subr.bf16.mxu0 %v5986_v42  ;;  %v6047_v41 = vld [vmem:[%s8528_s1 + $0xc78] ss:$48 sps:$4 sm:$0xff]   ;;  %v6052_v42 = vld [vmem:[%s8528_s1 + $0x61c] ss:$48 sps:$4 sm:$0xff]  }
 0x131   :  { %3946 = vmatprep.subr.bf16.mxu1 %v5989_v43  ;;  %v6055_v43 = vld [vmem:[%s8528_s1 + $0xc1c] ss:$48 sps:$4 sm:$0xff]  }
 0x133   :  { %3906 = vmatpush2.bf16.msra.mxu0 %v5984_v44  ;;  %v6050_v44 = vld [vmem:[%s8528_s1 + $0x618] ss:$48 sps:$4 sm:$0xff]  }
 0x134   :  { %3947 = vmatpush2.bf16.msra.mxu1 %v5987_v45  ;;  %3907 = vmatprep.subr.bf16.mxu0 %v5992_v46  ;;  %v6053_v45 = vld [vmem:[%s8528_s1 + $0xc18] ss:$48 sps:$4 sm:$0xff]   ;;  %v6058_v46 = vld [vmem:[%s8528_s1 + $0xbbc] ss:$48 sps:$4 sm:$0xff]  }
 0x135   :  { %3948 = vmatprep.subr.bf16.mxu1 %v5995_v47  ;;  %v6061_v47 = vld [vmem:[%s8528_s1 + $0x11bc] ss:$48 sps:$4 sm:$0xff]  }
 0x137   :  { %3908 = vmatpush2.bf16.msra.mxu0 %v5990_v48  ;;  %v6056_v48 = vld [vmem:[%s8528_s1 + $0xbb8] ss:$48 sps:$4 sm:$0xff]  }
 0x138   :  { %3949 = vmatpush2.bf16.msra.mxu1 %v5993_v50  ;;  %3909 = vmatprep.subr.bf16.mxu0 %v5998_v51  ;;  %v6059_v50 = vld [vmem:[%s8528_s1 + $0x11b8] ss:$48 sps:$4 sm:$0xff]   ;;  %v6064_v51 = vld [vmem:[%s8528_s1 + $0xb5c] ss:$48 sps:$4 sm:$0xff]  }
 0x139   :  { %3950 = vmatprep.subr.bf16.mxu1 %v6001_v54  ;;  %v6067_v54 = vld [vmem:[%s8528_s1 + $0x115c] ss:$48 sps:$4 sm:$0xff]  }
 0x13b   :  { %3910 = vmatpush2.bf16.msra.mxu0 %v5996_v55  ;;  %v6062_v55 = vld [vmem:[%s8528_s1 + $0xb58] ss:$48 sps:$4 sm:$0xff]  }
 0x13c   :  { %3951 = vmatpush2.bf16.msra.mxu1 %v5999_v56  ;;  %3911 = vmatprep.subr.bf16.mxu0 %v6004_v57  ;;  %v6065_v56 = vld [vmem:[%s8528_s1 + $0x1158] ss:$48 sps:$4 sm:$0xff]   ;;  %v6070_v57 = vld [vmem:[%s8528_s1 + $0xafc] ss:$48 sps:$4 sm:$0xff]  }
 0x13d   :  { %3952 = vmatprep.subr.bf16.mxu1 %v6007_v58  ;;  %v6073_v58 = vld [vmem:[%s8528_s1 + $0x10fc] ss:$48 sps:$4 sm:$0xff]  }
 0x13f   :  { %3912 = vmatpush2.bf16.msra.mxu0 %v6002_v60  ;;  %v6068_v60 = vld [vmem:[%s8528_s1 + $0xaf8] ss:$48 sps:$4 sm:$0xff]  }
 0x140   :  { %3953 = vmatpush2.bf16.msra.mxu1 %v6005_v61  ;;  %3963 = vmatprep.subr.bf16.mxu0 %v6010_v62  ;;  %v6071_v61 = vld [vmem:[%s8528_s1 + $0x10f8] ss:$48 sps:$4 sm:$0xff]   ;;  %v6076_v62 = vld [vmem:[%s8528_s1 + $0xa9c] ss:$48 sps:$4 sm:$0xff]  }
 0x141   :  { %4004 = vmatprep.subr.bf16.mxu1 %v6013_v63  ;;  %v6079_v63 = vld [vmem:[%s8528_s1 + $0x109c] ss:$48 sps:$4 sm:$0xff]  }
 0x142   :  { %v3669_v6 = vpop.f32.mrf.mxu0  ;;  %3914 = vmatmul.mubr.bf16.vlgmr.msra.gmra.mxu0 %v6901_v17 }
 0x143   :  { %v7528_v7 = vpop.f32.mrf.mxu1  ;;  %3955 = vmatmul.mubr.bf16.vlgmr.msra.gmra.mxu1 %v6693_v8  ;;  %v7533_v10 = vadd.f32 %v3669_v6, %v7336_v53  ;;  %3964 = vmatpush1.bf16.msra.mxu0 %v6008_v0  ;;  %v6020_v53 = vld [vmem:[%s8528_s1 + $0x7f8] ss:$48 sps:$4 sm:$0xff]   ;;  %v6088_v6 = vld [vmem:[%s8528_s1 + $0x9dc] ss:$48 sps:$4 sm:$0xff]  }
 0x144   :  { %4005 = vmatpush1.bf16.msra.mxu1 %v6011_v1  ;;  %v3671_v11 = vpop.f32.mrf.mxu0  ;;  %3965 = vmatprep.subr.bf16.mxu0 %v6016_v2  ;;  %v6074_v0 = vld [vmem:[%s8528_s1 + $0xa98] ss:$48 sps:$4 sm:$0xff]   ;;  %v6082_v2 = vld [vmem:[%s8528_s1 + $0xa3c] ss:$48 sps:$4 sm:$0xff]  }
 0x145   :  { %v7535_v12 = vpop.f32.mrf.mxu1  ;;  %4006 = vmatprep.subr.bf16.mxu1 %v6019_v3  ;;  %v7544_v15 = vadd.f32 %v3671_v11, %v7346_v59  ;;  %3995 = vmatprep.mubr.bf16.mxu0 %v6632_v52  ;;  %v6028_v59 = vld [vmem:[%s8528_s1 + $0x79c] ss:$48 sps:$4 sm:$0xff]   ;;  %v6077_v1 = vld [vmem:[%s8528_s1 + $0x1098] ss:$48 sps:$4 sm:$0xff]  }
 0x146   :  { %4036 = vmatprep.mubr.bf16.mxu1 %v6775_v35  ;;  %v3673_v18 = vpop.f32.mrf.mxu0  ;;  %v6085_v3 = vld [vmem:[%s8528_s1 + $0x103c] ss:$48 sps:$4 sm:$0xff]  }
 0x147   :  { %v3714_v19 = vpop.f32.mrf.mxu1  ;;  %3966 = vmatpush1.bf16.msra.mxu0 %v6014_v4  ;;  %v6080_v4 = vld [vmem:[%s8528_s1 + $0xa38] ss:$48 sps:$4 sm:$0xff]   ;;  %v6091_v11 = vld [vmem:[%s8528_s1 + $0xfdc] ss:$48 sps:$4 sm:$0xff]  }
 0x148   :  { %4007 = vmatpush1.bf16.msra.mxu1 %v6017_v5  ;;  %v3674_v20 = vpop.f32.mrf.mxu0  ;;  %3967 = vmatprep.subr.bf16.mxu0 %v6022_v13  ;;  %v6083_v5 = vld [vmem:[%s8528_s1 + $0x1038] ss:$48 sps:$4 sm:$0xff]  }
 0x149   :  { %v3715_v21 = vpop.f32.mrf.mxu1  ;;  %4008 = vmatprep.subr.bf16.mxu1 %v6025_v14  ;;  %v6086_v13 = vld [vmem:[%s8528_s1 + $0x9d8] ss:$48 sps:$4 sm:$0xff]   ;;  %v6100_v20 = vld [vmem:[%s8528_s1 + $0x91c] ss:$48 sps:$4 sm:$0xff]  }
 0x14a   :  { %v6089_v14 = vld [vmem:[%s8528_s1 + $0xfd8] ss:$48 sps:$4 sm:$0xff]   ;;  %v6103_v21 = vld [vmem:[%s8528_s1 + $0xf1c] ss:$48 sps:$4 sm:$0xff]  }
 0x14b   :  { %3968 = vmatpush1.bf16.msra.mxu0 %v6020_v53  ;;  %v6094_v53 = vld [vmem:[%s8528_s1 + $0x97c] ss:$48 sps:$4 sm:$0xff]   ;;  %v6092_v18 = vld [vmem:[%s8528_s1 + $0x978] ss:$48 sps:$4 sm:$0xff]  }
 0x14c   :  { %4009 = vmatpush1.bf16.msra.mxu1 %v6023_v16  ;;  %3969 = vmatprep.subr.bf16.mxu0 %v6028_v59  ;;  %v6097_v16 = vld [vmem:[%s8528_s1 + $0xf7c] ss:$48 sps:$4 sm:$0xff]   ;;  %v6095_v19 = vld [vmem:[%s8528_s1 + $0xf78] ss:$48 sps:$4 sm:$0xff]   ;;  %v623_v59 = vsub.s32 2, %v7280_v26 }
 0x14d   :  { %4010 = vmatprep.subr.bf16.mxu1 %v6031_v22  ;;  %v627_v22 = vsub.s32 3, %v7280_v26 }
 0x14f   :  { %3970 = vmatpush1.bf16.msra.mxu0 %v6026_v23  ;;  %v6098_v23 = vld [vmem:[%s8528_s1 + $0x918] ss:$48 sps:$4 sm:$0xff]  }
 0x150   :  { %4011 = vmatpush1.bf16.msra.mxu1 %v6029_v24  ;;  %3971 = vmatprep.subr.bf16.mxu0 %v6034_v25  ;;  %v6101_v24 = vld [vmem:[%s8528_s1 + $0xf18] ss:$48 sps:$4 sm:$0xff]   ;;  %v6106_v25 = vld [vmem:[%s8528_s1 + $0x2c4] ss:$48 sps:$4 sm:$0xff]  }
 0x151   :  { %4012 = vmatprep.subr.bf16.mxu1 %v6037_v27  ;;  %v6109_v27 = vld [vmem:[%s8528_s1 + $0x8c4] ss:$48 sps:$4 sm:$0xff]  }
 0x153   :  { %3972 = vmatpush1.bf16.msra.mxu0 %v6032_v28  ;;  %v624_v28 = vrot.slane %v7294_v30, %v623_v59 }
 0x154   :  { %4013 = vmatpush1.bf16.msra.mxu1 %v6035_v29  ;;  %3973 = vmatprep.subr.bf16.mxu0 %v6040_v32  ;;  %v628_v29 = vrot.slane %v7294_v30, %v627_v22  ;;  %v6104_v32 = vld [vmem:[%s8528_s1 + $0x2c0] ss:$48 sps:$4 sm:$0xff]   ;;  %v6115_v30 = vld [vmem:[%s8528_s1 + $0x864] ss:$48 sps:$4 sm:$0xff]  }
 0x155   :  { %4014 = vmatprep.subr.bf16.mxu1 %v6043_v33  ;;  %v6107_v33 = vld [vmem:[%s8528_s1 + $0x8c0] ss:$48 sps:$4 sm:$0xff]  }
 0x157   :  { %3974 = vmatpush1.bf16.msra.mxu0 %v6038_v36  ;;  %v6112_v36 = vld [vmem:[%s8528_s1 + $0x264] ss:$48 sps:$4 sm:$0xff]  }
 0x158   :  { %4015 = vmatpush1.bf16.msra.mxu1 %v6041_v37  ;;  %3975 = vmatprep.subr.bf16.mxu0 %v6046_v38  ;;  %v3711_v37 = vadd.f32 %v7528_v7, %v624_v28  ;;  %v6163_v28 = vld [vmem:[%s8528_s1 + $0xb64] ss:$48 sps:$4 sm:$0xff]  }
 0x159   :  { %4016 = vmatprep.subr.bf16.mxu1 %v6049_v39 }
 0x15b   :  { %3976 = vmatpush1.bf16.msra.mxu0 %v6044_v40  ;;  %v3713_v40 = vadd.f32 %v7535_v12, %v628_v29  ;;  %v6121_v12 = vld [vmem:[%s8528_s1 + $0x804] ss:$48 sps:$4 sm:$0xff]   ;;  %v6158_v29 = vld [vmem:[%s8528_s1 + $0x560] ss:$48 sps:$4 sm:$0xff]  }
 0x15c   :  { %4017 = vmatpush1.bf16.msra.mxu1 %v6047_v41  ;;  %3977 = vmatprep.subr.bf16.mxu0 %v6052_v42  ;;  %v6110_v42 = vld [vmem:[%s8528_s1 + $0x260] ss:$48 sps:$4 sm:$0xff]  }
 0x15d   :  { %4018 = vmatprep.subr.bf16.mxu1 %v6055_v43  ;;  %v6113_v43 = vld [vmem:[%s8528_s1 + $0x860] ss:$48 sps:$4 sm:$0xff]  }
 0x15f   :  { %3978 = vmatpush1.bf16.msra.mxu0 %v6050_v44 }
 0x160   :  { %4019 = vmatpush1.bf16.msra.mxu1 %v6053_v45  ;;  %3979 = vmatprep.subr.bf16.mxu0 %v6058_v46  ;;  %v6118_v45 = vld [vmem:[%s8528_s1 + $0x204] ss:$48 sps:$4 sm:$0xff]  }
 0x161   :  { %4020 = vmatprep.subr.bf16.mxu1 %v6061_v47 }
 0x163   :  { %3980 = vmatpush2.bf16.msra.mxu0 %v6056_v48 }
 0x164   :  { %4021 = vmatpush2.bf16.msra.mxu1 %v6059_v50  ;;  %3981 = vmatprep.subr.bf16.mxu0 %v6064_v51 }
 0x165   :  { %4022 = vmatprep.subr.bf16.mxu1 %v6067_v54  ;;  %v6116_v54 = vld [vmem:[%s8528_s1 + $0x200] ss:$48 sps:$4 sm:$0xff]  }
 0x167   :  { %3982 = vmatpush2.bf16.msra.mxu0 %v6062_v55  ;;  %v6119_v55 = vld [vmem:[%s8528_s1 + $0x800] ss:$48 sps:$4 sm:$0xff]  }
 0x168   :  { %4023 = vmatpush2.bf16.msra.mxu1 %v6065_v56  ;;  %3983 = vmatprep.subr.bf16.mxu0 %v6070_v57 }
 0x169   :  { %4024 = vmatprep.subr.bf16.mxu1 %v6073_v58  ;;  %v6124_v58 = vld [vmem:[%s8528_s1 + $0x1a4] ss:$48 sps:$4 sm:$0xff]  }
 0x16b   :  { %3984 = vmatpush2.bf16.msra.mxu0 %v6068_v60  ;;  %v6127_v60 = vld [vmem:[%s8528_s1 + $0x7a4] ss:$48 sps:$4 sm:$0xff]  }
 0x16c   :  { %4025 = vmatpush2.bf16.msra.mxu1 %v6071_v61  ;;  %3985 = vmatprep.subr.bf16.mxu0 %v6076_v62  ;;  %v6122_v61 = vld [vmem:[%s8528_s1 + $0x1a0] ss:$48 sps:$4 sm:$0xff]  }
 0x16d   :  { %4026 = vmatprep.subr.bf16.mxu1 %v6079_v63  ;;  %v6125_v62 = vld [vmem:[%s8528_s1 + $0x7a0] ss:$48 sps:$4 sm:$0xff]   ;;  %v6130_v63 = vld [vmem:[%s8528_s1 + $0x144] ss:$48 sps:$4 sm:$0xff]  }
 0x16f   :  { %3986 = vmatpush2.bf16.msra.mxu0 %v6074_v0  ;;  %v6133_v0 = vld [vmem:[%s8528_s1 + $0x744] ss:$48 sps:$4 sm:$0xff]  }
 0x170   :  { %4027 = vmatpush2.bf16.msra.mxu1 %v6077_v1  ;;  %3987 = vmatprep.subr.bf16.mxu0 %v6082_v2  ;;  %v6128_v1 = vld [vmem:[%s8528_s1 + $0x140] ss:$48 sps:$4 sm:$0xff]  }
 0x171   :  { %4028 = vmatprep.subr.bf16.mxu1 %v6085_v3  ;;  %v6131_v2 = vld [vmem:[%s8528_s1 + $0x740] ss:$48 sps:$4 sm:$0xff]   ;;  %v6136_v3 = vld [vmem:[%s8528_s1 + $0xe4] ss:$48 sps:$4 sm:$0xff]  }
 0x173   :  { %3988 = vmatpush2.bf16.msra.mxu0 %v6080_v4  ;;  %v6139_v4 = vld [vmem:[%s8528_s1 + $0x6e4] ss:$48 sps:$4 sm:$0xff]  }
 0x174   :  { %4029 = vmatpush2.bf16.msra.mxu1 %v6083_v5  ;;  %3989 = vmatprep.subr.bf16.mxu0 %v6088_v6  ;;  %v6134_v5 = vld [vmem:[%s8528_s1 + $0xe0] ss:$48 sps:$4 sm:$0xff]  }
 0x175   :  { %4030 = vmatprep.subr.bf16.mxu1 %v6091_v11  ;;  %v6137_v6 = vld [vmem:[%s8528_s1 + $0x6e0] ss:$48 sps:$4 sm:$0xff]   ;;  %v6142_v11 = vld [vmem:[%s8528_s1 + $0x84] ss:$48 sps:$4 sm:$0xff]  }
 0x177   :  { %3990 = vmatpush2.bf16.msra.mxu0 %v6086_v13  ;;  %v6145_v13 = vld [vmem:[%s8528_s1 + $0x684] ss:$48 sps:$4 sm:$0xff]  }
 0x178   :  { %4031 = vmatpush2.bf16.msra.mxu1 %v6089_v14  ;;  %3991 = vmatprep.subr.bf16.mxu0 %v6094_v53  ;;  %v6140_v14 = vld [vmem:[%s8528_s1 + $0x80] ss:$48 sps:$4 sm:$0xff]  }
 0x179   :  { %4032 = vmatprep.subr.bf16.mxu1 %v6097_v16  ;;  %v6143_v53 = vld [vmem:[%s8528_s1 + $0x680] ss:$48 sps:$4 sm:$0xff]   ;;  %v6148_v16 = vld [vmem:[%s8528_s1 + $0x24] ss:$48 sps:$4 sm:$0xff]  }
 0x17b   :  { %3992 = vmatpush2.bf16.msra.mxu0 %v6092_v18  ;;  %v6151_v18 = vld [vmem:[%s8528_s1 + $0x624] ss:$48 sps:$4 sm:$0xff]  }
 0x17c   :  { %4033 = vmatpush2.bf16.msra.mxu1 %v6095_v19  ;;  %3993 = vmatprep.subr.bf16.mxu0 %v6100_v20  ;;  %v6146_v19 = vld [vmem:[%s8528_s1 + $0x20] ss:$48 sps:$4 sm:$0xff]  }
 0x17d   :  { %4034 = vmatprep.subr.bf16.mxu1 %v6103_v21  ;;  %v6149_v20 = vld [vmem:[%s8528_s1 + $0x620] ss:$48 sps:$4 sm:$0xff]   ;;  %v6154_v21 = vld [vmem:[%s8528_s1 + $0x5c4] ss:$48 sps:$4 sm:$0xff]  }
 0x17f   :  { %3994 = vmatpush2.bf16.msra.mxu0 %v6098_v23  ;;  %v6157_v23 = vld [vmem:[%s8528_s1 + $0xbc4] ss:$48 sps:$4 sm:$0xff]  }
 0x180   :  { %4035 = vmatpush2.bf16.msra.mxu1 %v6101_v24  ;;  %4045 = vmatprep.subr.bf16.mxu0 %v6106_v25  ;;  %v6152_v24 = vld [vmem:[%s8528_s1 + $0x5c0] ss:$48 sps:$4 sm:$0xff]  }
 0x181   :  { %4086 = vmatprep.subr.bf16.mxu1 %v6109_v27  ;;  %v6155_v25 = vld [vmem:[%s8528_s1 + $0xbc0] ss:$48 sps:$4 sm:$0xff]   ;;  %v6160_v27 = vld [vmem:[%s8528_s1 + $0x564] ss:$48 sps:$4 sm:$0xff]  }
 0x182   :  { %v3751_v38 = vpop.f32.mrf.mxu0  ;;  %3996 = vmatmul.mubr.bf16.vlgmr.msra.gmra.mxu0 %v6695_v9 }
 0x183   :  { %v3792_v39 = vpop.f32.mrf.mxu1  ;;  %4037 = vmatmul.mubr.bf16.vlgmr.msra.gmra.mxu1 %v6901_v17  ;;  %v3752_v41 = vadd.f32 %v3751_v38, %v3711_v37  ;;  %4046 = vmatpush1.bf16.msra.mxu0 %v6104_v32  ;;  %v6161_v32 = vld [vmem:[%s8528_s1 + $0xb60] ss:$48 sps:$4 sm:$0xff]   ;;  %v6172_v38 = vld [vmem:[%s8528_s1 + $0x4a4] ss:$48 sps:$4 sm:$0xff]  }
 0x184   :  { %4087 = vmatpush1.bf16.msra.mxu1 %v6107_v33  ;;  %v3753_v7 = vpop.f32.mrf.mxu0  ;;  %4047 = vmatprep.subr.bf16.mxu0 %v6112_v36  ;;  %v6166_v33 = vld [vmem:[%s8528_s1 + $0x504] ss:$48 sps:$4 sm:$0xff]   ;;  %v6167_v37 = vld [vmem:[%s8528_s1 + $0xb00] ss:$48 sps:$4 sm:$0xff]  }
 0x185   :  { %v3794_v44 = vpop.f32.mrf.mxu1  ;;  %4088 = vmatprep.subr.bf16.mxu1 %v6115_v30  ;;  %v7752_v46 = vadd.f32 %v3792_v39, %v3752_v41  ;;  %v3754_v47 = vadd.f32 %v3753_v7, %v3713_v40  ;;  %4077 = vmatprep.mubr.bf16.mxu0 %v6624_v49  ;;  %v6169_v36 = vld [vmem:[%s8528_s1 + $0xb04] ss:$48 sps:$4 sm:$0xff]   ;;  %v6164_v30 = vld [vmem:[%s8528_s1 + $0x500] ss:$48 sps:$4 sm:$0xff]  }
 0x186   :  { %4118 = vmatprep.mubr.bf16.mxu1 %v6632_v52  ;;  %v3755_v48 = vpop.f32.mrf.mxu0  ;;  %v6175_v39 = vld [vmem:[%s8528_s1 + $0xaa4] ss:$48 sps:$4 sm:$0xff]   ;;  %v6170_v40 = vld [vmem:[%s8528_s1 + $0x4a0] ss:$48 sps:$4 sm:$0xff]  }
 0x187   :  { %v3796_v50 = vpop.f32.mrf.mxu1  ;;  %v7756_v51 = vadd.f32 %v3794_v44, %v3754_v47  ;;  %4048 = vmatpush1.bf16.msra.mxu0 %v6110_v42  ;;  %v6173_v41 = vld [vmem:[%s8528_s1 + $0xaa0] ss:$48 sps:$4 sm:$0xff]   ;;  %v6178_v42 = vld [vmem:[%s8528_s1 + $0x444] ss:$48 sps:$4 sm:$0xff]  }
 0x188   :  { %4089 = vmatpush1.bf16.msra.mxu1 %v6113_v43  ;;  %v3756_v56 = vpop.f32.mrf.mxu0  ;;  %4049 = vmatprep.subr.bf16.mxu0 %v6118_v45  ;;  %v6181_v43 = vld [vmem:[%s8528_s1 + $0xa44] ss:$48 sps:$4 sm:$0xff]   ;;  %v6176_v7 = vld [vmem:[%s8528_s1 + $0x440] ss:$48 sps:$4 sm:$0xff]  }
 0x189   :  { %v3797_v57 = vpop.f32.mrf.mxu1  ;;  %4090 = vmatprep.subr.bf16.mxu1 %v6121_v12  ;;  %v6179_v44 = vld [vmem:[%s8528_s1 + $0xa40] ss:$48 sps:$4 sm:$0xff]   ;;  %v6184_v45 = vld [vmem:[%s8528_s1 + $0x3e4] ss:$48 sps:$4 sm:$0xff]  }
 0x18a   :  { %v6187_v12 = vld [vmem:[%s8528_s1 + $0x9e4] ss:$48 sps:$4 sm:$0xff]   ;;  %v6182_v47 = vld [vmem:[%s8528_s1 + $0x3e0] ss:$48 sps:$4 sm:$0xff]  }
 0x18b   :  { %4050 = vmatpush1.bf16.msra.mxu0 %v6116_v54  ;;  %v6185_v48 = vld [vmem:[%s8528_s1 + $0x9e0] ss:$48 sps:$4 sm:$0xff]   ;;  %v6190_v50 = vld [vmem:[%s8528_s1 + $0x384] ss:$48 sps:$4 sm:$0xff]  }
 0x18c   :  { %4091 = vmatpush1.bf16.msra.mxu1 %v6119_v55  ;;  %4051 = vmatprep.subr.bf16.mxu0 %v6124_v58  ;;  %v6193_v54 = vld [vmem:[%s8528_s1 + $0x984] ss:$48 sps:$4 sm:$0xff]   ;;  %v6188_v55 = vld [vmem:[%s8528_s1 + $0x380] ss:$48 sps:$4 sm:$0xff]  }
 0x18d   :  { %4092 = vmatprep.subr.bf16.mxu1 %v6127_v60  ;;  %v6191_v56 = vld [vmem:[%s8528_s1 + $0x980] ss:$48 sps:$4 sm:$0xff]   ;;  %v6196_v57 = vld [vmem:[%s8528_s1 + $0x324] ss:$48 sps:$4 sm:$0xff]  }
 0x18e   :  { %v6199_v58 = vld [vmem:[%s8528_s1 + $0x924] ss:$48 sps:$4 sm:$0xff]   ;;  %v6194_v60 = vld [vmem:[%s8528_s1 + $0x320] ss:$48 sps:$4 sm:$0xff]  }
 0x18f   :  { %4052 = vmatpush1.bf16.msra.mxu0 %v6122_v61  ;;  %v6197_v61 = vld [vmem:[%s8528_s1 + $0x920] ss:$48 sps:$4 sm:$0xff]  }
 0x190   :  { %4093 = vmatpush1.bf16.msra.mxu1 %v6125_v62  ;;  %4053 = vmatprep.subr.bf16.mxu0 %v6130_v63  ;;  %v631_v62 = vsub.s32 4, %v7280_v26  ;;  %v6202_v63 = vld [vmem:[%s8528_s1 + $0xec4] ss:$48 sps:$4 sm:$0xff]  }
 0x191   :  { %4094 = vmatprep.subr.bf16.mxu1 %v6133_v0  ;;  %v6205_v0 = vld [vmem:[%s8528_s1 + $0x2cc] ss:$48 sps:$4 sm:$0xff]  }
 0x193   :  { %4054 = vmatpush1.bf16.msra.mxu0 %v6128_v1  ;;  %v635_v1 = vsub.s32 5, %v7280_v26 }
 0x194   :  { %4095 = vmatpush1.bf16.msra.mxu1 %v6131_v2  ;;  %4055 = vmatprep.subr.bf16.mxu0 %v6136_v3  ;;  %v7931_v2 = vld [vmem:[%s8530_s2] sm:$0xff] }
 0x195   :  { %4096 = vmatprep.subr.bf16.mxu1 %v6139_v4  ;;  %v632_v3 = vrot.slane %v7931_v2, %v631_v62  ;;  %v6200_v4 = vld [vmem:[%s8528_s1 + $0xec0] ss:$48 sps:$4 sm:$0xff]   ;;  %v6253_v62 = vld [vmem:[%s8528_s1 + $0x5cc] ss:$48 sps:$4 sm:$0xff]  }
 0x197   :  { %4056 = vmatpush1.bf16.msra.mxu0 %v6134_v5  ;;  %v6203_v5 = vld [vmem:[%s8528_s1 + $0x2c8] ss:$48 sps:$4 sm:$0xff]  }
 0x198   :  { %4097 = vmatpush1.bf16.msra.mxu1 %v6137_v6  ;;  %4057 = vmatprep.subr.bf16.mxu0 %v6142_v11  ;;  %v6208_v6 = vld [vmem:[%s8528_s1 + $0xe64] ss:$48 sps:$4 sm:$0xff]   ;;  %v6211_v11 = vld [vmem:[%s8528_s1 + $0x26c] ss:$48 sps:$4 sm:$0xff]  }
 0x199   :  { %4098 = vmatprep.subr.bf16.mxu1 %v6145_v13  ;;  %v636_v13 = vrot.slane %v7931_v2, %v635_v1  ;;  %v6256_v1 = vld [vmem:[%s8528_s1 + $0x1164] ss:$48 sps:$4 sm:$0xff]  }
 0x19b   :  { %4058 = vmatpush1.bf16.msra.mxu0 %v6140_v14  ;;  %v6206_v14 = vld [vmem:[%s8528_s1 + $0xe60] ss:$48 sps:$4 sm:$0xff]  }
 0x19c   :  { %4099 = vmatpush1.bf16.msra.mxu1 %v6143_v53  ;;  %4059 = vmatprep.subr.bf16.mxu0 %v6148_v16  ;;  %v6209_v53 = vld [vmem:[%s8528_s1 + $0x268] ss:$48 sps:$4 sm:$0xff]  }
 0x19d   :  { %4100 = vmatprep.subr.bf16.mxu1 %v6151_v18 }
 0x19f   :  { %4060 = vmatpush1.bf16.msra.mxu0 %v6146_v19  ;;  %v6214_v19 = vld [vmem:[%s8528_s1 + $0xe04] ss:$48 sps:$4 sm:$0xff]  }
 0x1a0   :  { %4101 = vmatpush1.bf16.msra.mxu1 %v6149_v20  ;;  %4061 = vmatprep.subr.bf16.mxu0 %v6154_v21 }
 0x1a1   :  { %4102 = vmatprep.subr.bf16.mxu1 %v6157_v23 }
 0x1a3   :  { %4062 = vmatpush2.bf16.msra.mxu0 %v6152_v24  ;;  %v6217_v24 = vld [vmem:[%s8528_s1 + $0x20c] ss:$48 sps:$4 sm:$0xff]  }
 0x1a4   :  { %4103 = vmatpush2.bf16.msra.mxu1 %v6155_v25  ;;  %4063 = vmatprep.subr.bf16.mxu0 %v6160_v27 }
 0x1a5   :  { %4104 = vmatprep.subr.bf16.mxu1 %v6163_v28  ;;  %v6212_v28 = vld [vmem:[%s8528_s1 + $0xe00] ss:$48 sps:$4 sm:$0xff]  }
 0x1a7   :  { %4064 = vmatpush2.bf16.msra.mxu0 %v6158_v29  ;;  %v6215_v29 = vld [vmem:[%s8528_s1 + $0x208] ss:$48 sps:$4 sm:$0xff]  }
 0x1a8   :  { %4105 = vmatpush2.bf16.msra.mxu1 %v6161_v32  ;;  %4065 = vmatprep.subr.bf16.mxu0 %v6166_v33 }
 0x1a9   :  { %4106 = vmatprep.subr.bf16.mxu1 %v6169_v36  ;;  %v6220_v36 = vld [vmem:[%s8528_s1 + $0xda4] ss:$48 sps:$4 sm:$0xff]  }
 0x1ab   :  { %4066 = vmatpush2.bf16.msra.mxu0 %v6164_v30 }
 0x1ac   :  { %4107 = vmatpush2.bf16.msra.mxu1 %v6167_v37  ;;  %4067 = vmatprep.subr.bf16.mxu0 %v6172_v38 }
 0x1ad   :  { %4108 = vmatprep.subr.bf16.mxu1 %v6175_v39  ;;  %v6223_v39 = vld [vmem:[%s8528_s1 + $0x1ac] ss:$48 sps:$4 sm:$0xff]  }
 0x1af   :  { %4068 = vmatpush2.bf16.msra.mxu0 %v6170_v40  ;;  %v6221_v40 = vld [vmem:[%s8528_s1 + $0x1a8] ss:$48 sps:$4 sm:$0xff]  }
 0x1b0   :  { %4109 = vmatpush2.bf16.msra.mxu1 %v6173_v41  ;;  %4069 = vmatprep.subr.bf16.mxu0 %v6178_v42  ;;  %v6226_v41 = vld [vmem:[%s8528_s1 + $0xd44] ss:$48 sps:$4 sm:$0xff]   ;;  %v6229_v42 = vld [vmem:[%s8528_s1 + $0x14c] ss:$48 sps:$4 sm:$0xff]  }
 0x1b1   :  { %4110 = vmatprep.subr.bf16.mxu1 %v6181_v43  ;;  %v6224_v43 = vld [vmem:[%s8528_s1 + $0xd40] ss:$48 sps:$4 sm:$0xff]  }
 0x1b3   :  { %4070 = vmatpush2.bf16.msra.mxu0 %v6176_v7  ;;  %v6227_v7 = vld [vmem:[%s8528_s1 + $0x148] ss:$48 sps:$4 sm:$0xff]  }
 0x1b4   :  { %4111 = vmatpush2.bf16.msra.mxu1 %v6179_v44  ;;  %4071 = vmatprep.subr.bf16.mxu0 %v6184_v45  ;;  %v6232_v44 = vld [vmem:[%s8528_s1 + $0xce4] ss:$48 sps:$4 sm:$0xff]   ;;  %v6235_v45 = vld [vmem:[%s8528_s1 + $0xec] ss:$48 sps:$4 sm:$0xff]  }
 0x1b5   :  { %4112 = vmatprep.subr.bf16.mxu1 %v6187_v12  ;;  %v6230_v12 = vld [vmem:[%s8528_s1 + $0xce0] ss:$48 sps:$4 sm:$0xff]  }
 0x1b7   :  { %4072 = vmatpush2.bf16.msra.mxu0 %v6182_v47  ;;  %v6233_v47 = vld [vmem:[%s8528_s1 + $0xe8] ss:$48 sps:$4 sm:$0xff]  }
 0x1b8   :  { %4113 = vmatpush2.bf16.msra.mxu1 %v6185_v48  ;;  %4073 = vmatprep.subr.bf16.mxu0 %v6190_v50  ;;  %v6238_v48 = vld [vmem:[%s8528_s1 + $0xc84] ss:$48 sps:$4 sm:$0xff]   ;;  %v6241_v50 = vld [vmem:[%s8528_s1 + $0x8c] ss:$48 sps:$4 sm:$0xff]  }
 0x1b9   :  { %4114 = vmatprep.subr.bf16.mxu1 %v6193_v54  ;;  %v6236_v54 = vld [vmem:[%s8528_s1 + $0xc80] ss:$48 sps:$4 sm:$0xff]  }
 0x1bb   :  { %4074 = vmatpush2.bf16.msra.mxu0 %v6188_v55  ;;  %v6239_v55 = vld [vmem:[%s8528_s1 + $0x88] ss:$48 sps:$4 sm:$0xff]  }
 0x1bc   :  { %4115 = vmatpush2.bf16.msra.mxu1 %v6191_v56  ;;  %4075 = vmatprep.subr.bf16.mxu0 %v6196_v57  ;;  %v6244_v56 = vld [vmem:[%s8528_s1 + $0xc24] ss:$48 sps:$4 sm:$0xff]   ;;  %v6247_v57 = vld [vmem:[%s8528_s1 + $0x2c] ss:$48 sps:$4 sm:$0xff]  }
 0x1bd   :  { %4116 = vmatprep.subr.bf16.mxu1 %v6199_v58  ;;  %v6242_v58 = vld [vmem:[%s8528_s1 + $0xc20] ss:$48 sps:$4 sm:$0xff]  }
 0x1bf   :  { %4076 = vmatpush2.bf16.msra.mxu0 %v6194_v60  ;;  %v6245_v60 = vld [vmem:[%s8528_s1 + $0x28] ss:$48 sps:$4 sm:$0xff]  }
 0x1c0   :  { %4117 = vmatpush2.bf16.msra.mxu1 %v6197_v61  ;;  %4127 = vmatprep.subr.bf16.mxu0 %v6202_v63  ;;  %v6250_v61 = vld [vmem:[%s8528_s1 + $0x11c4] ss:$48 sps:$4 sm:$0xff]   ;;  %v6248_v63 = vld [vmem:[%s8528_s1 + $0x11c0] ss:$48 sps:$4 sm:$0xff]  }
 0x1c1   :  { %4168 = vmatprep.subr.bf16.mxu1 %v6205_v0  ;;  %v6251_v0 = vld [vmem:[%s8528_s1 + $0x5c8] ss:$48 sps:$4 sm:$0xff]  }
 0x1c2   :  { %v3833_v16 = vpop.f32.mrf.mxu0  ;;  %4078 = vmatmul.mubr.bf16.vlgmr.msra.gmra.mxu0 %v6693_v8 }
 0x1c3   :  { %v3874_v18 = vpop.f32.mrf.mxu1  ;;  %4119 = vmatmul.mubr.bf16.vlgmr.msra.gmra.mxu1 %v6695_v9  ;;  %v3834_v20 = vadd.f32 %v3833_v16, %v632_v3  ;;  %4128 = vmatpush1.bf16.msra.mxu0 %v6200_v4  ;;  %v6259_v3 = vld [vmem:[%s8528_s1 + $0x56c] ss:$48 sps:$4 sm:$0xff]   ;;  %v6254_v4 = vld [vmem:[%s8528_s1 + $0x1160] ss:$48 sps:$4 sm:$0xff]  }
 0x1c4   :  { %4169 = vmatpush1.bf16.msra.mxu1 %v6203_v5  ;;  %v3835_v21 = vpop.f32.mrf.mxu0  ;;  %4129 = vmatprep.subr.bf16.mxu0 %v6208_v6  ;;  %v6257_v5 = vld [vmem:[%s8528_s1 + $0x568] ss:$48 sps:$4 sm:$0xff]   ;;  %v6262_v6 = vld [vmem:[%s8528_s1 + $0x1104] ss:$48 sps:$4 sm:$0xff]   ;;  %v6271_v16 = vld [vmem:[%s8528_s1 + $0x4ac] ss:$48 sps:$4 sm:$0xff]  }
 0x1c5   :  { %v3876_v23 = vpop.f32.mrf.mxu1  ;;  %4170 = vmatprep.subr.bf16.mxu1 %v6211_v11  ;;  %v7961_v25 = vadd.f32 %v3874_v18, %v3834_v20  ;;  %v3836_v27 = vadd.f32 %v3835_v21, %v636_v13  ;;  %4159 = vmatprep.mubr.bf16.mxu0 %v6775_v35  ;;  %v6265_v11 = vld [vmem:[%s8528_s1 + $0x50c] ss:$48 sps:$4 sm:$0xff]   ;;  %v6260_v13 = vld [vmem:[%s8528_s1 + $0x1100] ss:$48 sps:$4 sm:$0xff]   ;;  %v6274_v20 = vld [vmem:[%s8528_s1 + $0x1044] ss:$48 sps:$4 sm:$0xff]  }
 0x1c6   :  { %4200 = vmatprep.mubr.bf16.mxu1 %v6624_v49  ;;  %v3837_v32 = vpop.f32.mrf.mxu0  ;;  %v6218_v49 = vld [vmem:[%s8528_s1 + $0xda0] ss:$48 sps:$4 sm:$0xff]   ;;  %v6277_v21 = vld [vmem:[%s8528_s1 + $0x44c] ss:$48 sps:$4 sm:$0xff]  }
 0x1c7   :  { %v3878_v33 = vpop.f32.mrf.mxu1  ;;  %v7974_v30 = vadd.f32 %v3876_v23, %v3836_v27  ;;  %4130 = vmatpush1.bf16.msra.mxu0 %v6206_v14  ;;  %v6263_v14 = vld [vmem:[%s8528_s1 + $0x508] ss:$48 sps:$4 sm:$0xff]   ;;  %v6266_v18 = vld [vmem:[%s8528_s1 + $0x10a0] ss:$48 sps:$4 sm:$0xff]   ;;  %v6280_v27 = vld [vmem:[%s8528_s1 + $0xfe4] ss:$48 sps:$4 sm:$0xff]  }
 0x1c8   :  { %4171 = vmatpush1.bf16.msra.mxu1 %v6209_v53  ;;  %v3838_v37 = vpop.f32.mrf.mxu0  ;;  %4131 = vmatprep.subr.bf16.mxu0 %v6214_v19  ;;  %v6268_v53 = vld [vmem:[%s8528_s1 + $0x10a4] ss:$48 sps:$4 sm:$0xff]   ;;  %v6269_v19 = vld [vmem:[%s8528_s1 + $0x4a8] ss:$48 sps:$4 sm:$0xff]   ;;  %v6272_v23 = vld [vmem:[%s8528_s1 + $0x1040] ss:$48 sps:$4 sm:$0xff]  }
 0x1c9   :  { %v3879_v38 = vpop.f32.mrf.mxu1  ;;  %4172 = vmatprep.subr.bf16.mxu1 %v6217_v24  ;;  %v6275_v24 = vld [vmem:[%s8528_s1 + $0x448] ss:$48 sps:$4 sm:$0xff]   ;;  %v6286_v33 = vld [vmem:[%s8528_s1 + $0xf84] ss:$48 sps:$4 sm:$0xff]   ;;  %v6284_v37 = vld [vmem:[%s8528_s1 + $0xf80] ss:$48 sps:$4 sm:$0xff]  }
 0x1ca   :  { %v6281_v32 = vld [vmem:[%s8528_s1 + $0x3e8] ss:$48 sps:$4 sm:$0xff]  }
 0x1cb   :  { %4132 = vmatpush1.bf16.msra.mxu0 %v6212_v28  ;;  %v6283_v28 = vld [vmem:[%s8528_s1 + $0x3ec] ss:$48 sps:$4 sm:$0xff]   ;;  %v6287_v38 = vld [vmem:[%s8528_s1 + $0x388] ss:$48 sps:$4 sm:$0xff]  }
 0x1cc   :  { %4173 = vmatpush1.bf16.msra.mxu1 %v6215_v29  ;;  %4133 = vmatprep.subr.bf16.mxu0 %v6220_v36  ;;  %v6278_v29 = vld [vmem:[%s8528_s1 + $0xfe0] ss:$48 sps:$4 sm:$0xff]   ;;  %v6289_v36 = vld [vmem:[%s8528_s1 + $0x38c] ss:$48 sps:$4 sm:$0xff]  }
 0x1cd   :  { %4174 = vmatprep.subr.bf16.mxu1 %v6223_v39  ;;  %v6292_v39 = vld [vmem:[%s8528_s1 + $0xf24] ss:$48 sps:$4 sm:$0xff]  }
 0x1cf   :  { %4134 = vmatpush1.bf16.msra.mxu0 %v6218_v49  ;;  %v6295_v49 = vld [vmem:[%s8528_s1 + $0x32c] ss:$48 sps:$4 sm:$0xff]  }
 0x1d0   :  { %4175 = vmatpush1.bf16.msra.mxu1 %v6221_v40  ;;  %4135 = vmatprep.subr.bf16.mxu0 %v6226_v41  ;;  %v6290_v40 = vld [vmem:[%s8528_s1 + $0xf20] ss:$48 sps:$4 sm:$0xff]   ;;  %v6293_v41 = vld [vmem:[%s8528_s1 + $0x328] ss:$48 sps:$4 sm:$0xff]  }
 0x1d1   :  { %4176 = vmatprep.subr.bf16.mxu1 %v6229_v42  ;;  %v6298_v42 = vld [vmem:[%s8528_s1 + $0x8cc] ss:$48 sps:$4 sm:$0xff]  }
 0x1d3   :  { %4136 = vmatpush1.bf16.msra.mxu0 %v6224_v43  ;;  %v6301_v43 = vld [vmem:[%s8528_s1 + $0xecc] ss:$48 sps:$4 sm:$0xff]  }
 0x1d4   :  { %4177 = vmatpush1.bf16.msra.mxu1 %v6227_v7  ;;  %4137 = vmatprep.subr.bf16.mxu0 %v6232_v44  ;;  %v6296_v7 = vld [vmem:[%s8528_s1 + $0x8c8] ss:$48 sps:$4 sm:$0xff]  }
 0x1d5   :  { %4178 = vmatprep.subr.bf16.mxu1 %v6235_v45  ;;  %v6299_v44 = vld [vmem:[%s8528_s1 + $0xec8] ss:$48 sps:$4 sm:$0xff]   ;;  %v6304_v45 = vld [vmem:[%s8528_s1 + $0x86c] ss:$48 sps:$4 sm:$0xff]  }
 0x1d7   :  { %4138 = vmatpush1.bf16.msra.mxu0 %v6230_v12  ;;  %v6307_v12 = vld [vmem:[%s8528_s1 + $0xe6c] ss:$48 sps:$4 sm:$0xff]  }
 0x1d8   :  { %4179 = vmatpush1.bf16.msra.mxu1 %v6233_v47  ;;  %4139 = vmatprep.subr.bf16.mxu0 %v6238_v48 }
 0x1d9   :  { %4180 = vmatprep.subr.bf16.mxu1 %v6241_v50 }
 0x1db   :  { %4140 = vmatpush1.bf16.msra.mxu0 %v6236_v54  ;;  %v6302_v54 = vld [vmem:[%s8528_s1 + $0x868] ss:$48 sps:$4 sm:$0xff]  }
 0x1dc   :  { %4181 = vmatpush1.bf16.msra.mxu1 %v6239_v55  ;;  %4141 = vmatprep.subr.bf16.mxu0 %v6244_v56  ;;  %v6305_v55 = vld [vmem:[%s8528_s1 + $0xe68] ss:$48 sps:$4 sm:$0xff]  }
 0x1dd   :  { %4182 = vmatprep.subr.bf16.mxu1 %v6247_v57 }
 0x1df   :  { %4142 = vmatpush1.bf16.msra.mxu0 %v6242_v58 }
 0x1e0   :  { %4183 = vmatpush1.bf16.msra.mxu1 %v6245_v60  ;;  %4143 = vmatprep.subr.bf16.mxu0 %v6250_v61 }
 0x1e1   :  { %4184 = vmatprep.subr.bf16.mxu1 %v6253_v62  ;;  %v6308_v62 = vld [vmem:[%s8528_s1 + $0x808] ss:$48 sps:$4 sm:$0xff]  }
 0x1e3   :  { %4144 = vmatpush2.bf16.msra.mxu0 %v6248_v63  ;;  %v6311_v63 = vld [vmem:[%s8528_s1 + $0xe08] ss:$48 sps:$4 sm:$0xff]  }
 0x1e4   :  { %4185 = vmatpush2.bf16.msra.mxu1 %v6251_v0  ;;  %4145 = vmatprep.subr.bf16.mxu0 %v6256_v1 }
 0x1e5   :  { %4186 = vmatprep.subr.bf16.mxu1 %v6259_v3  ;;  %v6317_v3 = vld [vmem:[%s8528_s1 + $0xda8] ss:$48 sps:$4 sm:$0xff]  }
 0x1e7   :  { %4146 = vmatpush2.bf16.msra.mxu0 %v6254_v4  ;;  %v6322_v4 = vld [vmem:[%s8528_s1 + $0x74c] ss:$48 sps:$4 sm:$0xff]  }
 0x1e8   :  { %4187 = vmatpush2.bf16.msra.mxu1 %v6257_v5  ;;  %4147 = vmatprep.subr.bf16.mxu0 %v6262_v6  ;;  %v6325_v5 = vld [vmem:[%s8528_s1 + $0xd4c] ss:$48 sps:$4 sm:$0xff]   ;;  %v6320_v6 = vld [vmem:[%s8528_s1 + $0x748] ss:$48 sps:$4 sm:$0xff]  }
 0x1e9   :  { %4188 = vmatprep.subr.bf16.mxu1 %v6265_v11  ;;  %v6323_v11 = vld [vmem:[%s8528_s1 + $0xd48] ss:$48 sps:$4 sm:$0xff]  }
 0x1eb   :  { %4148 = vmatpush2.bf16.msra.mxu0 %v6260_v13  ;;  %v6328_v13 = vld [vmem:[%s8528_s1 + $0x6ec] ss:$48 sps:$4 sm:$0xff]  }
 0x1ec   :  { %4189 = vmatpush2.bf16.msra.mxu1 %v6263_v14  ;;  %4149 = vmatprep.subr.bf16.mxu0 %v6268_v53  ;;  %v6331_v14 = vld [vmem:[%s8528_s1 + $0xcec] ss:$48 sps:$4 sm:$0xff]   ;;  %v6326_v53 = vld [vmem:[%s8528_s1 + $0x6e8] ss:$48 sps:$4 sm:$0xff]  }
 0x1ed   :  { %4190 = vmatprep.subr.bf16.mxu1 %v6271_v16  ;;  %v6329_v16 = vld [vmem:[%s8528_s1 + $0xce8] ss:$48 sps:$4 sm:$0xff]  }
 0x1ef   :  { %4150 = vmatpush2.bf16.msra.mxu0 %v6266_v18  ;;  %v6334_v18 = vld [vmem:[%s8528_s1 + $0x68c] ss:$48 sps:$4 sm:$0xff]  }
 0x1f0   :  { %4191 = vmatpush2.bf16.msra.mxu1 %v6269_v19  ;;  %4151 = vmatprep.subr.bf16.mxu0 %v6274_v20  ;;  %v6337_v19 = vld [vmem:[%s8528_s1 + $0xc8c] ss:$48 sps:$4 sm:$0xff]   ;;  %v6332_v20 = vld [vmem:[%s8528_s1 + $0x688] ss:$48 sps:$4 sm:$0xff]  }
 0x1f1   :  { %4192 = vmatprep.subr.bf16.mxu1 %v6277_v21  ;;  %v6335_v21 = vld [vmem:[%s8528_s1 + $0xc88] ss:$48 sps:$4 sm:$0xff]  }
 0x1f3   :  { %4152 = vmatpush2.bf16.msra.mxu0 %v6272_v23  ;;  %v6340_v23 = vld [vmem:[%s8528_s1 + $0x62c] ss:$48 sps:$4 sm:$0xff]  }
 0x1f4   :  { %4193 = vmatpush2.bf16.msra.mxu1 %v6275_v24  ;;  %4153 = vmatprep.subr.bf16.mxu0 %v6280_v27  ;;  %v6343_v24 = vld [vmem:[%s8528_s1 + $0xc2c] ss:$48 sps:$4 sm:$0xff]   ;;  %v6338_v27 = vld [vmem:[%s8528_s1 + $0x628] ss:$48 sps:$4 sm:$0xff]  }
 0x1f5   :  { %4194 = vmatprep.subr.bf16.mxu1 %v6283_v28  ;;  %v6341_v28 = vld [vmem:[%s8528_s1 + $0xc28] ss:$48 sps:$4 sm:$0xff]  }
 0x1f7   :  { %4154 = vmatpush2.bf16.msra.mxu0 %v6278_v29  ;;  %v6346_v29 = vld [vmem:[%s8528_s1 + $0xbcc] ss:$48 sps:$4 sm:$0xff]  }
 0x1f8   :  { %4195 = vmatpush2.bf16.msra.mxu1 %v6281_v32  ;;  %4155 = vmatprep.subr.bf16.mxu0 %v6286_v33  ;;  %v6349_v32 = vld [vmem:[%s8528_s1 + $0x11cc] ss:$48 sps:$4 sm:$0xff]   ;;  %v6344_v33 = vld [vmem:[%s8528_s1 + $0xbc8] ss:$48 sps:$4 sm:$0xff]  }
 0x1f9   :  { %4196 = vmatprep.subr.bf16.mxu1 %v6289_v36  ;;  %v6347_v36 = vld [vmem:[%s8528_s1 + $0x11c8] ss:$48 sps:$4 sm:$0xff]  }
 0x1fb   :  { %4156 = vmatpush2.bf16.msra.mxu0 %v6284_v37  ;;  %v6352_v37 = vld [vmem:[%s8528_s1 + $0xb6c] ss:$48 sps:$4 sm:$0xff]  }
 0x1fc   :  { %4197 = vmatpush2.bf16.msra.mxu1 %v6287_v38  ;;  %4157 = vmatprep.subr.bf16.mxu0 %v6292_v39  ;;  %v6355_v38 = vld [vmem:[%s8528_s1 + $0x116c] ss:$48 sps:$4 sm:$0xff]   ;;  %v6350_v39 = vld [vmem:[%s8528_s1 + $0xb68] ss:$48 sps:$4 sm:$0xff]  }
 0x1fd   :  { %4198 = vmatprep.subr.bf16.mxu1 %v6295_v49  ;;  %v6353_v49 = vld [vmem:[%s8528_s1 + $0x1168] ss:$48 sps:$4 sm:$0xff]  }
 0x1ff   :  { %4158 = vmatpush2.bf16.msra.mxu0 %v6290_v40  ;;  %v6358_v40 = vld [vmem:[%s8528_s1 + $0xb0c] ss:$48 sps:$4 sm:$0xff]  }
 0x200   :  { %4199 = vmatpush2.bf16.msra.mxu1 %v6293_v41  ;;  %4209 = vmatprep.subr.bf16.mxu0 %v6298_v42  ;;  %v6361_v41 = vld [vmem:[%s8528_s1 + $0x110c] ss:$48 sps:$4 sm:$0xff]   ;;  %v6356_v42 = vld [vmem:[%s8528_s1 + $0xb08] ss:$48 sps:$4 sm:$0xff]  }
 0x201   :  { %4250 = vmatprep.subr.bf16.mxu1 %v6301_v43  ;;  %v6359_v43 = vld [vmem:[%s8528_s1 + $0x1108] ss:$48 sps:$4 sm:$0xff]  }
 0x202   :  { %v3915_v47 = vpop.f32.mrf.mxu0  ;;  %4160 = vmatmul.mubr.bf16.vlgmr.msra.gmra.mxu0 %v6901_v17 }
 0x203   :  { %v8147_v48 = vpop.f32.mrf.mxu1  ;;  %4201 = vmatmul.mubr.bf16.vlgmr.msra.gmra.mxu1 %v6693_v8  ;;  %v8152_v50 = vadd.f32 %v3915_v47, %v7961_v25  ;;  %4210 = vmatpush1.bf16.msra.mxu0 %v6296_v7  ;;  %v6310_v8 = vld [vmem:[%s8528_s1 + $0x80c] ss:$48 sps:$4 sm:$0xff]  }
 0x204   :  { %4251 = vmatpush1.bf16.msra.mxu1 %v6299_v44  ;;  %v3917_v56 = vpop.f32.mrf.mxu0  ;;  %4211 = vmatprep.subr.bf16.mxu0 %v6304_v45  ;;  %v6313_v25 = vld [vmem:[%s8528_s1 + $0xe0c] ss:$48 sps:$4 sm:$0xff]   ;;  %v6362_v45 = vld [vmem:[%s8528_s1 + $0xaa8] ss:$48 sps:$4 sm:$0xff]  }
 0x205   :  { %v8160_v57 = vpop.f32.mrf.mxu1  ;;  %4252 = vmatprep.subr.bf16.mxu1 %v6307_v12  ;;  %v8169_v58 = vadd.f32 %v3917_v56, %v7974_v30  ;;  %4241 = vmatprep.mubr.bf16.mxu0 %v6632_v52  ;;  %v6316_v52 = vld [vmem:[%s8528_s1 + $0x7ac] ss:$48 sps:$4 sm:$0xff]   ;;  %v6314_v30 = vld [vmem:[%s8528_s1 + $0x7a8] ss:$48 sps:$4 sm:$0xff]  }
 0x206   :  { %4282 = vmatprep.mubr.bf16.mxu1 %v6775_v35  ;;  %v3919_v60 = vpop.f32.mrf.mxu0  ;;  %v6319_v35 = vld [vmem:[%s8528_s1 + $0xdac] ss:$48 sps:$4 sm:$0xff]   ;;  %v6365_v12 = vld [vmem:[%s8528_s1 + $0x10a8] ss:$48 sps:$4 sm:$0xff]  }
 0x207   :  { %v3960_v61 = vpop.f32.mrf.mxu1  ;;  %4212 = vmatpush1.bf16.msra.mxu0 %v6302_v54  ;;  %v6364_v7 = vld [vmem:[%s8528_s1 + $0xaac] ss:$48 sps:$4 sm:$0xff]   ;;  %v6371_v56 = vld [vmem:[%s8528_s1 + $0x1048] ss:$48 sps:$4 sm:$0xff]  }
 0x208   :  { %4253 = vmatpush1.bf16.msra.mxu1 %v6305_v55  ;;  %v3920_v0 = vpop.f32.mrf.mxu0  ;;  %4213 = vmatprep.subr.bf16.mxu0 %v6310_v8  ;;  %v6367_v44 = vld [vmem:[%s8528_s1 + $0x10ac] ss:$48 sps:$4 sm:$0xff]   ;;  %v6368_v55 = vld [vmem:[%s8528_s1 + $0xa48] ss:$48 sps:$4 sm:$0xff]  }
 0x209   :  { %v3961_v1 = vpop.f32.mrf.mxu1  ;;  %4254 = vmatprep.subr.bf16.mxu1 %v6313_v25  ;;  %v6370_v47 = vld [vmem:[%s8528_s1 + $0xa4c] ss:$48 sps:$4 sm:$0xff]   ;;  %v6374_v60 = vld [vmem:[%s8528_s1 + $0x9e8] ss:$48 sps:$4 sm:$0xff]  }
 0x20a   :  { %v6373_v54 = vld [vmem:[%s8528_s1 + $0x104c] ss:$48 sps:$4 sm:$0xff]   ;;  %v6377_v61 = vld [vmem:[%s8528_s1 + $0xfe8] ss:$48 sps:$4 sm:$0xff]  }
 0x20b   :  { %4214 = vmatpush1.bf16.msra.mxu0 %v6308_v62  ;;  %v6376_v8 = vld [vmem:[%s8528_s1 + $0x9ec] ss:$48 sps:$4 sm:$0xff]   ;;  %v6380_v0 = vld [vmem:[%s8528_s1 + $0x988] ss:$48 sps:$4 sm:$0xff]  }
 0x20c   :  { %4255 = vmatpush1.bf16.msra.mxu1 %v6311_v63  ;;  %4215 = vmatprep.subr.bf16.mxu0 %v6316_v52  ;;  %v6379_v25 = vld [vmem:[%s8528_s1 + $0xfec] ss:$48 sps:$4 sm:$0xff]   ;;  %v6383_v1 = vld [vmem:[%s8528_s1 + $0xf88] ss:$48 sps:$4 sm:$0xff]  }
 0x20d   :  { %4256 = vmatprep.subr.bf16.mxu1 %v6319_v35  ;;  %v6382_v62 = vld [vmem:[%s8528_s1 + $0x98c] ss:$48 sps:$4 sm:$0xff]  }
 0x20e   :  { %v6385_v63 = vld [vmem:[%s8528_s1 + $0xf8c] ss:$48 sps:$4 sm:$0xff]  }
 0x20f   :  { %4216 = vmatpush1.bf16.msra.mxu0 %v6314_v30  ;;  %v6388_v52 = vld [vmem:[%s8528_s1 + $0x92c] ss:$48 sps:$4 sm:$0xff]   ;;  %v639_v30 = vsub.s32 6, %v7280_v26 }
 0x210   :  { %4257 = vmatpush1.bf16.msra.mxu1 %v6317_v3  ;;  %4217 = vmatprep.subr.bf16.mxu0 %v6322_v4  ;;  %v6391_v35 = vld [vmem:[%s8528_s1 + $0xf2c] ss:$48 sps:$4 sm:$0xff]   ;;  %v643_v3 = vsub.s32 7, %v7280_v26  ;;  %v6386_v4 = vld [vmem:[%s8528_s1 + $0x928] ss:$48 sps:$4 sm:$0xff]   ;;  %v6445_v26 = vld [vmem:[%s8529_s0 + $0x20] sm:$0xff] }
 0x211   :  { %4258 = vmatprep.subr.bf16.mxu1 %v6325_v5  ;;  %v6389_v5 = vld [vmem:[%s8528_s1 + $0xf28] ss:$48 sps:$4 sm:$0xff]  }
 0x213   :  { %4218 = vmatpush1.bf16.msra.mxu0 %v6320_v6  ;;  %v6392_v6 = vld [vmem:[%s8531_s3 + $0x78] sm:$0xff]  }
 0x214   :  { %4259 = vmatpush1.bf16.msra.mxu1 %v6323_v11  ;;  %4219 = vmatprep.subr.bf16.mxu0 %v6328_v13  ;;  %v6408_v11 = vld [vmem:[%s8531_s3 + $0xf8] sm:$0xff]   ;;  %v640_v13 = vrot.slane %v7931_v2, %v639_v30  ;;  %v6419_v30 = vld [vmem:[%s8531_s3 + $0x90] sm:$0xff]  }
 0x215   :  { %4260 = vmatprep.subr.bf16.mxu1 %v6331_v14  ;;  %v644_v14 = vrot.slane %v7931_v2, %v643_v3  ;;  %v6410_v2 = vld [vmem:[%s8531_s3 + $0xf0] sm:$0xff]   ;;  %v6420_v3 = vld [vmem:[%s8531_s3 + $0xc8] sm:$0xff]  }
 0x217   :  { %4220 = vmatpush1.bf16.msra.mxu0 %v6326_v53  ;;  %v6393_v53 = vld [vmem:[%s8531_s3 + $0x38] sm:$0xff]  }
 0x218   :  { %4261 = vmatpush1.bf16.msra.mxu1 %v6329_v16  ;;  %4221 = vmatprep.subr.bf16.mxu0 %v6334_v18  ;;  %v6409_v16 = vld [vmem:[%s8531_s3 + $0xb8] sm:$0xff]   ;;  %v6394_v18 = vld [vmem:[%s8531_s3 + $0x70] sm:$0xff]  }
 0x219   :  { %4262 = vmatprep.subr.bf16.mxu1 %v6337_v19  ;;  %v3957_v19 = vadd.f32 %v8147_v48, %v640_v13  ;;  %v6411_v48 = vld [vmem:[%s8531_s3 + $0xb0] sm:$0xff]   ;;  %v6407_v13 = vld [vmem:[%s8531_s3] sm:$0xff]  }
 0x21b   :  { %4222 = vmatpush1.bf16.msra.mxu0 %v6332_v20 }
 0x21c   :  { %4263 = vmatpush1.bf16.msra.mxu1 %v6335_v21  ;;  %4223 = vmatprep.subr.bf16.mxu0 %v6340_v23  ;;  %v4291_v23 = vmax.f32 %v7533_v10, 0.0  ;;  %v4292_v10 = vmax.f32 %v7544_v15, 0.0  ;;  %v6413_v15 = vld [vmem:[%s8531_s3 + $0xa8] sm:$0xff]  }
 0x21d   :  { %4264 = vmatprep.subr.bf16.mxu1 %v6343_v24  ;;  %v3959_v24 = vadd.f32 %v8160_v57, %v644_v14  ;;  %v6423_v14 = vld [vmem:[%s8531_s3 + $0x80] sm:$0xff]  }
 0x21f   :  { %4224 = vmatpush1.bf16.msra.mxu0 %v6338_v27 }
 0x220   :  { %4265 = vmatpush1.bf16.msra.mxu1 %v6341_v28  ;;  %4225 = vmatprep.subr.bf16.mxu0 %v6346_v29  ;;  %v6395_v28 = vld [vmem:[%s8531_s3 + $0x30] sm:$0xff]  }
 0x221   :  { %4266 = vmatprep.subr.bf16.mxu1 %v6349_v32 }
 0x223   :  { %4226 = vmatpush2.bf16.msra.mxu0 %v6344_v33 }
 0x224   :  { %4267 = vmatpush2.bf16.msra.mxu1 %v6347_v36  ;;  %4227 = vmatprep.subr.bf16.mxu0 %v6352_v37 }
 0x225   :  { %4268 = vmatprep.subr.bf16.mxu1 %v6355_v38  ;;  %v6441_v38 = vld [vmem:[%s8529_s0] sm:$0xff] }
 0x227   :  { %4228 = vmatpush2.bf16.msra.mxu0 %v6350_v39  ;;  %v4297_v39 = vadd.f32 %v6441_v38, %v4291_v23  ;;  %v6430_v23 = vld [vmem:[%s8531_s3 + $0x160] sm:$0xff]  }
 0x228   :  { %4269 = vmatpush2.bf16.msra.mxu1 %v6353_v49  ;;  %4229 = vmatprep.subr.bf16.mxu0 %v6358_v40 }
 0x229   :  { %4270 = vmatprep.subr.bf16.mxu1 %v6361_v41  ;;  %v6397_v41 = vld [vmem:[%s8531_s3 + $0x28] sm:$0xff]  }
 0x22b   :  { %4230 = vmatpush2.bf16.msra.mxu0 %v6356_v42 }
 0x22c   :  { %4271 = vmatpush2.bf16.msra.mxu1 %v6359_v43  ;;  %4231 = vmatprep.subr.bf16.mxu0 %v6364_v7  ;;  %v6398_v7 = vld [vmem:[%s8531_s3 + $0x60] sm:$0xff]  }
 0x22d   :  { %4272 = vmatprep.subr.bf16.mxu1 %v6367_v44  ;;  %v6414_v44 = vld [vmem:[%s8531_s3 + $0xe0] sm:$0xff]  }
 0x22f   :  { %4232 = vmatpush2.bf16.msra.mxu0 %v6362_v45  ;;  %v6442_v45 = vld [vmem:[%s8529_s0 + $0x8] sm:$0xff] }
 0x230   :  { %4273 = vmatpush2.bf16.msra.mxu1 %v6365_v12  ;;  %4233 = vmatprep.subr.bf16.mxu0 %v6370_v47  ;;  %v4298_v12 = vadd.f32 %v6442_v45, %v4292_v10 }
 0x231   :  { %4274 = vmatprep.subr.bf16.mxu1 %v6373_v54 }
 0x233   :  { %4234 = vmatpush2.bf16.msra.mxu0 %v6368_v55 }
 0x234   :  { %4275 = vmatpush2.bf16.msra.mxu1 %v6371_v56  ;;  %4235 = vmatprep.subr.bf16.mxu0 %v6376_v8  ;;  %v6399_v56 = vld [vmem:[%s8531_s3 + $0x20] sm:$0xff]   ;;  %v6400_v8 = vld [vmem:[%s8531_s3 + $0x58] sm:$0xff]  }
 0x235   :  { %4276 = vmatprep.subr.bf16.mxu1 %v6379_v25  ;;  %v6415_v25 = vld [vmem:[%s8531_s3 + $0xa0] sm:$0xff]  }
 0x237   :  { %4236 = vmatpush2.bf16.msra.mxu0 %v6374_v60 }
 0x238   :  { %4277 = vmatpush2.bf16.msra.mxu1 %v6377_v61  ;;  %4237 = vmatprep.subr.bf16.mxu0 %v6382_v62  ;;  %v6416_v61 = vld [vmem:[%s8531_s3 + $0xd8] sm:$0xff]  }
 0x239   :  { %4278 = vmatprep.subr.bf16.mxu1 %v6385_v63  ;;  %v6401_v62 = vld [vmem:[%s8531_s3 + $0x18] sm:$0xff]   ;;  %v6402_v63 = vld [vmem:[%s8531_s3 + $0x50] sm:$0xff]  }
 0x23b   :  { %4238 = vmatpush2.bf16.msra.mxu0 %v6380_v0  ;;  %v6417_v0 = vld [vmem:[%s8531_s3 + $0x98] sm:$0xff]  }
 0x23c   :  { %4279 = vmatpush2.bf16.msra.mxu1 %v6383_v1  ;;  %4239 = vmatprep.subr.bf16.mxu0 %v6388_v52  ;;  %v6418_v1 = vld [vmem:[%s8531_s3 + $0xd0] sm:$0xff]  }
 0x23d   :  { %4280 = vmatprep.subr.bf16.mxu1 %v6391_v35  ;;  %v6403_v52 = vld [vmem:[%s8531_s3 + $0x10] sm:$0xff]   ;;  %v6404_v35 = vld [vmem:[%s8531_s3 + $0x48] sm:$0xff]  }
 0x23f   :  { %4240 = vmatpush2.bf16.msra.mxu0 %v6386_v4  ;;  %v6405_v4 = vld [vmem:[%s8531_s3 + $0x8] sm:$0xff]  }
 0x240   :  { %4281 = vmatpush2.bf16.msra.mxu1 %v6389_v5  ;;  %5462 = vmatprep.subr.bf16.mxu0 %v6392_v6  ;;  %v6406_v5 = vld [vmem:[%s8531_s3 + $0x40] sm:$0xff]   ;;  %v6421_v6 = vld [vmem:[%s8531_s3 + $0x88] sm:$0xff]  }
 0x241   :  { %5484 = vmatprep.subr.bf16.mxu1 %v6408_v11  ;;  %v6422_v11 = vld [vmem:[%s8531_s3 + $0xc0] sm:$0xff]  }
 0x242   :  { %v3997_v20 = vpop.f32.mrf.mxu0  ;;  %4242 = vmatmul.mubr.bf16.vlgmr.msra.gmra.mxu0 %v6695_v9  ;;  %v6396_v9 = vld [vmem:[%s8531_s3 + $0x68] sm:$0xff]  }
 0x243   :  { %v4038_v21 = vpop.f32.mrf.mxu1  ;;  %4283 = vmatmul.mubr.bf16.vlgmr.msra.gmra.mxu1 %v6901_v17  ;;  %v3998_v27 = vadd.f32 %v3997_v20, %v3957_v19  ;;  %5463 = vmatpush3.bf16.msra.mxu0 %v6393_v53  ;;  %v6412_v17 = vld [vmem:[%s8531_s3 + $0xe8] sm:$0xff]   ;;  %v6424_v53 = vld [vmem:[%s8531_s3 + $0x178] sm:$0xff]   ;;  %v6427_v19 = vld [vmem:[%s8531_s3 + $0x130] sm:$0xff]  }
 0x244   :  { %5485 = vmatpush3.bf16.msra.mxu1 %v6409_v16  ;;  %v3999_v29 = vpop.f32.mrf.mxu0  ;;  %5464 = vmatprep.subr.bf16.mxu0 %v6394_v18  ;;  %v6425_v16 = vld [vmem:[%s8531_s3 + $0x138] sm:$0xff]   ;;  %v6428_v20 = vld [vmem:[%s8531_s3 + $0x168] sm:$0xff]  }
 0x245   :  { %v4040_v32 = vpop.f32.mrf.mxu1  ;;  %5486 = vmatprep.subr.bf16.mxu1 %v6410_v2  ;;  %v4039_v57 = vadd.f32 %v4038_v21, %v3998_v27  ;;  %v4000_v33 = vadd.f32 %v3999_v29, %v3959_v24  ;;  %v6426_v2 = vld [vmem:[%s8531_s3 + $0x170] sm:$0xff]   ;;  %v6429_v21 = vld [vmem:[%s8531_s3 + $0x128] sm:$0xff]   ;;  %v6431_v24 = vld [vmem:[%s8531_s3 + $0x120] sm:$0xff]  }
 0x246   :  { %v4001_v36 = vpop.f32.mrf.mxu0  ;;  %v6432_v27 = vld [vmem:[%s8531_s3 + $0x158] sm:$0xff]  }
 0x247   :  { %v4042_v37 = vpop.f32.mrf.mxu1  ;;  %v4303_v49 = vmax.f32 %v4039_v57, 0.0  ;;  %v4041_v40 = vadd.f32 %v4040_v32, %v4000_v33  ;;  %5465 = vmatpush3.bf16.msra.mxu0 %v6395_v28  ;;  %v6433_v28 = vld [vmem:[%s8531_s3 + $0x118] sm:$0xff]   ;;  %v6434_v32 = vld [vmem:[%s8531_s3 + $0x150] sm:$0xff]   ;;  %v6436_v36 = vld [vmem:[%s8531_s3 + $0x148] sm:$0xff]  }
 0x248   :  { %5487 = vmatpush3.bf16.msra.mxu1 %v6411_v48  ;;  %v4002_v42 = vpop.f32.mrf.mxu0  ;;  %5466 = vmatprep.subr.bf16.mxu0 %v6396_v9  ;;  %v6435_v9 = vld [vmem:[%s8531_s3 + $0x110] sm:$0xff]   ;;  %v6437_v37 = vld [vmem:[%s8531_s3 + $0x108] sm:$0xff]  }
 0x249   :  { %v4043_v43 = vpop.f32.mrf.mxu1  ;;  %5488 = vmatprep.subr.bf16.mxu1 %v6412_v17  ;;  %v4309_v47 = vadd.f32 %v4303_v49, %v4297_v39  ;;  %v4304_v54 = vmax.f32 %v4041_v40, 0.0  ;;  %v6438_v49 = vld [vmem:[%s8531_s3 + $0x140] sm:$0xff]  }
 0x24a   :  { %v6439_v40 = vld [vmem:[%s8531_s3 + $0x100] sm:$0xff]  }
 0x24b   :  { %v4310_v55 = vadd.f32 %v4304_v54, %v4298_v12  ;;  %5467 = vmatpush3.bf16.msra.mxu0 %v6397_v41  ;;  %v4315_v18 = vpack.c.bf16 %v4309_v47, %v4309_v47  ;;  %v610_v41 = vld [vmem:[%s8530_s2 + $0x8] sm:$0xf]  ;;  %v4294_v54 = vmax.f32 %v7756_v51, 0.0 }
 0x24c   :  { %5489 = vmatpush3.bf16.msra.mxu1 %v6413_v15  ;;  %5468 = vmatprep.subr.bf16.mxu0 %v6398_v7  ;;  %v648_v15 = vrot.slane %v610_v41, %v615_v31  ;;  %v652_v42 = vrot.slane %v610_v41, %v619_v34  ;;  %v6443_v31 = vld [vmem:[%s8529_s0 + $0x10] sm:$0xff] }
 0x24d   :  { %5490 = vmatprep.subr.bf16.mxu1 %v6414_v44  ;;  %v4316_v60 = vpack.c.bf16 %v4310_v55, %v4310_v55  ;;  %v4293_v44 = vmax.f32 %v7752_v46, 0.0  ;;  %v6444_v46 = vld [vmem:[%s8529_s0 + $0x18] sm:$0xff] }
 0x24f   :  { %5469 = vmatpush3.bf16.msra.mxu0 %v6399_v56  ;;  %4744 = vmatprep.mubr.bf16.mxu0 %v4316_v60  ;;  %v4299_v60 = vadd.f32 %v6443_v31, %v4293_v44 }
 0x250   :  { %5470 = vmatprep.subr.bf16.mxu0 %v6400_v8  ;;  %5491 = vmatpush3.bf16.msra.mxu1 %v6415_v25 }
 0x251   :  { %5492 = vmatprep.subr.bf16.mxu1 %v6416_v61 }
 0x253   :  { %5471 = vmatpush3.bf16.msra.mxu0 %v6401_v62 }
 0x254   :  { %5472 = vmatprep.subr.bf16.mxu0 %v6402_v63  ;;  %5493 = vmatpush3.bf16.msra.mxu1 %v6417_v0  ;;  %v4300_v0 = vadd.f32 %v6444_v46, %v4294_v54 }
 0x255   :  { %5494 = vmatprep.subr.bf16.mxu1 %v6418_v1 }
 0x257   :  { %5473 = vmatpush3.bf16.msra.mxu0 %v6403_v52 }
 0x258   :  { %5474 = vmatprep.subr.bf16.mxu0 %v6404_v35  ;;  %5495 = vmatpush3.bf16.msra.mxu1 %v6419_v30 }
 0x259   :  { %5496 = vmatprep.subr.bf16.mxu1 %v6420_v3 }
 0x25b   :  { %5475 = vmatpush3.bf16.msra.mxu0 %v6405_v4 }
 0x25c   :  { %5476 = vmatprep.subr.bf16.mxu0 %v6406_v5  ;;  %5497 = vmatpush3.bf16.msra.mxu1 %v6421_v6  ;;  %v656_v5 = vrot.slane %v610_v41, %v623_v59  ;;  %v660_v6 = vrot.slane %v610_v41, %v627_v22 }
 0x25d   :  { %5498 = vmatprep.subr.bf16.mxu1 %v6422_v11 }
 0x25f   :  { %5477 = vmatpush3.bf16.msra.mxu0 %v6407_v13 }
 0x260   :  { %5499 = vmatpush3.bf16.msra.mxu1 %v6423_v14  ;;  %5506 = vmatprep.subr.bf16.mxu0 %v6424_v53  ;;  %v4295_v53 = vmax.f32 %v8152_v50, 0.0  ;;  %v6446_v50 = vld [vmem:[%s8529_s0 + $0x28] sm:$0xff] }
 0x262   :  { %4745 = vmatmul.mubr.bf16.vlgmr.msra.gmra.mxu0 %v4315_v18  ;;  %v4301_v59 = vadd.f32 %v6445_v26, %v4295_v53 }
 0x263   :  { %5507 = vmatpush3.bf16.msra.mxu0 %v6425_v16 }
 0x264   :  { %5508 = vmatprep.subr.bf16.mxu0 %v6426_v2 }
 0x267   :  { %5509 = vmatpush3.bf16.msra.mxu0 %v6427_v19 }
 0x268   :  { %5510 = vmatprep.subr.bf16.mxu0 %v6428_v20  ;;  %v4296_v20 = vmax.f32 %v8169_v58, 0.0 }
 0x26b   :  { %5511 = vmatpush3.bf16.msra.mxu0 %v6429_v21 }
 0x26c   :  { %5512 = vmatprep.subr.bf16.mxu0 %v6430_v23 }
 0x26f   :  { %5513 = vmatpush3.bf16.msra.mxu0 %v6431_v24 }
 0x270   :  { %5514 = vmatprep.subr.bf16.mxu0 %v6432_v27 }
 0x273   :  { %5515 = vmatpush3.bf16.msra.mxu0 %v6433_v28 }
 0x274   :  { %5516 = vmatprep.subr.bf16.mxu0 %v6434_v32  ;;  %v4302_v32 = vadd.f32 %v6446_v50, %v4296_v20 }
 0x277   :  { %5517 = vmatpush3.bf16.msra.mxu0 %v6435_v9 }
 0x278   :  { %5518 = vmatprep.subr.bf16.mxu0 %v6436_v36 }
 0x27b   :  { %5519 = vmatpush3.bf16.msra.mxu0 %v6437_v37 }
 0x27c   :  { %5520 = vmatprep.subr.bf16.mxu0 %v6438_v49  ;;  %v5413_v49 = vld [vmem:[%s8532_s4] ss:$0 sm:$0xff] }
 0x27f   :  { %5521 = vmatpush3.bf16.msra.mxu0 %v6439_v40 }
 0x282   :  { %v4079_v48 = vpop.f32.mrf.mxu0 }
 0x283   :  { %v4120_v29 = vpop.f32.mrf.mxu1  ;;  %v4080_v43 = vadd.f32 %v4079_v48, %v648_v15 }
 0x284   :  { %v4081_v17 = vpop.f32.mrf.mxu0 }
 0x285   :  { %v4122_v10 = vpop.f32.mrf.mxu1  ;;  %v4082_v7 = vadd.f32 %v4081_v17, %v652_v42  ;;  %v4121_v45 = vadd.f32 %v4120_v29, %v4080_v43 }
 0x286   :  { %v4083_v57 = vpop.f32.mrf.mxu0 }
 0x287   :  { %v4124_v33 = vpop.f32.mrf.mxu1  ;;  %v4123_v55 = vadd.f32 %v4122_v10, %v4082_v7 }
 0x288   :  { %v4084_v38 = vpop.f32.mrf.mxu0 }
 0x289   :  { %v4125_v39 = vpop.f32.mrf.mxu1 }
 0x2c2   :  { %v4161_v12 = vpop.f32.mrf.mxu0 }
 0x2c3   :  { %v4202_v47 = vpop.f32.mrf.mxu1  ;;  %v4162_v56 = vadd.f32 %v4161_v12, %v4121_v45 }
 0x2c4   :  { %v4163_v8 = vpop.f32.mrf.mxu0  ;;  %v4203_v11 = vadd.f32 %v4202_v47, %v656_v5 }
 0x2c5   :  { %v4204_v25 = vpop.f32.mrf.mxu1  ;;  %v4305_v61 = vmax.f32 %v4162_v56, 0.0  ;;  %v4164_v34 = vadd.f32 %v4163_v8, %v4123_v55 }
 0x2c6   :  { %v4165_v62 = vpop.f32.mrf.mxu0  ;;  %v4205_v16 = vadd.f32 %v4204_v25, %v660_v6 }
 0x2c7   :  { %v4206_v63 = vpop.f32.mrf.mxu1  ;;  %v4311_v1 = vadd.f32 %v4305_v61, %v4299_v60  ;;  %v4306_v51 = vmax.f32 %v4164_v34, 0.0 }
 0x2c8   :  { %v4166_v52 = vpop.f32.mrf.mxu0 }
 0x2c9   :  { %v4207_v35 = vpop.f32.mrf.mxu1  ;;  %v4312_v30 = vadd.f32 %v4306_v51, %v4300_v0  ;;  %v4317_v4 = vpack.c.bf16 %v4311_v1, %v4311_v1 }
 0x2cb   :  { %v4318_v3 = vpack.c.bf16 %v4312_v30, %v4312_v30 }
 0x2cd   :  { %4784 = vmatprep.mubr.bf16.mxu1 %v4318_v3 }
 0x2ce   :  { %4785 = vmatmul.mubr.bf16.vlgmr.msra.gmra.mxu1 %v4317_v4 }
 0x302   :  { %v4243_v13 = vpop.f32.mrf.mxu0 }
 0x303   :  { %v4284_v14 = vpop.f32.mrf.mxu1  ;;  %v4244_v18 = vadd.f32 %v4243_v13, %v4203_v11 }
 0x304   :  { %v4245_v2 = vpop.f32.mrf.mxu0 }
 0x305   :  { %v4286_v19 = vpop.f32.mrf.mxu1  ;;  %v4285_v21 = vadd.f32 %v4284_v14, %v4244_v18  ;;  %v4246_v23 = vadd.f32 %v4245_v2, %v4205_v16 }
 0x306   :  { %v4247_v24 = vpop.f32.mrf.mxu0 }
 0x307   :  { %v4288_v27 = vpop.f32.mrf.mxu1  ;;  %v4307_v22 = vmax.f32 %v4285_v21, 0.0  ;;  %v4287_v28 = vadd.f32 %v4286_v19, %v4246_v23 }
 0x308   :  { %v4248_v48 = vpop.f32.mrf.mxu0 }
 0x309   :  { %v4289_v29 = vpop.f32.mrf.mxu1  ;;  %v4313_v9 = vadd.f32 %v4307_v22, %v4301_v59  ;;  %v4308_v58 = vmax.f32 %v4287_v28, 0.0 }
 0x30b   :  { %v4314_v17 = vadd.f32 %v4308_v58, %v4302_v32  ;;  %v4319_v57 = vpack.c.bf16 %v4313_v9, %v4313_v9 }
 0x30d   :  { %v4320_v10 = vpack.c.bf16 %v4314_v17, %v4314_v17 }
 0x30f   :  { %4824 = vmatprep.mubr.bf16.mxu0 %v4320_v10 }
 0x310   :  { %4825 = vmatmul.mubr.bf16.vlgmr.msra.gmra.mxu0 %v4319_v57 }
 0x322   :  { %v5478_v33 = vpop.f32.mrf.mxu0 }
 0x324   :  { %v5479_v36 = vpop.f32.mrf.mxu0 }
 0x325   :  { %v5480_v37 = vadd.f32 %v5479_v36, %v5478_v33 }
 0x326   :  { %v5481_v38 = vpop.f32.mrf.mxu0 }
 0x327   :  { %v4747_v15 = vadd.f32 %v5480_v37, %v5413_v49 }
 0x328   :  { %v5482_v39 = vpop.f32.mrf.mxu0 }
 0x38e   :  { %v5500_v40 = vpop.f32.mrf.mxu1 }
 0x390   :  { %v5501_v41 = vpop.f32.mrf.mxu1 }
 0x391   :  { %v5502_v42 = vadd.f32 %v5501_v41, %v5500_v40 }
 0x392   :  { %v5503_v43 = vpop.f32.mrf.mxu1 }
 0x393   :  { %v4787_v7 = vadd.f32 %v5502_v42, %v4747_v15 }
 0x394   :  { %v5504_v44 = vpop.f32.mrf.mxu1 }
 0x3d0   :  { %v5522_v45 = vpop.f32.mrf.mxu0 }
 0x3d2   :  { %v5523_v12 = vpop.f32.mrf.mxu0 }
 0x3d3   :  { %v5524_v47 = vadd.f32 %v5523_v12, %v5522_v45 }
 0x3d4   :  { %v5525_v54 = vpop.f32.mrf.mxu0 }
 0x3d5   :  { %v4827_v55 = vadd.f32 %v5524_v47, %v4787_v7 }
 0x3d6   :  { %v5526_v56 = vpop.f32.mrf.mxu0 }
 0x3d7   :  { %4832 = vst [vmem:[%s8533_s5] sm:$0xff] %v4827_v55 }

</bundles_post_ra>
